<compile_context>
chip_gen: v7x
topology: tpu7x:2x2x1
jax: 0.10.0
libtpu: 0.0.40
codegen_flags: <defaults>
</compile_context>

<pallas_src>
import functools

import jax
import jax.numpy as jnp
from jax import lax
from jax.experimental import pallas as pl
from jax.experimental.pallas import tpu as pltpu

C_IN = 1024 * 2     # 2048
C1 = 1024
C2 = 512
G = 32
EPS = 1e-5          # GroupNorm eps (PyTorch default)
NEG_SLOPE = 0.01    # F.leaky_relu default

ROWS_TARGET = 512       # target MXU M rows per grid step
MIN_CHUNK_ROWS = 256    # never sub-chunk a step below this many rows/chunk


def _leaky_relu(x):
    # max(x, 0.01*x) == leaky_relu(x) for 0 < slope < 1; one fewer VALU op
    # than compare+select.
    return jnp.maximum(x, NEG_SLOPE * x)


def _gn_stats(h3, e, mask, l_real):
    """Per-sample GroupNorm statistics.

    h3: (nb, Lp, C) f32 activations, e: (G, C) f32 one-hot group indicator,
    mask: (Lp, 1) f32 row-validity mask or None (no L padding),
    l_real: number of valid positions.
    Returns per-channel (mean, var) of shape (nb, C), biased variance
    (matches torch.nn.GroupNorm).  Stats stay in f32.
    """
    nb, _, c = h3.shape
    g = e.shape[0]
    inv_n = 1.0 / float(l_real * (c // g))
    hm = h3 if mask is None else h3 * mask[None]
    s = jnp.sum(hm, axis=1)                        # (nb, C)
    s2 = jnp.sum(hm * h3, axis=1)                  # (nb, C) masked sum of squares
    st = jnp.concatenate([s, s2], axis=0)          # (2*nb, C) fused stat matmul
    dn = (((1,), (1,)), ((), ()))                  # contract over channels
    gs = lax.dot_general(st, e, dn, preferred_element_type=jnp.float32) * inv_n
    mean_g = gs[:nb]                               # (nb, G)
    var_g = gs[nb:] - mean_g * mean_g              # biased variance
    mv = jnp.concatenate([mean_g, var_g], axis=0)              # (2*nb, G)
    mvc = jnp.dot(mv, e, preferred_element_type=jnp.float32)   # (2*nb, C)
    mean_c = mvc[:nb]
    var_c = jnp.maximum(mvc[nb:], 0.0)             # guard tiny negative cancellation
    return mean_c, var_c


def _lp_kernel(x_ref, w1_ref, b1_ref, g1_ref, be1_ref, e1_ref,
               w2_ref, b2_ref, g2_ref, be2_ref, e2_ref,
               w3_ref, b3_ref, out_ref, *, chunks, l_pad, l_real):
    w1 = w1_ref[...]; b1 = b1_ref[...]; g1 = g1_ref[...]; be1 = be1_ref[...]
    e1 = e1_ref[...]
    w2 = w2_ref[...]; b2 = b2_ref[...]; g2 = g2_ref[...]; be2 = be2_ref[...]
    e2 = e2_ref[...]
    w3 = w3_ref[...]; b3 = b3_ref[...]

    if l_pad != l_real:
        pos = lax.broadcasted_iota(jnp.int32, (l_pad, 1), 0)
        mask = (pos < l_real).astype(jnp.float32)          # (Lp, 1)
    else:
        mask = None

    x_all = x_ref[0]                                       # (bb*Lp, C_IN) bf16
    ys = []
    # `chunks` is a static tuple of (start_sample, n_samples); with 2 chunks
    # the two pipelines are independent, so the scheduler overlaps chunk B's
    # GEMM pushes with chunk A's GroupNorm/leaky VPU epilogue.
    for s0, nb in chunks:
        x = x_all[s0 * l_pad:(s0 + nb) * l_pad, :]         # (nb*Lp, C_IN)
        # ----- layer1: weight-standardized 1x1 conv as a lane-dense matmul -----
        h = jnp.dot(x, w1, preferred_element_type=jnp.float32) + b1
        # ----- GroupNorm(32, 1024) per sample + leaky_relu (f32) -----
        h3 = h.reshape(nb, l_pad, C1)
        mean_c, var_c = _gn_stats(h3, e1, mask, l_real)
        inv = lax.rsqrt(var_c + EPS)
        h3 = (h3 - mean_c[:, None, :]) * inv[:, None, :]
        h3 = _leaky_relu(h3 * g1[None] + be1[None])
        # ----- layer2: weight-standardized 1x1 conv -----
        h = jnp.dot(h3.reshape(nb * l_pad, C1).astype(jnp.bfloat16), w2,
                    preferred_element_type=jnp.float32) + b2
        # ----- GroupNorm(32, 512): stats over real L, apply only at l=0 -----
        h3 = h.reshape(nb, l_pad, C2)
        mean_c, var_c = _gn_stats(h3, e2, mask, l_real)
        h0 = h3[:, 0, :]                                   # (nb, C2)
        inv = lax.rsqrt(var_c + EPS)
        h0 = _leaky_relu((h0 - mean_c) * inv * g2 + be2)
        # ----- layer3: plain 1x1 conv; only position l=0 kept -----
        ys.append(jnp.dot(h0.astype(jnp.bfloat16), w3,
                          preferred_element_type=jnp.float32) + b3)
    y = ys[0] if len(ys) == 1 else jnp.concatenate(ys, axis=0)
    out_ref[0] = y


def _standardize(w):
    """Weight standardization of a (O, I) 1x1-conv weight (kernel dim squeezed).

    Matches the PyTorch Conv1d override: subtract per-output-channel mean over
    (in, kernel), divide by unbiased std (torch.std default) of the centered
    weight + 1e-5.
    """
    mean = jnp.mean(w, axis=1, keepdims=True)
    wc = w - mean
    std = jnp.std(wc, axis=1, ddof=1, keepdims=True) + 1e-5
    return wc / std


def _group_indicator(C, g):
    cidx = jnp.arange(C) // (C // g)
    return (cidx[None, :] == jnp.arange(g)[:, None]).astype(jnp.float32)   # (g, C)


def _pick_b_blk(B, L_pad):
    """Fill the MXU M-dimension: ~ROWS_TARGET rows per grid step.

    Single-TC chips (v5e/v6e) want one fat step; we only split the batch into
    several steps when every step still gets >= ROWS_TARGET/2 rows (so v7x's
    two TCs both stay filled instead of manufacturing thin 'parallel' steps).
    """
    total = B * L_pad
    if total <= ROWS_TARGET:
        return B
    n_steps = pl.cdiv(total, ROWS_TARGET)
    return pl.cdiv(B, n_steps)


def _invariant_spec(shape):
    """Grid-invariant operand: constant index map, single-buffered."""
    nd = len(shape)
    idx = lambda *_: (0,) * nd
    try:
        return pl.BlockSpec(shape, idx, pipeline_mode=pl.Buffered(1))
    except Exception:  # older BlockSpec without pipeline_mode
        return pl.BlockSpec(shape, idx)


@functools.partial(jax.jit, static_argnames=("b_blk",))
def linear_prediction_forward(x_ncl, params, b_blk=None):
    """x_ncl: (B, 2048, L) float32 (PyTorch NCL). Returns (B, output_dim)."""
    B, Cin, L = x_ncl.shape
    assert Cin == C_IN
    (w1, b1, g1, be1, w2, b2, g2, be2, w3, b3) = params
    out_dim = w3.shape[0]

    # Pad L to a sublane multiple so in-kernel reshapes/reductions stay
    # layout-free; padded rows are masked out of the GroupNorm stats.
    L_pad = ((L + 7) // 8) * 8
    if b_blk is None:
        b_blk = _pick_b_blk(B, L_pad)
    n_blk = pl.cdiv(B, b_blk)
    B_pad = n_blk * b_blk

    rows = b_blk * L_pad
    n_chunks = 2 if (b_blk >= 2 and rows >= 2 * MIN_CHUNK_ROWS) else 1
    sizes = [b_blk // n_chunks + (1 if i < b_blk % n_chunks else 0)
             for i in range(n_chunks)]
    starts = [sum(sizes[:i]) for i in range(n_chunks)]
    chunks = tuple(zip(starts, sizes))

    # Single fused layout pass over x: NCL -> channels-last bf16 (+pad).
    # Under jit the convert fuses into the transpose copy, so x touches HBM
    # once at ~6 B/elem instead of several f32 round trips.
    # TODO(synk): have the producer emit channels-last bf16 and drop this copy.
    x_blc = jnp.transpose(x_ncl, (0, 2, 1)).astype(jnp.bfloat16)   # (B, L, C_in)
    if B_pad != B or L_pad != L:
        x_blc = jnp.pad(x_blc, ((0, B_pad - B), (0, L_pad - L), (0, 0)))
    x_rows = x_blc.reshape(n_blk, b_blk * L_pad, C_IN)

    # Weight standardization in f32, then bf16 operands for the MXU.
    w1t = _standardize(w1).T.astype(jnp.bfloat16)                # (C_in, C1)
    w2t = _standardize(w2).T.astype(jnp.bfloat16)                # (C1, C2)
    w3t = w3.T.astype(jnp.bfloat16)                              # (C2, out_dim)
    e1 = _group_indicator(C1, G)                                 # (32, 1024) f32
    e2 = _group_indicator(C2, G)                                 # (32, 512)  f32

    args = (x_rows,
            w1t, b1[None, :], g1[None, :], be1[None, :], e1,
            w2t, b2[None, :], g2[None, :], be2[None, :], e2,
            w3t, b3[None, :])

    in_specs = [
        pl.BlockSpec((1, b_blk * L_pad, C_IN), lambda i: (i, 0, 0)),  # streamed x
        _invariant_spec((C_IN, C1)),
        _invariant_spec((1, C1)),
        _invariant_spec((1, C1)),
        _invariant_spec((1, C1)),
        _invariant_spec((G, C1)),
        _invariant_spec((C1, C2)),
        _invariant_spec((1, C2)),
        _invariant_spec((1, C2)),
        _invariant_spec((1, C2)),
        _invariant_spec((G, C2)),
        _invariant_spec((C2, out_dim)),
        _invariant_spec((1, out_dim)),
    ]
    out_spec = pl.BlockSpec((1, b_blk, out_dim), lambda i: (i, 0, 0))

    kernel = functools.partial(_lp_kernel, chunks=chunks, l_pad=L_pad, l_real=L)

    out = pl.pallas_call(
        kernel,
        out_shape=jax.ShapeDtypeStruct((n_blk, b_blk, out_dim), jnp.float32),
        grid_spec=pltpu.PrefetchScalarGridSpec(
            num_scalar_prefetch=0,
            grid=(n_blk,),
            in_specs=in_specs,
            out_specs=out_spec),
        compiler_params=pltpu.CompilerParams(
            dimension_semantics=("parallel",),
            vmem_limit_bytes=48 * 1024 * 1024),
    )(*args)
    return out.reshape(B_pad, out_dim)[:B]


def reference(x_ncl, params):
    """Pure-JAX f32 reference mirroring the PyTorch forward (NCL layout)."""
    (w1, b1, g1, be1, w2, b2, g2, be2, w3, b3) = params

    def conv1x1(x, w, b):
        return jnp.einsum('oi,bil->bol', w, x) + b[None, :, None]

    def gn(x, gamma, beta):
        B, C, L = x.shape
        xg = x.reshape(B, G, (C // G) * L)
        m = xg.mean(-1, keepdims=True)
        v = xg.var(-1, keepdims=True)
        xn = ((xg - m) * lax.rsqrt(v + EPS)).reshape(B, C, L)
        return xn * gamma[None, :, None] + beta[None, :, None]

    h = _leaky_relu(gn(conv1x1(x_ncl, _standardize(w1), b1), g1, be1))
    h = _leaky_relu(gn(conv1x1(h, _standardize(w2), b2), g2, be2))
    h = conv1x1(h, w3, b3)
    return h[:, :, 0]


def _make_params(key, out_dim):
    ks = jax.random.split(key, 10)
    w1 = jax.random.normal(ks[0], (C1, C_IN), jnp.float32) * 0.02
    b1 = jax.random.normal(ks[1], (C1,), jnp.float32) * 0.1
    g1 = 1.0 + 0.1 * jax.random.normal(ks[2], (C1,), jnp.float32)
    be1 = 0.1 * jax.random.normal(ks[3], (C1,), jnp.float32)
    w2 = jax.random.normal(ks[4], (C2, C1), jnp.float32) * 0.02
    b2 = jax.random.normal(ks[5], (C2,), jnp.float32) * 0.1
    g2 = 1.0 + 0.1 * jax.random.normal(ks[6], (C2,), jnp.float32)
    be2 = 0.1 * jax.random.normal(ks[7], (C2,), jnp.float32)
    w3 = jax.random.normal(ks[8], (out_dim, C2), jnp.float32) * 0.02
    b3 = jax.random.normal(ks[9], (out_dim,), jnp.float32) * 0.1
    return (w1, b1, g1, be1, w2, b2, g2, be2, w3, b3)


if __name__ == "__main__":
    key = jax.random.PRNGKey(0)
    out_dim = 128
    pkey, key = jax.random.split(key)
    params = _make_params(pkey, out_dim)

    # configs: (B, L)
    #  (5, 8)  -> one fat step, no padding, single chunk
    #  (6, 5)  -> L padded to 8, masked GroupNorm stats path
    #  (64, 8) -> 512-row step, exercises the 2-sub-chunk GEMM/GN interleave
    configs = [(5, 8), (6, 5), (64, 8)]
    for B, L in configs:
        key, xkey = jax.random.split(key)
        x = jax.random.normal(xkey, (B, C_IN, L), jnp.float32)

        out = linear_prediction_forward(x, params)
        jax.block_until_ready(out)
        assert out.shape == (B, out_dim), out.shape

        ref = reference(x, params)
        # bf16 matmul operands with f32 accumulation vs. a pure-f32 reference.
        if not jnp.allclose(out, ref, rtol=2e-2, atol=2e-2):
            err = float(jnp.max(jnp.abs(out - ref)))
            raise AssertionError(
                f"Pallas kernel mismatch for (B={B}, L={L}): max abs err {err}")

    print("KERNEL_OK")
</pallas_src>

<mosaic_0001>
module attributes {stable_mosaic.version = 11 : i64} {
  func.func @_lp_kernel(%arg0: i32, %arg1: memref<1x40x2048xbf16, #tpu.memory_space<vmem>>, %arg2: memref<2048x1024xbf16, #tpu.memory_space<vmem>>, %arg3: memref<1x1024xf32, #tpu.memory_space<vmem>>, %arg4: memref<1x1024xf32, #tpu.memory_space<vmem>>, %arg5: memref<1x1024xf32, #tpu.memory_space<vmem>>, %arg6: memref<32x1024xf32, #tpu.memory_space<vmem>>, %arg7: memref<1024x512xbf16, #tpu.memory_space<vmem>>, %arg8: memref<1x512xf32, #tpu.memory_space<vmem>>, %arg9: memref<1x512xf32, #tpu.memory_space<vmem>>, %arg10: memref<1x512xf32, #tpu.memory_space<vmem>>, %arg11: memref<32x512xf32, #tpu.memory_space<vmem>>, %arg12: memref<512x128xbf16, #tpu.memory_space<vmem>>, %arg13: memref<1x128xf32, #tpu.memory_space<vmem>>, %arg14: memref<1x5x128xf32, #tpu.memory_space<vmem>>) attributes {dimension_semantics = [#tpu.dimension_semantics<parallel>], iteration_bounds = array<i64: 1>, scalar_prefetch = 0 : i64, scratch_operands = 0 : i64, tpu.core_type = #tpu.core_type<tc>, window_params = [{transform_indices = @transform_0, window_bounds = array<i64: 1, 40, 2048>}, {pipeline_mode = #tpu.pipeline_mode<synchronous>, transform_indices = @transform_1, window_bounds = array<i64: 2048, 1024>}, {pipeline_mode = #tpu.pipeline_mode<synchronous>, transform_indices = @transform_2, window_bounds = array<i64: 1, 1024>}, {pipeline_mode = #tpu.pipeline_mode<synchronous>, transform_indices = @transform_3, window_bounds = array<i64: 1, 1024>}, {pipeline_mode = #tpu.pipeline_mode<synchronous>, transform_indices = @transform_4, window_bounds = array<i64: 1, 1024>}, {pipeline_mode = #tpu.pipeline_mode<synchronous>, transform_indices = @transform_5, window_bounds = array<i64: 32, 1024>}, {pipeline_mode = #tpu.pipeline_mode<synchronous>, transform_indices = @transform_6, window_bounds = array<i64: 1024, 512>}, {pipeline_mode = #tpu.pipeline_mode<synchronous>, transform_indices = @transform_7, window_bounds = array<i64: 1, 512>}, {pipeline_mode = #tpu.pipeline_mode<synchronous>, transform_indices = @transform_8, window_bounds = array<i64: 1, 512>}, {pipeline_mode = #tpu.pipeline_mode<synchronous>, transform_indices = @transform_9, window_bounds = array<i64: 1, 512>}, {pipeline_mode = #tpu.pipeline_mode<synchronous>, transform_indices = @transform_10, window_bounds = array<i64: 32, 512>}, {pipeline_mode = #tpu.pipeline_mode<synchronous>, transform_indices = @transform_11, window_bounds = array<i64: 512, 128>}, {pipeline_mode = #tpu.pipeline_mode<synchronous>, transform_indices = @transform_12, window_bounds = array<i64: 1, 128>}, {transform_indices = @transform_13, window_bounds = array<i64: 1, 5, 128>}]} {
    %c0 = arith.constant 0 : index
    %c0_0 = arith.constant 0 : index
    %0 = vector.load %arg2[%c0, %c0_0] : memref<2048x1024xbf16, #tpu.memory_space<vmem>>, vector<2048x1024xbf16>
    %c0_1 = arith.constant 0 : index
    %c0_2 = arith.constant 0 : index
    %1 = vector.load %arg3[%c0_1, %c0_2] : memref<1x1024xf32, #tpu.memory_space<vmem>>, vector<1x1024xf32>
    %c0_3 = arith.constant 0 : index
    %c0_4 = arith.constant 0 : index
    %2 = vector.load %arg4[%c0_3, %c0_4] : memref<1x1024xf32, #tpu.memory_space<vmem>>, vector<1x1024xf32>
    %c0_5 = arith.constant 0 : index
    %c0_6 = arith.constant 0 : index
    %3 = vector.load %arg5[%c0_5, %c0_6] : memref<1x1024xf32, #tpu.memory_space<vmem>>, vector<1x1024xf32>
    %c0_7 = arith.constant 0 : index
    %c0_8 = arith.constant 0 : index
    %4 = vector.load %arg6[%c0_7, %c0_8] : memref<32x1024xf32, #tpu.memory_space<vmem>>, vector<32x1024xf32>
    %c0_9 = arith.constant 0 : index
    %c0_10 = arith.constant 0 : index
    %5 = vector.load %arg7[%c0_9, %c0_10] : memref<1024x512xbf16, #tpu.memory_space<vmem>>, vector<1024x512xbf16>
    %c0_11 = arith.constant 0 : index
    %c0_12 = arith.constant 0 : index
    %6 = vector.load %arg8[%c0_11, %c0_12] : memref<1x512xf32, #tpu.memory_space<vmem>>, vector<1x512xf32>
    %c0_13 = arith.constant 0 : index
    %c0_14 = arith.constant 0 : index
    %7 = vector.load %arg9[%c0_13, %c0_14] : memref<1x512xf32, #tpu.memory_space<vmem>>, vector<1x512xf32>
    %c0_15 = arith.constant 0 : index
    %c0_16 = arith.constant 0 : index
    %8 = vector.load %arg10[%c0_15, %c0_16] : memref<1x512xf32, #tpu.memory_space<vmem>>, vector<1x512xf32>
    %c0_17 = arith.constant 0 : index
    %c0_18 = arith.constant 0 : index
    %9 = vector.load %arg11[%c0_17, %c0_18] : memref<32x512xf32, #tpu.memory_space<vmem>>, vector<32x512xf32>
    %c0_19 = arith.constant 0 : index
    %c0_20 = arith.constant 0 : index
    %10 = vector.load %arg12[%c0_19, %c0_20] : memref<512x128xbf16, #tpu.memory_space<vmem>>, vector<512x128xbf16>
    %c0_21 = arith.constant 0 : index
    %c0_22 = arith.constant 0 : index
    %11 = vector.load %arg13[%c0_21, %c0_22] : memref<1x128xf32, #tpu.memory_space<vmem>>, vector<1x128xf32>
    %c0_23 = arith.constant 0 : index
    %c0_24 = arith.constant 0 : index
    %c0_25 = arith.constant 0 : index
    %12 = vector.load %arg1[%c0_23, %c0_24, %c0_25] : memref<1x40x2048xbf16, #tpu.memory_space<vmem>>, vector<1x40x2048xbf16>
    %13 = vector.shape_cast %12 : vector<1x40x2048xbf16> to vector<40x2048xbf16>
    %cst = arith.constant dense<0.000000e+00> : vector<40x1024xf32>
    %14 = tpu.matmul %13, %0, %cst {dimension_numbers = #tpu.dot_dimension_numbers<[1], [0], [0], [1], [0, 0, 1, 1], [], []>} : vector<40x2048xbf16>, vector<2048x1024xbf16>, vector<40x1024xf32> -> vector<40x1024xf32>
    %15 = vector.broadcast %1 : vector<1x1024xf32> to vector<40x1024xf32>
    %16 = arith.addf %14, %15 : vector<40x1024xf32>
    %17 = vector.shape_cast %16 : vector<40x1024xf32> to vector<5x8x1024xf32>
    %cst_26 = arith.constant dense<0.000000e+00> : vector<5x1024xf32>
    %18 = vector.multi_reduction <add>, %17, %cst_26 [1] : vector<5x8x1024xf32> to vector<5x1024xf32>
    %19 = arith.mulf %17, %17 : vector<5x8x1024xf32>
    %cst_27 = arith.constant dense<0.000000e+00> : vector<5x1024xf32>
    %20 = vector.multi_reduction <add>, %19, %cst_27 [1] : vector<5x8x1024xf32> to vector<5x1024xf32>
    %21 = tpu.concatenate %18, %20 in 0 : vector<5x1024xf32>, vector<5x1024xf32> -> vector<10x1024xf32>
    %cst_28 = arith.constant dense<0.000000e+00> : vector<10x32xf32>
    %22 = tpu.matmul %21, %4, %cst_28 {dimension_numbers = #tpu.dot_dimension_numbers<[1], [1], [0], [0], [0, 0, 1, 0], [], []>} : vector<10x1024xf32>, vector<32x1024xf32>, vector<10x32xf32> -> vector<10x32xf32>
    %cst_29 = arith.constant 3.906250e-03 : f32
    %23 = vector.broadcast %cst_29 : f32 to vector<10x32xf32>
    %24 = arith.mulf %22, %23 : vector<10x32xf32>
    %25 = vector.extract_strided_slice %24 {offsets = [0, 0], sizes = [5, 32], strides = [1, 1]} : vector<10x32xf32> to vector<5x32xf32>
    %26 = vector.extract_strided_slice %24 {offsets = [5, 0], sizes = [5, 32], strides = [1, 1]} : vector<10x32xf32> to vector<5x32xf32>
    %27 = arith.mulf %25, %25 : vector<5x32xf32>
    %28 = arith.subf %26, %27 : vector<5x32xf32>
    %29 = tpu.concatenate %25, %28 in 0 : vector<5x32xf32>, vector<5x32xf32> -> vector<10x32xf32>
    %cst_30 = arith.constant dense<0.000000e+00> : vector<10x1024xf32>
    %30 = tpu.matmul %29, %4, %cst_30 {dimension_numbers = #tpu.dot_dimension_numbers<[1], [0], [0], [1], [0, 0, 1, 1], [], []>} : vector<10x32xf32>, vector<32x1024xf32>, vector<10x1024xf32> -> vector<10x1024xf32>
    %31 = vector.extract_strided_slice %30 {offsets = [0, 0], sizes = [5, 1024], strides = [1, 1]} : vector<10x1024xf32> to vector<5x1024xf32>
    %32 = vector.extract_strided_slice %30 {offsets = [5, 0], sizes = [5, 1024], strides = [1, 1]} : vector<10x1024xf32> to vector<5x1024xf32>
    %cst_31 = arith.constant 0.000000e+00 : f32
    %33 = vector.broadcast %cst_31 : f32 to vector<5x1024xf32>
    %34 = arith.maximumf %32, %33 : vector<5x1024xf32>
    %cst_32 = arith.constant 9.99999974E-6 : f32
    %35 = vector.broadcast %cst_32 : f32 to vector<5x1024xf32>
    %36 = arith.addf %34, %35 : vector<5x1024xf32>
    %37 = math.rsqrt %36 : vector<5x1024xf32>
    %38 = vector.shape_cast %31 : vector<5x1024xf32> to vector<5x1x1024xf32>
    %39 = vector.broadcast %38 : vector<5x1x1024xf32> to vector<5x8x1024xf32>
    %40 = arith.subf %17, %39 : vector<5x8x1024xf32>
    %41 = vector.shape_cast %37 : vector<5x1024xf32> to vector<5x1x1024xf32>
    %42 = vector.broadcast %41 : vector<5x1x1024xf32> to vector<5x8x1024xf32>
    %43 = arith.mulf %40, %42 : vector<5x8x1024xf32>
    %44 = vector.shape_cast %2 : vector<1x1024xf32> to vector<1x1x1024xf32>
    %45 = vector.broadcast %44 : vector<1x1x1024xf32> to vector<5x8x1024xf32>
    %46 = arith.mulf %43, %45 : vector<5x8x1024xf32>
    %47 = vector.shape_cast %3 : vector<1x1024xf32> to vector<1x1x1024xf32>
    %48 = vector.broadcast %47 : vector<1x1x1024xf32> to vector<5x8x1024xf32>
    %49 = arith.addf %46, %48 : vector<5x8x1024xf32>
    %cst_33 = arith.constant 0.00999999977 : f32
    %50 = vector.broadcast %cst_33 : f32 to vector<5x8x1024xf32>
    %51 = arith.mulf %50, %49 : vector<5x8x1024xf32>
    %52 = arith.maximumf %49, %51 : vector<5x8x1024xf32>
    %53 = vector.shape_cast %52 : vector<5x8x1024xf32> to vector<40x1024xf32>
    %54 = arith.truncf %53 : vector<40x1024xf32> to vector<40x1024xbf16>
    %cst_34 = arith.constant dense<0.000000e+00> : vector<40x512xf32>
    %55 = tpu.matmul %54, %5, %cst_34 {dimension_numbers = #tpu.dot_dimension_numbers<[1], [0], [0], [1], [0, 0, 1, 1], [], []>} : vector<40x1024xbf16>, vector<1024x512xbf16>, vector<40x512xf32> -> vector<40x512xf32>
    %56 = vector.broadcast %6 : vector<1x512xf32> to vector<40x512xf32>
    %57 = arith.addf %55, %56 : vector<40x512xf32>
    %58 = vector.shape_cast %57 : vector<40x512xf32> to vector<5x8x512xf32>
    %cst_35 = arith.constant dense<0.000000e+00> : vector<5x512xf32>
    %59 = vector.multi_reduction <add>, %58, %cst_35 [1] : vector<5x8x512xf32> to vector<5x512xf32>
    %60 = arith.mulf %58, %58 : vector<5x8x512xf32>
    %cst_36 = arith.constant dense<0.000000e+00> : vector<5x512xf32>
    %61 = vector.multi_reduction <add>, %60, %cst_36 [1] : vector<5x8x512xf32> to vector<5x512xf32>
    %62 = tpu.concatenate %59, %61 in 0 : vector<5x512xf32>, vector<5x512xf32> -> vector<10x512xf32>
    %cst_37 = arith.constant dense<0.000000e+00> : vector<10x32xf32>
    %63 = tpu.matmul %62, %9, %cst_37 {dimension_numbers = #tpu.dot_dimension_numbers<[1], [1], [0], [0], [0, 0, 1, 0], [], []>} : vector<10x512xf32>, vector<32x512xf32>, vector<10x32xf32> -> vector<10x32xf32>
    %cst_38 = arith.constant 7.812500e-03 : f32
    %64 = vector.broadcast %cst_38 : f32 to vector<10x32xf32>
    %65 = arith.mulf %63, %64 : vector<10x32xf32>
    %66 = vector.extract_strided_slice %65 {offsets = [0, 0], sizes = [5, 32], strides = [1, 1]} : vector<10x32xf32> to vector<5x32xf32>
    %67 = vector.extract_strided_slice %65 {offsets = [5, 0], sizes = [5, 32], strides = [1, 1]} : vector<10x32xf32> to vector<5x32xf32>
    %68 = arith.mulf %66, %66 : vector<5x32xf32>
    %69 = arith.subf %67, %68 : vector<5x32xf32>
    %70 = tpu.concatenate %66, %69 in 0 : vector<5x32xf32>, vector<5x32xf32> -> vector<10x32xf32>
    %cst_39 = arith.constant dense<0.000000e+00> : vector<10x512xf32>
    %71 = tpu.matmul %70, %9, %cst_39 {dimension_numbers = #tpu.dot_dimension_numbers<[1], [0], [0], [1], [0, 0, 1, 1], [], []>} : vector<10x32xf32>, vector<32x512xf32>, vector<10x512xf32> -> vector<10x512xf32>
    %72 = vector.extract_strided_slice %71 {offsets = [0, 0], sizes = [5, 512], strides = [1, 1]} : vector<10x512xf32> to vector<5x512xf32>
    %73 = vector.extract_strided_slice %71 {offsets = [5, 0], sizes = [5, 512], strides = [1, 1]} : vector<10x512xf32> to vector<5x512xf32>
    %cst_40 = arith.constant 0.000000e+00 : f32
    %74 = vector.broadcast %cst_40 : f32 to vector<5x512xf32>
    %75 = arith.maximumf %73, %74 : vector<5x512xf32>
    %76 = vector.extract_strided_slice %58 {offsets = [0, 0, 0], sizes = [5, 1, 512], strides = [1, 1, 1]} : vector<5x8x512xf32> to vector<5x1x512xf32>
    %77 = vector.shape_cast %76 : vector<5x1x512xf32> to vector<5x512xf32>
    %cst_41 = arith.constant 9.99999974E-6 : f32
    %78 = vector.broadcast %cst_41 : f32 to vector<5x512xf32>
    %79 = arith.addf %75, %78 : vector<5x512xf32>
    %80 = math.rsqrt %79 : vector<5x512xf32>
    %81 = arith.subf %77, %72 : vector<5x512xf32>
    %82 = arith.mulf %81, %80 : vector<5x512xf32>
    %83 = vector.broadcast %7 : vector<1x512xf32> to vector<5x512xf32>
    %84 = arith.mulf %82, %83 : vector<5x512xf32>
    %85 = vector.broadcast %8 : vector<1x512xf32> to vector<5x512xf32>
    %86 = arith.addf %84, %85 : vector<5x512xf32>
    %cst_42 = arith.constant 0.00999999977 : f32
    %87 = vector.broadcast %cst_42 : f32 to vector<5x512xf32>
    %88 = arith.mulf %87, %86 : vector<5x512xf32>
    %89 = arith.maximumf %86, %88 : vector<5x512xf32>
    %90 = arith.truncf %89 : vector<5x512xf32> to vector<5x512xbf16>
    %cst_43 = arith.constant dense<0.000000e+00> : vector<5x128xf32>
    %91 = tpu.matmul %90, %10, %cst_43 {dimension_numbers = #tpu.dot_dimension_numbers<[1], [0], [0], [1], [0, 0, 1, 1], [], []>} : vector<5x512xbf16>, vector<512x128xbf16>, vector<5x128xf32> -> vector<5x128xf32>
    %92 = vector.broadcast %11 : vector<1x128xf32> to vector<5x128xf32>
    %93 = arith.addf %91, %92 : vector<5x128xf32>
    %c0_44 = arith.constant 0 : index
    %c0_45 = arith.constant 0 : index
    %c0_46 = arith.constant 0 : index
    %94 = vector.load %arg14[%c0_44, %c0_45, %c0_46] : memref<1x5x128xf32, #tpu.memory_space<vmem>>, vector<1x5x128xf32>
    %95 = vector.shape_cast %94 : vector<1x5x128xf32> to vector<5x128xf32>
    %96 = vector.shape_cast %93 : vector<5x128xf32> to vector<1x5x128xf32>
    tpu.vector_store %arg14[%c0_44, %c0_45, %c0_46], %96 {strides = array<i32>} : memref<1x5x128xf32, #tpu.memory_space<vmem>>, vector<1x5x128xf32>,
    return
  }
  func.func @transform_0(%arg0: i32) -> (i32, i32, i32) {
    %c0_i32 = arith.constant 0 : i32
    %c0_i32_0 = arith.constant 0 : i32
    %c0_i32_1 = arith.constant 0 : i32
    return %arg0, %c0_i32, %c0_i32_0 : i32, i32, i32
  }
  func.func @transform_1(%arg0: i32) -> (i32, i32) {
    %c0_i32 = arith.constant 0 : i32
    %c0_i32_0 = arith.constant 0 : i32
    %c0_i32_1 = arith.constant 0 : i32
    return %c0_i32, %c0_i32_0 : i32, i32
  }
  func.func @transform_2(%arg0: i32) -> (i32, i32) {
    %c0_i32 = arith.constant 0 : i32
    %c0_i32_0 = arith.constant 0 : i32
    %c0_i32_1 = arith.constant 0 : i32
    return %c0_i32, %c0_i32_0 : i32, i32
  }
  func.func @transform_3(%arg0: i32) -> (i32, i32) {
    %c0_i32 = arith.constant 0 : i32
    %c0_i32_0 = arith.constant 0 : i32
    %c0_i32_1 = arith.constant 0 : i32
    return %c0_i32, %c0_i32_0 : i32, i32
  }
  func.func @transform_4(%arg0: i32) -> (i32, i32) {
    %c0_i32 = arith.constant 0 : i32
    %c0_i32_0 = arith.constant 0 : i32
    %c0_i32_1 = arith.constant 0 : i32
    return %c0_i32, %c0_i32_0 : i32, i32
  }
  func.func @transform_5(%arg0: i32) -> (i32, i32) {
    %c0_i32 = arith.constant 0 : i32
    %c0_i32_0 = arith.constant 0 : i32
    %c0_i32_1 = arith.constant 0 : i32
    return %c0_i32, %c0_i32_0 : i32, i32
  }
  func.func @transform_6(%arg0: i32) -> (i32, i32) {
    %c0_i32 = arith.constant 0 : i32
    %c0_i32_0 = arith.constant 0 : i32
    %c0_i32_1 = arith.constant 0 : i32
    return %c0_i32, %c0_i32_0 : i32, i32
  }
  func.func @transform_7(%arg0: i32) -> (i32, i32) {
    %c0_i32 = arith.constant 0 : i32
    %c0_i32_0 = arith.constant 0 : i32
    %c0_i32_1 = arith.constant 0 : i32
    return %c0_i32, %c0_i32_0 : i32, i32
  }
  func.func @transform_8(%arg0: i32) -> (i32, i32) {
    %c0_i32 = arith.constant 0 : i32
    %c0_i32_0 = arith.constant 0 : i32
    %c0_i32_1 = arith.constant 0 : i32
    return %c0_i32, %c0_i32_0 : i32, i32
  }
  func.func @transform_9(%arg0: i32) -> (i32, i32) {
    %c0_i32 = arith.constant 0 : i32
    %c0_i32_0 = arith.constant 0 : i32
    %c0_i32_1 = arith.constant 0 : i32
    return %c0_i32, %c0_i32_0 : i32, i32
  }
  func.func @transform_10(%arg0: i32) -> (i32, i32) {
    %c0_i32 = arith.constant 0 : i32
    %c0_i32_0 = arith.constant 0 : i32
    %c0_i32_1 = arith.constant 0 : i32
    return %c0_i32, %c0_i32_0 : i32, i32
  }
  func.func @transform_11(%arg0: i32) -> (i32, i32) {
    %c0_i32 = arith.constant 0 : i32
    %c0_i32_0 = arith.constant 0 : i32
    %c0_i32_1 = arith.constant 0 : i32
    return %c0_i32, %c0_i32_0 : i32, i32
  }
  func.func @transform_12(%arg0: i32) -> (i32, i32) {
    %c0_i32 = arith.constant 0 : i32
    %c0_i32_0 = arith.constant 0 : i32
    %c0_i32_1 = arith.constant 0 : i32
    return %c0_i32, %c0_i32_0 : i32, i32
  }
  func.func @transform_13(%arg0: i32) -> (i32, i32, i32) {
    %c0_i32 = arith.constant 0 : i32
    %c0_i32_0 = arith.constant 0 : i32
    %c0_i32_1 = arith.constant 0 : i32
    return %arg0, %c0_i32, %c0_i32_0 : i32, i32, i32
  }
}

</mosaic_0001>

<bundles_post_ra>
// kernel: linear_prediction_forward.1
= control target key start
LH: loop header
LB: loop body
LE: loop exit
PB: predicated region body
PF: predicated region fallthrough
CT: control target
= control target key end

     0   :  { %s23496_s0 = inlined_call_operand.vmem [shape: bf16[1,40,2048], index: 0, kind: input, shape index: {}]   ;;  %s23497_s1 = inlined_call_operand.vmem [shape: bf16[2048,1024], index: 1, kind: input, shape index: {}]   ;;  %s23498_s2 = inlined_call_operand.vmem [shape: f32[1,1024], index: 2, kind: input, shape index: {}]   ;;  %s23499_s3 = inlined_call_operand.vmem [shape: f32[1,1024], index: 3, kind: input, shape index: {}]   ;;  %s23500_s4 = inlined_call_operand.vmem [shape: f32[1,1024], index: 4, kind: input, shape index: {}]   ;;  %s23501_s5 = inlined_call_operand.vmem [shape: f32[32,1024], index: 5, kind: input, shape index: {}]   ;;  %s23502_s6 = inlined_call_operand.vmem [shape: bf16[1024,512], index: 6, kind: input, shape index: {}]   ;;  %s23503_s7 = inlined_call_operand.vmem [shape: f32[1,512], index: 7, kind: input, shape index: {}]   ;;  %s23504_s8 = inlined_call_operand.vmem [shape: f32[1,512], index: 8, kind: input, shape index: {}]   ;;  %s23505_s9 = inlined_call_operand.vmem [shape: f32[1,512], index: 9, kind: input, shape index: {}]   ;;  %s23506_s10 = inlined_call_operand.vmem [shape: f32[32,512], index: 10, kind: input, shape index: {}]   ;;  %s23507_s11 = inlined_call_operand.vmem [shape: bf16[512,128], index: 11, kind: input, shape index: {}]   ;;  %s23508_s12 = inlined_call_operand.vmem [shape: f32[1,128], index: 12, kind: input, shape index: {}]   ;;  %s23509_s13 = inlined_call_operand.hbm [shape: f32[1,5,128], index: 13, kind: output, shape index: {}]  }
   0x1   :  { %v46_v0 = vld [vmem:[%s23497_s1] sm:$0xff]  ;;  %v47_v2 = vld [vmem:[%s23497_s1 + $0x8] sm:$0xff] }
   0x2   :  { %v50_v1 = vld [vmem:[%s23497_s1 + $0x20] sm:$0xff]  ;;  %v51_v4 = vld [vmem:[%s23497_s1 + $0x28] sm:$0xff] }
   0x3   :  { %v14365_v3 = vcombine.high %v46_v0, %v50_v1  ;;  %v14364_v5 = vcombine.low %v46_v0, %v50_v1  ;;  %v54_v6 = vld [vmem:[%s23497_s1 + $0x40] sm:$0xff]  ;;  %v14367_v8 = vcombine.high %v47_v2, %v51_v4  ;;  %v14366_v9 = vcombine.low %v47_v2, %v51_v4  ;;  %v55_v11 = vld [vmem:[%s23497_s1 + $0x48] sm:$0xff] }
   0x4   :  { %v58_v7 = vld [vmem:[%s23497_s1 + $0x60] sm:$0xff]  ;;  %v59_v12 = vld [vmem:[%s23497_s1 + $0x68] sm:$0xff] }
   0x5   :  { %v14373_v10 = vcombine.high %v54_v6, %v58_v7  ;;  %v62_v13 = vld [vmem:[%s23497_s1 + $0x80] sm:$0xff]  ;;  %6862 = vmatprep.subr.bf16.mxu0 %v14365_v3  ;;  %v14375_v14 = vcombine.high %v55_v11, %v59_v12  ;;  %v63_v16 = vld [vmem:[%s23497_s1 + $0x88] sm:$0xff]  ;;  %7350 = vmatprep.subr.bf16.mxu1 %v14367_v8  ;;  %v14372_v18 = vcombine.low %v54_v6, %v58_v7 }
   0x6   :  { %v66_v15 = vld [vmem:[%s23497_s1 + $0xa0] sm:$0xff]  ;;  %v67_v17 = vld [vmem:[%s23497_s1 + $0xa8] sm:$0xff]  ;;  %6863 = vmatpush1.bf16.msra.mxu0 %v14364_v5  ;;  %7351 = vmatpush1.bf16.msra.mxu1 %v14366_v9  ;;  %v14374_v19 = vcombine.low %v55_v11, %v59_v12 }
   0x7   :  { %6864 = vmatprep.subr.bf16.mxu0 %v14373_v10  ;;  %v14381_v20 = vcombine.high %v62_v13, %v66_v15  ;;  %7352 = vmatprep.subr.bf16.mxu1 %v14375_v14  ;;  %v14383_v21 = vcombine.high %v63_v16, %v67_v17  ;;  %v70_v22 = vld [vmem:[%s23497_s1 + $0xc0] sm:$0xff]  ;;  %v71_v24 = vld [vmem:[%s23497_s1 + $0xc8] sm:$0xff]  ;;  %v14380_v26 = vcombine.low %v62_v13, %v66_v15 }
   0x8   :  { %v74_v23 = vld [vmem:[%s23497_s1 + $0xe0] sm:$0xff]  ;;  %v75_v25 = vld [vmem:[%s23497_s1 + $0xe8] sm:$0xff]  ;;  %v14382_v27 = vcombine.low %v63_v16, %v67_v17 }
   0x9   :  { %v14389_v28 = vcombine.high %v70_v22, %v74_v23  ;;  %v14391_v29 = vcombine.high %v71_v24, %v75_v25  ;;  %v78_v30 = vld [vmem:[%s23497_s1 + $0x100] sm:$0xff]  ;;  %v79_v32 = vld [vmem:[%s23497_s1 + $0x108] sm:$0xff]  ;;  %v14388_v34 = vcombine.low %v70_v22, %v74_v23  ;;  %v14390_v35 = vcombine.low %v71_v24, %v75_v25 }
   0xa   :  { %6865 = vmatpush1.bf16.msra.mxu0 %v14372_v18  ;;  %7353 = vmatpush1.bf16.msra.mxu1 %v14374_v19  ;;  %v82_v31 = vld [vmem:[%s23497_s1 + $0x120] sm:$0xff]  ;;  %v83_v33 = vld [vmem:[%s23497_s1 + $0x128] sm:$0xff] }
   0xb   :  { %6866 = vmatprep.subr.bf16.mxu0 %v14381_v20  ;;  %7354 = vmatprep.subr.bf16.mxu1 %v14383_v21  ;;  %v14397_v36 = vcombine.high %v78_v30, %v82_v31  ;;  %v14399_v37 = vcombine.high %v79_v32, %v83_v33  ;;  %v86_v38 = vld [vmem:[%s23497_s1 + $0x140] sm:$0xff]  ;;  %v87_v40 = vld [vmem:[%s23497_s1 + $0x148] sm:$0xff]  ;;  %v14396_v42 = vcombine.low %v78_v30, %v82_v31 }
   0xc   :  { %v90_v39 = vld [vmem:[%s23497_s1 + $0x160] sm:$0xff]  ;;  %v91_v41 = vld [vmem:[%s23497_s1 + $0x168] sm:$0xff]  ;;  %v14398_v43 = vcombine.low %v79_v32, %v83_v33 }
   0xd   :  { %v14405_v44 = vcombine.high %v86_v38, %v90_v39  ;;  %v14407_v45 = vcombine.high %v87_v40, %v91_v41  ;;  %v94_v46 = vld [vmem:[%s23497_s1 + $0x180] sm:$0xff]  ;;  %v95_v48 = vld [vmem:[%s23497_s1 + $0x188] sm:$0xff]  ;;  %v14404_v50 = vcombine.low %v86_v38, %v90_v39  ;;  %v14406_v51 = vcombine.low %v87_v40, %v91_v41 }
   0xe   :  { %6867 = vmatpush1.bf16.msra.mxu0 %v14380_v26  ;;  %7355 = vmatpush1.bf16.msra.mxu1 %v14382_v27  ;;  %v98_v47 = vld [vmem:[%s23497_s1 + $0x1a0] sm:$0xff]  ;;  %v99_v49 = vld [vmem:[%s23497_s1 + $0x1a8] sm:$0xff] }
   0xf   :  { %6868 = vmatprep.subr.bf16.mxu0 %v14389_v28  ;;  %7356 = vmatprep.subr.bf16.mxu1 %v14391_v29  ;;  %v14413_v52 = vcombine.high %v94_v46, %v98_v47  ;;  %v16981_v53 = vld [vmem:[%s23496_s0] sm:$0xff]  ;;  %v14415_v55 = vcombine.high %v95_v48, %v99_v49  ;;  %v103_v59 = vld [vmem:[%s23497_s1 + $0x1c8] sm:$0xff]  ;;  %v14412_v61 = vcombine.low %v94_v46, %v98_v47 }
  0x10   :  { %v16986_v54 = vld [vmem:[%s23496_s0 + $0x40] sm:$0xff]  ;;  %v107_v60 = vld [vmem:[%s23497_s1 + $0x1e8] sm:$0xff]  ;;  %v14414_v62 = vcombine.low %v95_v48, %v99_v49 }
  0x11   :  { %v102_v56 = vld [vmem:[%s23497_s1 + $0x1c0] sm:$0xff]  ;;  %v16996_v58 = vcombine.high %v16981_v53, %v16986_v54  ;;  %v14423_v0 = vcombine.high %v103_v59, %v107_v60  ;;  %v111_v3 = vld [vmem:[%s23497_s1 + $0x208] sm:$0xff]  ;;  %v14422_v6 = vcombine.low %v103_v59, %v107_v60 }
  0x12   :  { %6869 = vmatpush1.bf16.msra.mxu0 %v14388_v34  ;;  %7357 = vmatpush1.bf16.msra.mxu1 %v14390_v35  ;;  %v106_v57 = vld [vmem:[%s23497_s1 + $0x1e0] sm:$0xff]  ;;  %v115_v4 = vld [vmem:[%s23497_s1 + $0x228] sm:$0xff] }
  0x13   :  { %6870 = vmatprep.subr.bf16.mxu0 %v14397_v36  ;;  %7358 = vmatprep.subr.bf16.mxu1 %v14399_v37  ;;  %v14421_v63 = vcombine.high %v102_v56, %v106_v57  ;;  %v110_v1 = vld [vmem:[%s23497_s1 + $0x200] sm:$0xff]  ;;  %v14420_v5 = vcombine.low %v102_v56, %v106_v57  ;;  %v14431_v8 = vcombine.high %v111_v3, %v115_v4  ;;  %v119_v11 = vld [vmem:[%s23497_s1 + $0x248] sm:$0xff] }
  0x14   :  { %6894 = vmatprep.mubr.bf16.mxu0 %v16996_v58  ;;  %v114_v2 = vld [vmem:[%s23497_s1 + $0x220] sm:$0xff]  ;;  %7382 = vmatprep.mubr.bf16.mxu1 %v16996_v58  ;;  %v123_v12 = vld [vmem:[%s23497_s1 + $0x268] sm:$0xff]  ;;  %v14430_v14 = vcombine.low %v111_v3, %v115_v4 }
  0x15   :  { %v14429_v7 = vcombine.high %v110_v1, %v114_v2  ;;  %v118_v9 = vld [vmem:[%s23497_s1 + $0x240] sm:$0xff]  ;;  %v14428_v13 = vcombine.low %v110_v1, %v114_v2  ;;  %v14439_v16 = vcombine.high %v119_v11, %v123_v12  ;;  %v127_v19 = vld [vmem:[%s23497_s1 + $0x288] sm:$0xff]  ;;  %v14438_v22 = vcombine.low %v119_v11, %v123_v12 }
  0x16   :  { %6871 = vmatpush1.bf16.msra.mxu0 %v14396_v42  ;;  %7359 = vmatpush1.bf16.msra.mxu1 %v14398_v43  ;;  %v122_v10 = vld [vmem:[%s23497_s1 + $0x260] sm:$0xff]  ;;  %v131_v20 = vld [vmem:[%s23497_s1 + $0x2a8] sm:$0xff] }
  0x17   :  { %6872 = vmatprep.subr.bf16.mxu0 %v14405_v44  ;;  %7360 = vmatprep.subr.bf16.mxu1 %v14407_v45  ;;  %v14437_v15 = vcombine.high %v118_v9, %v122_v10  ;;  %v126_v17 = vld [vmem:[%s23497_s1 + $0x280] sm:$0xff]  ;;  %v14436_v21 = vcombine.low %v118_v9, %v122_v10  ;;  %v14447_v24 = vcombine.high %v127_v19, %v131_v20  ;;  %v135_v27 = vld [vmem:[%s23497_s1 + $0x2c8] sm:$0xff] }
  0x18   :  { %v130_v18 = vld [vmem:[%s23497_s1 + $0x2a0] sm:$0xff]  ;;  %v139_v28 = vld [vmem:[%s23497_s1 + $0x2e8] sm:$0xff]  ;;  %v14446_v30 = vcombine.low %v127_v19, %v131_v20 }
  0x19   :  { %v14445_v23 = vcombine.high %v126_v17, %v130_v18  ;;  %v134_v25 = vld [vmem:[%s23497_s1 + $0x2c0] sm:$0xff]  ;;  %v14444_v29 = vcombine.low %v126_v17, %v130_v18  ;;  %v14455_v32 = vcombine.high %v135_v27, %v139_v28  ;;  %v143_v35 = vld [vmem:[%s23497_s1 + $0x308] sm:$0xff]  ;;  %v14454_v38 = vcombine.low %v135_v27, %v139_v28 }
  0x1a   :  { %6873 = vmatpush1.bf16.msra.mxu0 %v14404_v50  ;;  %7361 = vmatpush1.bf16.msra.mxu1 %v14406_v51  ;;  %v138_v26 = vld [vmem:[%s23497_s1 + $0x2e0] sm:$0xff]  ;;  %v147_v36 = vld [vmem:[%s23497_s1 + $0x328] sm:$0xff] }
  0x1b   :  { %6874 = vmatprep.subr.bf16.mxu0 %v14413_v52  ;;  %7362 = vmatprep.subr.bf16.mxu1 %v14415_v55  ;;  %v14453_v31 = vcombine.high %v134_v25, %v138_v26  ;;  %v142_v33 = vld [vmem:[%s23497_s1 + $0x300] sm:$0xff]  ;;  %v14452_v37 = vcombine.low %v134_v25, %v138_v26  ;;  %v14463_v40 = vcombine.high %v143_v35, %v147_v36  ;;  %v151_v43 = vld [vmem:[%s23497_s1 + $0x348] sm:$0xff] }
  0x1c   :  { %v146_v34 = vld [vmem:[%s23497_s1 + $0x320] sm:$0xff]  ;;  %v155_v44 = vld [vmem:[%s23497_s1 + $0x368] sm:$0xff]  ;;  %v14462_v46 = vcombine.low %v143_v35, %v147_v36 }
  0x1d   :  { %v14461_v39 = vcombine.high %v142_v33, %v146_v34  ;;  %v150_v41 = vld [vmem:[%s23497_s1 + $0x340] sm:$0xff]  ;;  %v14460_v45 = vcombine.low %v142_v33, %v146_v34  ;;  %v14471_v48 = vcombine.high %v151_v43, %v155_v44  ;;  %v159_v51 = vld [vmem:[%s23497_s1 + $0x388] sm:$0xff]  ;;  %v14470_v56 = vcombine.low %v151_v43, %v155_v44 }
  0x1e   :  { %6875 = vmatpush1.bf16.msra.mxu0 %v14412_v61  ;;  %7363 = vmatpush1.bf16.msra.mxu1 %v14414_v62  ;;  %v154_v42 = vld [vmem:[%s23497_s1 + $0x360] sm:$0xff]  ;;  %v163_v52 = vld [vmem:[%s23497_s1 + $0x3a8] sm:$0xff] }
  0x1f   :  { %6876 = vmatprep.subr.bf16.mxu0 %v14421_v63  ;;  %7364 = vmatprep.subr.bf16.mxu1 %v14423_v0  ;;  %v14469_v47 = vcombine.high %v150_v41, %v154_v42  ;;  %v158_v49 = vld [vmem:[%s23497_s1 + $0x380] sm:$0xff]  ;;  %v14468_v55 = vcombine.low %v150_v41, %v154_v42  ;;  %v14479_v59 = vcombine.high %v159_v51, %v163_v52  ;;  %v167_v62 = vld [vmem:[%s23497_s1 + $0x3c8] sm:$0xff] }
  0x20   :  { %v162_v50 = vld [vmem:[%s23497_s1 + $0x3a0] sm:$0xff]  ;;  %v171_v63 = vld [vmem:[%s23497_s1 + $0x3e8] sm:$0xff]  ;;  %v14478_v1 = vcombine.low %v159_v51, %v163_v52 }
  0x21   :  { %v14477_v57 = vcombine.high %v158_v49, %v162_v50  ;;  %v166_v60 = vld [vmem:[%s23497_s1 + $0x3c0] sm:$0xff]  ;;  %v14476_v0 = vcombine.low %v158_v49, %v162_v50  ;;  %v14487_v3 = vcombine.high %v167_v62, %v171_v63  ;;  %v14486_v9 = vcombine.low %v167_v62, %v171_v63  ;;  %v195_v25 = vld [vmem:[%s23497_s1 + $0x4a8] sm:$0xff] }
  0x22   :  { %6877 = vmatpush1.bf16.msra.mxu0 %v14420_v5  ;;  %7365 = vmatpush1.bf16.msra.mxu1 %v14422_v6  ;;  %v170_v61 = vld [vmem:[%s23497_s1 + $0x3e0] sm:$0xff]  ;;  %v175_v6 = vld [vmem:[%s23497_s1 + $0x408] sm:$0xff] }
  0x23   :  { %6878 = vmatprep.subr.bf16.mxu0 %v14429_v7  ;;  %7366 = vmatprep.subr.bf16.mxu1 %v14431_v8  ;;  %v14485_v2 = vcombine.high %v166_v60, %v170_v61  ;;  %v174_v4 = vld [vmem:[%s23497_s1 + $0x400] sm:$0xff]  ;;  %v179_v7 = vld [vmem:[%s23497_s1 + $0x428] sm:$0xff]  ;;  %v14484_v8 = vcombine.low %v166_v60, %v170_v61 }
  0x24   :  { %v178_v5 = vld [vmem:[%s23497_s1 + $0x420] sm:$0xff]  ;;  %v14495_v11 = vcombine.high %v175_v6, %v179_v7  ;;  %v14494_v20 = vcombine.low %v175_v6, %v179_v7  ;;  %v203_v33 = vld [vmem:[%s23497_s1 + $0x4e8] sm:$0xff] }
  0x25   :  { %v14493_v10 = vcombine.high %v174_v4, %v178_v5  ;;  %v182_v12 = vld [vmem:[%s23497_s1 + $0x440] sm:$0xff]  ;;  %v14492_v19 = vcombine.low %v174_v4, %v178_v5  ;;  %v207_v41 = vld [vmem:[%s23497_s1 + $0x508] sm:$0xff] }
  0x26   :  { %6879 = vmatpush1.bf16.msra.mxu0 %v14428_v13  ;;  %7367 = vmatpush1.bf16.msra.mxu1 %v14430_v14  ;;  %v186_v13 = vld [vmem:[%s23497_s1 + $0x460] sm:$0xff]  ;;  %v183_v14 = vld [vmem:[%s23497_s1 + $0x448] sm:$0xff] }
  0x27   :  { %6880 = vmatprep.subr.bf16.mxu0 %v14437_v15  ;;  %7368 = vmatprep.subr.bf16.mxu1 %v14439_v16  ;;  %v17125_v15 = vcombine.low %v16981_v53, %v16986_v54  ;;  %v187_v16 = vld [vmem:[%s23497_s1 + $0x468] sm:$0xff]  ;;  %v1461_v17 = vld [vmem:[%s23496_s0 + $0x80] sm:$0xff]  ;;  %v14500_v26 = vcombine.low %v182_v12, %v186_v13 }
  0x28   :  { %v1469_v18 = vld [vmem:[%s23496_s0 + $0xc0] sm:$0xff]  ;;  %v14503_v53 = vcombine.high %v183_v14, %v187_v16  ;;  %v14502_v27 = vcombine.low %v183_v14, %v187_v16  ;;  %v211_v43 = vld [vmem:[%s23497_s1 + $0x528] sm:$0xff] }
  0x29   :  { %v190_v54 = vld [vmem:[%s23497_s1 + $0x480] sm:$0xff]  ;;  %v17169_v35 = vcombine.low %v1461_v17, %v1469_v18  ;;  %v215_v50 = vld [vmem:[%s23497_s1 + $0x548] sm:$0xff]  ;;  %v14526_v60 = vcombine.low %v207_v41, %v211_v43 }
  0x2a   :  { %6881 = vmatpush1.bf16.msra.mxu0 %v14436_v21  ;;  %7369 = vmatpush1.bf16.msra.mxu1 %v14438_v22  ;;  %v14501_v21 = vcombine.high %v182_v12, %v186_v13  ;;  %v194_v22 = vld [vmem:[%s23497_s1 + $0x4a0] sm:$0xff]  ;;  %v219_v51 = vld [vmem:[%s23497_s1 + $0x568] sm:$0xff] }
  0x2b   :  { %6882 = vmatprep.subr.bf16.mxu0 %v14445_v23  ;;  %7370 = vmatprep.subr.bf16.mxu1 %v14447_v24  ;;  %v17142_v23 = vcombine.high %v1461_v17, %v1469_v18  ;;  %v191_v24 = vld [vmem:[%s23497_s1 + $0x488] sm:$0xff]  ;;  %v14509_v28 = vcombine.high %v190_v54, %v194_v22  ;;  %v1477_v34 = vld [vmem:[%s23496_s0 + $0x100] sm:$0xff]  ;;  %v14508_v36 = vcombine.low %v190_v54, %v194_v22 }
  0x2c   :  { %v17183_v44 = vcombine.high %v1477_v34, %v1477_v34  ;;  %v17202_v52 = vld [vmem:[%s23496_s0 + $0x8] sm:$0xff]  ;;  %v222_v62 = vld [vmem:[%s23497_s1 + $0x580] sm:$0xff]  ;;  %v14534_v5 = vcombine.low %v215_v50, %v219_v51 }
  0x2d   :  { %v226_v63 = vld [vmem:[%s23497_s1 + $0x5a0] sm:$0xff]  ;;  %v239_v18 = vld [vmem:[%s23497_s1 + $0x608] sm:$0xff] }
  0x2e   :  { %6883 = vmatpush1.bf16.msra.mxu0 %v14444_v29  ;;  %7371 = vmatpush1.bf16.msra.mxu1 %v14446_v30  ;;  %v198_v29 = vld [vmem:[%s23497_s1 + $0x4c0] sm:$0xff]  ;;  %v14541_v6 = vcombine.high %v222_v62, %v226_v63  ;;  %v14540_v12 = vcombine.low %v222_v62, %v226_v63 }
  0x2f   :  { %6884 = vmatprep.subr.bf16.mxu0 %v14453_v31  ;;  %7372 = vmatprep.subr.bf16.mxu1 %v14455_v32  ;;  %v202_v30 = vld [vmem:[%s23497_s1 + $0x4e0] sm:$0xff]  ;;  %v199_v31 = vld [vmem:[%s23497_s1 + $0x4c8] sm:$0xff]  ;;  %v14511_v32 = vcombine.high %v191_v24, %v195_v25 }
  0x30   :  { %v14519_v42 = vcombine.high %v199_v31, %v203_v33  ;;  %v230_v7 = vld [vmem:[%s23497_s1 + $0x5c0] sm:$0xff] }
  0x31   :  { %v238_v16 = vld [vmem:[%s23497_s1 + $0x600] sm:$0xff] }
  0x32   :  { %6885 = vmatpush1.bf16.msra.mxu0 %v14452_v37  ;;  %7373 = vmatpush1.bf16.msra.mxu1 %v14454_v38  ;;  %v14510_v37 = vcombine.low %v191_v24, %v195_v25  ;;  %v14517_v38 = vcombine.high %v198_v29, %v202_v30  ;;  %v242_v17 = vld [vmem:[%s23497_s1 + $0x620] sm:$0xff]  ;;  %v247_v25 = vld [vmem:[%s23497_s1 + $0x648] sm:$0xff] }
  0x33   :  { %6886 = vmatprep.subr.bf16.mxu0 %v14461_v39  ;;  %7374 = vmatprep.subr.bf16.mxu1 %v14463_v40  ;;  %v206_v39 = vld [vmem:[%s23497_s1 + $0x500] sm:$0xff]  ;;  %v14557_v54 = vcombine.high %v238_v16, %v242_v17 }
  0x34   :  { %v210_v40 = vld [vmem:[%s23497_s1 + $0x520] sm:$0xff] }
  0x35   :  { %v14525_v49 = vcombine.high %v206_v39, %v210_v40  ;;  %v246_v22 = vld [vmem:[%s23497_s1 + $0x640] sm:$0xff] }
  0x36   :  { %6887 = vmatpush1.bf16.msra.mxu0 %v14460_v45  ;;  %7375 = vmatpush1.bf16.msra.mxu1 %v14462_v46  ;;  %v14516_v45 = vcombine.low %v198_v29, %v202_v30  ;;  %v214_v46 = vld [vmem:[%s23497_s1 + $0x540] sm:$0xff] }
  0x37   :  { %6888 = vmatprep.subr.bf16.mxu0 %v14469_v47  ;;  %7376 = vmatprep.subr.bf16.mxu1 %v14471_v48  ;;  %v218_v47 = vld [vmem:[%s23497_s1 + $0x560] sm:$0xff]  ;;  %v14518_v48 = vcombine.low %v199_v31, %v203_v33  ;;  %v255_v33 = vld [vmem:[%s23497_s1 + $0x688] sm:$0xff] }
  0x38   :  { %v14533_v61 = vcombine.high %v214_v46, %v218_v47  ;;  %v14532_v4 = vcombine.low %v214_v46, %v218_v47  ;;  %v250_v24 = vld [vmem:[%s23497_s1 + $0x660] sm:$0xff] }
  0x39   :  { %v14565_v30 = vcombine.high %v246_v22, %v250_v24  ;;  %v254_v31 = vld [vmem:[%s23497_s1 + $0x680] sm:$0xff] }
  0x3a   :  { %6889 = vmatpush1.bf16.msra.mxu0 %v14468_v55  ;;  %7377 = vmatpush1.bf16.msra.mxu1 %v14470_v56  ;;  %v14527_v55 = vcombine.high %v207_v41, %v211_v43  ;;  %v17208_v56 = vld [vmem:[%s23496_s0 + $0x48] sm:$0xff]  ;;  %v266_v41 = vld [vmem:[%s23497_s1 + $0x6e0] sm:$0xff] }
  0x3b   :  { %6890 = vmatprep.subr.bf16.mxu0 %v14477_v57  ;;  %7378 = vmatprep.subr.bf16.mxu1 %v14479_v59  ;;  %v17211_v57 = vcombine.low %v1477_v34, %v1477_v34  ;;  %v14524_v59 = vcombine.low %v206_v39, %v210_v40  ;;  %v262_v40 = vld [vmem:[%s23497_s1 + $0x6c0] sm:$0xff] }
  0x3c   :  { %v278_v63 = vld [vmem:[%s23497_s1 + $0x740] sm:$0xff] }
  0x3e   :  { %6891 = vmatpush1.bf16.msra.mxu0 %v14476_v0  ;;  %7379 = vmatpush1.bf16.msra.mxu1 %v14478_v1  ;;  %v223_v0 = vld [vmem:[%s23497_s1 + $0x588] sm:$0xff]  ;;  %v14535_v1 = vcombine.high %v215_v50, %v219_v51  ;;  %v274_v50 = vld [vmem:[%s23497_s1 + $0x720] sm:$0xff] }
  0x3f   :  { %6892 = vmatprep.subr.bf16.mxu0 %v14485_v2  ;;  %7380 = vmatprep.subr.bf16.mxu1 %v14487_v3  ;;  %v227_v2 = vld [vmem:[%s23497_s1 + $0x5a8] sm:$0xff]  ;;  %v17227_v3 = vcombine.high %v17202_v52, %v17208_v56 }
  0x40   :  { %v14542_v13 = vcombine.low %v223_v0, %v227_v2  ;;  %v271_v51 = vld [vmem:[%s23497_s1 + $0x708] sm:$0xff] }
  0x42   :  { %6893 = vmatpush1.bf16.msra.mxu0 %v14484_v8  ;;  %7381 = vmatpush1.bf16.msra.mxu1 %v14486_v9  ;;  %v234_v8 = vld [vmem:[%s23497_s1 + $0x5e0] sm:$0xff]  ;;  %v231_v9 = vld [vmem:[%s23497_s1 + $0x5c8] sm:$0xff] }
  0x43   :  { %6923 = vmatprep.subr.bf16.mxu0 %v14493_v10  ;;  %7411 = vmatprep.subr.bf16.mxu1 %v14495_v11  ;;  %v14543_v10 = vcombine.high %v223_v0, %v227_v2  ;;  %v235_v11 = vld [vmem:[%s23497_s1 + $0x5e8] sm:$0xff]  ;;  %v14549_v14 = vcombine.high %v230_v7, %v234_v8  ;;  %v282_v0 = vld [vmem:[%s23497_s1 + $0x760] sm:$0xff] }
  0x45   :  { %6895 = vmatmul.mubr.bf16.vlgmr.msra.gmra.mrb[0].mxu0 %v17125_v15  ;;  %7383 = vmatmul.mubr.bf16.vlgmr.msra.gmra.mrb[0].mxu1 %v17125_v15 }
  0x46   :  { %6924 = vmatpush1.bf16.msra.mxu0 %v14492_v19  ;;  %7412 = vmatpush1.bf16.msra.mxu1 %v14494_v20  ;;  %v14551_v19 = vcombine.high %v231_v9, %v235_v11  ;;  %v243_v20 = vld [vmem:[%s23497_s1 + $0x628] sm:$0xff] }
  0x47   :  { %6925 = vmatprep.subr.bf16.mxu0 %v14501_v21  ;;  %7413 = vmatprep.subr.bf16.mxu1 %v14503_v53  ;;  %v14548_v21 = vcombine.low %v230_v7, %v234_v8  ;;  %v14550_v53 = vcombine.low %v231_v9, %v235_v11  ;;  %v14558_v29 = vcombine.low %v239_v18, %v243_v20  ;;  %v286_v8 = vld [vmem:[%s23497_s1 + $0x780] sm:$0xff]  ;;  %v287_v11 = vld [vmem:[%s23497_s1 + $0x788] sm:$0xff] }
  0x48   :  { %6904 = vmatprep.mubr.bf16.mxu0 %v17142_v23  ;;  %7392 = vmatprep.mubr.bf16.mxu1 %v17142_v23  ;;  %v14597_v7 = vcombine.high %v278_v63, %v282_v0 }
  0x4a   :  { %6926 = vmatpush1.bf16.msra.mxu0 %v14500_v26  ;;  %7414 = vmatpush1.bf16.msra.mxu1 %v14502_v27  ;;  %v14559_v26 = vcombine.high %v239_v18, %v243_v20  ;;  %v251_v27 = vld [vmem:[%s23497_s1 + $0x668] sm:$0xff]  ;;  %v298_v18 = vld [vmem:[%s23497_s1 + $0x7e0] sm:$0xff] }
  0x4b   :  { %6927 = vmatprep.subr.bf16.mxu0 %v14509_v28  ;;  %7415 = vmatprep.subr.bf16.mxu1 %v14511_v32  ;;  %v14556_v28 = vcombine.low %v238_v16, %v242_v17  ;;  %v258_v32 = vld [vmem:[%s23497_s1 + $0x6a0] sm:$0xff]  ;;  %v14567_v34 = vcombine.high %v247_v25, %v251_v27 }
  0x4c   :  { %v14573_v39 = vcombine.high %v254_v31, %v258_v32  ;;  %v14572_v46 = vcombine.low %v254_v31, %v258_v32  ;;  %v294_v17 = vld [vmem:[%s23497_s1 + $0x7c0] sm:$0xff] }
  0x4d   :  { %6905 = vmatmul.mubr.bf16.gmra.mrb[4].mxu0 %v17169_v35  ;;  %7393 = vmatmul.mubr.bf16.gmra.mrb[4].mxu1 %v17169_v35  ;;  %v314_v31 = vld [vmem:[%s23497_s1 + $0x860] sm:$0xff] }
  0x4e   :  { %6928 = vmatpush1.bf16.msra.mxu0 %v14508_v36  ;;  %7416 = vmatpush1.bf16.msra.mxu1 %v14510_v37  ;;  %v259_v36 = vld [vmem:[%s23497_s1 + $0x6a8] sm:$0xff]  ;;  %v14564_v37 = vcombine.low %v246_v22, %v250_v24  ;;  %v14613_v22 = vcombine.high %v294_v17, %v298_v18  ;;  %v302_v24 = vld [vmem:[%s23497_s1 + $0x800] sm:$0xff] }
  0x4f   :  { %6929 = vmatprep.subr.bf16.mxu0 %v14517_v38  ;;  %7417 = vmatprep.subr.bf16.mxu1 %v14519_v42  ;;  %v14566_v38 = vcombine.low %v247_v25, %v251_v27  ;;  %v263_v42 = vld [vmem:[%s23497_s1 + $0x6c8] sm:$0xff]  ;;  %v14575_v43 = vcombine.high %v255_v33, %v259_v36  ;;  %v14574_v47 = vcombine.low %v255_v33, %v259_v36  ;;  %v306_v25 = vld [vmem:[%s23497_s1 + $0x820] sm:$0xff] }
  0x50   :  { %6914 = vmatprep.mubr.bf16.mxu0 %v17183_v44  ;;  %7402 = vmatprep.mubr.bf16.mxu1 %v17183_v44  ;;  %v303_v27 = vld [vmem:[%s23497_s1 + $0x808] sm:$0xff]  ;;  %v14621_v33 = vcombine.high %v302_v24, %v306_v25 }
  0x51   :  { %v315_v36 = vld [vmem:[%s23497_s1 + $0x868] sm:$0xff] }
  0x52   :  { %6930 = vmatpush1.bf16.msra.mxu0 %v14516_v45  ;;  %7418 = vmatpush1.bf16.msra.mxu1 %v14518_v48  ;;  %v267_v45 = vld [vmem:[%s23497_s1 + $0x6e8] sm:$0xff]  ;;  %v14581_v48 = vcombine.high %v262_v40, %v266_v41 }
  0x53   :  { %6931 = vmatprep.subr.bf16.mxu0 %v14525_v49  ;;  %7419 = vmatprep.subr.bf16.mxu1 %v14527_v55  ;;  %v270_v49 = vld [vmem:[%s23497_s1 + $0x700] sm:$0xff]  ;;  %v14583_v55 = vcombine.high %v263_v42, %v267_v45 }
  0x54   :  { %v14589_v62 = vcombine.high %v270_v49, %v274_v50 }
  0x55   :  { %6915 = vmatmul.mubr.bf16.gmra.mrb[8].mxu0 %v17211_v57  ;;  %7403 = vmatmul.mubr.bf16.gmra.mrb[8].mxu1 %v17211_v57 }
  0x56   :  { %6932 = vmatpush1.bf16.msra.mxu0 %v14524_v59  ;;  %7420 = vmatpush1.bf16.msra.mxu1 %v14526_v60  ;;  %v275_v59 = vld [vmem:[%s23497_s1 + $0x728] sm:$0xff]  ;;  %v14580_v60 = vcombine.low %v262_v40, %v266_v41  ;;  %v17373_v40 = vcombine.low %v17202_v52, %v17208_v56  ;;  %v14620_v41 = vcombine.low %v302_v24, %v306_v25  ;;  %v350_v25 = vld [vmem:[%s23497_s1 + $0x980] sm:$0xff] }
  0x57   :  { %6933 = vmatprep.subr.bf16.mxu0 %v14533_v61  ;;  %7421 = vmatprep.subr.bf16.mxu1 %v14535_v1  ;;  %v14582_v61 = vcombine.low %v263_v42, %v267_v45  ;;  %v279_v1 = vld [vmem:[%s23497_s1 + $0x748] sm:$0xff]  ;;  %v14591_v2 = vcombine.high %v271_v51, %v275_v59  ;;  %v318_v45 = vld [vmem:[%s23497_s1 + $0x880] sm:$0xff] }
  0x58   :  { %6955 = vmatprep.mubr.bf16.mxu0 %v17227_v3  ;;  %7443 = vmatprep.mubr.bf16.mxu1 %v17227_v3  ;;  %v319_v52 = vld [vmem:[%s23497_s1 + $0x888] sm:$0xff] }
  0x59   :  { %v323_v56 = vld [vmem:[%s23497_s1 + $0x8a8] sm:$0xff] }
  0x5a   :  { %6934 = vmatpush1.bf16.msra.mxu0 %v14532_v4  ;;  %7422 = vmatpush1.bf16.msra.mxu1 %v14534_v5  ;;  %v283_v4 = vld [vmem:[%s23497_s1 + $0x768] sm:$0xff]  ;;  %v14588_v5 = vcombine.low %v270_v49, %v274_v50  ;;  %v326_v50 = vld [vmem:[%s23497_s1 + $0x8c0] sm:$0xff] }
  0x5b   :  { %6935 = vmatprep.subr.bf16.mxu0 %v14541_v6  ;;  %7423 = vmatprep.subr.bf16.mxu1 %v14543_v10  ;;  %v14590_v6 = vcombine.low %v271_v51, %v275_v59  ;;  %v14599_v9 = vcombine.high %v279_v1, %v283_v4  ;;  %v290_v10 = vld [vmem:[%s23497_s1 + $0x7a0] sm:$0xff] }
  0x5c   :  { %v14605_v16 = vcombine.high %v286_v8, %v290_v10  ;;  %v330_v59 = vld [vmem:[%s23497_s1 + $0x8e0] sm:$0xff] }
  0x5e   :  { %6936 = vmatpush1.bf16.msra.mxu0 %v14540_v12  ;;  %7424 = vmatpush1.bf16.msra.mxu1 %v14542_v13  ;;  %v291_v12 = vld [vmem:[%s23497_s1 + $0x7a8] sm:$0xff]  ;;  %v14596_v13 = vcombine.low %v278_v63, %v282_v0 }
  0x5f   :  { %6937 = vmatprep.subr.bf16.mxu0 %v14549_v14  ;;  %7425 = vmatprep.subr.bf16.mxu1 %v14551_v19  ;;  %v14598_v14 = vcombine.low %v279_v1, %v283_v4  ;;  %v295_v19 = vld [vmem:[%s23497_s1 + $0x7c8] sm:$0xff]  ;;  %v14607_v20 = vcombine.high %v287_v11, %v291_v12  ;;  %v14645_v4 = vcombine.high %v326_v50, %v330_v59 }
  0x60   :  { %v1478_v63 = vld [vmem:[%s23496_s0 + $0x108] sm:$0xff] }
  0x62   :  { %6938 = vmatpush1.bf16.msra.mxu0 %v14548_v21  ;;  %7426 = vmatpush1.bf16.msra.mxu1 %v14550_v53  ;;  %v299_v21 = vld [vmem:[%s23497_s1 + $0x7e8] sm:$0xff]  ;;  %v14604_v53 = vcombine.low %v286_v8, %v290_v10  ;;  %v17422_v10 = vcombine.high %v1478_v63, %v1478_v63 }
  0x63   :  { %6939 = vmatprep.subr.bf16.mxu0 %v14557_v54  ;;  %7427 = vmatprep.subr.bf16.mxu1 %v14559_v26  ;;  %v14606_v54 = vcombine.low %v287_v11, %v291_v12  ;;  %v14615_v26 = vcombine.high %v295_v19, %v299_v21  ;;  %v14614_v32 = vcombine.low %v295_v19, %v299_v21  ;;  %v342_v12 = vld [vmem:[%s23497_s1 + $0x940] sm:$0xff]  ;;  %v17441_v19 = vld [vmem:[%s23496_s0 + $0x10] sm:$0xff] }
  0x64   :  { %v14644_v11 = vcombine.low %v326_v50, %v330_v59  ;;  %v17447_v21 = vld [vmem:[%s23496_s0 + $0x50] sm:$0xff]  ;;  %v378_v59 = vld [vmem:[%s23497_s1 + $0xa60] sm:$0xff] }
  0x66   :  { %6940 = vmatpush1.bf16.msra.mxu0 %v14556_v28  ;;  %7428 = vmatpush1.bf16.msra.mxu1 %v14558_v29  ;;  %v307_v28 = vld [vmem:[%s23497_s1 + $0x828] sm:$0xff]  ;;  %v14612_v29 = vcombine.low %v294_v17, %v298_v18 }
  0x67   :  { %6941 = vmatprep.subr.bf16.mxu0 %v14565_v30  ;;  %7429 = vmatprep.subr.bf16.mxu1 %v14567_v34  ;;  %v310_v30 = vld [vmem:[%s23497_s1 + $0x840] sm:$0xff]  ;;  %v311_v34 = vld [vmem:[%s23497_s1 + $0x848] sm:$0xff]  ;;  %v14622_v42 = vcombine.low %v303_v27, %v307_v28 }
  0x68   :  { %v14628_v49 = vcombine.low %v310_v30, %v314_v31  ;;  %v14630_v51 = vcombine.low %v311_v34, %v315_v36  ;;  %v343_v17 = vld [vmem:[%s23497_s1 + $0x948] sm:$0xff] }
  0x69   :  { %v347_v18 = vld [vmem:[%s23497_s1 + $0x968] sm:$0xff] }
  0x6a   :  { %6942 = vmatpush1.bf16.msra.mxu0 %v14564_v37  ;;  %7430 = vmatpush1.bf16.msra.mxu1 %v14566_v38  ;;  %v1462_v37 = vld [vmem:[%s23496_s0 + $0x88] sm:$0xff]  ;;  %v14623_v38 = vcombine.high %v303_v27, %v307_v28  ;;  %v14663_v28 = vcombine.high %v343_v17, %v347_v18 }
  0x6b   :  { %6943 = vmatprep.subr.bf16.mxu0 %v14573_v39  ;;  %7431 = vmatprep.subr.bf16.mxu1 %v14575_v43  ;;  %v1470_v39 = vld [vmem:[%s23496_s0 + $0xc8] sm:$0xff]  ;;  %v14629_v43 = vcombine.high %v310_v30, %v314_v31  ;;  %v17466_v30 = vcombine.high %v17441_v19, %v17447_v21 }
  0x6c   :  { %v17408_v0 = vcombine.low %v1462_v37, %v1470_v39  ;;  %v351_v27 = vld [vmem:[%s23497_s1 + $0x988] sm:$0xff] }
  0x6e   :  { %6944 = vmatpush1.bf16.msra.mxu0 %v14572_v46  ;;  %7432 = vmatpush1.bf16.msra.mxu1 %v14574_v47  ;;  %v14631_v46 = vcombine.high %v311_v34, %v315_v36  ;;  %v322_v47 = vld [vmem:[%s23497_s1 + $0x8a0] sm:$0xff] }
  0x6f   :  { %6945 = vmatprep.subr.bf16.mxu0 %v14581_v48  ;;  %7433 = vmatprep.subr.bf16.mxu1 %v14583_v55  ;;  %v17387_v48 = vcombine.high %v1462_v37, %v1470_v39  ;;  %v14637_v55 = vcombine.high %v318_v45, %v322_v47  ;;  %v14636_v1 = vcombine.low %v318_v45, %v322_v47  ;;  %v358_v34 = vld [vmem:[%s23497_s1 + $0x9c0] sm:$0xff]  ;;  %v359_v37 = vld [vmem:[%s23497_s1 + $0x9c8] sm:$0xff] }
  0x70   :  { %v362_v36 = vld [vmem:[%s23497_s1 + $0x9e0] sm:$0xff]  ;;  %v363_v39 = vld [vmem:[%s23497_s1 + $0x9e8] sm:$0xff] }
  0x71   :  { %v366_v45 = vld [vmem:[%s23497_s1 + $0xa00] sm:$0xff]  ;;  %v367_v47 = vld [vmem:[%s23497_s1 + $0xa08] sm:$0xff]  ;;  %v14678_v50 = vcombine.low %v359_v37, %v363_v39 }
  0x72   :  { %6946 = vmatpush1.bf16.msra.mxu0 %v14580_v60  ;;  %7434 = vmatpush1.bf16.msra.mxu1 %v14582_v61  ;;  %v327_v60 = vld [vmem:[%s23497_s1 + $0x8c8] sm:$0xff] }
  0x73   :  { %6947 = vmatprep.subr.bf16.mxu0 %v14589_v62  ;;  %7435 = vmatprep.subr.bf16.mxu1 %v14591_v2  ;;  %v331_v61 = vld [vmem:[%s23497_s1 + $0x8e8] sm:$0xff]  ;;  %v14639_v62 = vcombine.high %v319_v52, %v323_v56  ;;  %v14638_v2 = vcombine.low %v319_v52, %v323_v56  ;;  %v14679_v52 = vcombine.high %v359_v37, %v363_v39 }
  0x74   :  { %v14647_v8 = vcombine.high %v327_v60, %v331_v61  ;;  %v371_v56 = vld [vmem:[%s23497_s1 + $0xa28] sm:$0xff] }
  0x76   :  { %6948 = vmatpush1.bf16.msra.mxu0 %v14588_v5  ;;  %7436 = vmatpush1.bf16.msra.mxu1 %v14590_v6  ;;  %v334_v5 = vld [vmem:[%s23497_s1 + $0x900] sm:$0xff] }
  0x77   :  { %6949 = vmatprep.subr.bf16.mxu0 %v14597_v7  ;;  %7437 = vmatprep.subr.bf16.mxu1 %v14599_v9  ;;  %v338_v6 = vld [vmem:[%s23497_s1 + $0x920] sm:$0xff]  ;;  %v335_v7 = vld [vmem:[%s23497_s1 + $0x908] sm:$0xff] }
  0x78   :  { %v339_v9 = vld [vmem:[%s23497_s1 + $0x928] sm:$0xff] }
  0x7a   :  { %6950 = vmatpush1.bf16.msra.mxu0 %v14596_v13  ;;  %7438 = vmatpush1.bf16.msra.mxu1 %v14598_v14  ;;  %v346_v13 = vld [vmem:[%s23497_s1 + $0x960] sm:$0xff]  ;;  %v14646_v14 = vcombine.low %v327_v60, %v331_v61  ;;  %v375_v60 = vld [vmem:[%s23497_s1 + $0xa48] sm:$0xff]  ;;  %v14687_v61 = vcombine.high %v367_v47, %v371_v56 }
  0x7b   :  { %6951 = vmatprep.subr.bf16.mxu0 %v14605_v16  ;;  %7439 = vmatprep.subr.bf16.mxu1 %v14607_v20  ;;  %v14653_v16 = vcombine.high %v334_v5, %v338_v6  ;;  %v14655_v20 = vcombine.high %v335_v7, %v339_v9  ;;  %v14661_v24 = vcombine.high %v342_v12, %v346_v13 }
  0x7c   :  { %v14660_v31 = vcombine.low %v342_v12, %v346_v13  ;;  %v390_v13 = vld [vmem:[%s23497_s1 + $0xac0] sm:$0xff] }
  0x7e   :  { %6952 = vmatpush1.bf16.msra.mxu0 %v14604_v53  ;;  %7440 = vmatpush1.bf16.msra.mxu1 %v14606_v54  ;;  %v17450_v53 = vcombine.low %v1478_v63, %v1478_v63  ;;  %v14652_v54 = vcombine.low %v334_v5, %v338_v6  ;;  %v386_v5 = vld [vmem:[%s23497_s1 + $0xaa0] sm:$0xff]  ;;  %v383_v6 = vld [vmem:[%s23497_s1 + $0xa88] sm:$0xff] }
  0x7f   :  { %6953 = vmatprep.subr.bf16.mxu0 %v14613_v22  ;;  %7441 = vmatprep.subr.bf16.mxu1 %v14615_v26  ;;  %v14654_v22 = vcombine.low %v335_v7, %v339_v9  ;;  %v354_v26 = vld [vmem:[%s23497_s1 + $0x9a0] sm:$0xff] }
  0x82   :  { %6954 = vmatpush1.bf16.msra.mxu0 %v14612_v29  ;;  %7442 = vmatpush1.bf16.msra.mxu1 %v14614_v32  ;;  %v355_v29 = vld [vmem:[%s23497_s1 + $0x9a8] sm:$0xff]  ;;  %v14662_v32 = vcombine.low %v343_v17, %v347_v18 }
  0x83   :  { %6984 = vmatprep.subr.bf16.mxu0 %v14621_v33  ;;  %7472 = vmatprep.subr.bf16.mxu1 %v14623_v38  ;;  %v14669_v33 = vcombine.high %v350_v25, %v354_v26  ;;  %v14671_v38 = vcombine.high %v351_v27, %v355_v29  ;;  %v395_v18 = vld [vmem:[%s23497_s1 + $0xae8] sm:$0xff] }
  0x85   :  { %6956 = vmatmul.mubr.bf16.vlgmr.msra.gmra.mrb[0].mxu0 %v17373_v40  ;;  %7444 = vmatmul.mubr.bf16.vlgmr.msra.gmra.mrb[0].mxu1 %v17373_v40 }
  0x86   :  { %6985 = vmatpush1.bf16.msra.mxu0 %v14620_v41  ;;  %7473 = vmatpush1.bf16.msra.mxu1 %v14622_v42  ;;  %v14668_v41 = vcombine.low %v350_v25, %v354_v26  ;;  %v14670_v42 = vcombine.low %v351_v27, %v355_v29  ;;  %v402_v25 = vld [vmem:[%s23497_s1 + $0xb20] sm:$0xff]  ;;  %v399_v26 = vld [vmem:[%s23497_s1 + $0xb08] sm:$0xff] }
  0x87   :  { %6986 = vmatprep.subr.bf16.mxu0 %v14629_v43  ;;  %7474 = vmatprep.subr.bf16.mxu1 %v14631_v46  ;;  %v14677_v43 = vcombine.high %v358_v34, %v362_v36  ;;  %v370_v46 = vld [vmem:[%s23497_s1 + $0xa20] sm:$0xff] }
  0x88   :  { %6965 = vmatprep.mubr.bf16.mxu0 %v17387_v48  ;;  %7453 = vmatprep.mubr.bf16.mxu1 %v17387_v48  ;;  %v14684_v63 = vcombine.low %v366_v45, %v370_v46 }
  0x8a   :  { %6987 = vmatpush1.bf16.msra.mxu0 %v14628_v49  ;;  %7475 = vmatpush1.bf16.msra.mxu1 %v14630_v51  ;;  %v14676_v49 = vcombine.low %v358_v34, %v362_v36  ;;  %v14685_v51 = vcombine.high %v366_v45, %v370_v46  ;;  %v410_v34 = vld [vmem:[%s23497_s1 + $0xb60] sm:$0xff]  ;;  %v407_v36 = vld [vmem:[%s23497_s1 + $0xb48] sm:$0xff] }
  0x8b   :  { %6988 = vmatprep.subr.bf16.mxu0 %v14637_v55  ;;  %7476 = vmatprep.subr.bf16.mxu1 %v14639_v62  ;;  %v374_v55 = vld [vmem:[%s23497_s1 + $0xa40] sm:$0xff]  ;;  %v379_v62 = vld [vmem:[%s23497_s1 + $0xa68] sm:$0xff] }
  0x8c   :  { %v14695_v7 = vcombine.high %v375_v60, %v379_v62  ;;  %v14692_v9 = vcombine.low %v374_v55, %v378_v59  ;;  %v418_v46 = vld [vmem:[%s23497_s1 + $0xba0] sm:$0xff] }
  0x8d   :  { %6966 = vmatmul.mubr.bf16.gmra.mrb[4].mxu0 %v17408_v0  ;;  %7454 = vmatmul.mubr.bf16.gmra.mrb[4].mxu1 %v17408_v0 }
  0x8e   :  { %6989 = vmatpush1.bf16.msra.mxu0 %v14636_v1  ;;  %7477 = vmatpush1.bf16.msra.mxu1 %v14638_v2  ;;  %v14686_v1 = vcombine.low %v367_v47, %v371_v56  ;;  %v14693_v2 = vcombine.high %v374_v55, %v378_v59  ;;  %v415_v47 = vld [vmem:[%s23497_s1 + $0xb88] sm:$0xff]  ;;  %v426_v55 = vld [vmem:[%s23497_s1 + $0xbe0] sm:$0xff] }
  0x8f   :  { %6990 = vmatprep.subr.bf16.mxu0 %v14645_v4  ;;  %7478 = vmatprep.subr.bf16.mxu1 %v14647_v8  ;;  %v382_v4 = vld [vmem:[%s23497_s1 + $0xa80] sm:$0xff]  ;;  %v387_v8 = vld [vmem:[%s23497_s1 + $0xaa8] sm:$0xff] }
  0x90   :  { %6975 = vmatprep.mubr.bf16.mxu0 %v17422_v10  ;;  %7463 = vmatprep.mubr.bf16.mxu1 %v17422_v10  ;;  %v14701_v12 = vcombine.high %v382_v4, %v386_v5  ;;  %v14703_v17 = vcombine.high %v383_v6, %v387_v8  ;;  %v423_v59 = vld [vmem:[%s23497_s1 + $0xbc8] sm:$0xff] }
  0x92   :  { %6991 = vmatpush1.bf16.msra.mxu0 %v14644_v11  ;;  %7479 = vmatpush1.bf16.msra.mxu1 %v14646_v14  ;;  %v14694_v11 = vcombine.low %v375_v60, %v379_v62  ;;  %v394_v14 = vld [vmem:[%s23497_s1 + $0xae0] sm:$0xff] }
  0x93   :  { %6992 = vmatprep.subr.bf16.mxu0 %v14653_v16  ;;  %7480 = vmatprep.subr.bf16.mxu1 %v14655_v20  ;;  %v391_v16 = vld [vmem:[%s23497_s1 + $0xac8] sm:$0xff]  ;;  %v14700_v20 = vcombine.low %v382_v4, %v386_v5  ;;  %v14708_v29 = vcombine.low %v390_v13, %v394_v14  ;;  %v434_v4 = vld [vmem:[%s23497_s1 + $0xc20] sm:$0xff] }
  0x94   :  { %v14711_v27 = vcombine.high %v391_v16, %v395_v18 }
  0x95   :  { %6976 = vmatmul.mubr.bf16.gmra.mrb[8].mxu0 %v17450_v53  ;;  %7464 = vmatmul.mubr.bf16.gmra.mrb[8].mxu1 %v17450_v53 }
  0x96   :  { %6993 = vmatpush1.bf16.msra.mxu0 %v14652_v54  ;;  %7481 = vmatpush1.bf16.msra.mxu1 %v14654_v22  ;;  %v14702_v54 = vcombine.low %v383_v6, %v387_v8  ;;  %v14709_v22 = vcombine.high %v390_v13, %v394_v14  ;;  %v431_v6 = vld [vmem:[%s23497_s1 + $0xc08] sm:$0xff] }
  0x97   :  { %6994 = vmatprep.subr.bf16.mxu0 %v14661_v24  ;;  %7482 = vmatprep.subr.bf16.mxu1 %v14663_v28  ;;  %v398_v24 = vld [vmem:[%s23497_s1 + $0xb00] sm:$0xff]  ;;  %v403_v28 = vld [vmem:[%s23497_s1 + $0xb28] sm:$0xff] }
  0x98   :  { %7016 = vmatprep.mubr.bf16.mxu0 %v17466_v30  ;;  %7504 = vmatprep.mubr.bf16.mxu1 %v17466_v30  ;;  %v14719_v37 = vcombine.high %v399_v26, %v403_v28  ;;  %v14716_v39 = vcombine.low %v398_v24, %v402_v25  ;;  %v439_v14 = vld [vmem:[%s23497_s1 + $0xc48] sm:$0xff] }
  0x9a   :  { %6995 = vmatpush1.bf16.msra.mxu0 %v14660_v31  ;;  %7483 = vmatpush1.bf16.msra.mxu1 %v14662_v32  ;;  %v14710_v31 = vcombine.low %v391_v16, %v395_v18  ;;  %v14717_v32 = vcombine.high %v398_v24, %v402_v25  ;;  %v443_v16 = vld [vmem:[%s23497_s1 + $0xc68] sm:$0xff] }
  0x9b   :  { %6996 = vmatprep.subr.bf16.mxu0 %v14669_v33  ;;  %7484 = vmatprep.subr.bf16.mxu1 %v14671_v38  ;;  %v406_v33 = vld [vmem:[%s23497_s1 + $0xb40] sm:$0xff]  ;;  %v411_v38 = vld [vmem:[%s23497_s1 + $0xb68] sm:$0xff] }
  0x9c   :  { %v14727_v45 = vcombine.high %v407_v36, %v411_v38  ;;  %v14724_v56 = vcombine.low %v406_v33, %v410_v34 }
  0x9e   :  { %6997 = vmatpush1.bf16.msra.mxu0 %v14668_v41  ;;  %7485 = vmatpush1.bf16.msra.mxu1 %v14670_v42  ;;  %v14718_v41 = vcombine.low %v399_v26, %v403_v28  ;;  %v14725_v42 = vcombine.high %v406_v33, %v410_v34  ;;  %v446_v26 = vld [vmem:[%s23497_s1 + $0xc80] sm:$0xff]  ;;  %v14758_v33 = vcombine.low %v439_v14, %v443_v16 }
  0x9f   :  { %6998 = vmatprep.subr.bf16.mxu0 %v14677_v43  ;;  %7486 = vmatprep.subr.bf16.mxu1 %v14679_v52  ;;  %v414_v43 = vld [vmem:[%s23497_s1 + $0xb80] sm:$0xff]  ;;  %v419_v52 = vld [vmem:[%s23497_s1 + $0xba8] sm:$0xff] }
  0xa0   :  { %v14735_v60 = vcombine.high %v415_v47, %v419_v52  ;;  %v14732_v62 = vcombine.low %v414_v43, %v418_v46  ;;  %v450_v28 = vld [vmem:[%s23497_s1 + $0xca0] sm:$0xff] }
  0xa1   :  { %v14765_v34 = vcombine.high %v446_v26, %v450_v28 }
  0xa2   :  { %6999 = vmatpush1.bf16.msra.mxu0 %v14676_v49  ;;  %7487 = vmatpush1.bf16.msra.mxu1 %v14678_v50  ;;  %v14726_v49 = vcombine.low %v407_v36, %v411_v38  ;;  %v14733_v50 = vcombine.high %v414_v43, %v418_v46  ;;  %v458_v36 = vld [vmem:[%s23497_s1 + $0xce0] sm:$0xff]  ;;  %v459_v38 = vld [vmem:[%s23497_s1 + $0xce8] sm:$0xff]  ;;  %v14764_v43 = vcombine.low %v446_v26, %v450_v28 }
  0xa3   :  { %7000 = vmatprep.subr.bf16.mxu0 %v14685_v51  ;;  %7488 = vmatprep.subr.bf16.mxu1 %v14687_v61  ;;  %v422_v51 = vld [vmem:[%s23497_s1 + $0xbc0] sm:$0xff]  ;;  %v427_v61 = vld [vmem:[%s23497_s1 + $0xbe8] sm:$0xff] }
  0xa4   :  { %v14743_v5 = vcombine.high %v423_v59, %v427_v61  ;;  %v14740_v8 = vcombine.low %v422_v51, %v426_v55  ;;  %v487_v26 = vld [vmem:[%s23497_s1 + $0xdc8] sm:$0xff] }
  0xa5   :  { %v491_v28 = vld [vmem:[%s23497_s1 + $0xde8] sm:$0xff] }
  0xa6   :  { %7001 = vmatpush1.bf16.msra.mxu0 %v14684_v63  ;;  %7489 = vmatpush1.bf16.msra.mxu1 %v14686_v1  ;;  %v14734_v63 = vcombine.low %v415_v47, %v419_v52  ;;  %v14741_v1 = vcombine.high %v422_v51, %v426_v55  ;;  %v462_v47 = vld [vmem:[%s23497_s1 + $0xd00] sm:$0xff] }
  0xa7   :  { %7002 = vmatprep.subr.bf16.mxu0 %v14693_v2  ;;  %7490 = vmatprep.subr.bf16.mxu1 %v14695_v7  ;;  %v430_v2 = vld [vmem:[%s23497_s1 + $0xc00] sm:$0xff]  ;;  %v435_v7 = vld [vmem:[%s23497_s1 + $0xc28] sm:$0xff] }
  0xa8   :  { %v14749_v13 = vcombine.high %v430_v2, %v434_v4  ;;  %v14751_v18 = vcombine.high %v431_v6, %v435_v7  ;;  %v14750_v24 = vcombine.low %v431_v6, %v435_v7  ;;  %v466_v52 = vld [vmem:[%s23497_s1 + $0xd20] sm:$0xff] }
  0xa9   :  { %v14780_v7 = vcombine.low %v462_v47, %v466_v52 }
  0xaa   :  { %7003 = vmatpush1.bf16.msra.mxu0 %v14692_v9  ;;  %7491 = vmatpush1.bf16.msra.mxu1 %v14694_v11  ;;  %v438_v9 = vld [vmem:[%s23497_s1 + $0xc40] sm:$0xff] }
  0xab   :  { %7004 = vmatprep.subr.bf16.mxu0 %v14701_v12  ;;  %7492 = vmatprep.subr.bf16.mxu1 %v14703_v17  ;;  %v442_v11 = vld [vmem:[%s23497_s1 + $0xc60] sm:$0xff]  ;;  %v14742_v12 = vcombine.low %v423_v59, %v427_v61  ;;  %v1463_v17 = vld [vmem:[%s23496_s0 + $0x90] sm:$0xff] }
  0xac   :  { %v14757_v25 = vcombine.high %v438_v9, %v442_v11  ;;  %v470_v59 = vld [vmem:[%s23497_s1 + $0xd40] sm:$0xff] }
  0xae   :  { %7005 = vmatpush1.bf16.msra.mxu0 %v14700_v20  ;;  %7493 = vmatpush1.bf16.msra.mxu1 %v14702_v54  ;;  %v1471_v20 = vld [vmem:[%s23496_s0 + $0xd0] sm:$0xff]  ;;  %v17612_v54 = vcombine.low %v17441_v19, %v17447_v21  ;;  %v447_v19 = vld [vmem:[%s23497_s1 + $0xc88] sm:$0xff] }
  0xaf   :  { %7006 = vmatprep.subr.bf16.mxu0 %v14709_v22  ;;  %7494 = vmatprep.subr.bf16.mxu1 %v14711_v27  ;;  %v14748_v22 = vcombine.low %v430_v2, %v434_v4  ;;  %v14759_v27 = vcombine.high %v439_v14, %v443_v16  ;;  %v451_v21 = vld [vmem:[%s23497_s1 + $0xca8] sm:$0xff]  ;;  %v17680_v2 = vld [vmem:[%s23496_s0 + $0x18] sm:$0xff] }
  0xb0   :  { %v483_v16 = vld [vmem:[%s23497_s1 + $0xda8] sm:$0xff] }
  0xb2   :  { %7007 = vmatpush1.bf16.msra.mxu0 %v14708_v29  ;;  %7495 = vmatpush1.bf16.msra.mxu1 %v14710_v31  ;;  %v17626_v29 = vcombine.high %v1463_v17, %v1471_v20  ;;  %v14756_v31 = vcombine.low %v438_v9, %v442_v11  ;;  %v478_v11 = vld [vmem:[%s23497_s1 + $0xd80] sm:$0xff] }
  0xb3   :  { %7008 = vmatprep.subr.bf16.mxu0 %v14717_v32  ;;  %7496 = vmatprep.subr.bf16.mxu1 %v14719_v37  ;;  %v454_v32 = vld [vmem:[%s23497_s1 + $0xcc0] sm:$0xff]  ;;  %v455_v37 = vld [vmem:[%s23497_s1 + $0xcc8] sm:$0xff] }
  0xb4   :  { %v14773_v46 = vcombine.high %v454_v32, %v458_v36  ;;  %v14772_v55 = vcombine.low %v454_v32, %v458_v36  ;;  %v14774_v61 = vcombine.low %v455_v37, %v459_v38  ;;  %v494_v32 = vld [vmem:[%s23497_s1 + $0xe00] sm:$0xff]  ;;  %v14807_v36 = vcombine.high %v487_v26, %v491_v28 }
  0xb6   :  { %7009 = vmatpush1.bf16.msra.mxu0 %v14716_v39  ;;  %7497 = vmatpush1.bf16.msra.mxu1 %v14718_v41  ;;  %v14767_v39 = vcombine.high %v447_v19, %v451_v21  ;;  %v1479_v41 = vld [vmem:[%s23496_s0 + $0x110] sm:$0xff] }
  0xb7   :  { %7010 = vmatprep.subr.bf16.mxu0 %v14725_v42  ;;  %7498 = vmatprep.subr.bf16.mxu1 %v14727_v45  ;;  %v17647_v42 = vcombine.low %v1463_v17, %v1471_v20  ;;  %v14766_v45 = vcombine.low %v447_v19, %v451_v21  ;;  %v17661_v51 = vcombine.high %v1479_v41, %v1479_v41 }
  0xb8   :  { %v17689_v6 = vcombine.low %v1479_v41, %v1479_v41 }
  0xba   :  { %7011 = vmatpush1.bf16.msra.mxu0 %v14724_v56  ;;  %7499 = vmatpush1.bf16.msra.mxu1 %v14726_v49  ;;  %v463_v56 = vld [vmem:[%s23497_s1 + $0xd08] sm:$0xff]  ;;  %v14775_v49 = vcombine.high %v455_v37, %v459_v38 }
  0xbb   :  { %7012 = vmatprep.subr.bf16.mxu0 %v14733_v50  ;;  %7500 = vmatprep.subr.bf16.mxu1 %v14735_v60  ;;  %v467_v50 = vld [vmem:[%s23497_s1 + $0xd28] sm:$0xff]  ;;  %v474_v60 = vld [vmem:[%s23497_s1 + $0xd60] sm:$0xff] }
  0xbc   :  { %v14783_v4 = vcombine.high %v463_v56, %v467_v50  ;;  %v14789_v9 = vcombine.high %v470_v59, %v474_v60  ;;  %v499_v37 = vld [vmem:[%s23497_s1 + $0xe28] sm:$0xff] }
  0xbe   :  { %7013 = vmatpush1.bf16.msra.mxu0 %v14732_v62  ;;  %7501 = vmatpush1.bf16.msra.mxu1 %v14734_v63  ;;  %v14781_v62 = vcombine.high %v462_v47, %v466_v52  ;;  %v471_v63 = vld [vmem:[%s23497_s1 + $0xd48] sm:$0xff] }
  0xbf   :  { %7014 = vmatprep.subr.bf16.mxu0 %v14741_v1  ;;  %7502 = vmatprep.subr.bf16.mxu1 %v14743_v5  ;;  %v475_v1 = vld [vmem:[%s23497_s1 + $0xd68] sm:$0xff]  ;;  %v17686_v5 = vld [vmem:[%s23496_s0 + $0x58] sm:$0xff] }
  0xc0   :  { %v14791_v14 = vcombine.high %v471_v63, %v475_v1  ;;  %v17705_v17 = vcombine.high %v17680_v2, %v17686_v5  ;;  %v14790_v20 = vcombine.low %v471_v63, %v475_v1  ;;  %v507_v52 = vld [vmem:[%s23497_s1 + $0xe68] sm:$0xff] }
  0xc2   :  { %7015 = vmatpush1.bf16.msra.mxu0 %v14740_v8  ;;  %7503 = vmatpush1.bf16.msra.mxu1 %v14742_v12  ;;  %v14782_v8 = vcombine.low %v463_v56, %v467_v50  ;;  %v482_v12 = vld [vmem:[%s23497_s1 + $0xda0] sm:$0xff] }
  0xc3   :  { %7045 = vmatprep.subr.bf16.mxu0 %v14749_v13  ;;  %7533 = vmatprep.subr.bf16.mxu1 %v14751_v18  ;;  %v479_v13 = vld [vmem:[%s23497_s1 + $0xd88] sm:$0xff]  ;;  %v14788_v18 = vcombine.low %v470_v59, %v474_v60  ;;  %v14796_v19 = vcombine.low %v478_v11, %v482_v12  ;;  %v514_v59 = vld [vmem:[%s23497_s1 + $0xea0] sm:$0xff] }
  0xc4   :  { %v14798_v21 = vcombine.low %v479_v13, %v483_v16  ;;  %v511_v60 = vld [vmem:[%s23497_s1 + $0xe88] sm:$0xff] }
  0xc5   :  { %7017 = vmatmul.mubr.bf16.vlgmr.msra.gmra.mrb[0].mxu0 %v17612_v54  ;;  %7505 = vmatmul.mubr.bf16.vlgmr.msra.gmra.mrb[0].mxu1 %v17612_v54 }
  0xc6   :  { %7046 = vmatpush1.bf16.msra.mxu0 %v14748_v22  ;;  %7534 = vmatpush1.bf16.msra.mxu1 %v14750_v24  ;;  %v14797_v22 = vcombine.high %v478_v11, %v482_v12  ;;  %v486_v24 = vld [vmem:[%s23497_s1 + $0xdc0] sm:$0xff]  ;;  %v523_v12 = vld [vmem:[%s23497_s1 + $0xee8] sm:$0xff] }
  0xc7   :  { %7047 = vmatprep.subr.bf16.mxu0 %v14757_v25  ;;  %7535 = vmatprep.subr.bf16.mxu1 %v14759_v27  ;;  %v490_v25 = vld [vmem:[%s23497_s1 + $0xde0] sm:$0xff]  ;;  %v14799_v27 = vcombine.high %v479_v13, %v483_v16 }
  0xc8   :  { %7026 = vmatprep.mubr.bf16.mxu0 %v17626_v29  ;;  %7514 = vmatprep.mubr.bf16.mxu1 %v17626_v29  ;;  %v14804_v38 = vcombine.low %v486_v24, %v490_v25 }
  0xca   :  { %7048 = vmatpush1.bf16.msra.mxu0 %v14756_v31  ;;  %7536 = vmatpush1.bf16.msra.mxu1 %v14758_v33  ;;  %v14805_v31 = vcombine.high %v486_v24, %v490_v25  ;;  %v498_v33 = vld [vmem:[%s23497_s1 + $0xe20] sm:$0xff]  ;;  %v527_v24 = vld [vmem:[%s23497_s1 + $0xf08] sm:$0xff] }
  0xcb   :  { %7049 = vmatprep.subr.bf16.mxu0 %v14765_v34  ;;  %7537 = vmatprep.subr.bf16.mxu1 %v14767_v39  ;;  %v495_v34 = vld [vmem:[%s23497_s1 + $0xe08] sm:$0xff]  ;;  %v14806_v39 = vcombine.low %v487_v26, %v491_v28  ;;  %v14813_v41 = vcombine.high %v494_v32, %v498_v33  ;;  %v14812_v56 = vcombine.low %v494_v32, %v498_v33 }
  0xcc   :  { %v14815_v47 = vcombine.high %v495_v34, %v499_v37  ;;  %v531_v25 = vld [vmem:[%s23497_s1 + $0xf28] sm:$0xff] }
  0xcd   :  { %7027 = vmatmul.mubr.bf16.gmra.mrb[4].mxu0 %v17647_v42  ;;  %7515 = vmatmul.mubr.bf16.gmra.mrb[4].mxu1 %v17647_v42 }
  0xce   :  { %7050 = vmatpush1.bf16.msra.mxu0 %v14764_v43  ;;  %7538 = vmatpush1.bf16.msra.mxu1 %v14766_v45  ;;  %v502_v43 = vld [vmem:[%s23497_s1 + $0xe40] sm:$0xff] }
  0xcf   :  { %7051 = vmatprep.subr.bf16.mxu0 %v14773_v46  ;;  %7539 = vmatprep.subr.bf16.mxu1 %v14775_v49  ;;  %v506_v45 = vld [vmem:[%s23497_s1 + $0xe60] sm:$0xff]  ;;  %v503_v46 = vld [vmem:[%s23497_s1 + $0xe48] sm:$0xff]  ;;  %v14814_v49 = vcombine.low %v495_v34, %v499_v37 }
  0xd0   :  { %7036 = vmatprep.mubr.bf16.mxu0 %v17661_v51  ;;  %7524 = vmatprep.mubr.bf16.mxu1 %v17661_v51  ;;  %v14821_v50 = vcombine.high %v502_v43, %v506_v45  ;;  %v14820_v63 = vcombine.low %v502_v43, %v506_v45  ;;  %v14822_v1 = vcombine.low %v503_v46, %v507_v52 }
  0xd2   :  { %7052 = vmatpush1.bf16.msra.mxu0 %v14772_v55  ;;  %7540 = vmatpush1.bf16.msra.mxu1 %v14774_v61  ;;  %v510_v55 = vld [vmem:[%s23497_s1 + $0xe80] sm:$0xff]  ;;  %v14823_v61 = vcombine.high %v503_v46, %v507_v52 }
  0xd3   :  { %7053 = vmatprep.subr.bf16.mxu0 %v14781_v62  ;;  %7541 = vmatprep.subr.bf16.mxu1 %v14783_v4  ;;  %v515_v62 = vld [vmem:[%s23497_s1 + $0xea8] sm:$0xff]  ;;  %v14829_v4 = vcombine.high %v510_v55, %v514_v59  ;;  %v14828_v13 = vcombine.low %v510_v55, %v514_v59 }
  0xd4   :  { %v14831_v11 = vcombine.high %v511_v60, %v515_v62 }
  0xd5   :  { %7037 = vmatmul.mubr.bf16.gmra.mrb[8].mxu0 %v17689_v6  ;;  %7525 = vmatmul.mubr.bf16.gmra.mrb[8].mxu1 %v17689_v6 }
  0xd6   :  { %7054 = vmatpush1.bf16.msra.mxu0 %v14780_v7  ;;  %7542 = vmatpush1.bf16.msra.mxu1 %v14782_v8  ;;  %v518_v7 = vld [vmem:[%s23497_s1 + $0xec0] sm:$0xff] }
  0xd7   :  { %7055 = vmatprep.subr.bf16.mxu0 %v14789_v9  ;;  %7543 = vmatprep.subr.bf16.mxu1 %v14791_v14  ;;  %v522_v8 = vld [vmem:[%s23497_s1 + $0xee0] sm:$0xff]  ;;  %v519_v9 = vld [vmem:[%s23497_s1 + $0xec8] sm:$0xff]  ;;  %v14830_v14 = vcombine.low %v511_v60, %v515_v62 }
  0xd8   :  { %7077 = vmatprep.mubr.bf16.mxu0 %v17705_v17  ;;  %7565 = vmatprep.mubr.bf16.mxu1 %v17705_v17  ;;  %v14837_v16 = vcombine.high %v518_v7, %v522_v8 }
  0xda   :  { %7056 = vmatpush1.bf16.msra.mxu0 %v14788_v18  ;;  %7544 = vmatpush1.bf16.msra.mxu1 %v14790_v20  ;;  %v526_v18 = vld [vmem:[%s23497_s1 + $0xf00] sm:$0xff] }
  0xdb   :  { %7057 = vmatprep.subr.bf16.mxu0 %v14797_v22  ;;  %7545 = vmatprep.subr.bf16.mxu1 %v14799_v27  ;;  %v530_v20 = vld [vmem:[%s23497_s1 + $0xf20] sm:$0xff]  ;;  %v14839_v22 = vcombine.high %v519_v9, %v523_v12 }
  0xde   :  { %7058 = vmatpush1.bf16.msra.mxu0 %v14796_v19  ;;  %7546 = vmatpush1.bf16.msra.mxu1 %v14798_v21 }
  0xdf   :  { %7059 = vmatprep.subr.bf16.mxu0 %v14805_v31  ;;  %7547 = vmatprep.subr.bf16.mxu1 %v14807_v36 }
  0xe2   :  { %7060 = vmatpush1.bf16.msra.mxu0 %v14804_v38  ;;  %7548 = vmatpush1.bf16.msra.mxu1 %v14806_v39 }
  0xe3   :  { %7061 = vmatprep.subr.bf16.mxu0 %v14813_v41  ;;  %7549 = vmatprep.subr.bf16.mxu1 %v14815_v47 }
  0xe6   :  { %7062 = vmatpush1.bf16.msra.mxu0 %v14812_v56  ;;  %7550 = vmatpush1.bf16.msra.mxu1 %v14814_v49 }
  0xe7   :  { %7063 = vmatprep.subr.bf16.mxu0 %v14821_v50  ;;  %7551 = vmatprep.subr.bf16.mxu1 %v14823_v61 }
  0xea   :  { %7064 = vmatpush1.bf16.msra.mxu0 %v14820_v63  ;;  %7552 = vmatpush1.bf16.msra.mxu1 %v14822_v1 }
  0xeb   :  { %7065 = vmatprep.subr.bf16.mxu0 %v14829_v4  ;;  %7553 = vmatprep.subr.bf16.mxu1 %v14831_v11 }
  0xec   :  { %18 = vsyncpa [#allocation3], 0  ;;  %v14836_v26 = vcombine.low %v518_v7, %v522_v8  ;;  %v14838_v27 = vcombine.low %v519_v9, %v523_v12  ;;  %v14845_v28 = vcombine.high %v526_v18, %v530_v20  ;;  %v14847_v19 = vcombine.high %v527_v24, %v531_v25  ;;  %v534_v21 = vld [vmem:[%s23497_s1 + $0xf40] sm:$0xff]  ;;  %v535_v32 = vld [vmem:[%s23497_s1 + $0xf48] sm:$0xff] }
  0xed   :  { %v538_v31 = vld [vmem:[%s23497_s1 + $0xf60] sm:$0xff]  ;;  %v539_v33 = vld [vmem:[%s23497_s1 + $0xf68] sm:$0xff]  ;;  %v14844_v34 = vcombine.low %v526_v18, %v530_v20  ;;  %v14846_v36 = vcombine.low %v527_v24, %v531_v25  ;;  %v17842_v20 = vcombine.low %v17680_v2, %v17686_v5  ;;  %v1464_v24 = vld [vmem:[%s23496_s0 + $0x98] sm:$0xff]  ;;  %vm9374_vm0 = vcmask 1041409  }
  0xee   :  { %7066 = vmatpush1.bf16.msra.mxu0 %v14828_v13  ;;  %7554 = vmatpush1.bf16.msra.mxu1 %v14830_v14  ;;  %v14853_v37 = vcombine.high %v534_v21, %v538_v31  ;;  %v14855_v38 = vcombine.high %v535_v32, %v539_v33  ;;  %v542_v39 = vld [vmem:[%s23497_s1 + $0xf80] sm:$0xff]  ;;  %v543_v43 = vld [vmem:[%s23497_s1 + $0xf88] sm:$0xff]  ;;  %v14852_v46 = vcombine.low %v534_v21, %v538_v31  ;;  %v1472_v25 = vld [vmem:[%s23496_s0 + $0xd8] sm:$0xff]  ;;  %vm9376_vm1 = vcmask 1042434  }
  0xef   :  { %7067 = vmatprep.subr.bf16.mxu0 %v14837_v16  ;;  %7555 = vmatprep.subr.bf16.mxu1 %v14839_v22  ;;  %v546_v41 = vld [vmem:[%s23497_s1 + $0xfa0] sm:$0xff]  ;;  %v547_v45 = vld [vmem:[%s23497_s1 + $0xfa8] sm:$0xff]  ;;  %v14854_v47 = vcombine.low %v535_v32, %v539_v33  ;;  %v17859_v21 = vcombine.high %v1464_v24, %v1472_v25  ;;  %vm9378_vm2 = vcmask 1043459   ;;  %vm9380_vm3 = vcmask 1044484  }
  0xf0   :  { %v14861_v52 = vcombine.high %v542_v39, %v546_v41  ;;  %v14863_v56 = vcombine.high %v543_v43, %v547_v45  ;;  %v550_v49 = vld [vmem:[%s23497_s1 + $0xfc0] sm:$0xff]  ;;  %v551_v55 = vld [vmem:[%s23497_s1 + $0xfc8] sm:$0xff]  ;;  %v14860_v60 = vcombine.low %v542_v39, %v546_v41  ;;  %v14862_v61 = vcombine.low %v543_v43, %v547_v45 }
  0xf1   :  { %v554_v50 = vld [vmem:[%s23497_s1 + $0xfe0] sm:$0xff]  ;;  %v555_v59 = vld [vmem:[%s23497_s1 + $0xfe8] sm:$0xff]  ;;  %v17883_v45 = vcombine.low %v1464_v24, %v1472_v25  ;;  %vm9458_vm4 = vcmask 1046534   ;;  %vm9460_vm5 = vcmask 1047559   ;;  %vm9500_vm6 = vcmask 1044480  }
  0xf2   :  { %7068 = vmatpush1.bf16.msra.mxu0 %v14836_v26  ;;  %7556 = vmatpush1.bf16.msra.mxu1 %v14838_v27  ;;  %v14869_v62 = vcombine.high %v550_v49, %v554_v50  ;;  %v14871_v63 = vcombine.high %v551_v55, %v555_v59  ;;  %v558_v1 = vld [vmem:[%s23497_s1 + $0x1000] sm:$0xff]  ;;  %v559_v7 = vld [vmem:[%s23497_s1 + $0x1008] sm:$0xff]  ;;  %v14868_v9 = vcombine.low %v550_v49, %v554_v50  ;;  %vm9818_vm7 = vcmask 261120  }
  0xf3   :  { %7069 = vmatprep.subr.bf16.mxu0 %v14845_v28  ;;  %7557 = vmatprep.subr.bf16.mxu1 %v14847_v19  ;;  %v562_v4 = vld [vmem:[%s23497_s1 + $0x1020] sm:$0xff]  ;;  %v563_v8 = vld [vmem:[%s23497_s1 + $0x1028] sm:$0xff]  ;;  %v14870_v11 = vcombine.low %v551_v55, %v555_v59 }
  0xf4   :  { %v14877_v12 = vcombine.high %v558_v1, %v562_v4  ;;  %v14879_v13 = vcombine.high %v559_v7, %v563_v8  ;;  %v566_v14 = vld [vmem:[%s23497_s1 + $0x1040] sm:$0xff]  ;;  %v567_v18 = vld [vmem:[%s23497_s1 + $0x1048] sm:$0xff]  ;;  %v14876_v26 = vcombine.low %v558_v1, %v562_v4  ;;  %v14878_v27 = vcombine.low %v559_v7, %v563_v8 }
  0xf5   :  { %v570_v16 = vld [vmem:[%s23497_s1 + $0x1060] sm:$0xff]  ;;  %v571_v22 = vld [vmem:[%s23497_s1 + $0x1068] sm:$0xff] }
  0xf6   :  { %7070 = vmatpush1.bf16.msra.mxu0 %v14844_v34  ;;  %7558 = vmatpush1.bf16.msra.mxu1 %v14846_v36  ;;  %v14885_v28 = vcombine.high %v566_v14, %v570_v16  ;;  %v14887_v2 = vcombine.high %v567_v18, %v571_v22  ;;  %v574_v5 = vld [vmem:[%s23497_s1 + $0x1080] sm:$0xff]  ;;  %v575_v31 = vld [vmem:[%s23497_s1 + $0x1088] sm:$0xff]  ;;  %v14884_v33 = vcombine.low %v566_v14, %v570_v16 }
  0xf7   :  { %7071 = vmatprep.subr.bf16.mxu0 %v14853_v37  ;;  %7559 = vmatprep.subr.bf16.mxu1 %v14855_v38  ;;  %v578_v19 = vld [vmem:[%s23497_s1 + $0x10a0] sm:$0xff]  ;;  %v579_v32 = vld [vmem:[%s23497_s1 + $0x10a8] sm:$0xff]  ;;  %v14886_v34 = vcombine.low %v567_v18, %v571_v22 }
  0xf8   :  { %v14893_v36 = vcombine.high %v574_v5, %v578_v19  ;;  %v14895_v37 = vcombine.high %v575_v31, %v579_v32  ;;  %v582_v38 = vld [vmem:[%s23497_s1 + $0x10c0] sm:$0xff]  ;;  %v583_v41 = vld [vmem:[%s23497_s1 + $0x10c8] sm:$0xff] }
  0xf9   :  { %v586_v39 = vld [vmem:[%s23497_s1 + $0x10e0] sm:$0xff]  ;;  %v587_v43 = vld [vmem:[%s23497_s1 + $0x10e8] sm:$0xff] }
  0xfa   :  { %7072 = vmatpush1.bf16.msra.mxu0 %v14852_v46  ;;  %7560 = vmatpush1.bf16.msra.mxu1 %v14854_v47  ;;  %v1480_v46 = vld [vmem:[%s23496_s0 + $0x118] sm:$0xff]  ;;  %v14892_v47 = vcombine.low %v574_v5, %v578_v19  ;;  %v14903_v49 = vcombine.high %v583_v41, %v587_v43  ;;  %v590_v50 = vld [vmem:[%s23497_s1 + $0x1100] sm:$0xff] }
  0xfb   :  { %7073 = vmatprep.subr.bf16.mxu0 %v14861_v52  ;;  %7561 = vmatprep.subr.bf16.mxu1 %v14863_v56  ;;  %v14894_v52 = vcombine.low %v575_v31, %v579_v32  ;;  %v14901_v56 = vcombine.high %v582_v38, %v586_v39  ;;  %v594_v55 = vld [vmem:[%s23497_s1 + $0x1120] sm:$0xff]  ;;  %v17894_v59 = vcombine.high %v1480_v46, %v1480_v46 }
  0xfc   :  { %v14909_v1 = vcombine.high %v590_v50, %v594_v55  ;;  %v598_v7 = vld [vmem:[%s23497_s1 + $0x1140] sm:$0xff]  ;;  %v14908_v16 = vcombine.low %v590_v50, %v594_v55 }
  0xfd   :  { %v602_v8 = vld [vmem:[%s23497_s1 + $0x1160] sm:$0xff] }
  0xfe   :  { %7074 = vmatpush1.bf16.msra.mxu0 %v14860_v60  ;;  %7562 = vmatpush1.bf16.msra.mxu1 %v14862_v61  ;;  %v591_v60 = vld [vmem:[%s23497_s1 + $0x1108] sm:$0xff]  ;;  %v17928_v14 = vld [vmem:[%s23496_s0 + $0x60] sm:$0xff]  ;;  %v14917_v22 = vcombine.high %v598_v7, %v602_v8  ;;  %v14916_v5 = vcombine.low %v598_v7, %v602_v8 }
  0xff   :  { %7075 = vmatprep.subr.bf16.mxu0 %v14869_v62  ;;  %7563 = vmatprep.subr.bf16.mxu1 %v14871_v63  ;;  %v595_v61 = vld [vmem:[%s23497_s1 + $0x1128] sm:$0xff]  ;;  %v14900_v62 = vcombine.low %v582_v38, %v586_v39  ;;  %v14902_v63 = vcombine.low %v583_v41, %v587_v43  ;;  %v606_v25 = vld [vmem:[%s23497_s1 + $0x1180] sm:$0xff] }
 0x100   :  { %v14911_v4 = vcombine.high %v591_v60, %v595_v61  ;;  %v14910_v18 = vcombine.low %v591_v60, %v595_v61  ;;  %v630_v61 = vld [vmem:[%s23497_s1 + $0x1240] sm:$0xff] }
 0x102   :  { %7076 = vmatpush1.bf16.msra.mxu0 %v14868_v9  ;;  %7564 = vmatpush1.bf16.msra.mxu1 %v14870_v11  ;;  %v599_v9 = vld [vmem:[%s23497_s1 + $0x1148] sm:$0xff] }
 0x103   :  { %7106 = vmatprep.subr.bf16.mxu0 %v14877_v12  ;;  %7594 = vmatprep.subr.bf16.mxu1 %v14879_v13  ;;  %v603_v11 = vld [vmem:[%s23497_s1 + $0x1168] sm:$0xff]  ;;  %v17918_v12 = vcombine.low %v1480_v46, %v1480_v46  ;;  %v17923_v13 = vld [vmem:[%s23496_s0 + $0x20] sm:$0xff] }
 0x104   :  { %v14919_v24 = vcombine.high %v599_v9, %v603_v11  ;;  %v14918_v19 = vcombine.low %v599_v9, %v603_v11  ;;  %v622_v46 = vld [vmem:[%s23497_s1 + $0x1200] sm:$0xff] }
 0x105   :  { %7078 = vmatmul.mubr.bf16.vlgmr.msra.gmra.mrb[0].mxu0 %v17842_v20  ;;  %7566 = vmatmul.mubr.bf16.vlgmr.msra.gmra.mrb[0].mxu1 %v17842_v20  ;;  %v638_v11 = vld [vmem:[%s23497_s1 + $0x1280] sm:$0xff] }
 0x106   :  { %7107 = vmatpush1.bf16.msra.mxu0 %v14876_v26  ;;  %7595 = vmatpush1.bf16.msra.mxu1 %v14878_v27  ;;  %v610_v26 = vld [vmem:[%s23497_s1 + $0x11a0] sm:$0xff]  ;;  %v17938_v27 = vcombine.high %v17923_v13, %v17928_v14 }
 0x107   :  { %7108 = vmatprep.subr.bf16.mxu0 %v14885_v28  ;;  %7596 = vmatprep.subr.bf16.mxu1 %v14887_v2  ;;  %v607_v28 = vld [vmem:[%s23497_s1 + $0x1188] sm:$0xff]  ;;  %v14925_v31 = vcombine.high %v606_v25, %v610_v26  ;;  %v14924_v38 = vcombine.low %v606_v25, %v610_v26 }
 0x108   :  { %7087 = vmatprep.mubr.bf16.mxu0 %v17859_v21  ;;  %7575 = vmatprep.mubr.bf16.mxu1 %v17859_v21  ;;  %v611_v2 = vld [vmem:[%s23497_s1 + $0x11a8] sm:$0xff] }
 0x109   :  { %v14927_v32 = vcombine.high %v607_v28, %v611_v2  ;;  %v14926_v39 = vcombine.low %v607_v28, %v611_v2  ;;  %v646_v2 = vld [vmem:[%s23497_s1 + $0x12c0] sm:$0xff] }
 0x10a   :  { %7109 = vmatpush1.bf16.msra.mxu0 %v14884_v33  ;;  %7597 = vmatpush1.bf16.msra.mxu1 %v14886_v34  ;;  %v614_v33 = vld [vmem:[%s23497_s1 + $0x11c0] sm:$0xff] }
 0x10b   :  { %7110 = vmatprep.subr.bf16.mxu0 %v14893_v36  ;;  %7598 = vmatprep.subr.bf16.mxu1 %v14895_v37  ;;  %v618_v34 = vld [vmem:[%s23497_s1 + $0x11e0] sm:$0xff]  ;;  %v615_v36 = vld [vmem:[%s23497_s1 + $0x11c8] sm:$0xff] }
 0x10c   :  { %v619_v37 = vld [vmem:[%s23497_s1 + $0x11e8] sm:$0xff]  ;;  %v14933_v41 = vcombine.high %v614_v33, %v618_v34 }
 0x10d   :  { %7088 = vmatmul.mubr.bf16.gmra.mrb[4].mxu0 %v17883_v45  ;;  %7576 = vmatmul.mubr.bf16.gmra.mrb[4].mxu1 %v17883_v45  ;;  %v14935_v43 = vcombine.high %v615_v36, %v619_v37  ;;  %v14934_v50 = vcombine.low %v615_v36, %v619_v37  ;;  %v654_v37 = vld [vmem:[%s23497_s1 + $0x1300] sm:$0xff] }
 0x10e   :  { %7111 = vmatpush1.bf16.msra.mxu0 %v14892_v47  ;;  %7599 = vmatpush1.bf16.msra.mxu1 %v14894_v52  ;;  %v626_v47 = vld [vmem:[%s23497_s1 + $0x1220] sm:$0xff]  ;;  %v623_v52 = vld [vmem:[%s23497_s1 + $0x1208] sm:$0xff] }
 0x10f   :  { %7112 = vmatprep.subr.bf16.mxu0 %v14901_v56  ;;  %7600 = vmatprep.subr.bf16.mxu1 %v14903_v49  ;;  %v627_v56 = vld [vmem:[%s23497_s1 + $0x1228] sm:$0xff]  ;;  %v14932_v49 = vcombine.low %v614_v33, %v618_v34  ;;  %v14941_v55 = vcombine.high %v622_v46, %v626_v47 }
 0x110   :  { %7097 = vmatprep.mubr.bf16.mxu0 %v17894_v59  ;;  %7585 = vmatprep.mubr.bf16.mxu1 %v17894_v59  ;;  %v14943_v60 = vcombine.high %v623_v52, %v627_v56  ;;  %v14942_v7 = vcombine.low %v623_v52, %v627_v56  ;;  %v662_v56 = vld [vmem:[%s23497_s1 + $0x1340] sm:$0xff] }
 0x112   :  { %7113 = vmatpush1.bf16.msra.mxu0 %v14900_v62  ;;  %7601 = vmatpush1.bf16.msra.mxu1 %v14902_v63  ;;  %v634_v62 = vld [vmem:[%s23497_s1 + $0x1260] sm:$0xff]  ;;  %v631_v63 = vld [vmem:[%s23497_s1 + $0x1248] sm:$0xff] }
 0x113   :  { %7114 = vmatprep.subr.bf16.mxu0 %v14909_v1  ;;  %7602 = vmatprep.subr.bf16.mxu1 %v14911_v4  ;;  %v635_v1 = vld [vmem:[%s23497_s1 + $0x1268] sm:$0xff]  ;;  %v14940_v4 = vcombine.low %v622_v46, %v626_v47  ;;  %v14949_v8 = vcombine.high %v630_v61, %v634_v62 }
 0x114   :  { %v14951_v9 = vcombine.high %v631_v63, %v635_v1  ;;  %v14950_v25 = vcombine.low %v631_v63, %v635_v1  ;;  %v670_v1 = vld [vmem:[%s23497_s1 + $0x1380] sm:$0xff] }
 0x115   :  { %7098 = vmatmul.mubr.bf16.gmra.mrb[8].mxu0 %v17918_v12  ;;  %7586 = vmatmul.mubr.bf16.gmra.mrb[8].mxu1 %v17918_v12 }
 0x116   :  { %7115 = vmatpush1.bf16.msra.mxu0 %v14908_v16  ;;  %7603 = vmatpush1.bf16.msra.mxu1 %v14910_v18  ;;  %v642_v16 = vld [vmem:[%s23497_s1 + $0x12a0] sm:$0xff]  ;;  %v639_v18 = vld [vmem:[%s23497_s1 + $0x1288] sm:$0xff] }
 0x117   :  { %7116 = vmatprep.subr.bf16.mxu0 %v14917_v22  ;;  %7604 = vmatprep.subr.bf16.mxu1 %v14919_v24  ;;  %v643_v22 = vld [vmem:[%s23497_s1 + $0x12a8] sm:$0xff]  ;;  %v14948_v24 = vcombine.low %v630_v61, %v634_v62  ;;  %v14957_v26 = vcombine.high %v638_v11, %v642_v16 }
 0x118   :  { %7138 = vmatprep.mubr.bf16.mxu0 %v17938_v27  ;;  %7626 = vmatprep.mubr.bf16.mxu1 %v17938_v27  ;;  %v14959_v28 = vcombine.high %v639_v18, %v643_v22  ;;  %v14958_v33 = vcombine.low %v639_v18, %v643_v22  ;;  %v678_v22 = vld [vmem:[%s23497_s1 + $0x13c0] sm:$0xff] }
 0x11a   :  { %7117 = vmatpush1.bf16.msra.mxu0 %v14916_v5  ;;  %7605 = vmatpush1.bf16.msra.mxu1 %v14918_v19  ;;  %v650_v5 = vld [vmem:[%s23497_s1 + $0x12e0] sm:$0xff]  ;;  %v647_v19 = vld [vmem:[%s23497_s1 + $0x12c8] sm:$0xff] }
 0x11b   :  { %7118 = vmatprep.subr.bf16.mxu0 %v14925_v31  ;;  %7606 = vmatprep.subr.bf16.mxu1 %v14927_v32  ;;  %v651_v31 = vld [vmem:[%s23497_s1 + $0x12e8] sm:$0xff]  ;;  %v14956_v32 = vcombine.low %v638_v11, %v642_v16  ;;  %v14965_v34 = vcombine.high %v646_v2, %v650_v5 }
 0x11c   :  { %v14967_v36 = vcombine.high %v647_v19, %v651_v31  ;;  %v14966_v46 = vcombine.low %v647_v19, %v651_v31  ;;  %v686_v31 = vld [vmem:[%s23497_s1 + $0x1400] sm:$0xff] }
 0x11e   :  { %7119 = vmatpush1.bf16.msra.mxu0 %v14924_v38  ;;  %7607 = vmatpush1.bf16.msra.mxu1 %v14926_v39  ;;  %v658_v38 = vld [vmem:[%s23497_s1 + $0x1320] sm:$0xff]  ;;  %v655_v39 = vld [vmem:[%s23497_s1 + $0x1308] sm:$0xff] }
 0x11f   :  { %7120 = vmatprep.subr.bf16.mxu0 %v14933_v41  ;;  %7608 = vmatprep.subr.bf16.mxu1 %v14935_v43  ;;  %v659_v41 = vld [vmem:[%s23497_s1 + $0x1328] sm:$0xff]  ;;  %v14964_v43 = vcombine.low %v646_v2, %v650_v5  ;;  %v14973_v47 = vcombine.high %v654_v37, %v658_v38 }
 0x120   :  { %v14975_v52 = vcombine.high %v655_v39, %v659_v41  ;;  %v14974_v61 = vcombine.low %v655_v39, %v659_v41  ;;  %v694_v41 = vld [vmem:[%s23497_s1 + $0x1440] sm:$0xff] }
 0x122   :  { %7121 = vmatpush1.bf16.msra.mxu0 %v14932_v49  ;;  %7609 = vmatpush1.bf16.msra.mxu1 %v14934_v50  ;;  %v666_v49 = vld [vmem:[%s23497_s1 + $0x1360] sm:$0xff]  ;;  %v663_v50 = vld [vmem:[%s23497_s1 + $0x1348] sm:$0xff] }
 0x123   :  { %7122 = vmatprep.subr.bf16.mxu0 %v14941_v55  ;;  %7610 = vmatprep.subr.bf16.mxu1 %v14943_v60  ;;  %v667_v55 = vld [vmem:[%s23497_s1 + $0x1368] sm:$0xff]  ;;  %v14972_v60 = vcombine.low %v654_v37, %v658_v38  ;;  %v14981_v62 = vcombine.high %v662_v56, %v666_v49 }
 0x124   :  { %v14983_v63 = vcombine.high %v663_v50, %v667_v55  ;;  %v14982_v11 = vcombine.low %v663_v50, %v667_v55 }
 0x126   :  { %7123 = vmatpush1.bf16.msra.mxu0 %v14940_v4  ;;  %7611 = vmatpush1.bf16.msra.mxu1 %v14942_v7  ;;  %v674_v4 = vld [vmem:[%s23497_s1 + $0x13a0] sm:$0xff]  ;;  %v671_v7 = vld [vmem:[%s23497_s1 + $0x1388] sm:$0xff] }
 0x127   :  { %7124 = vmatprep.subr.bf16.mxu0 %v14949_v8  ;;  %7612 = vmatprep.subr.bf16.mxu1 %v14951_v9  ;;  %v675_v8 = vld [vmem:[%s23497_s1 + $0x13a8] sm:$0xff]  ;;  %v14980_v9 = vcombine.low %v662_v56, %v666_v49  ;;  %v14989_v16 = vcombine.high %v670_v1, %v674_v4  ;;  %v1465_v56 = vld [vmem:[%s23496_s0 + $0xa0] sm:$0xff] }
 0x128   :  { %v14991_v18 = vcombine.high %v671_v7, %v675_v8  ;;  %v14990_v2 = vcombine.low %v671_v7, %v675_v8  ;;  %v1473_v49 = vld [vmem:[%s23496_s0 + $0xe0] sm:$0xff] }
 0x12a   :  { %7125 = vmatpush1.bf16.msra.mxu0 %v14948_v24  ;;  %7613 = vmatpush1.bf16.msra.mxu1 %v14950_v25  ;;  %v682_v24 = vld [vmem:[%s23497_s1 + $0x13e0] sm:$0xff]  ;;  %v679_v25 = vld [vmem:[%s23497_s1 + $0x13c8] sm:$0xff] }
 0x12b   :  { %7126 = vmatprep.subr.bf16.mxu0 %v14957_v26  ;;  %7614 = vmatprep.subr.bf16.mxu1 %v14959_v28  ;;  %v683_v26 = vld [vmem:[%s23497_s1 + $0x13e8] sm:$0xff]  ;;  %v14988_v28 = vcombine.low %v670_v1, %v674_v4  ;;  %v14997_v5 = vcombine.high %v678_v22, %v682_v24 }
 0x12c   :  { %v14999_v19 = vcombine.high %v679_v25, %v683_v26  ;;  %v14998_v37 = vcombine.low %v679_v25, %v683_v26  ;;  %v707_v1 = vld [vmem:[%s23497_s1 + $0x14a8] sm:$0xff]  ;;  %v1481_v25 = vld [vmem:[%s23496_s0 + $0x120] sm:$0xff] }
 0x12e   :  { %7127 = vmatpush1.bf16.msra.mxu0 %v14956_v32  ;;  %7615 = vmatpush1.bf16.msra.mxu1 %v14958_v33  ;;  %v690_v32 = vld [vmem:[%s23497_s1 + $0x1420] sm:$0xff]  ;;  %v687_v33 = vld [vmem:[%s23497_s1 + $0x1408] sm:$0xff] }
 0x12f   :  { %7128 = vmatprep.subr.bf16.mxu0 %v14965_v34  ;;  %7616 = vmatprep.subr.bf16.mxu1 %v14967_v36  ;;  %v691_v34 = vld [vmem:[%s23497_s1 + $0x1428] sm:$0xff]  ;;  %v14996_v36 = vcombine.low %v678_v22, %v682_v24  ;;  %v15005_v38 = vcombine.high %v686_v31, %v690_v32  ;;  %v15004_v50 = vcombine.low %v686_v31, %v690_v32  ;;  %v722_v31 = vld [vmem:[%s23497_s1 + $0x1520] sm:$0xff] }
 0x130   :  { %v15007_v39 = vcombine.high %v687_v33, %v691_v34  ;;  %v15006_v55 = vcombine.low %v687_v33, %v691_v34  ;;  %v715_v22 = vld [vmem:[%s23497_s1 + $0x14e8] sm:$0xff]  ;;  %v18122_v24 = vcombine.low %v1465_v56, %v1473_v49  ;;  %v18133_v32 = vcombine.high %v1481_v25, %v1481_v25 }
 0x131   :  { %v719_v33 = vld [vmem:[%s23497_s1 + $0x1508] sm:$0xff] }
 0x132   :  { %7129 = vmatpush1.bf16.msra.mxu0 %v14964_v43  ;;  %7617 = vmatpush1.bf16.msra.mxu1 %v14966_v46  ;;  %v698_v43 = vld [vmem:[%s23497_s1 + $0x1460] sm:$0xff]  ;;  %v695_v46 = vld [vmem:[%s23497_s1 + $0x1448] sm:$0xff] }
 0x133   :  { %7130 = vmatprep.subr.bf16.mxu0 %v14973_v47  ;;  %7618 = vmatprep.subr.bf16.mxu1 %v14975_v52  ;;  %v18081_v47 = vcombine.low %v17923_v13, %v17928_v14  ;;  %v699_v52 = vld [vmem:[%s23497_s1 + $0x1468] sm:$0xff]  ;;  %v702_v14 = vld [vmem:[%s23497_s1 + $0x1480] sm:$0xff]  ;;  %v15012_v4 = vcombine.low %v694_v41, %v698_v43 }
 0x134   :  { %v15015_v13 = vcombine.high %v695_v46, %v699_v52  ;;  %v15014_v7 = vcombine.low %v695_v46, %v699_v52  ;;  %v723_v34 = vld [vmem:[%s23497_s1 + $0x1528] sm:$0xff] }
 0x135   :  { %v727_v46 = vld [vmem:[%s23497_s1 + $0x1548] sm:$0xff] }
 0x136   :  { %7131 = vmatpush1.bf16.msra.mxu0 %v14972_v60  ;;  %7619 = vmatpush1.bf16.msra.mxu1 %v14974_v61  ;;  %v15013_v60 = vcombine.high %v694_v41, %v698_v43  ;;  %v706_v61 = vld [vmem:[%s23497_s1 + $0x14a0] sm:$0xff]  ;;  %v731_v52 = vld [vmem:[%s23497_s1 + $0x1568] sm:$0xff] }
 0x137   :  { %7132 = vmatprep.subr.bf16.mxu0 %v14981_v62  ;;  %7620 = vmatprep.subr.bf16.mxu1 %v14983_v63  ;;  %v18098_v62 = vcombine.high %v1465_v56, %v1473_v49  ;;  %v703_v63 = vld [vmem:[%s23497_s1 + $0x1488] sm:$0xff]  ;;  %v15021_v8 = vcombine.high %v702_v14, %v706_v61  ;;  %v15020_v26 = vcombine.low %v702_v14, %v706_v61  ;;  %v726_v41 = vld [vmem:[%s23497_s1 + $0x1540] sm:$0xff] }
 0x138   :  { %v730_v43 = vld [vmem:[%s23497_s1 + $0x1560] sm:$0xff]  ;;  %v18157_v56 = vcombine.low %v1481_v25, %v1481_v25  ;;  %v18162_v49 = vld [vmem:[%s23496_s0 + $0x28] sm:$0xff]  ;;  %v15047_v14 = vcombine.high %v727_v46, %v731_v52 }
 0x139   :  { %v734_v61 = vld [vmem:[%s23497_s1 + $0x1580] sm:$0xff]  ;;  %v743_v25 = vld [vmem:[%s23497_s1 + $0x15c8] sm:$0xff] }
 0x13a   :  { %7133 = vmatpush1.bf16.msra.mxu0 %v14980_v9  ;;  %7621 = vmatpush1.bf16.msra.mxu1 %v14982_v11  ;;  %v15023_v9 = vcombine.high %v703_v63, %v707_v1  ;;  %v710_v11 = vld [vmem:[%s23497_s1 + $0x14c0] sm:$0xff] }
 0x13b   :  { %7134 = vmatprep.subr.bf16.mxu0 %v14989_v16  ;;  %7622 = vmatprep.subr.bf16.mxu1 %v14991_v18  ;;  %v714_v16 = vld [vmem:[%s23497_s1 + $0x14e0] sm:$0xff]  ;;  %v711_v18 = vld [vmem:[%s23497_s1 + $0x14c8] sm:$0xff] }
 0x13e   :  { %7135 = vmatpush1.bf16.msra.mxu0 %v14988_v28  ;;  %7623 = vmatpush1.bf16.msra.mxu1 %v14990_v2  ;;  %v15022_v28 = vcombine.low %v703_v63, %v707_v1  ;;  %v15029_v2 = vcombine.high %v710_v11, %v714_v16  ;;  %v738_v63 = vld [vmem:[%s23497_s1 + $0x15a0] sm:$0xff] }
 0x13f   :  { %7136 = vmatprep.subr.bf16.mxu0 %v14997_v5  ;;  %7624 = vmatprep.subr.bf16.mxu1 %v14999_v19  ;;  %v15031_v5 = vcombine.high %v711_v18, %v715_v22  ;;  %v718_v19 = vld [vmem:[%s23497_s1 + $0x1500] sm:$0xff] }
 0x142   :  { %7137 = vmatpush1.bf16.msra.mxu0 %v14996_v36  ;;  %7625 = vmatpush1.bf16.msra.mxu1 %v14998_v37  ;;  %v15028_v36 = vcombine.low %v710_v11, %v714_v16  ;;  %v15030_v37 = vcombine.low %v711_v18, %v715_v22  ;;  %v15053_v11 = vcombine.high %v734_v61, %v738_v63  ;;  %v742_v18 = vld [vmem:[%s23497_s1 + $0x15c0] sm:$0xff] }
 0x143   :  { %7167 = vmatprep.subr.bf16.mxu0 %v15005_v38  ;;  %7655 = vmatprep.subr.bf16.mxu1 %v15007_v39  ;;  %v15037_v38 = vcombine.high %v718_v19, %v722_v31  ;;  %v15039_v39 = vcombine.high %v719_v33, %v723_v34  ;;  %v746_v22 = vld [vmem:[%s23497_s1 + $0x15e0] sm:$0xff] }
 0x145   :  { %7139 = vmatmul.mubr.bf16.vlgmr.msra.gmra.mrb[0].mxu0 %v18081_v47  ;;  %7627 = vmatmul.mubr.bf16.vlgmr.msra.gmra.mrb[0].mxu1 %v18081_v47 }
 0x146   :  { %7168 = vmatpush1.bf16.msra.mxu0 %v15004_v50  ;;  %7656 = vmatpush1.bf16.msra.mxu1 %v15006_v55  ;;  %v18167_v50 = vld [vmem:[%s23496_s0 + $0x68] sm:$0xff]  ;;  %v15036_v55 = vcombine.low %v718_v19, %v722_v31  ;;  %v750_v31 = vld [vmem:[%s23497_s1 + $0x1600] sm:$0xff] }
 0x147   :  { %7169 = vmatprep.subr.bf16.mxu0 %v15013_v60  ;;  %7657 = vmatprep.subr.bf16.mxu1 %v15015_v13  ;;  %v15038_v60 = vcombine.low %v719_v33, %v723_v34  ;;  %v15045_v13 = vcombine.high %v726_v41, %v730_v43  ;;  %v18177_v1 = vcombine.high %v18162_v49, %v18167_v50  ;;  %v754_v33 = vld [vmem:[%s23497_s1 + $0x1620] sm:$0xff]  ;;  %v751_v34 = vld [vmem:[%s23497_s1 + $0x1608] sm:$0xff] }
 0x148   :  { %7148 = vmatprep.mubr.bf16.mxu0 %v18098_v62  ;;  %7636 = vmatprep.mubr.bf16.mxu1 %v18098_v62 }
 0x14a   :  { %7170 = vmatpush1.bf16.msra.mxu0 %v15012_v4  ;;  %7658 = vmatpush1.bf16.msra.mxu1 %v15014_v7  ;;  %v735_v4 = vld [vmem:[%s23497_s1 + $0x1588] sm:$0xff] }
 0x14b   :  { %7171 = vmatprep.subr.bf16.mxu0 %v15021_v8  ;;  %7659 = vmatprep.subr.bf16.mxu1 %v15023_v9  ;;  %v739_v7 = vld [vmem:[%s23497_s1 + $0x15a8] sm:$0xff]  ;;  %v15044_v8 = vcombine.low %v726_v41, %v730_v43  ;;  %v15046_v9 = vcombine.low %v727_v46, %v731_v52  ;;  %v758_v43 = vld [vmem:[%s23497_s1 + $0x1640] sm:$0xff] }
 0x14c   :  { %v15055_v16 = vcombine.high %v735_v4, %v739_v7  ;;  %v762_v46 = vld [vmem:[%s23497_s1 + $0x1660] sm:$0xff]  ;;  %v759_v52 = vld [vmem:[%s23497_s1 + $0x1648] sm:$0xff] }
 0x14d   :  { %7149 = vmatmul.mubr.bf16.gmra.mrb[4].mxu0 %v18122_v24  ;;  %7637 = vmatmul.mubr.bf16.gmra.mrb[4].mxu1 %v18122_v24 }
 0x14e   :  { %7172 = vmatpush1.bf16.msra.mxu0 %v15020_v26  ;;  %7660 = vmatpush1.bf16.msra.mxu1 %v15022_v28  ;;  %v747_v26 = vld [vmem:[%s23497_s1 + $0x15e8] sm:$0xff]  ;;  %v15052_v28 = vcombine.low %v734_v61, %v738_v63  ;;  %v766_v63 = vld [vmem:[%s23497_s1 + $0x1680] sm:$0xff] }
 0x14f   :  { %7173 = vmatprep.subr.bf16.mxu0 %v15029_v2  ;;  %7661 = vmatprep.subr.bf16.mxu1 %v15031_v5  ;;  %v15054_v2 = vcombine.low %v735_v4, %v739_v7  ;;  %v15061_v5 = vcombine.high %v742_v18, %v746_v22  ;;  %v15063_v19 = vcombine.high %v743_v25, %v747_v26  ;;  %v770_v4 = vld [vmem:[%s23497_s1 + $0x16a0] sm:$0xff]  ;;  %v767_v7 = vld [vmem:[%s23497_s1 + $0x1688] sm:$0xff] }
 0x150   :  { %7158 = vmatprep.mubr.bf16.mxu0 %v18133_v32  ;;  %7646 = vmatprep.mubr.bf16.mxu1 %v18133_v32 }
 0x152   :  { %7174 = vmatpush1.bf16.msra.mxu0 %v15028_v36  ;;  %7662 = vmatpush1.bf16.msra.mxu1 %v15030_v37  ;;  %v755_v36 = vld [vmem:[%s23497_s1 + $0x1628] sm:$0xff]  ;;  %v15060_v37 = vcombine.low %v742_v18, %v746_v22  ;;  %v774_v22 = vld [vmem:[%s23497_s1 + $0x16c0] sm:$0xff] }
 0x153   :  { %7175 = vmatprep.subr.bf16.mxu0 %v15037_v38  ;;  %7663 = vmatprep.subr.bf16.mxu1 %v15039_v39  ;;  %v15062_v38 = vcombine.low %v743_v25, %v747_v26  ;;  %v15069_v39 = vcombine.high %v750_v31, %v754_v33  ;;  %v15071_v41 = vcombine.high %v751_v34, %v755_v36  ;;  %v778_v25 = vld [vmem:[%s23497_s1 + $0x16e0] sm:$0xff]  ;;  %v775_v26 = vld [vmem:[%s23497_s1 + $0x16c8] sm:$0xff] }
 0x155   :  { %7159 = vmatmul.mubr.bf16.gmra.mrb[8].mxu0 %v18157_v56  ;;  %7647 = vmatmul.mubr.bf16.gmra.mrb[8].mxu1 %v18157_v56 }
 0x156   :  { %7176 = vmatpush1.bf16.msra.mxu0 %v15036_v55  ;;  %7664 = vmatpush1.bf16.msra.mxu1 %v15038_v60  ;;  %v763_v55 = vld [vmem:[%s23497_s1 + $0x1668] sm:$0xff]  ;;  %v15068_v60 = vcombine.low %v750_v31, %v754_v33  ;;  %v782_v33 = vld [vmem:[%s23497_s1 + $0x1700] sm:$0xff] }
 0x157   :  { %7177 = vmatprep.subr.bf16.mxu0 %v15045_v13  ;;  %7665 = vmatprep.subr.bf16.mxu1 %v15047_v14  ;;  %v15070_v13 = vcombine.low %v751_v34, %v755_v36  ;;  %v15077_v14 = vcombine.high %v758_v43, %v762_v46  ;;  %v15079_v61 = vcombine.high %v759_v52, %v763_v55  ;;  %v786_v34 = vld [vmem:[%s23497_s1 + $0x1720] sm:$0xff]  ;;  %v783_v36 = vld [vmem:[%s23497_s1 + $0x1708] sm:$0xff] }
 0x158   :  { %7199 = vmatprep.mubr.bf16.mxu0 %v18177_v1  ;;  %7687 = vmatprep.mubr.bf16.mxu1 %v18177_v1 }
 0x15a   :  { %7178 = vmatpush1.bf16.msra.mxu0 %v15044_v8  ;;  %7666 = vmatpush1.bf16.msra.mxu1 %v15046_v9  ;;  %v771_v8 = vld [vmem:[%s23497_s1 + $0x16a8] sm:$0xff]  ;;  %v15076_v9 = vcombine.low %v758_v43, %v762_v46  ;;  %v790_v46 = vld [vmem:[%s23497_s1 + $0x1740] sm:$0xff] }
 0x15b   :  { %7179 = vmatprep.subr.bf16.mxu0 %v15053_v11  ;;  %7667 = vmatprep.subr.bf16.mxu1 %v15055_v16  ;;  %v15078_v11 = vcombine.low %v759_v52, %v763_v55  ;;  %v15085_v16 = vcombine.high %v766_v63, %v770_v4  ;;  %v15087_v18 = vcombine.high %v767_v7, %v771_v8  ;;  %v794_v52 = vld [vmem:[%s23497_s1 + $0x1760] sm:$0xff]  ;;  %v791_v55 = vld [vmem:[%s23497_s1 + $0x1748] sm:$0xff] }
 0x15e   :  { %7180 = vmatpush1.bf16.msra.mxu0 %v15052_v28  ;;  %7668 = vmatpush1.bf16.msra.mxu1 %v15054_v2  ;;  %v779_v28 = vld [vmem:[%s23497_s1 + $0x16e8] sm:$0xff]  ;;  %v15084_v2 = vcombine.low %v766_v63, %v770_v4  ;;  %v798_v4 = vld [vmem:[%s23497_s1 + $0x1780] sm:$0xff] }
 0x15f   :  { %7181 = vmatprep.subr.bf16.mxu0 %v15061_v5  ;;  %7669 = vmatprep.subr.bf16.mxu1 %v15063_v19  ;;  %v15086_v5 = vcombine.low %v767_v7, %v771_v8  ;;  %v15093_v19 = vcombine.high %v774_v22, %v778_v25  ;;  %v15095_v31 = vcombine.high %v775_v26, %v779_v28  ;;  %v802_v7 = vld [vmem:[%s23497_s1 + $0x17a0] sm:$0xff]  ;;  %v799_v8 = vld [vmem:[%s23497_s1 + $0x1788] sm:$0xff] }
 0x162   :  { %7182 = vmatpush1.bf16.msra.mxu0 %v15060_v37  ;;  %7670 = vmatpush1.bf16.msra.mxu1 %v15062_v38  ;;  %v787_v37 = vld [vmem:[%s23497_s1 + $0x1728] sm:$0xff]  ;;  %v15092_v38 = vcombine.low %v774_v22, %v778_v25  ;;  %v806_v25 = vld [vmem:[%s23497_s1 + $0x17c0] sm:$0xff] }
 0x163   :  { %7183 = vmatprep.subr.bf16.mxu0 %v15069_v39  ;;  %7671 = vmatprep.subr.bf16.mxu1 %v15071_v41  ;;  %v15094_v39 = vcombine.low %v775_v26, %v779_v28  ;;  %v15101_v41 = vcombine.high %v782_v33, %v786_v34  ;;  %v15103_v43 = vcombine.high %v783_v36, %v787_v37  ;;  %v810_v26 = vld [vmem:[%s23497_s1 + $0x17e0] sm:$0xff]  ;;  %v807_v28 = vld [vmem:[%s23497_s1 + $0x17c8] sm:$0xff] }
 0x166   :  { %7184 = vmatpush1.bf16.msra.mxu0 %v15068_v60  ;;  %7672 = vmatpush1.bf16.msra.mxu1 %v15070_v13  ;;  %v795_v60 = vld [vmem:[%s23497_s1 + $0x1768] sm:$0xff]  ;;  %v15100_v13 = vcombine.low %v782_v33, %v786_v34  ;;  %v814_v34 = vld [vmem:[%s23497_s1 + $0x1800] sm:$0xff] }
 0x167   :  { %7185 = vmatprep.subr.bf16.mxu0 %v15077_v14  ;;  %7673 = vmatprep.subr.bf16.mxu1 %v15079_v61  ;;  %v15102_v14 = vcombine.low %v783_v36, %v787_v37  ;;  %v15109_v61 = vcombine.high %v790_v46, %v794_v52  ;;  %v15111_v63 = vcombine.high %v791_v55, %v795_v60  ;;  %v818_v36 = vld [vmem:[%s23497_s1 + $0x1820] sm:$0xff]  ;;  %v815_v37 = vld [vmem:[%s23497_s1 + $0x1808] sm:$0xff] }
 0x16a   :  { %7186 = vmatpush1.bf16.msra.mxu0 %v15076_v9  ;;  %7674 = vmatpush1.bf16.msra.mxu1 %v15078_v11  ;;  %v803_v9 = vld [vmem:[%s23497_s1 + $0x17a8] sm:$0xff]  ;;  %v15108_v11 = vcombine.low %v790_v46, %v794_v52  ;;  %v822_v52 = vld [vmem:[%s23497_s1 + $0x1840] sm:$0xff] }
 0x16b   :  { %7187 = vmatprep.subr.bf16.mxu0 %v15085_v16  ;;  %7675 = vmatprep.subr.bf16.mxu1 %v15087_v18  ;;  %v15110_v16 = vcombine.low %v791_v55, %v795_v60  ;;  %v15117_v18 = vcombine.high %v798_v4, %v802_v7  ;;  %v15119_v22 = vcombine.high %v799_v8, %v803_v9  ;;  %v826_v55 = vld [vmem:[%s23497_s1 + $0x1860] sm:$0xff]  ;;  %v823_v60 = vld [vmem:[%s23497_s1 + $0x1848] sm:$0xff] }
 0x16e   :  { %7188 = vmatpush1.bf16.msra.mxu0 %v15084_v2  ;;  %7676 = vmatpush1.bf16.msra.mxu1 %v15086_v5  ;;  %v811_v2 = vld [vmem:[%s23497_s1 + $0x17e8] sm:$0xff]  ;;  %v15116_v5 = vcombine.low %v798_v4, %v802_v7  ;;  %v15132_v4 = vcombine.low %v814_v34, %v818_v36 }
 0x16f   :  { %7189 = vmatprep.subr.bf16.mxu0 %v15093_v19  ;;  %7677 = vmatprep.subr.bf16.mxu1 %v15095_v31  ;;  %v15118_v19 = vcombine.low %v799_v8, %v803_v9  ;;  %v15125_v31 = vcombine.high %v806_v25, %v810_v26  ;;  %v15127_v33 = vcombine.high %v807_v28, %v811_v2  ;;  %v834_v9 = vld [vmem:[%s23497_s1 + $0x18a0] sm:$0xff] }
 0x170   :  { %v15141_v8 = vcombine.high %v822_v52, %v826_v55 }
 0x172   :  { %7190 = vmatpush1.bf16.msra.mxu0 %v15092_v38  ;;  %7678 = vmatpush1.bf16.msra.mxu1 %v15094_v39  ;;  %v819_v38 = vld [vmem:[%s23497_s1 + $0x1828] sm:$0xff]  ;;  %v15124_v39 = vcombine.low %v806_v25, %v810_v26 }
 0x173   :  { %7191 = vmatprep.subr.bf16.mxu0 %v15101_v41  ;;  %7679 = vmatprep.subr.bf16.mxu1 %v15103_v43  ;;  %v15126_v41 = vcombine.low %v807_v28, %v811_v2  ;;  %v15133_v43 = vcombine.high %v814_v34, %v818_v36  ;;  %v15135_v46 = vcombine.high %v815_v37, %v819_v38  ;;  %v838_v2 = vld [vmem:[%s23497_s1 + $0x18c0] sm:$0xff]  ;;  %v1482_v34 = vld [vmem:[%s23496_s0 + $0x128] sm:$0xff] }
 0x174   :  { %v15134_v7 = vcombine.low %v815_v37, %v819_v38 }
 0x176   :  { %7192 = vmatpush1.bf16.msra.mxu0 %v15100_v13  ;;  %7680 = vmatpush1.bf16.msra.mxu1 %v15102_v14  ;;  %v18320_v13 = vcombine.low %v18162_v49, %v18167_v50  ;;  %v827_v14 = vld [vmem:[%s23497_s1 + $0x1868] sm:$0xff]  ;;  %v830_v50 = vld [vmem:[%s23497_s1 + $0x1880] sm:$0xff] }
 0x177   :  { %7193 = vmatprep.subr.bf16.mxu0 %v15109_v61  ;;  %7681 = vmatprep.subr.bf16.mxu1 %v15111_v63  ;;  %v1466_v61 = vld [vmem:[%s23496_s0 + $0xa8] sm:$0xff]  ;;  %v15143_v49 = vcombine.high %v823_v60, %v827_v14  ;;  %v15142_v25 = vcombine.low %v823_v60, %v827_v14  ;;  %v15149_v26 = vcombine.high %v830_v50, %v834_v9 }
 0x178   :  { %v1474_v63 = vld [vmem:[%s23496_s0 + $0xe8] sm:$0xff]  ;;  %v15148_v36 = vcombine.low %v830_v50, %v834_v9  ;;  %v18396_v50 = vcombine.low %v1482_v34, %v1482_v34  ;;  %v18401_v9 = vld [vmem:[%s23496_s0 + $0x30] sm:$0xff] }
 0x17a   :  { %7194 = vmatpush1.bf16.msra.mxu0 %v15108_v11  ;;  %7682 = vmatpush1.bf16.msra.mxu1 %v15110_v16  ;;  %v18337_v11 = vcombine.high %v1466_v61, %v1474_v63  ;;  %v831_v16 = vld [vmem:[%s23497_s1 + $0x1888] sm:$0xff] }
 0x17b   :  { %7195 = vmatprep.subr.bf16.mxu0 %v15117_v18  ;;  %7683 = vmatprep.subr.bf16.mxu1 %v15119_v22  ;;  %v835_v18 = vld [vmem:[%s23497_s1 + $0x18a8] sm:$0xff]  ;;  %v15140_v22 = vcombine.low %v822_v52, %v826_v55 }
 0x17c   :  { %v15151_v28 = vcombine.high %v831_v16, %v835_v18  ;;  %v15150_v37 = vcombine.low %v831_v16, %v835_v18  ;;  %v847_v52 = vld [vmem:[%s23497_s1 + $0x1908] sm:$0xff]  ;;  %v18406_v16 = vld [vmem:[%s23496_s0 + $0x70] sm:$0xff] }
 0x17d   :  { %v851_v55 = vld [vmem:[%s23497_s1 + $0x1928] sm:$0xff] }
 0x17e   :  { %7196 = vmatpush1.bf16.msra.mxu0 %v15116_v5  ;;  %7684 = vmatpush1.bf16.msra.mxu1 %v15118_v19  ;;  %v842_v5 = vld [vmem:[%s23497_s1 + $0x18e0] sm:$0xff]  ;;  %v839_v19 = vld [vmem:[%s23497_s1 + $0x18c8] sm:$0xff] }
 0x17f   :  { %7197 = vmatprep.subr.bf16.mxu0 %v15125_v31  ;;  %7685 = vmatprep.subr.bf16.mxu1 %v15127_v33  ;;  %v843_v31 = vld [vmem:[%s23497_s1 + $0x18e8] sm:$0xff]  ;;  %v18361_v33 = vcombine.low %v1466_v61, %v1474_v63  ;;  %v15157_v38 = vcombine.high %v838_v2, %v842_v5  ;;  %v15156_v60 = vcombine.low %v838_v2, %v842_v5  ;;  %v866_v2 = vld [vmem:[%s23497_s1 + $0x19a0] sm:$0xff] }
 0x180   :  { %v15158_v14 = vcombine.low %v839_v19, %v843_v31  ;;  %v15167_v63 = vcombine.high %v847_v52, %v851_v55  ;;  %v18416_v5 = vcombine.high %v18401_v9, %v18406_v16 }
 0x182   :  { %7198 = vmatpush1.bf16.msra.mxu0 %v15124_v39  ;;  %7686 = vmatpush1.bf16.msra.mxu1 %v15126_v41  ;;  %v15159_v39 = vcombine.high %v839_v19, %v843_v31  ;;  %v846_v41 = vld [vmem:[%s23497_s1 + $0x1900] sm:$0xff]  ;;  %v863_v19 = vld [vmem:[%s23497_s1 + $0x1988] sm:$0xff] }
 0x183   :  { %7228 = vmatprep.subr.bf16.mxu0 %v15133_v43  ;;  %7716 = vmatprep.subr.bf16.mxu1 %v15135_v46  ;;  %v850_v43 = vld [vmem:[%s23497_s1 + $0x1920] sm:$0xff]  ;;  %v18372_v46 = vcombine.high %v1482_v34, %v1482_v34  ;;  %v867_v31 = vld [vmem:[%s23497_s1 + $0x19a8] sm:$0xff] }
 0x184   :  { %v15165_v61 = vcombine.high %v846_v41, %v850_v43  ;;  %v15164_v18 = vcombine.low %v846_v41, %v850_v43  ;;  %v874_v41 = vld [vmem:[%s23497_s1 + $0x19e0] sm:$0xff]  ;;  %v871_v43 = vld [vmem:[%s23497_s1 + $0x19c8] sm:$0xff] }
 0x185   :  { %7200 = vmatmul.mubr.bf16.vlgmr.msra.gmra.mrb[0].mxu0 %v18320_v13  ;;  %7688 = vmatmul.mubr.bf16.vlgmr.msra.gmra.mrb[0].mxu1 %v18320_v13 }
 0x186   :  { %7229 = vmatpush1.bf16.msra.mxu0 %v15132_v4  ;;  %7717 = vmatpush1.bf16.msra.mxu1 %v15134_v7  ;;  %v854_v4 = vld [vmem:[%s23497_s1 + $0x1940] sm:$0xff] }
 0x187   :  { %7230 = vmatprep.subr.bf16.mxu0 %v15141_v8  ;;  %7718 = vmatprep.subr.bf16.mxu1 %v15143_v49  ;;  %v858_v7 = vld [vmem:[%s23497_s1 + $0x1960] sm:$0xff]  ;;  %v855_v8 = vld [vmem:[%s23497_s1 + $0x1948] sm:$0xff] }
 0x188   :  { %7209 = vmatprep.mubr.bf16.mxu0 %v18337_v11  ;;  %7697 = vmatprep.mubr.bf16.mxu1 %v18337_v11  ;;  %v859_v49 = vld [vmem:[%s23497_s1 + $0x1968] sm:$0xff]  ;;  %v15172_v34 = vcombine.low %v854_v4, %v858_v7 }
 0x18a   :  { %7231 = vmatpush1.bf16.msra.mxu0 %v15140_v22  ;;  %7719 = vmatpush1.bf16.msra.mxu1 %v15142_v25  ;;  %v15166_v22 = vcombine.low %v847_v52, %v851_v55  ;;  %v15173_v25 = vcombine.high %v854_v4, %v858_v7  ;;  %v875_v52 = vld [vmem:[%s23497_s1 + $0x19e8] sm:$0xff]  ;;  %v882_v4 = vld [vmem:[%s23497_s1 + $0x1a20] sm:$0xff] }
 0x18b   :  { %7232 = vmatprep.subr.bf16.mxu0 %v15149_v26  ;;  %7720 = vmatprep.subr.bf16.mxu1 %v15151_v28  ;;  %v15175_v26 = vcombine.high %v855_v8, %v859_v49  ;;  %v862_v28 = vld [vmem:[%s23497_s1 + $0x1980] sm:$0xff]  ;;  %v879_v7 = vld [vmem:[%s23497_s1 + $0x1a08] sm:$0xff] }
 0x18c   :  { %v15180_v55 = vcombine.low %v862_v28, %v866_v2 }
 0x18d   :  { %7210 = vmatmul.mubr.bf16.gmra.mrb[4].mxu0 %v18361_v33  ;;  %7698 = vmatmul.mubr.bf16.gmra.mrb[4].mxu1 %v18361_v33 }
 0x18e   :  { %7233 = vmatpush1.bf16.msra.mxu0 %v15148_v36  ;;  %7721 = vmatpush1.bf16.msra.mxu1 %v15150_v37  ;;  %v15174_v36 = vcombine.low %v855_v8, %v859_v49  ;;  %v15181_v37 = vcombine.high %v862_v28, %v866_v2  ;;  %v883_v8 = vld [vmem:[%s23497_s1 + $0x1a28] sm:$0xff]  ;;  %v890_v28 = vld [vmem:[%s23497_s1 + $0x1a60] sm:$0xff] }
 0x18f   :  { %7234 = vmatprep.subr.bf16.mxu0 %v15157_v38  ;;  %7722 = vmatprep.subr.bf16.mxu1 %v15159_v39  ;;  %v15183_v38 = vcombine.high %v863_v19, %v867_v31  ;;  %v870_v39 = vld [vmem:[%s23497_s1 + $0x19c0] sm:$0xff]  ;;  %v887_v2 = vld [vmem:[%s23497_s1 + $0x1a48] sm:$0xff] }
 0x190   :  { %7219 = vmatprep.mubr.bf16.mxu0 %v18372_v46  ;;  %7707 = vmatprep.mubr.bf16.mxu1 %v18372_v46  ;;  %v15188_v49 = vcombine.low %v870_v39, %v874_v41 }
 0x192   :  { %7235 = vmatpush1.bf16.msra.mxu0 %v15156_v60  ;;  %7723 = vmatpush1.bf16.msra.mxu1 %v15158_v14  ;;  %v15182_v60 = vcombine.low %v863_v19, %v867_v31  ;;  %v15189_v14 = vcombine.high %v870_v39, %v874_v41  ;;  %v891_v19 = vld [vmem:[%s23497_s1 + $0x1a68] sm:$0xff]  ;;  %v898_v39 = vld [vmem:[%s23497_s1 + $0x1aa0] sm:$0xff] }
 0x193   :  { %7236 = vmatprep.subr.bf16.mxu0 %v15165_v61  ;;  %7724 = vmatprep.subr.bf16.mxu1 %v15167_v63  ;;  %v15191_v61 = vcombine.high %v871_v43, %v875_v52  ;;  %v878_v63 = vld [vmem:[%s23497_s1 + $0x1a00] sm:$0xff]  ;;  %v895_v41 = vld [vmem:[%s23497_s1 + $0x1a88] sm:$0xff] }
 0x194   :  { %v15196_v31 = vcombine.low %v878_v63, %v882_v4 }
 0x195   :  { %7220 = vmatmul.mubr.bf16.gmra.mrb[8].mxu0 %v18396_v50  ;;  %7708 = vmatmul.mubr.bf16.gmra.mrb[8].mxu1 %v18396_v50 }
 0x196   :  { %7237 = vmatpush1.bf16.msra.mxu0 %v15164_v18  ;;  %7725 = vmatpush1.bf16.msra.mxu1 %v15166_v22  ;;  %v15190_v18 = vcombine.low %v871_v43, %v875_v52  ;;  %v15197_v22 = vcombine.high %v878_v63, %v882_v4  ;;  %v899_v43 = vld [vmem:[%s23497_s1 + $0x1aa8] sm:$0xff]  ;;  %v906_v63 = vld [vmem:[%s23497_s1 + $0x1ae0] sm:$0xff] }
 0x197   :  { %7238 = vmatprep.subr.bf16.mxu0 %v15173_v25  ;;  %7726 = vmatprep.subr.bf16.mxu1 %v15175_v26  ;;  %v15199_v25 = vcombine.high %v879_v7, %v883_v8  ;;  %v886_v26 = vld [vmem:[%s23497_s1 + $0x1a40] sm:$0xff]  ;;  %v903_v4 = vld [vmem:[%s23497_s1 + $0x1ac8] sm:$0xff] }
 0x198   :  { %7260 = vmatprep.mubr.bf16.mxu0 %v18416_v5  ;;  %7748 = vmatprep.mubr.bf16.mxu1 %v18416_v5  ;;  %v15204_v52 = vcombine.low %v886_v26, %v890_v28 }
 0x19a   :  { %7239 = vmatpush1.bf16.msra.mxu0 %v15172_v34  ;;  %7727 = vmatpush1.bf16.msra.mxu1 %v15174_v36  ;;  %v15198_v34 = vcombine.low %v879_v7, %v883_v8  ;;  %v15205_v36 = vcombine.high %v886_v26, %v890_v28  ;;  %v907_v7 = vld [vmem:[%s23497_s1 + $0x1ae8] sm:$0xff]  ;;  %v914_v26 = vld [vmem:[%s23497_s1 + $0x1b20] sm:$0xff] }
 0x19b   :  { %7240 = vmatprep.subr.bf16.mxu0 %v15181_v37  ;;  %7728 = vmatprep.subr.bf16.mxu1 %v15183_v38  ;;  %v15207_v37 = vcombine.high %v887_v2, %v891_v19  ;;  %v894_v38 = vld [vmem:[%s23497_s1 + $0x1a80] sm:$0xff]  ;;  %v911_v28 = vld [vmem:[%s23497_s1 + $0x1b08] sm:$0xff] }
 0x19c   :  { %v15212_v8 = vcombine.low %v894_v38, %v898_v39 }
 0x19e   :  { %7241 = vmatpush1.bf16.msra.mxu0 %v15180_v55  ;;  %7729 = vmatpush1.bf16.msra.mxu1 %v15182_v60  ;;  %v15206_v55 = vcombine.low %v887_v2, %v891_v19  ;;  %v15213_v60 = vcombine.high %v894_v38, %v898_v39  ;;  %v915_v2 = vld [vmem:[%s23497_s1 + $0x1b28] sm:$0xff]  ;;  %v922_v38 = vld [vmem:[%s23497_s1 + $0x1b60] sm:$0xff] }
 0x19f   :  { %7242 = vmatprep.subr.bf16.mxu0 %v15189_v14  ;;  %7730 = vmatprep.subr.bf16.mxu1 %v15191_v61  ;;  %v15215_v14 = vcombine.high %v895_v41, %v899_v43  ;;  %v902_v61 = vld [vmem:[%s23497_s1 + $0x1ac0] sm:$0xff]  ;;  %v919_v39 = vld [vmem:[%s23497_s1 + $0x1b48] sm:$0xff] }
 0x1a0   :  { %v15220_v19 = vcombine.low %v902_v61, %v906_v63 }
 0x1a2   :  { %7243 = vmatpush1.bf16.msra.mxu0 %v15188_v49  ;;  %7731 = vmatpush1.bf16.msra.mxu1 %v15190_v18  ;;  %v15214_v49 = vcombine.low %v895_v41, %v899_v43  ;;  %v15221_v18 = vcombine.high %v902_v61, %v906_v63  ;;  %v923_v41 = vld [vmem:[%s23497_s1 + $0x1b68] sm:$0xff]  ;;  %v930_v61 = vld [vmem:[%s23497_s1 + $0x1ba0] sm:$0xff] }
 0x1a3   :  { %7244 = vmatprep.subr.bf16.mxu0 %v15197_v22  ;;  %7732 = vmatprep.subr.bf16.mxu1 %v15199_v25  ;;  %v15223_v22 = vcombine.high %v903_v4, %v907_v7  ;;  %v910_v25 = vld [vmem:[%s23497_s1 + $0x1b00] sm:$0xff]  ;;  %v927_v63 = vld [vmem:[%s23497_s1 + $0x1b88] sm:$0xff] }
 0x1a4   :  { %v15228_v43 = vcombine.low %v910_v25, %v914_v26 }
 0x1a6   :  { %7245 = vmatpush1.bf16.msra.mxu0 %v15196_v31  ;;  %7733 = vmatpush1.bf16.msra.mxu1 %v15198_v34  ;;  %v15222_v31 = vcombine.low %v903_v4, %v907_v7  ;;  %v15229_v34 = vcombine.high %v910_v25, %v914_v26  ;;  %v931_v4 = vld [vmem:[%s23497_s1 + $0x1ba8] sm:$0xff]  ;;  %v938_v25 = vld [vmem:[%s23497_s1 + $0x1be0] sm:$0xff] }
 0x1a7   :  { %7246 = vmatprep.subr.bf16.mxu0 %v15205_v36  ;;  %7734 = vmatprep.subr.bf16.mxu1 %v15207_v37  ;;  %v15231_v36 = vcombine.high %v911_v28, %v915_v2  ;;  %v918_v37 = vld [vmem:[%s23497_s1 + $0x1b40] sm:$0xff]  ;;  %v935_v26 = vld [vmem:[%s23497_s1 + $0x1bc8] sm:$0xff] }
 0x1a8   :  { %v15236_v7 = vcombine.low %v918_v37, %v922_v38 }
 0x1aa   :  { %7247 = vmatpush1.bf16.msra.mxu0 %v15204_v52  ;;  %7735 = vmatpush1.bf16.msra.mxu1 %v15206_v55  ;;  %v15230_v52 = vcombine.low %v911_v28, %v915_v2  ;;  %v15237_v55 = vcombine.high %v918_v37, %v922_v38  ;;  %v939_v28 = vld [vmem:[%s23497_s1 + $0x1be8] sm:$0xff]  ;;  %v946_v37 = vld [vmem:[%s23497_s1 + $0x1c20] sm:$0xff] }
 0x1ab   :  { %7248 = vmatprep.subr.bf16.mxu0 %v15213_v60  ;;  %7736 = vmatprep.subr.bf16.mxu1 %v15215_v14  ;;  %v15239_v60 = vcombine.high %v919_v39, %v923_v41  ;;  %v926_v14 = vld [vmem:[%s23497_s1 + $0x1b80] sm:$0xff]  ;;  %v943_v38 = vld [vmem:[%s23497_s1 + $0x1c08] sm:$0xff] }
 0x1ac   :  { %v15244_v2 = vcombine.low %v926_v14, %v930_v61 }
 0x1ae   :  { %7249 = vmatpush1.bf16.msra.mxu0 %v15212_v8  ;;  %7737 = vmatpush1.bf16.msra.mxu1 %v15214_v49  ;;  %v15238_v8 = vcombine.low %v919_v39, %v923_v41  ;;  %v15245_v49 = vcombine.high %v926_v14, %v930_v61  ;;  %v947_v39 = vld [vmem:[%s23497_s1 + $0x1c28] sm:$0xff]  ;;  %v954_v14 = vld [vmem:[%s23497_s1 + $0x1c60] sm:$0xff] }
 0x1af   :  { %7250 = vmatprep.subr.bf16.mxu0 %v15221_v18  ;;  %7738 = vmatprep.subr.bf16.mxu1 %v15223_v22  ;;  %v15247_v18 = vcombine.high %v927_v63, %v931_v4  ;;  %v934_v22 = vld [vmem:[%s23497_s1 + $0x1bc0] sm:$0xff]  ;;  %v951_v61 = vld [vmem:[%s23497_s1 + $0x1c48] sm:$0xff] }
 0x1b0   :  { %v15252_v41 = vcombine.low %v934_v22, %v938_v25 }
 0x1b2   :  { %7251 = vmatpush1.bf16.msra.mxu0 %v15220_v19  ;;  %7739 = vmatpush1.bf16.msra.mxu1 %v15222_v31  ;;  %v15246_v19 = vcombine.low %v927_v63, %v931_v4  ;;  %v15253_v31 = vcombine.high %v934_v22, %v938_v25  ;;  %v18559_v63 = vcombine.low %v18401_v9, %v18406_v16  ;;  %v955_v4 = vld [vmem:[%s23497_s1 + $0x1c68] sm:$0xff]  ;;  %v958_v16 = vld [vmem:[%s23497_s1 + $0x1c80] sm:$0xff] }
 0x1b3   :  { %7252 = vmatprep.subr.bf16.mxu0 %v15229_v34  ;;  %7740 = vmatprep.subr.bf16.mxu1 %v15231_v36  ;;  %v15255_v34 = vcombine.high %v935_v26, %v939_v28  ;;  %v942_v36 = vld [vmem:[%s23497_s1 + $0x1c00] sm:$0xff]  ;;  %v15271_v9 = vcombine.high %v951_v61, %v955_v4 }
 0x1b4   :  { %v962_v25 = vld [vmem:[%s23497_s1 + $0x1ca0] sm:$0xff] }
 0x1b6   :  { %7253 = vmatpush1.bf16.msra.mxu0 %v15228_v43  ;;  %7741 = vmatpush1.bf16.msra.mxu1 %v15230_v52  ;;  %v15254_v43 = vcombine.low %v935_v26, %v939_v28  ;;  %v15261_v52 = vcombine.high %v942_v36, %v946_v37  ;;  %v959_v28 = vld [vmem:[%s23497_s1 + $0x1c88] sm:$0xff] }
 0x1b7   :  { %7254 = vmatprep.subr.bf16.mxu0 %v15237_v55  ;;  %7742 = vmatprep.subr.bf16.mxu1 %v15239_v60  ;;  %v15263_v55 = vcombine.high %v943_v38, %v947_v39  ;;  %v950_v60 = vld [vmem:[%s23497_s1 + $0x1c40] sm:$0xff] }
 0x1b8   :  { %v15269_v22 = vcombine.high %v950_v60, %v954_v14 }
 0x1ba   :  { %7255 = vmatpush1.bf16.msra.mxu0 %v15236_v7  ;;  %7743 = vmatpush1.bf16.msra.mxu1 %v15238_v8  ;;  %v1467_v7 = vld [vmem:[%s23496_s0 + $0xb0] sm:$0xff] }
 0x1bb   :  { %7256 = vmatprep.subr.bf16.mxu0 %v15245_v49  ;;  %7744 = vmatprep.subr.bf16.mxu1 %v15247_v18  ;;  %v1475_v8 = vld [vmem:[%s23496_s0 + $0xf0] sm:$0xff]  ;;  %v15260_v49 = vcombine.low %v942_v36, %v946_v37  ;;  %v15262_v18 = vcombine.low %v943_v38, %v947_v39  ;;  %v966_v37 = vld [vmem:[%s23497_s1 + $0x1cc0] sm:$0xff]  ;;  %v967_v39 = vld [vmem:[%s23497_s1 + $0x1cc8] sm:$0xff] }
 0x1bc   :  { %v18576_v26 = vcombine.high %v1467_v7, %v1475_v8  ;;  %v970_v38 = vld [vmem:[%s23497_s1 + $0x1ce0] sm:$0xff] }
 0x1be   :  { %7257 = vmatpush1.bf16.msra.mxu0 %v15244_v2  ;;  %7745 = vmatpush1.bf16.msra.mxu1 %v15246_v19  ;;  %v963_v2 = vld [vmem:[%s23497_s1 + $0x1ca8] sm:$0xff]  ;;  %v15268_v19 = vcombine.low %v950_v60, %v954_v14  ;;  %v15285_v14 = vcombine.high %v966_v37, %v970_v38 }
 0x1bf   :  { %7258 = vmatprep.subr.bf16.mxu0 %v15253_v31  ;;  %7746 = vmatprep.subr.bf16.mxu1 %v15255_v34  ;;  %v15270_v31 = vcombine.low %v951_v61, %v955_v4  ;;  %v15277_v34 = vcombine.high %v958_v16, %v962_v25  ;;  %v15279_v36 = vcombine.high %v959_v28, %v963_v2  ;;  %v974_v4 = vld [vmem:[%s23497_s1 + $0x1d00] sm:$0xff] }
 0x1c0   :  { %v15278_v60 = vcombine.low %v959_v28, %v963_v2  ;;  %v982_v28 = vld [vmem:[%s23497_s1 + $0x1d40] sm:$0xff] }
 0x1c1   :  { %v986_v2 = vld [vmem:[%s23497_s1 + $0x1d60] sm:$0xff] }
 0x1c2   :  { %7259 = vmatpush1.bf16.msra.mxu0 %v15252_v41  ;;  %7747 = vmatpush1.bf16.msra.mxu1 %v15254_v43  ;;  %v971_v41 = vld [vmem:[%s23497_s1 + $0x1ce8] sm:$0xff]  ;;  %v18600_v43 = vcombine.low %v1467_v7, %v1475_v8  ;;  %v978_v7 = vld [vmem:[%s23497_s1 + $0x1d20] sm:$0xff] }
 0x1c3   :  { %7289 = vmatprep.subr.bf16.mxu0 %v15261_v52  ;;  %7777 = vmatprep.subr.bf16.mxu1 %v15263_v55  ;;  %v1483_v52 = vld [vmem:[%s23496_s0 + $0x130] sm:$0xff]  ;;  %v15276_v55 = vcombine.low %v958_v16, %v962_v25  ;;  %v15287_v61 = vcombine.high %v967_v39, %v971_v41  ;;  %v15293_v16 = vcombine.high %v974_v4, %v978_v7 }
 0x1c4   :  { %v18611_v8 = vcombine.high %v1483_v52, %v1483_v52 }
 0x1c5   :  { %7261 = vmatmul.mubr.bf16.vlgmr.msra.gmra.mrb[0].mxu0 %v18559_v63  ;;  %7749 = vmatmul.mubr.bf16.vlgmr.msra.gmra.mrb[0].mxu1 %v18559_v63 }
 0x1c6   :  { %7290 = vmatpush1.bf16.msra.mxu0 %v15260_v49  ;;  %7778 = vmatpush1.bf16.msra.mxu1 %v15262_v18  ;;  %v975_v49 = vld [vmem:[%s23497_s1 + $0x1d08] sm:$0xff] }
 0x1c7   :  { %7291 = vmatprep.subr.bf16.mxu0 %v15269_v22  ;;  %7779 = vmatprep.subr.bf16.mxu1 %v15271_v9  ;;  %v979_v18 = vld [vmem:[%s23497_s1 + $0x1d28] sm:$0xff]  ;;  %v15284_v22 = vcombine.low %v966_v37, %v970_v38  ;;  %v15286_v9 = vcombine.low %v967_v39, %v971_v41  ;;  %v18645_v37 = vld [vmem:[%s23496_s0 + $0x78] sm:$0xff]  ;;  %v15292_v38 = vcombine.low %v974_v4, %v978_v7 }
 0x1c8   :  { %7270 = vmatprep.mubr.bf16.mxu0 %v18576_v26  ;;  %7758 = vmatprep.mubr.bf16.mxu1 %v18576_v26  ;;  %v15295_v25 = vcombine.high %v975_v49, %v979_v18  ;;  %v15294_v39 = vcombine.low %v975_v49, %v979_v18  ;;  %v15301_v41 = vcombine.high %v982_v28, %v986_v2  ;;  %v995_v4 = vld [vmem:[%s23497_s1 + $0x1da8] sm:$0xff] }
 0x1c9   :  { %v15300_v7 = vcombine.low %v982_v28, %v986_v2  ;;  %v1003_v28 = vld [vmem:[%s23497_s1 + $0x1de8] sm:$0xff] }
 0x1ca   :  { %7292 = vmatpush1.bf16.msra.mxu0 %v15268_v19  ;;  %7780 = vmatpush1.bf16.msra.mxu1 %v15270_v31  ;;  %v983_v19 = vld [vmem:[%s23497_s1 + $0x1d48] sm:$0xff] }
 0x1cb   :  { %7293 = vmatprep.subr.bf16.mxu0 %v15277_v34  ;;  %7781 = vmatprep.subr.bf16.mxu1 %v15279_v36  ;;  %v987_v31 = vld [vmem:[%s23497_s1 + $0x1d68] sm:$0xff]  ;;  %v18635_v34 = vcombine.low %v1483_v52, %v1483_v52  ;;  %v18640_v36 = vld [vmem:[%s23496_s0 + $0x38] sm:$0xff]  ;;  %v990_v52 = vld [vmem:[%s23497_s1 + $0x1d80] sm:$0xff] }
 0x1cc   :  { %v15302_v49 = vcombine.low %v983_v19, %v987_v31 }
 0x1cd   :  { %7271 = vmatmul.mubr.bf16.gmra.mrb[4].mxu0 %v18600_v43  ;;  %7759 = vmatmul.mubr.bf16.gmra.mrb[4].mxu1 %v18600_v43 }
 0x1ce   :  { %7294 = vmatpush1.bf16.msra.mxu0 %v15276_v55  ;;  %7782 = vmatpush1.bf16.msra.mxu1 %v15278_v60  ;;  %v15303_v55 = vcombine.high %v983_v19, %v987_v31  ;;  %v994_v60 = vld [vmem:[%s23497_s1 + $0x1da0] sm:$0xff] }
 0x1cf   :  { %7295 = vmatprep.subr.bf16.mxu0 %v15285_v14  ;;  %7783 = vmatprep.subr.bf16.mxu1 %v15287_v61  ;;  %v18655_v14 = vcombine.high %v18640_v36, %v18645_v37  ;;  %v991_v61 = vld [vmem:[%s23497_s1 + $0x1d88] sm:$0xff]  ;;  %v15309_v18 = vcombine.high %v990_v52, %v994_v60  ;;  %v15308_v2 = vcombine.low %v990_v52, %v994_v60 }
 0x1d0   :  { %7280 = vmatprep.mubr.bf16.mxu0 %v18611_v8  ;;  %7768 = vmatprep.mubr.bf16.mxu1 %v18611_v8  ;;  %v15310_v19 = vcombine.low %v991_v61, %v995_v4  ;;  %v1011_v52 = vld [vmem:[%s23497_s1 + $0x1e28] sm:$0xff] }
 0x1d1   :  { %23626 = vst [vmem:[#allocation5_spill] sm:$0xff] %v18655_v14 }
 0x1d2   :  { %7296 = vmatpush1.bf16.msra.mxu0 %v15284_v22  ;;  %7784 = vmatpush1.bf16.msra.mxu1 %v15286_v9  ;;  %v15311_v22 = vcombine.high %v991_v61, %v995_v4  ;;  %v998_v9 = vld [vmem:[%s23497_s1 + $0x1dc0] sm:$0xff] }
 0x1d3   :  { %7297 = vmatprep.subr.bf16.mxu0 %v15293_v16  ;;  %7785 = vmatprep.subr.bf16.mxu1 %v15295_v25  ;;  %v1002_v16 = vld [vmem:[%s23497_s1 + $0x1de0] sm:$0xff]  ;;  %v999_v25 = vld [vmem:[%s23497_s1 + $0x1dc8] sm:$0xff] }
 0x1d4   :  { %v15317_v31 = vcombine.high %v998_v9, %v1002_v16  ;;  %v15316_v60 = vcombine.low %v998_v9, %v1002_v16  ;;  %v15318_v61 = vcombine.low %v999_v25, %v1003_v28  ;;  %v1019_v9 = vld [vmem:[%s23497_s1 + $0x1e68] sm:$0xff] }
 0x1d5   :  { %7281 = vmatmul.mubr.bf16.gmra.mrb[8].mxu0 %v18635_v34  ;;  %7769 = vmatmul.mubr.bf16.gmra.mrb[8].mxu1 %v18635_v34 }
 0x1d6   :  { %7298 = vmatpush1.bf16.msra.mxu0 %v15292_v38  ;;  %7786 = vmatpush1.bf16.msra.mxu1 %v15294_v39  ;;  %v15319_v38 = vcombine.high %v999_v25, %v1003_v28  ;;  %v1006_v39 = vld [vmem:[%s23497_s1 + $0x1e00] sm:$0xff] }
 0x1d7   :  { %7299 = vmatprep.subr.bf16.mxu0 %v15301_v41  ;;  %7787 = vmatprep.subr.bf16.mxu1 %v15303_v55  ;;  %v1010_v41 = vld [vmem:[%s23497_s1 + $0x1e20] sm:$0xff]  ;;  %v1007_v55 = vld [vmem:[%s23497_s1 + $0x1e08] sm:$0xff] }
 0x1d8   :  { %7321 = vmatprep.mubr.bf16.mxu0 %v18655_v14  ;;  %7809 = vmatprep.mubr.bf16.mxu1 %v18655_v14  ;;  %v15325_v4 = vcombine.high %v1006_v39, %v1010_v41  ;;  %v15324_v16 = vcombine.low %v1006_v39, %v1010_v41  ;;  %v15326_v25 = vcombine.low %v1007_v55, %v1011_v52  ;;  %v1027_v39 = vld [vmem:[%s23497_s1 + $0x1ea8] sm:$0xff]  ;;  %v68_v14 = vld [vmem:[%s23497_s1 + $0xb0] sm:$0xff] }
 0x1da   :  { %7300 = vmatpush1.bf16.msra.mxu0 %v15300_v7  ;;  %7788 = vmatpush1.bf16.msra.mxu1 %v15302_v49  ;;  %v15327_v7 = vcombine.high %v1007_v55, %v1011_v52  ;;  %v1014_v49 = vld [vmem:[%s23497_s1 + $0x1e40] sm:$0xff] }
 0x1db   :  { %7301 = vmatprep.subr.bf16.mxu0 %v15309_v18  ;;  %7789 = vmatprep.subr.bf16.mxu1 %v15311_v22  ;;  %v1018_v18 = vld [vmem:[%s23497_s1 + $0x1e60] sm:$0xff]  ;;  %v1015_v22 = vld [vmem:[%s23497_s1 + $0x1e48] sm:$0xff] }
 0x1dc   :  { %v15333_v28 = vcombine.high %v1014_v49, %v1018_v18  ;;  %v15332_v41 = vcombine.low %v1014_v49, %v1018_v18  ;;  %v15334_v55 = vcombine.low %v1015_v22, %v1019_v9  ;;  %v1035_v49 = vld [vmem:[%s23497_s1 + $0x1ee8] sm:$0xff] }
 0x1de   :  { %7302 = vmatpush1.bf16.msra.mxu0 %v15308_v2  ;;  %7790 = vmatpush1.bf16.msra.mxu1 %v15310_v19  ;;  %v15335_v2 = vcombine.high %v1015_v22, %v1019_v9  ;;  %v1022_v19 = vld [vmem:[%s23497_s1 + $0x1e80] sm:$0xff] }
 0x1df   :  { %7303 = vmatprep.subr.bf16.mxu0 %v15317_v31  ;;  %7791 = vmatprep.subr.bf16.mxu1 %v15319_v38  ;;  %v1026_v31 = vld [vmem:[%s23497_s1 + $0x1ea0] sm:$0xff]  ;;  %v1023_v38 = vld [vmem:[%s23497_s1 + $0x1e88] sm:$0xff] }
 0x1e0   :  { %v15341_v52 = vcombine.high %v1022_v19, %v1026_v31  ;;  %v15340_v18 = vcombine.low %v1022_v19, %v1026_v31  ;;  %v15342_v22 = vcombine.low %v1023_v38, %v1027_v39  ;;  %v1043_v19 = vld [vmem:[%s23497_s1 + $0x1f28] sm:$0xff] }
 0x1e2   :  { %7304 = vmatpush1.bf16.msra.mxu0 %v15316_v60  ;;  %7792 = vmatpush1.bf16.msra.mxu1 %v15318_v61  ;;  %v15343_v60 = vcombine.high %v1023_v38, %v1027_v39  ;;  %v1030_v61 = vld [vmem:[%s23497_s1 + $0x1ec0] sm:$0xff] }
 0x1e3   :  { %7305 = vmatprep.subr.bf16.mxu0 %v15325_v4  ;;  %7793 = vmatprep.subr.bf16.mxu1 %v15327_v7  ;;  %v1034_v4 = vld [vmem:[%s23497_s1 + $0x1ee0] sm:$0xff]  ;;  %v1031_v7 = vld [vmem:[%s23497_s1 + $0x1ec8] sm:$0xff] }
 0x1e4   :  { %v15349_v9 = vcombine.high %v1030_v61, %v1034_v4  ;;  %v15348_v31 = vcombine.low %v1030_v61, %v1034_v4  ;;  %v15350_v38 = vcombine.low %v1031_v7, %v1035_v49  ;;  %v1051_v61 = vld [vmem:[%s23497_s1 + $0x1f68] sm:$0xff] }
 0x1e6   :  { %7306 = vmatpush1.bf16.msra.mxu0 %v15324_v16  ;;  %7794 = vmatpush1.bf16.msra.mxu1 %v15326_v25  ;;  %v15351_v16 = vcombine.high %v1031_v7, %v1035_v49  ;;  %v1038_v25 = vld [vmem:[%s23497_s1 + $0x1f00] sm:$0xff] }
 0x1e7   :  { %7307 = vmatprep.subr.bf16.mxu0 %v15333_v28  ;;  %7795 = vmatprep.subr.bf16.mxu1 %v15335_v2  ;;  %v1042_v28 = vld [vmem:[%s23497_s1 + $0x1f20] sm:$0xff]  ;;  %v1039_v2 = vld [vmem:[%s23497_s1 + $0x1f08] sm:$0xff] }
 0x1e8   :  { %v15357_v39 = vcombine.high %v1038_v25, %v1042_v28  ;;  %v15356_v4 = vcombine.low %v1038_v25, %v1042_v28  ;;  %v15358_v7 = vcombine.low %v1039_v2, %v1043_v19  ;;  %v1059_v25 = vld [vmem:[%s23497_s1 + $0x1fa8] sm:$0xff] }
 0x1ea   :  { %7308 = vmatpush1.bf16.msra.mxu0 %v15332_v41  ;;  %7796 = vmatpush1.bf16.msra.mxu1 %v15334_v55  ;;  %v15359_v41 = vcombine.high %v1039_v2, %v1043_v19  ;;  %v1046_v55 = vld [vmem:[%s23497_s1 + $0x1f40] sm:$0xff] }
 0x1eb   :  { %7309 = vmatprep.subr.bf16.mxu0 %v15341_v52  ;;  %7797 = vmatprep.subr.bf16.mxu1 %v15343_v60  ;;  %v1050_v52 = vld [vmem:[%s23497_s1 + $0x1f60] sm:$0xff]  ;;  %v1047_v60 = vld [vmem:[%s23497_s1 + $0x1f48] sm:$0xff] }
 0x1ec   :  { %v15365_v49 = vcombine.high %v1046_v55, %v1050_v52  ;;  %v15364_v28 = vcombine.low %v1046_v55, %v1050_v52  ;;  %v15366_v2 = vcombine.low %v1047_v60, %v1051_v61  ;;  %v1067_v55 = vld [vmem:[%s23497_s1 + $0x1fe8] sm:$0xff] }
 0x1ee   :  { %7310 = vmatpush1.bf16.msra.mxu0 %v15340_v18  ;;  %7798 = vmatpush1.bf16.msra.mxu1 %v15342_v22  ;;  %v15367_v18 = vcombine.high %v1047_v60, %v1051_v61  ;;  %v1054_v22 = vld [vmem:[%s23497_s1 + $0x1f80] sm:$0xff] }
 0x1ef   :  { %7311 = vmatprep.subr.bf16.mxu0 %v15349_v9  ;;  %7799 = vmatprep.subr.bf16.mxu1 %v15351_v16  ;;  %v1058_v9 = vld [vmem:[%s23497_s1 + $0x1fa0] sm:$0xff]  ;;  %v1055_v16 = vld [vmem:[%s23497_s1 + $0x1f88] sm:$0xff] }
 0x1f0   :  { %v15373_v19 = vcombine.high %v1054_v22, %v1058_v9  ;;  %v15372_v52 = vcombine.low %v1054_v22, %v1058_v9  ;;  %v15374_v60 = vcombine.low %v1055_v16, %v1059_v25  ;;  %v53_v22 = vld [vmem:[%s23497_s1 + $0x38] sm:$0xff] }
 0x1f2   :  { %7312 = vmatpush1.bf16.msra.mxu0 %v15348_v31  ;;  %7800 = vmatpush1.bf16.msra.mxu1 %v15350_v38  ;;  %v15375_v31 = vcombine.high %v1055_v16, %v1059_v25  ;;  %v1062_v38 = vld [vmem:[%s23497_s1 + $0x1fc0] sm:$0xff] }
 0x1f3   :  { %7313 = vmatprep.subr.bf16.mxu0 %v15357_v39  ;;  %7801 = vmatprep.subr.bf16.mxu1 %v15359_v41  ;;  %v1066_v39 = vld [vmem:[%s23497_s1 + $0x1fe0] sm:$0xff]  ;;  %v1063_v41 = vld [vmem:[%s23497_s1 + $0x1fc8] sm:$0xff] }
 0x1f4   :  { %v15381_v61 = vcombine.high %v1062_v38, %v1066_v39  ;;  %v15380_v9 = vcombine.low %v1062_v38, %v1066_v39  ;;  %v15382_v16 = vcombine.low %v1063_v41, %v1067_v55  ;;  %v18798_v38 = vcombine.low %v18640_v36, %v18645_v37  ;;  %v61_v39 = vld [vmem:[%s23497_s1 + $0x78] sm:$0xff] }
 0x1f6   :  { %7314 = vmatpush1.bf16.msra.mxu0 %v15356_v4  ;;  %7802 = vmatpush1.bf16.msra.mxu1 %v15358_v7  ;;  %v15383_v4 = vcombine.high %v1063_v41, %v1067_v55  ;;  %v48_v7 = vld [vmem:[%s23497_s1 + $0x10] sm:$0xff]  ;;  %23627 = vst [vmem:[#allocation6_spill] sm:$0xff] %v18798_v38  ;;  %v1468_v41 = vld [vmem:[%s23496_s0 + $0xb8] sm:$0xff] }
 0x1f7   :  { %7315 = vmatprep.subr.bf16.mxu0 %v15365_v49  ;;  %7803 = vmatprep.subr.bf16.mxu1 %v15367_v18  ;;  %v52_v49 = vld [vmem:[%s23497_s1 + $0x30] sm:$0xff]  ;;  %v49_v18 = vld [vmem:[%s23497_s1 + $0x18] sm:$0xff] }
 0x1f8   :  { %v14369_v25 = vcombine.high %v48_v7, %v52_v49  ;;  %v1476_v55 = vld [vmem:[%s23496_s0 + $0xf8] sm:$0xff] }
 0x1f9   :  { %v18809_v37 = vcombine.high %v1468_v41, %v1476_v55 }
 0x1fa   :  { %7316 = vmatpush1.bf16.msra.mxu0 %v15364_v28  ;;  %7804 = vmatpush1.bf16.msra.mxu1 %v15366_v2  ;;  %v14371_v28 = vcombine.high %v49_v18, %v53_v22  ;;  %v56_v2 = vld [vmem:[%s23497_s1 + $0x50] sm:$0xff] }
 0x1fb   :  { %7317 = vmatprep.subr.bf16.mxu0 %v15373_v19  ;;  %7805 = vmatprep.subr.bf16.mxu1 %v15375_v31  ;;  %v60_v19 = vld [vmem:[%s23497_s1 + $0x70] sm:$0xff]  ;;  %v57_v31 = vld [vmem:[%s23497_s1 + $0x58] sm:$0xff]  ;;  %23628 = vst [vmem:[#allocation7_spill] sm:$0xff] %v18809_v37 }
 0x1fc   :  { %v14379_v36 = vcombine.high %v57_v31, %v61_v39 }
 0x1fe   :  { %7318 = vmatpush1.bf16.msra.mxu0 %v15372_v52  ;;  %7806 = vmatpush1.bf16.msra.mxu1 %v15374_v60  ;;  %v14368_v52 = vcombine.low %v48_v7, %v52_v49  ;;  %v14370_v60 = vcombine.low %v49_v18, %v53_v22  ;;  %v65_v7 = vld [vmem:[%s23497_s1 + $0x98] sm:$0xff]  ;;  %v14376_v18 = vcombine.low %v56_v2, %v60_v19 }
 0x1ff   :  { %7319 = vmatprep.subr.bf16.mxu0 %v15381_v61  ;;  %7807 = vmatprep.subr.bf16.mxu1 %v15383_v4  ;;  %v14377_v61 = vcombine.high %v56_v2, %v60_v19  ;;  %v64_v4 = vld [vmem:[%s23497_s1 + $0x90] sm:$0xff]  ;;  %v69_v49 = vld [vmem:[%s23497_s1 + $0xb8] sm:$0xff]  ;;  %v14378_v22 = vcombine.low %v57_v31, %v61_v39 }
 0x200   :  { %v73_v2 = vld [vmem:[%s23497_s1 + $0xd8] sm:$0xff]  ;;  %v14384_v39 = vcombine.low %v64_v4, %v68_v14 }
 0x201   :  { %v77_v19 = vld [vmem:[%s23497_s1 + $0xf8] sm:$0xff] }
 0x202   :  { %7320 = vmatpush1.bf16.msra.mxu0 %v15380_v9  ;;  %7808 = vmatpush1.bf16.msra.mxu1 %v15382_v16  ;;  %v14385_v9 = vcombine.high %v64_v4, %v68_v14  ;;  %v14387_v16 = vcombine.high %v65_v7, %v69_v49  ;;  %v1484_v31 = vld [vmem:[%s23496_s0 + $0x138] sm:$0xff] }
 0x203   :  { %7838 = vmatprep.subr.bf16.mxu0 %v14369_v25  ;;  %8326 = vmatprep.subr.bf16.mxu1 %v14371_v28  ;;  %v72_v25 = vld [vmem:[%s23497_s1 + $0xd0] sm:$0xff]  ;;  %v81_v14 = vld [vmem:[%s23497_s1 + $0x118] sm:$0xff] }
 0x204   :  { %v76_v28 = vld [vmem:[%s23497_s1 + $0xf0] sm:$0xff]  ;;  %v85_v4 = vld [vmem:[%s23497_s1 + $0x138] sm:$0xff] }
 0x205   :  { %7322 = vmatmul.mubr.bf16.vlgmr.msra.gmra.mrb[0].mxu0 %v18798_v38  ;;  %7810 = vmatmul.mubr.bf16.vlgmr.msra.gmra.mrb[0].mxu1 %v18798_v38  ;;  %v528_v38 = vld [vmem:[%s23497_s1 + $0xf10] sm:$0xff] }
 0x206   :  { %7839 = vmatpush1.bf16.msra.mxu0 %v14368_v52  ;;  %8327 = vmatpush1.bf16.msra.mxu1 %v14370_v60  ;;  %v18833_v52 = vcombine.low %v1468_v41, %v1476_v55  ;;  %v14386_v60 = vcombine.low %v65_v7, %v69_v49  ;;  %v14395_v41 = vcombine.high %v73_v2, %v77_v19 }
 0x207   :  { %7840 = vmatprep.subr.bf16.mxu0 %v14377_v61  ;;  %8328 = vmatprep.subr.bf16.mxu1 %v14379_v36  ;;  %v14393_v61 = vcombine.high %v72_v25, %v76_v28  ;;  %v18844_v55 = vcombine.high %v1484_v31, %v1484_v31  ;;  %v80_v36 = vld [vmem:[%s23497_s1 + $0x110] sm:$0xff]  ;;  %v14392_v7 = vcombine.low %v72_v25, %v76_v28  ;;  %v89_v25 = vld [vmem:[%s23497_s1 + $0x158] sm:$0xff] }
 0x208   :  { %7331 = vmatprep.mubr.bf16.mxu0 %v18809_v37  ;;  %7819 = vmatprep.mubr.bf16.mxu1 %v18809_v37  ;;  %23629 = vst [vmem:[#allocation8_spill] sm:$0xff] %v18833_v52  ;;  %v84_v37 = vld [vmem:[%s23497_s1 + $0x130] sm:$0xff]  ;;  %v14394_v49 = vcombine.low %v73_v2, %v77_v19  ;;  %v93_v28 = vld [vmem:[%s23497_s1 + $0x178] sm:$0xff]  ;;  %v14402_v19 = vcombine.low %v81_v14, %v85_v4 }
 0x209   :  { %23630 = vst [vmem:[#allocation9_spill] sm:$0xff] %v18844_v55  ;;  %v14400_v2 = vcombine.low %v80_v36, %v84_v37 }
 0x20a   :  { %7841 = vmatpush1.bf16.msra.mxu0 %v14376_v18  ;;  %8329 = vmatpush1.bf16.msra.mxu1 %v14378_v22  ;;  %v14401_v18 = vcombine.high %v80_v36, %v84_v37  ;;  %v14403_v22 = vcombine.high %v81_v14, %v85_v4  ;;  %v97_v37 = vld [vmem:[%s23497_s1 + $0x198] sm:$0xff]  ;;  %v14410_v4 = vcombine.low %v89_v25, %v93_v28 }
 0x20b   :  { %7842 = vmatprep.subr.bf16.mxu0 %v14385_v9  ;;  %8330 = vmatprep.subr.bf16.mxu1 %v14387_v16  ;;  %v88_v9 = vld [vmem:[%s23497_s1 + $0x150] sm:$0xff]  ;;  %v101_v36 = vld [vmem:[%s23497_s1 + $0x1b8] sm:$0xff] }
 0x20c   :  { %v92_v16 = vld [vmem:[%s23497_s1 + $0x170] sm:$0xff] }
 0x20d   :  { %7332 = vmatmul.mubr.bf16.gmra.mrb[4].mxu0 %v18833_v52  ;;  %7820 = vmatmul.mubr.bf16.gmra.mrb[4].mxu1 %v18833_v52  ;;  %v14408_v14 = vcombine.low %v88_v9, %v92_v16 }
 0x20e   :  { %7843 = vmatpush1.bf16.msra.mxu0 %v14384_v39  ;;  %8331 = vmatpush1.bf16.msra.mxu1 %v14386_v60  ;;  %v18868_v39 = vcombine.low %v1484_v31, %v1484_v31  ;;  %v14409_v60 = vcombine.high %v88_v9, %v92_v16  ;;  %v96_v31 = vld [vmem:[%s23497_s1 + $0x190] sm:$0xff]  ;;  %v105_v9 = vld [vmem:[%s23497_s1 + $0x1d8] sm:$0xff] }
 0x20f   :  { %7844 = vmatprep.subr.bf16.mxu0 %v14393_v61  ;;  %8332 = vmatprep.subr.bf16.mxu1 %v14395_v41  ;;  %v14411_v61 = vcombine.high %v89_v25, %v93_v28  ;;  %v100_v41 = vld [vmem:[%s23497_s1 + $0x1b0] sm:$0xff]  ;;  %v109_v16 = vld [vmem:[%s23497_s1 + $0x1f8] sm:$0xff]  ;;  %v14418_v28 = vcombine.low %v97_v37, %v101_v36 }
 0x210   :  { %7341 = vmatprep.mubr.bf16.mxu0 %v18844_v55  ;;  %7829 = vmatprep.mubr.bf16.mxu1 %v18844_v55  ;;  %23631 = vst [vmem:[#allocation10_spill] sm:$0xff] %v18868_v39  ;;  %v14416_v25 = vcombine.low %v96_v31, %v100_v41 }
 0x212   :  { %7845 = vmatpush1.bf16.msra.mxu0 %v14392_v7  ;;  %8333 = vmatpush1.bf16.msra.mxu1 %v14394_v49  ;;  %v14417_v7 = vcombine.high %v96_v31, %v100_v41  ;;  %v14419_v49 = vcombine.high %v97_v37, %v101_v36  ;;  %v117_v31 = vld [vmem:[%s23497_s1 + $0x238] sm:$0xff]  ;;  %v14426_v37 = vcombine.low %v105_v9, %v109_v16 }
 0x213   :  { %7846 = vmatprep.subr.bf16.mxu0 %v14401_v18  ;;  %8334 = vmatprep.subr.bf16.mxu1 %v14403_v22  ;;  %v104_v18 = vld [vmem:[%s23497_s1 + $0x1d0] sm:$0xff] }
 0x214   :  { %v108_v22 = vld [vmem:[%s23497_s1 + $0x1f0] sm:$0xff] }
 0x215   :  { %7342 = vmatmul.mubr.bf16.gmra.mrb[8].mxu0 %v18868_v39  ;;  %7830 = vmatmul.mubr.bf16.gmra.mrb[8].mxu1 %v18868_v39  ;;  %v14424_v41 = vcombine.low %v104_v18, %v108_v22 }
 0x216   :  { %7847 = vmatpush1.bf16.msra.mxu0 %v14400_v2  ;;  %8335 = vmatpush1.bf16.msra.mxu1 %v14402_v19  ;;  %v14425_v2 = vcombine.high %v104_v18, %v108_v22  ;;  %v14427_v19 = vcombine.high %v105_v9, %v109_v16  ;;  %v125_v18 = vld [vmem:[%s23497_s1 + $0x278] sm:$0xff] }
 0x217   :  { %7848 = vmatprep.subr.bf16.mxu0 %v14409_v60  ;;  %8336 = vmatprep.subr.bf16.mxu1 %v14411_v61  ;;  %v112_v60 = vld [vmem:[%s23497_s1 + $0x210] sm:$0xff] }
 0x218   :  { %7870 = vmatprep.mubr.bf16.mxu0 %v16996_v58  ;;  %8358 = vmatprep.mubr.bf16.mxu1 %v16996_v58  ;;  %v116_v61 = vld [vmem:[%s23497_s1 + $0x230] sm:$0xff]  ;;  %v113_v58 = vld [vmem:[%s23497_s1 + $0x218] sm:$0xff] }
 0x219   :  { %v14433_v36 = vcombine.high %v112_v60, %v116_v61  ;;  %v14432_v22 = vcombine.low %v112_v60, %v116_v61  ;;  %v14434_v9 = vcombine.low %v113_v58, %v117_v31  ;;  %v133_v60 = vld [vmem:[%s23497_s1 + $0x2b8] sm:$0xff] }
 0x21a   :  { %7849 = vmatpush1.bf16.msra.mxu0 %v14408_v14  ;;  %8337 = vmatpush1.bf16.msra.mxu1 %v14410_v4  ;;  %v14435_v14 = vcombine.high %v113_v58, %v117_v31  ;;  %v120_v4 = vld [vmem:[%s23497_s1 + $0x250] sm:$0xff] }
 0x21b   :  { %7850 = vmatprep.subr.bf16.mxu0 %v14417_v7  ;;  %8338 = vmatprep.subr.bf16.mxu1 %v14419_v49  ;;  %v124_v7 = vld [vmem:[%s23497_s1 + $0x270] sm:$0xff]  ;;  %v121_v49 = vld [vmem:[%s23497_s1 + $0x258] sm:$0xff] }
 0x21c   :  { %v14441_v16 = vcombine.high %v120_v4, %v124_v7  ;;  %v14440_v61 = vcombine.low %v120_v4, %v124_v7  ;;  %v14442_v58 = vcombine.low %v121_v49, %v125_v18  ;;  %v141_v4 = vld [vmem:[%s23497_s1 + $0x2f8] sm:$0xff] }
 0x21e   :  { %7851 = vmatpush1.bf16.msra.mxu0 %v14416_v25  ;;  %8339 = vmatpush1.bf16.msra.mxu1 %v14418_v28  ;;  %v14443_v25 = vcombine.high %v121_v49, %v125_v18  ;;  %v128_v28 = vld [vmem:[%s23497_s1 + $0x290] sm:$0xff] }
 0x21f   :  { %7852 = vmatprep.subr.bf16.mxu0 %v14425_v2  ;;  %8340 = vmatprep.subr.bf16.mxu1 %v14427_v19  ;;  %v132_v2 = vld [vmem:[%s23497_s1 + $0x2b0] sm:$0xff]  ;;  %v129_v19 = vld [vmem:[%s23497_s1 + $0x298] sm:$0xff] }
 0x220   :  { %v14449_v31 = vcombine.high %v128_v28, %v132_v2  ;;  %v14448_v7 = vcombine.low %v128_v28, %v132_v2  ;;  %v14450_v49 = vcombine.low %v129_v19, %v133_v60  ;;  %v149_v28 = vld [vmem:[%s23497_s1 + $0x338] sm:$0xff] }
 0x222   :  { %7853 = vmatpush1.bf16.msra.mxu0 %v14424_v41  ;;  %8341 = vmatpush1.bf16.msra.mxu1 %v14426_v37  ;;  %v14451_v41 = vcombine.high %v129_v19, %v133_v60  ;;  %v136_v37 = vld [vmem:[%s23497_s1 + $0x2d0] sm:$0xff] }
 0x223   :  { %7854 = vmatprep.subr.bf16.mxu0 %v14433_v36  ;;  %8342 = vmatprep.subr.bf16.mxu1 %v14435_v14  ;;  %v140_v36 = vld [vmem:[%s23497_s1 + $0x2f0] sm:$0xff]  ;;  %v137_v14 = vld [vmem:[%s23497_s1 + $0x2d8] sm:$0xff] }
 0x224   :  { %v14457_v18 = vcombine.high %v136_v37, %v140_v36  ;;  %v14456_v2 = vcombine.low %v136_v37, %v140_v36  ;;  %v14458_v19 = vcombine.low %v137_v14, %v141_v4  ;;  %v157_v37 = vld [vmem:[%s23497_s1 + $0x378] sm:$0xff] }
 0x226   :  { %7855 = vmatpush1.bf16.msra.mxu0 %v14432_v22  ;;  %8343 = vmatpush1.bf16.msra.mxu1 %v14434_v9  ;;  %v14459_v22 = vcombine.high %v137_v14, %v141_v4  ;;  %v144_v9 = vld [vmem:[%s23497_s1 + $0x310] sm:$0xff] }
 0x227   :  { %7856 = vmatprep.subr.bf16.mxu0 %v14441_v16  ;;  %8344 = vmatprep.subr.bf16.mxu1 %v14443_v25  ;;  %v148_v16 = vld [vmem:[%s23497_s1 + $0x330] sm:$0xff]  ;;  %v145_v25 = vld [vmem:[%s23497_s1 + $0x318] sm:$0xff] }
 0x228   :  { %v14465_v60 = vcombine.high %v144_v9, %v148_v16  ;;  %v14464_v36 = vcombine.low %v144_v9, %v148_v16  ;;  %v14466_v14 = vcombine.low %v145_v25, %v149_v28  ;;  %v165_v9 = vld [vmem:[%s23497_s1 + $0x3b8] sm:$0xff] }
 0x22a   :  { %7857 = vmatpush1.bf16.msra.mxu0 %v14440_v61  ;;  %8345 = vmatpush1.bf16.msra.mxu1 %v14442_v58  ;;  %v14467_v61 = vcombine.high %v145_v25, %v149_v28  ;;  %v152_v58 = vld [vmem:[%s23497_s1 + $0x350] sm:$0xff] }
 0x22b   :  { %7858 = vmatprep.subr.bf16.mxu0 %v14449_v31  ;;  %8346 = vmatprep.subr.bf16.mxu1 %v14451_v41  ;;  %v156_v31 = vld [vmem:[%s23497_s1 + $0x370] sm:$0xff]  ;;  %v153_v41 = vld [vmem:[%s23497_s1 + $0x358] sm:$0xff] }
 0x22c   :  { %v14473_v4 = vcombine.high %v152_v58, %v156_v31  ;;  %v14472_v16 = vcombine.low %v152_v58, %v156_v31  ;;  %v14474_v25 = vcombine.low %v153_v41, %v157_v37  ;;  %v173_v58 = vld [vmem:[%s23497_s1 + $0x3f8] sm:$0xff] }
 0x22e   :  { %7859 = vmatpush1.bf16.msra.mxu0 %v14448_v7  ;;  %8347 = vmatpush1.bf16.msra.mxu1 %v14450_v49  ;;  %v14475_v7 = vcombine.high %v153_v41, %v157_v37  ;;  %v160_v49 = vld [vmem:[%s23497_s1 + $0x390] sm:$0xff] }
 0x22f   :  { %7860 = vmatprep.subr.bf16.mxu0 %v14457_v18  ;;  %8348 = vmatprep.subr.bf16.mxu1 %v14459_v22  ;;  %v164_v18 = vld [vmem:[%s23497_s1 + $0x3b0] sm:$0xff]  ;;  %v161_v22 = vld [vmem:[%s23497_s1 + $0x398] sm:$0xff] }
 0x230   :  { %v14481_v28 = vcombine.high %v160_v49, %v164_v18  ;;  %v14480_v31 = vcombine.low %v160_v49, %v164_v18  ;;  %v14482_v41 = vcombine.low %v161_v22, %v165_v9  ;;  %v181_v49 = vld [vmem:[%s23497_s1 + $0x438] sm:$0xff] }
 0x232   :  { %7861 = vmatpush1.bf16.msra.mxu0 %v14456_v2  ;;  %8349 = vmatpush1.bf16.msra.mxu1 %v14458_v19  ;;  %v14483_v2 = vcombine.high %v161_v22, %v165_v9  ;;  %v168_v19 = vld [vmem:[%s23497_s1 + $0x3d0] sm:$0xff] }
 0x233   :  { %7862 = vmatprep.subr.bf16.mxu0 %v14465_v60  ;;  %8350 = vmatprep.subr.bf16.mxu1 %v14467_v61  ;;  %v172_v60 = vld [vmem:[%s23497_s1 + $0x3f0] sm:$0xff]  ;;  %v169_v61 = vld [vmem:[%s23497_s1 + $0x3d8] sm:$0xff] }
 0x234   :  { %v14489_v37 = vcombine.high %v168_v19, %v172_v60  ;;  %v14488_v18 = vcombine.low %v168_v19, %v172_v60  ;;  %v14490_v22 = vcombine.low %v169_v61, %v173_v58  ;;  %v189_v19 = vld [vmem:[%s23497_s1 + $0x478] sm:$0xff] }
 0x236   :  { %7863 = vmatpush1.bf16.msra.mxu0 %v14464_v36  ;;  %8351 = vmatpush1.bf16.msra.mxu1 %v14466_v14  ;;  %v14491_v36 = vcombine.high %v169_v61, %v173_v58  ;;  %v176_v14 = vld [vmem:[%s23497_s1 + $0x410] sm:$0xff] }
 0x237   :  { %7864 = vmatprep.subr.bf16.mxu0 %v14473_v4  ;;  %8352 = vmatprep.subr.bf16.mxu1 %v14475_v7  ;;  %v180_v4 = vld [vmem:[%s23497_s1 + $0x430] sm:$0xff]  ;;  %v177_v7 = vld [vmem:[%s23497_s1 + $0x418] sm:$0xff] }
 0x238   :  { %v14497_v9 = vcombine.high %v176_v14, %v180_v4  ;;  %v14496_v60 = vcombine.low %v176_v14, %v180_v4  ;;  %v14498_v61 = vcombine.low %v177_v7, %v181_v49  ;;  %v197_v14 = vld [vmem:[%s23497_s1 + $0x4b8] sm:$0xff] }
 0x23a   :  { %7865 = vmatpush1.bf16.msra.mxu0 %v14472_v16  ;;  %8353 = vmatpush1.bf16.msra.mxu1 %v14474_v25  ;;  %v14499_v16 = vcombine.high %v177_v7, %v181_v49  ;;  %v184_v25 = vld [vmem:[%s23497_s1 + $0x450] sm:$0xff] }
 0x23b   :  { %7866 = vmatprep.subr.bf16.mxu0 %v14481_v28  ;;  %8354 = vmatprep.subr.bf16.mxu1 %v14483_v2  ;;  %v188_v28 = vld [vmem:[%s23497_s1 + $0x470] sm:$0xff]  ;;  %v185_v2 = vld [vmem:[%s23497_s1 + $0x458] sm:$0xff] }
 0x23c   :  { %v14505_v58 = vcombine.high %v184_v25, %v188_v28  ;;  %v14504_v4 = vcombine.low %v184_v25, %v188_v28  ;;  %v14506_v7 = vcombine.low %v185_v2, %v189_v19 }
 0x23e   :  { %7867 = vmatpush1.bf16.msra.mxu0 %v14480_v31  ;;  %8355 = vmatpush1.bf16.msra.mxu1 %v14482_v41  ;;  %v14507_v31 = vcombine.high %v185_v2, %v189_v19  ;;  %v192_v41 = vld [vmem:[%s23497_s1 + $0x490] sm:$0xff] }
 0x23f   :  { %7868 = vmatprep.subr.bf16.mxu0 %v14489_v37  ;;  %8356 = vmatprep.subr.bf16.mxu1 %v14491_v36  ;;  %v196_v37 = vld [vmem:[%s23497_s1 + $0x4b0] sm:$0xff]  ;;  %v193_v36 = vld [vmem:[%s23497_s1 + $0x498] sm:$0xff] }
 0x240   :  { %v14513_v49 = vcombine.high %v192_v41, %v196_v37  ;;  %v14512_v25 = vcombine.low %v192_v41, %v196_v37  ;;  %v14514_v28 = vcombine.low %v193_v36, %v197_v14 }
 0x242   :  { %7869 = vmatpush1.bf16.msra.mxu0 %v14488_v18  ;;  %8357 = vmatpush1.bf16.msra.mxu1 %v14490_v22  ;;  %v14515_v18 = vcombine.high %v193_v36, %v197_v14  ;;  %v200_v22 = vld [vmem:[%s23497_s1 + $0x4d0] sm:$0xff] }
 0x243   :  { %7899 = vmatprep.subr.bf16.mxu0 %v14497_v9  ;;  %8387 = vmatprep.subr.bf16.mxu1 %v14499_v16  ;;  %v204_v9 = vld [vmem:[%s23497_s1 + $0x4f0] sm:$0xff]  ;;  %v205_v16 = vld [vmem:[%s23497_s1 + $0x4f8] sm:$0xff] }
 0x244   :  { %v14521_v2 = vcombine.high %v200_v22, %v204_v9  ;;  %v216_v14 = vld [vmem:[%s23497_s1 + $0x550] sm:$0xff] }
 0x245   :  { %7871 = vmatmul.mubr.bf16.vlgmr.msra.gmra.mrb[12].mxu0 %v17125_v15  ;;  %8359 = vmatmul.mubr.bf16.vlgmr.msra.gmra.mrb[12].mxu1 %v17125_v15  ;;  %v201_v15 = vld [vmem:[%s23497_s1 + $0x4d8] sm:$0xff] }
 0x246   :  { %7900 = vmatpush1.bf16.msra.mxu0 %v14496_v60  ;;  %8388 = vmatpush1.bf16.msra.mxu1 %v14498_v61  ;;  %v14523_v19 = vcombine.high %v201_v15, %v205_v16  ;;  %v208_v60 = vld [vmem:[%s23497_s1 + $0x510] sm:$0xff]  ;;  %v14522_v41 = vcombine.low %v201_v15, %v205_v16 }
 0x247   :  { %7901 = vmatprep.subr.bf16.mxu0 %v14505_v58  ;;  %8389 = vmatprep.subr.bf16.mxu1 %v14507_v31  ;;  %v212_v61 = vld [vmem:[%s23497_s1 + $0x530] sm:$0xff]  ;;  %v213_v58 = vld [vmem:[%s23497_s1 + $0x538] sm:$0xff]  ;;  %v14520_v31 = vcombine.low %v200_v22, %v204_v9 }
 0x248   :  { %7880 = vmatprep.mubr.bf16.mxu0 %v17142_v23  ;;  %8368 = vmatprep.mubr.bf16.mxu1 %v17142_v23  ;;  %v209_v23 = vld [vmem:[%s23497_s1 + $0x518] sm:$0xff]  ;;  %v14529_v37 = vcombine.high %v208_v60, %v212_v61  ;;  %v224_v15 = vld [vmem:[%s23497_s1 + $0x590] sm:$0xff] }
 0x249   :  { %v14531_v36 = vcombine.high %v209_v23, %v213_v58  ;;  %v228_v16 = vld [vmem:[%s23497_s1 + $0x5b0] sm:$0xff] }
 0x24a   :  { %7902 = vmatpush1.bf16.msra.mxu0 %v14504_v4  ;;  %8390 = vmatpush1.bf16.msra.mxu1 %v14506_v7  ;;  %v220_v4 = vld [vmem:[%s23497_s1 + $0x570] sm:$0xff]  ;;  %v221_v7 = vld [vmem:[%s23497_s1 + $0x578] sm:$0xff] }
 0x24b   :  { %7903 = vmatprep.subr.bf16.mxu0 %v14513_v49  ;;  %8391 = vmatprep.subr.bf16.mxu1 %v14515_v18  ;;  %v14528_v49 = vcombine.low %v208_v60, %v212_v61  ;;  %v14530_v18 = vcombine.low %v209_v23, %v213_v58  ;;  %v14537_v22 = vcombine.high %v216_v14, %v220_v4  ;;  %v232_v61 = vld [vmem:[%s23497_s1 + $0x5d0] sm:$0xff]  ;;  %v237_v58 = vld [vmem:[%s23497_s1 + $0x5f8] sm:$0xff] }
 0x24c   :  { %v236_v23 = vld [vmem:[%s23497_s1 + $0x5f0] sm:$0xff] }
 0x24d   :  { %7881 = vmatmul.mubr.bf16.gmra.mrb[16].mxu0 %v17169_v35  ;;  %8369 = vmatmul.mubr.bf16.gmra.mrb[16].mxu1 %v17169_v35  ;;  %v217_v35 = vld [vmem:[%s23497_s1 + $0x558] sm:$0xff] }
 0x24e   :  { %7904 = vmatpush1.bf16.msra.mxu0 %v14512_v25  ;;  %8392 = vmatpush1.bf16.msra.mxu1 %v14514_v28  ;;  %v14539_v9 = vcombine.high %v217_v35, %v221_v7  ;;  %v229_v25 = vld [vmem:[%s23497_s1 + $0x5b8] sm:$0xff]  ;;  %v14536_v28 = vcombine.low %v216_v14, %v220_v4  ;;  %v240_v14 = vld [vmem:[%s23497_s1 + $0x610] sm:$0xff] }
 0x24f   :  { %7905 = vmatprep.subr.bf16.mxu0 %v14521_v2  ;;  %8393 = vmatprep.subr.bf16.mxu1 %v14523_v19  ;;  %v14538_v2 = vcombine.low %v217_v35, %v221_v7  ;;  %v14545_v19 = vcombine.high %v224_v15, %v228_v16  ;;  %v244_v4 = vld [vmem:[%s23497_s1 + $0x630] sm:$0xff]  ;;  %v245_v35 = vld [vmem:[%s23497_s1 + $0x638] sm:$0xff]  ;;  %v14552_v7 = vcombine.low %v232_v61, %v236_v23 }
 0x250   :  { %7890 = vmatprep.mubr.bf16.mxu0 %v17183_v44  ;;  %8378 = vmatprep.mubr.bf16.mxu1 %v17183_v44  ;;  %v225_v44 = vld [vmem:[%s23497_s1 + $0x598] sm:$0xff] }
 0x251   :  { %v14547_v60 = vcombine.high %v225_v44, %v229_v25 }
 0x252   :  { %7906 = vmatpush1.bf16.msra.mxu0 %v14520_v31  ;;  %8394 = vmatpush1.bf16.msra.mxu1 %v14522_v41  ;;  %v14544_v31 = vcombine.low %v224_v15, %v228_v16  ;;  %v14546_v41 = vcombine.low %v225_v44, %v229_v25  ;;  %v252_v15 = vld [vmem:[%s23497_s1 + $0x670] sm:$0xff]  ;;  %v249_v16 = vld [vmem:[%s23497_s1 + $0x658] sm:$0xff]  ;;  %v14560_v25 = vcombine.low %v240_v14, %v244_v4 }
 0x253   :  { %7907 = vmatprep.subr.bf16.mxu0 %v14529_v37  ;;  %8395 = vmatprep.subr.bf16.mxu1 %v14531_v36  ;;  %v14553_v37 = vcombine.high %v232_v61, %v236_v23  ;;  %v253_v44 = vld [vmem:[%s23497_s1 + $0x678] sm:$0xff]  ;;  %v260_v61 = vld [vmem:[%s23497_s1 + $0x6b0] sm:$0xff] }
 0x254   :  { %v257_v23 = vld [vmem:[%s23497_s1 + $0x698] sm:$0xff] }
 0x255   :  { %7891 = vmatmul.mubr.bf16.gmra.mrb[20].mxu0 %v17211_v57  ;;  %8379 = vmatmul.mubr.bf16.gmra.mrb[20].mxu1 %v17211_v57  ;;  %v233_v57 = vld [vmem:[%s23497_s1 + $0x5d8] sm:$0xff] }
 0x256   :  { %7908 = vmatpush1.bf16.msra.mxu0 %v14528_v49  ;;  %8396 = vmatpush1.bf16.msra.mxu1 %v14530_v18  ;;  %v14555_v36 = vcombine.high %v233_v57, %v237_v58  ;;  %v14554_v49 = vcombine.low %v233_v57, %v237_v58  ;;  %v14561_v18 = vcombine.high %v240_v14, %v244_v4  ;;  %v261_v57 = vld [vmem:[%s23497_s1 + $0x6b8] sm:$0xff]  ;;  %v268_v14 = vld [vmem:[%s23497_s1 + $0x6f0] sm:$0xff] }
 0x257   :  { %7909 = vmatprep.subr.bf16.mxu0 %v14537_v22  ;;  %8397 = vmatprep.subr.bf16.mxu1 %v14539_v9  ;;  %v248_v9 = vld [vmem:[%s23497_s1 + $0x650] sm:$0xff]  ;;  %v265_v4 = vld [vmem:[%s23497_s1 + $0x6d8] sm:$0xff] }
 0x258   :  { %7931 = vmatprep.mubr.bf16.mxu0 %v17227_v3  ;;  %8419 = vmatprep.mubr.bf16.mxu1 %v17227_v3  ;;  %v241_v3 = vld [vmem:[%s23497_s1 + $0x618] sm:$0xff]  ;;  %v14568_v58 = vcombine.low %v248_v9, %v252_v15 }
 0x259   :  { %v14563_v22 = vcombine.high %v241_v3, %v245_v35 }
 0x25a   :  { %7910 = vmatpush1.bf16.msra.mxu0 %v14536_v28  ;;  %8398 = vmatpush1.bf16.msra.mxu1 %v14538_v2  ;;  %v14562_v28 = vcombine.low %v241_v3, %v245_v35  ;;  %v14569_v2 = vcombine.high %v248_v9, %v252_v15  ;;  %v269_v3 = vld [vmem:[%s23497_s1 + $0x6f8] sm:$0xff]  ;;  %v276_v9 = vld [vmem:[%s23497_s1 + $0x730] sm:$0xff] }
 0x25b   :  { %7911 = vmatprep.subr.bf16.mxu0 %v14545_v19  ;;  %8399 = vmatprep.subr.bf16.mxu1 %v14547_v60  ;;  %v14571_v19 = vcombine.high %v249_v16, %v253_v44  ;;  %v256_v60 = vld [vmem:[%s23497_s1 + $0x690] sm:$0xff]  ;;  %v273_v15 = vld [vmem:[%s23497_s1 + $0x718] sm:$0xff] }
 0x25c   :  { %v14576_v35 = vcombine.low %v256_v60, %v260_v61 }
 0x25e   :  { %7912 = vmatpush1.bf16.msra.mxu0 %v14544_v31  ;;  %8400 = vmatpush1.bf16.msra.mxu1 %v14546_v41  ;;  %v14570_v31 = vcombine.low %v249_v16, %v253_v44  ;;  %v14577_v41 = vcombine.high %v256_v60, %v260_v61  ;;  %v277_v16 = vld [vmem:[%s23497_s1 + $0x738] sm:$0xff]  ;;  %v284_v60 = vld [vmem:[%s23497_s1 + $0x770] sm:$0xff] }
 0x25f   :  { %7913 = vmatprep.subr.bf16.mxu0 %v14553_v37  ;;  %8401 = vmatprep.subr.bf16.mxu1 %v14555_v36  ;;  %v14579_v37 = vcombine.high %v257_v23, %v261_v57  ;;  %v264_v36 = vld [vmem:[%s23497_s1 + $0x6d0] sm:$0xff]  ;;  %v281_v61 = vld [vmem:[%s23497_s1 + $0x758] sm:$0xff] }
 0x260   :  { %v14584_v44 = vcombine.low %v264_v36, %v268_v14 }
 0x262   :  { %7914 = vmatpush1.bf16.msra.mxu0 %v14552_v7  ;;  %8402 = vmatpush1.bf16.msra.mxu1 %v14554_v49  ;;  %v14578_v7 = vcombine.low %v257_v23, %v261_v57  ;;  %v14585_v49 = vcombine.high %v264_v36, %v268_v14  ;;  %v285_v23 = vld [vmem:[%s23497_s1 + $0x778] sm:$0xff]  ;;  %v292_v36 = vld [vmem:[%s23497_s1 + $0x7b0] sm:$0xff] }
 0x263   :  { %7915 = vmatprep.subr.bf16.mxu0 %v14561_v18  ;;  %8403 = vmatprep.subr.bf16.mxu1 %v14563_v22  ;;  %v14587_v18 = vcombine.high %v265_v4, %v269_v3  ;;  %v272_v22 = vld [vmem:[%s23497_s1 + $0x710] sm:$0xff]  ;;  %v289_v14 = vld [vmem:[%s23497_s1 + $0x798] sm:$0xff] }
 0x264   :  { %v14592_v57 = vcombine.low %v272_v22, %v276_v9 }
 0x266   :  { %7916 = vmatpush1.bf16.msra.mxu0 %v14560_v25  ;;  %8404 = vmatpush1.bf16.msra.mxu1 %v14562_v28  ;;  %v14586_v25 = vcombine.low %v265_v4, %v269_v3  ;;  %v14593_v28 = vcombine.high %v272_v22, %v276_v9  ;;  %v293_v4 = vld [vmem:[%s23497_s1 + $0x7b8] sm:$0xff]  ;;  %v300_v22 = vld [vmem:[%s23497_s1 + $0x7f0] sm:$0xff] }
 0x267   :  { %7917 = vmatprep.subr.bf16.mxu0 %v14569_v2  ;;  %8405 = vmatprep.subr.bf16.mxu1 %v14571_v19  ;;  %v14595_v2 = vcombine.high %v273_v15, %v277_v16  ;;  %v280_v19 = vld [vmem:[%s23497_s1 + $0x750] sm:$0xff]  ;;  %v297_v9 = vld [vmem:[%s23497_s1 + $0x7d8] sm:$0xff] }
 0x268   :  { %v14600_v3 = vcombine.low %v280_v19, %v284_v60 }
 0x26a   :  { %7918 = vmatpush1.bf16.msra.mxu0 %v14568_v58  ;;  %8406 = vmatpush1.bf16.msra.mxu1 %v14570_v31  ;;  %v14594_v58 = vcombine.low %v273_v15, %v277_v16  ;;  %v14601_v31 = vcombine.high %v280_v19, %v284_v60  ;;  %v301_v15 = vld [vmem:[%s23497_s1 + $0x7f8] sm:$0xff]  ;;  %v308_v19 = vld [vmem:[%s23497_s1 + $0x830] sm:$0xff] }
 0x26b   :  { %7919 = vmatprep.subr.bf16.mxu0 %v14577_v41  ;;  %8407 = vmatprep.subr.bf16.mxu1 %v14579_v37  ;;  %v14603_v41 = vcombine.high %v281_v61, %v285_v23  ;;  %v288_v37 = vld [vmem:[%s23497_s1 + $0x790] sm:$0xff]  ;;  %v305_v60 = vld [vmem:[%s23497_s1 + $0x818] sm:$0xff] }
 0x26c   :  { %v14608_v16 = vcombine.low %v288_v37, %v292_v36 }
 0x26e   :  { %7920 = vmatpush1.bf16.msra.mxu0 %v14576_v35  ;;  %8408 = vmatpush1.bf16.msra.mxu1 %v14578_v7  ;;  %v14602_v35 = vcombine.low %v281_v61, %v285_v23  ;;  %v14609_v7 = vcombine.high %v288_v37, %v292_v36  ;;  %v309_v61 = vld [vmem:[%s23497_s1 + $0x838] sm:$0xff]  ;;  %v316_v37 = vld [vmem:[%s23497_s1 + $0x870] sm:$0xff] }
 0x26f   :  { %7921 = vmatprep.subr.bf16.mxu0 %v14585_v49  ;;  %8409 = vmatprep.subr.bf16.mxu1 %v14587_v18  ;;  %v14611_v49 = vcombine.high %v289_v14, %v293_v4  ;;  %v296_v18 = vld [vmem:[%s23497_s1 + $0x7d0] sm:$0xff]  ;;  %v313_v36 = vld [vmem:[%s23497_s1 + $0x858] sm:$0xff] }
 0x270   :  { %v14616_v23 = vcombine.low %v296_v18, %v300_v22 }
 0x272   :  { %7922 = vmatpush1.bf16.msra.mxu0 %v14584_v44  ;;  %8410 = vmatpush1.bf16.msra.mxu1 %v14586_v25  ;;  %v14610_v44 = vcombine.low %v289_v14, %v293_v4  ;;  %v14617_v25 = vcombine.high %v296_v18, %v300_v22  ;;  %v317_v14 = vld [vmem:[%s23497_s1 + $0x878] sm:$0xff]  ;;  %v324_v18 = vld [vmem:[%s23497_s1 + $0x8b0] sm:$0xff] }
 0x273   :  { %7923 = vmatprep.subr.bf16.mxu0 %v14593_v28  ;;  %8411 = vmatprep.subr.bf16.mxu1 %v14595_v2  ;;  %v14619_v28 = vcombine.high %v297_v9, %v301_v15  ;;  %v304_v2 = vld [vmem:[%s23497_s1 + $0x810] sm:$0xff]  ;;  %v321_v22 = vld [vmem:[%s23497_s1 + $0x898] sm:$0xff] }
 0x274   :  { %v14624_v4 = vcombine.low %v304_v2, %v308_v19 }
 0x276   :  { %7924 = vmatpush1.bf16.msra.mxu0 %v14592_v57  ;;  %8412 = vmatpush1.bf16.msra.mxu1 %v14594_v58  ;;  %v14618_v57 = vcombine.low %v297_v9, %v301_v15  ;;  %v14625_v58 = vcombine.high %v304_v2, %v308_v19  ;;  %v325_v9 = vld [vmem:[%s23497_s1 + $0x8b8] sm:$0xff]  ;;  %v332_v2 = vld [vmem:[%s23497_s1 + $0x8f0] sm:$0xff] }
 0x277   :  { %7925 = vmatprep.subr.bf16.mxu0 %v14601_v31  ;;  %8413 = vmatprep.subr.bf16.mxu1 %v14603_v41  ;;  %v14627_v31 = vcombine.high %v305_v60, %v309_v61  ;;  %v312_v41 = vld [vmem:[%s23497_s1 + $0x850] sm:$0xff]  ;;  %v333_v19 = vld [vmem:[%s23497_s1 + $0x8f8] sm:$0xff] }
 0x278   :  { %v14632_v15 = vcombine.low %v312_v41, %v316_v37 }
 0x27a   :  { %7926 = vmatpush1.bf16.msra.mxu0 %v14600_v3  ;;  %8414 = vmatpush1.bf16.msra.mxu1 %v14602_v35  ;;  %v14626_v3 = vcombine.low %v305_v60, %v309_v61  ;;  %v14633_v35 = vcombine.high %v312_v41, %v316_v37  ;;  %v14642_v61 = vcombine.low %v321_v22, %v325_v9  ;;  %v341_v41 = vld [vmem:[%s23497_s1 + $0x938] sm:$0xff] }
 0x27b   :  { %7927 = vmatprep.subr.bf16.mxu0 %v14609_v7  ;;  %8415 = vmatprep.subr.bf16.mxu1 %v14611_v49  ;;  %v14635_v7 = vcombine.high %v313_v36, %v317_v14  ;;  %v320_v49 = vld [vmem:[%s23497_s1 + $0x890] sm:$0xff] }
 0x27c   :  { %v14640_v60 = vcombine.low %v320_v49, %v324_v18 }
 0x27e   :  { %7928 = vmatpush1.bf16.msra.mxu0 %v14608_v16  ;;  %8416 = vmatpush1.bf16.msra.mxu1 %v14610_v44  ;;  %v14634_v16 = vcombine.low %v313_v36, %v317_v14  ;;  %v14641_v44 = vcombine.high %v320_v49, %v324_v18 }
 0x27f   :  { %7929 = vmatprep.subr.bf16.mxu0 %v14617_v25  ;;  %8417 = vmatprep.subr.bf16.mxu1 %v14619_v28  ;;  %v14643_v25 = vcombine.high %v321_v22, %v325_v9  ;;  %v328_v28 = vld [vmem:[%s23497_s1 + $0x8d0] sm:$0xff] }
 0x280   :  { %v14648_v37 = vcombine.low %v328_v28, %v332_v2 }
 0x282   :  { %7930 = vmatpush1.bf16.msra.mxu0 %v14616_v23  ;;  %8418 = vmatpush1.bf16.msra.mxu1 %v14618_v57  ;;  %v14649_v23 = vcombine.high %v328_v28, %v332_v2 }
 0x283   :  { %7960 = vmatprep.subr.bf16.mxu0 %v14625_v58  ;;  %8448 = vmatprep.subr.bf16.mxu1 %v14627_v31  ;;  %v336_v58 = vld [vmem:[%s23497_s1 + $0x910] sm:$0xff] }
 0x284   :  { %v340_v31 = vld [vmem:[%s23497_s1 + $0x930] sm:$0xff] }
 0x285   :  { %7932 = vmatmul.mubr.bf16.vlgmr.msra.gmra.mrb[12].mxu0 %v17373_v40  ;;  %8420 = vmatmul.mubr.bf16.vlgmr.msra.gmra.mrb[12].mxu1 %v17373_v40  ;;  %v329_v40 = vld [vmem:[%s23497_s1 + $0x8d8] sm:$0xff]  ;;  %v14657_v14 = vcombine.high %v336_v58, %v340_v31  ;;  %v14656_v49 = vcombine.low %v336_v58, %v340_v31 }
 0x286   :  { %7961 = vmatpush1.bf16.msra.mxu0 %v14624_v4  ;;  %8449 = vmatpush1.bf16.msra.mxu1 %v14626_v3  ;;  %v14651_v57 = vcombine.high %v329_v40, %v333_v19  ;;  %v14650_v36 = vcombine.low %v329_v40, %v333_v19  ;;  %v344_v3 = vld [vmem:[%s23497_s1 + $0x950] sm:$0xff] }
 0x287   :  { %7962 = vmatprep.subr.bf16.mxu0 %v14633_v35  ;;  %8450 = vmatprep.subr.bf16.mxu1 %v14635_v7  ;;  %v348_v35 = vld [vmem:[%s23497_s1 + $0x970] sm:$0xff]  ;;  %v349_v7 = vld [vmem:[%s23497_s1 + $0x978] sm:$0xff] }
 0x288   :  { %7941 = vmatprep.mubr.bf16.mxu0 %v17387_v48  ;;  %8429 = vmatprep.mubr.bf16.mxu1 %v17387_v48  ;;  %v337_v48 = vld [vmem:[%s23497_s1 + $0x918] sm:$0xff]  ;;  %v14665_v22 = vcombine.high %v344_v3, %v348_v35  ;;  %v360_v19 = vld [vmem:[%s23497_s1 + $0x9d0] sm:$0xff] }
 0x289   :  { %v14659_v4 = vcombine.high %v337_v48, %v341_v41  ;;  %v14658_v18 = vcombine.low %v337_v48, %v341_v41  ;;  %v368_v48 = vld [vmem:[%s23497_s1 + $0xa10] sm:$0xff] }
 0x28a   :  { %7963 = vmatpush1.bf16.msra.mxu0 %v14632_v15  ;;  %8451 = vmatpush1.bf16.msra.mxu1 %v14634_v16  ;;  %v352_v15 = vld [vmem:[%s23497_s1 + $0x990] sm:$0xff] }
 0x28b   :  { %7964 = vmatprep.subr.bf16.mxu0 %v14641_v44  ;;  %8452 = vmatprep.subr.bf16.mxu1 %v14643_v25  ;;  %v356_v16 = vld [vmem:[%s23497_s1 + $0x9b0] sm:$0xff]  ;;  %v357_v44 = vld [vmem:[%s23497_s1 + $0x9b8] sm:$0xff]  ;;  %v14664_v25 = vcombine.low %v344_v3, %v348_v35 }
 0x28c   :  { %v14673_v2 = vcombine.high %v352_v15, %v356_v16  ;;  %v372_v41 = vld [vmem:[%s23497_s1 + $0xa30] sm:$0xff] }
 0x28d   :  { %7942 = vmatmul.mubr.bf16.gmra.mrb[16].mxu0 %v17408_v0  ;;  %8430 = vmatmul.mubr.bf16.gmra.mrb[16].mxu1 %v17408_v0  ;;  %v345_v0 = vld [vmem:[%s23497_s1 + $0x958] sm:$0xff]  ;;  %v376_v35 = vld [vmem:[%s23497_s1 + $0xa50] sm:$0xff] }
 0x28e   :  { %7965 = vmatpush1.bf16.msra.mxu0 %v14640_v60  ;;  %8453 = vmatpush1.bf16.msra.mxu1 %v14642_v61  ;;  %v14667_v9 = vcombine.high %v345_v0, %v349_v7  ;;  %v14666_v28 = vcombine.low %v345_v0, %v349_v7  ;;  %v364_v60 = vld [vmem:[%s23497_s1 + $0x9f0] sm:$0xff]  ;;  %v365_v61 = vld [vmem:[%s23497_s1 + $0x9f8] sm:$0xff] }
 0x28f   :  { %7966 = vmatprep.subr.bf16.mxu0 %v14649_v23  ;;  %8454 = vmatprep.subr.bf16.mxu1 %v14651_v57  ;;  %v14672_v23 = vcombine.low %v352_v15, %v356_v16  ;;  %v14681_v58 = vcombine.high %v360_v19, %v364_v60  ;;  %v380_v0 = vld [vmem:[%s23497_s1 + $0xa70] sm:$0xff]  ;;  %v377_v7 = vld [vmem:[%s23497_s1 + $0xa58] sm:$0xff] }
 0x290   :  { %7951 = vmatprep.mubr.bf16.mxu0 %v17422_v10  ;;  %8439 = vmatprep.mubr.bf16.mxu1 %v17422_v10  ;;  %v353_v10 = vld [vmem:[%s23497_s1 + $0x998] sm:$0xff]  ;;  %v384_v16 = vld [vmem:[%s23497_s1 + $0xa90] sm:$0xff] }
 0x291   :  { %v14675_v40 = vcombine.high %v353_v10, %v357_v44  ;;  %v14674_v57 = vcombine.low %v353_v10, %v357_v44  ;;  %v388_v10 = vld [vmem:[%s23497_s1 + $0xab0] sm:$0xff]  ;;  %v385_v44 = vld [vmem:[%s23497_s1 + $0xa98] sm:$0xff] }
 0x292   :  { %7967 = vmatpush1.bf16.msra.mxu0 %v14648_v37  ;;  %8455 = vmatpush1.bf16.msra.mxu1 %v14650_v36  ;;  %v373_v37 = vld [vmem:[%s23497_s1 + $0xa38] sm:$0xff]  ;;  %v14680_v36 = vcombine.low %v360_v19, %v364_v60  ;;  %v392_v60 = vld [vmem:[%s23497_s1 + $0xad0] sm:$0xff] }
 0x293   :  { %7968 = vmatprep.subr.bf16.mxu0 %v14657_v14  ;;  %8456 = vmatprep.subr.bf16.mxu1 %v14659_v4  ;;  %v14689_v4 = vcombine.high %v368_v48, %v372_v41 }
 0x295   :  { %7952 = vmatmul.mubr.bf16.gmra.mrb[20].mxu0 %v17450_v53  ;;  %8440 = vmatmul.mubr.bf16.gmra.mrb[20].mxu1 %v17450_v53  ;;  %v361_v53 = vld [vmem:[%s23497_s1 + $0x9d8] sm:$0xff] }
 0x296   :  { %7969 = vmatpush1.bf16.msra.mxu0 %v14656_v49  ;;  %8457 = vmatpush1.bf16.msra.mxu1 %v14658_v18  ;;  %v14683_v31 = vcombine.high %v361_v53, %v365_v61  ;;  %v14682_v14 = vcombine.low %v361_v53, %v365_v61  ;;  %v381_v49 = vld [vmem:[%s23497_s1 + $0xa78] sm:$0xff]  ;;  %v14688_v18 = vcombine.low %v368_v48, %v372_v41  ;;  %v396_v53 = vld [vmem:[%s23497_s1 + $0xaf0] sm:$0xff] }
 0x297   :  { %7970 = vmatprep.subr.bf16.mxu0 %v14665_v22  ;;  %8458 = vmatprep.subr.bf16.mxu1 %v14667_v9  ;;  %v14697_v9 = vcombine.high %v376_v35, %v380_v0  ;;  %v14699_v15 = vcombine.high %v377_v7, %v381_v49  ;;  %v393_v61 = vld [vmem:[%s23497_s1 + $0xad8] sm:$0xff]  ;;  %v400_v41 = vld [vmem:[%s23497_s1 + $0xb10] sm:$0xff] }
 0x298   :  { %7992 = vmatprep.mubr.bf16.mxu0 %v17466_v30  ;;  %8480 = vmatprep.mubr.bf16.mxu1 %v17466_v30  ;;  %v369_v30 = vld [vmem:[%s23497_s1 + $0xa18] sm:$0xff] }
 0x299   :  { %v14691_v3 = vcombine.high %v369_v30, %v373_v37  ;;  %v14690_v22 = vcombine.low %v369_v30, %v373_v37  ;;  %v404_v30 = vld [vmem:[%s23497_s1 + $0xb30] sm:$0xff]  ;;  %v401_v37 = vld [vmem:[%s23497_s1 + $0xb18] sm:$0xff] }
 0x29a   :  { %7971 = vmatpush1.bf16.msra.mxu0 %v14664_v25  ;;  %8459 = vmatpush1.bf16.msra.mxu1 %v14666_v28  ;;  %v389_v25 = vld [vmem:[%s23497_s1 + $0xab8] sm:$0xff]  ;;  %v14696_v28 = vcombine.low %v376_v35, %v380_v0  ;;  %v408_v0 = vld [vmem:[%s23497_s1 + $0xb50] sm:$0xff] }
 0x29b   :  { %7972 = vmatprep.subr.bf16.mxu0 %v14673_v2  ;;  %8460 = vmatprep.subr.bf16.mxu1 %v14675_v40  ;;  %v14698_v2 = vcombine.low %v377_v7, %v381_v49  ;;  %v14705_v40 = vcombine.high %v384_v16, %v388_v10  ;;  %v14707_v19 = vcombine.high %v385_v44, %v389_v25  ;;  %v412_v7 = vld [vmem:[%s23497_s1 + $0xb70] sm:$0xff]  ;;  %v409_v49 = vld [vmem:[%s23497_s1 + $0xb58] sm:$0xff] }
 0x29e   :  { %7973 = vmatpush1.bf16.msra.mxu0 %v14672_v23  ;;  %8461 = vmatpush1.bf16.msra.mxu1 %v14674_v57  ;;  %v397_v23 = vld [vmem:[%s23497_s1 + $0xaf8] sm:$0xff]  ;;  %v14704_v57 = vcombine.low %v384_v16, %v388_v10  ;;  %v416_v10 = vld [vmem:[%s23497_s1 + $0xb90] sm:$0xff] }
 0x29f   :  { %7974 = vmatprep.subr.bf16.mxu0 %v14681_v58  ;;  %8462 = vmatprep.subr.bf16.mxu1 %v14683_v31  ;;  %v14706_v58 = vcombine.low %v385_v44, %v389_v25  ;;  %v14713_v31 = vcombine.high %v392_v60, %v396_v53  ;;  %v14715_v48 = vcombine.high %v393_v61, %v397_v23  ;;  %v420_v44 = vld [vmem:[%s23497_s1 + $0xbb0] sm:$0xff]  ;;  %v417_v25 = vld [vmem:[%s23497_s1 + $0xb98] sm:$0xff] }
 0x2a2   :  { %7975 = vmatpush1.bf16.msra.mxu0 %v14680_v36  ;;  %8463 = vmatpush1.bf16.msra.mxu1 %v14682_v14  ;;  %v405_v36 = vld [vmem:[%s23497_s1 + $0xb38] sm:$0xff]  ;;  %v14712_v14 = vcombine.low %v392_v60, %v396_v53  ;;  %v424_v53 = vld [vmem:[%s23497_s1 + $0xbd0] sm:$0xff] }
 0x2a3   :  { %7976 = vmatprep.subr.bf16.mxu0 %v14689_v4  ;;  %8464 = vmatprep.subr.bf16.mxu1 %v14691_v3  ;;  %v14714_v4 = vcombine.low %v393_v61, %v397_v23  ;;  %v14721_v3 = vcombine.high %v400_v41, %v404_v30  ;;  %v14723_v35 = vcombine.high %v401_v37, %v405_v36  ;;  %v428_v61 = vld [vmem:[%s23497_s1 + $0xbf0] sm:$0xff]  ;;  %v425_v23 = vld [vmem:[%s23497_s1 + $0xbd8] sm:$0xff] }
 0x2a6   :  { %7977 = vmatpush1.bf16.msra.mxu0 %v14688_v18  ;;  %8465 = vmatpush1.bf16.msra.mxu1 %v14690_v22  ;;  %v413_v18 = vld [vmem:[%s23497_s1 + $0xb78] sm:$0xff]  ;;  %v14720_v22 = vcombine.low %v400_v41, %v404_v30  ;;  %v432_v30 = vld [vmem:[%s23497_s1 + $0xc10] sm:$0xff] }
 0x2a7   :  { %7978 = vmatprep.subr.bf16.mxu0 %v14697_v9  ;;  %8466 = vmatprep.subr.bf16.mxu1 %v14699_v15  ;;  %v14722_v9 = vcombine.low %v401_v37, %v405_v36  ;;  %v14729_v15 = vcombine.high %v408_v0, %v412_v7  ;;  %v14731_v16 = vcombine.high %v409_v49, %v413_v18  ;;  %v436_v37 = vld [vmem:[%s23497_s1 + $0xc30] sm:$0xff]  ;;  %v433_v36 = vld [vmem:[%s23497_s1 + $0xc18] sm:$0xff] }
 0x2aa   :  { %7979 = vmatpush1.bf16.msra.mxu0 %v14696_v28  ;;  %8467 = vmatpush1.bf16.msra.mxu1 %v14698_v2  ;;  %v421_v28 = vld [vmem:[%s23497_s1 + $0xbb8] sm:$0xff]  ;;  %v14728_v2 = vcombine.low %v408_v0, %v412_v7  ;;  %v440_v7 = vld [vmem:[%s23497_s1 + $0xc50] sm:$0xff] }
 0x2ab   :  { %7980 = vmatprep.subr.bf16.mxu0 %v14705_v40  ;;  %8468 = vmatprep.subr.bf16.mxu1 %v14707_v19  ;;  %v14730_v40 = vcombine.low %v409_v49, %v413_v18  ;;  %v14737_v19 = vcombine.high %v416_v10, %v420_v44  ;;  %v14739_v60 = vcombine.high %v417_v25, %v421_v28  ;;  %v444_v49 = vld [vmem:[%s23497_s1 + $0xc70] sm:$0xff]  ;;  %v441_v18 = vld [vmem:[%s23497_s1 + $0xc58] sm:$0xff] }
 0x2ae   :  { %7981 = vmatpush1.bf16.msra.mxu0 %v14704_v57  ;;  %8469 = vmatpush1.bf16.msra.mxu1 %v14706_v58  ;;  %v429_v57 = vld [vmem:[%s23497_s1 + $0xbf8] sm:$0xff]  ;;  %v14736_v58 = vcombine.low %v416_v10, %v420_v44  ;;  %v448_v44 = vld [vmem:[%s23497_s1 + $0xc90] sm:$0xff] }
 0x2af   :  { %7982 = vmatprep.subr.bf16.mxu0 %v14713_v31  ;;  %8470 = vmatprep.subr.bf16.mxu1 %v14715_v48  ;;  %v14738_v31 = vcombine.low %v417_v25, %v421_v28  ;;  %v14745_v48 = vcombine.high %v424_v53, %v428_v61  ;;  %v14747_v41 = vcombine.high %v425_v23, %v429_v57  ;;  %v452_v25 = vld [vmem:[%s23497_s1 + $0xcb0] sm:$0xff]  ;;  %v449_v28 = vld [vmem:[%s23497_s1 + $0xc98] sm:$0xff] }
 0x2b2   :  { %7983 = vmatpush1.bf16.msra.mxu0 %v14712_v14  ;;  %8471 = vmatpush1.bf16.msra.mxu1 %v14714_v4  ;;  %v437_v14 = vld [vmem:[%s23497_s1 + $0xc38] sm:$0xff]  ;;  %v14744_v4 = vcombine.low %v424_v53, %v428_v61  ;;  %v456_v61 = vld [vmem:[%s23497_s1 + $0xcd0] sm:$0xff] }
 0x2b3   :  { %7984 = vmatprep.subr.bf16.mxu0 %v14721_v3  ;;  %8472 = vmatprep.subr.bf16.mxu1 %v14723_v35  ;;  %v14746_v3 = vcombine.low %v425_v23, %v429_v57  ;;  %v14753_v35 = vcombine.high %v432_v30, %v436_v37  ;;  %v14755_v0 = vcombine.high %v433_v36, %v437_v14  ;;  %v460_v23 = vld [vmem:[%s23497_s1 + $0xcf0] sm:$0xff]  ;;  %v461_v57 = vld [vmem:[%s23497_s1 + $0xcf8] sm:$0xff] }
 0x2b6   :  { %7985 = vmatpush1.bf16.msra.mxu0 %v14720_v22  ;;  %8473 = vmatpush1.bf16.msra.mxu1 %v14722_v9  ;;  %v445_v22 = vld [vmem:[%s23497_s1 + $0xc78] sm:$0xff]  ;;  %v14752_v9 = vcombine.low %v432_v30, %v436_v37  ;;  %v464_v30 = vld [vmem:[%s23497_s1 + $0xd10] sm:$0xff] }
 0x2b7   :  { %7986 = vmatprep.subr.bf16.mxu0 %v14729_v15  ;;  %8474 = vmatprep.subr.bf16.mxu1 %v14731_v16  ;;  %v14754_v15 = vcombine.low %v433_v36, %v437_v14  ;;  %v14761_v16 = vcombine.high %v440_v7, %v444_v49  ;;  %v14763_v10 = vcombine.high %v441_v18, %v445_v22  ;;  %v468_v37 = vld [vmem:[%s23497_s1 + $0xd30] sm:$0xff]  ;;  %v469_v36 = vld [vmem:[%s23497_s1 + $0xd38] sm:$0xff] }
 0x2b8   :  { %v14776_v14 = vcombine.low %v456_v61, %v460_v23 }
 0x2ba   :  { %7987 = vmatpush1.bf16.msra.mxu0 %v14728_v2  ;;  %8475 = vmatpush1.bf16.msra.mxu1 %v14730_v40  ;;  %v453_v2 = vld [vmem:[%s23497_s1 + $0xcb8] sm:$0xff]  ;;  %v14760_v40 = vcombine.low %v440_v7, %v444_v49  ;;  %v476_v7 = vld [vmem:[%s23497_s1 + $0xd70] sm:$0xff] }
 0x2bb   :  { %7988 = vmatprep.subr.bf16.mxu0 %v14737_v19  ;;  %8476 = vmatprep.subr.bf16.mxu1 %v14739_v60  ;;  %v14762_v19 = vcombine.low %v441_v18, %v445_v22  ;;  %v14769_v60 = vcombine.high %v448_v44, %v452_v25  ;;  %v14771_v53 = vcombine.high %v449_v28, %v453_v2  ;;  %v477_v49 = vld [vmem:[%s23497_s1 + $0xd78] sm:$0xff] }
 0x2bc   :  { %v14784_v18 = vcombine.low %v464_v30, %v468_v37 }
 0x2be   :  { %7989 = vmatpush1.bf16.msra.mxu0 %v14736_v58  ;;  %8477 = vmatpush1.bf16.msra.mxu1 %v14738_v31  ;;  %v14768_v58 = vcombine.low %v448_v44, %v452_v25  ;;  %v14770_v31 = vcombine.low %v449_v28, %v453_v2  ;;  %v485_v44 = vld [vmem:[%s23497_s1 + $0xdb8] sm:$0xff] }
 0x2bf   :  { %7990 = vmatprep.subr.bf16.mxu0 %v14745_v48  ;;  %8478 = vmatprep.subr.bf16.mxu1 %v14747_v41  ;;  %v14777_v48 = vcombine.high %v456_v61, %v460_v23  ;;  %v489_v23 = vld [vmem:[%s23497_s1 + $0xdd8] sm:$0xff] }
 0x2c2   :  { %7991 = vmatpush1.bf16.msra.mxu0 %v14744_v4  ;;  %8479 = vmatpush1.bf16.msra.mxu1 %v14746_v3  ;;  %v14785_v3 = vcombine.high %v464_v30, %v468_v37 }
 0x2c3   :  { %8021 = vmatprep.subr.bf16.mxu0 %v14753_v35  ;;  %8509 = vmatprep.subr.bf16.mxu1 %v14755_v0  ;;  %v472_v0 = vld [vmem:[%s23497_s1 + $0xd50] sm:$0xff] }
 0x2c4   :  { %v14792_v25 = vcombine.low %v472_v0, %v476_v7 }
 0x2c5   :  { %7993 = vmatmul.mubr.bf16.vlgmr.msra.gmra.mrb[12].mxu0 %v17612_v54  ;;  %8481 = vmatmul.mubr.bf16.vlgmr.msra.gmra.mrb[12].mxu1 %v17612_v54  ;;  %v457_v54 = vld [vmem:[%s23497_s1 + $0xcd8] sm:$0xff] }
 0x2c6   :  { %8022 = vmatpush1.bf16.msra.mxu0 %v14752_v9  ;;  %8510 = vmatpush1.bf16.msra.mxu1 %v14754_v15  ;;  %v14779_v41 = vcombine.high %v457_v54, %v461_v57  ;;  %v14778_v4 = vcombine.low %v457_v54, %v461_v57  ;;  %v14793_v9 = vcombine.high %v472_v0, %v476_v7  ;;  %v493_v54 = vld [vmem:[%s23497_s1 + $0xdf8] sm:$0xff] }
 0x2c7   :  { %8023 = vmatprep.subr.bf16.mxu0 %v14761_v16  ;;  %8511 = vmatprep.subr.bf16.mxu1 %v14763_v10  ;;  %v480_v16 = vld [vmem:[%s23497_s1 + $0xd90] sm:$0xff]  ;;  %v14810_v0 = vcombine.low %v489_v23, %v493_v54 }
 0x2c8   :  { %8002 = vmatprep.mubr.bf16.mxu0 %v17626_v29  ;;  %8490 = vmatprep.mubr.bf16.mxu1 %v17626_v29  ;;  %v465_v29 = vld [vmem:[%s23497_s1 + $0xd18] sm:$0xff]  ;;  %v484_v10 = vld [vmem:[%s23497_s1 + $0xdb0] sm:$0xff] }
 0x2c9   :  { %v14787_v35 = vcombine.high %v465_v29, %v469_v36  ;;  %v14786_v22 = vcombine.low %v465_v29, %v469_v36  ;;  %v14801_v2 = vcombine.high %v480_v16, %v484_v10  ;;  %v14811_v36 = vcombine.high %v489_v23, %v493_v54  ;;  %v512_v23 = vld [vmem:[%s23497_s1 + $0xe90] sm:$0xff] }
 0x2ca   :  { %8024 = vmatpush1.bf16.msra.mxu0 %v14760_v40  ;;  %8512 = vmatpush1.bf16.msra.mxu1 %v14762_v19  ;;  %v516_v54 = vld [vmem:[%s23497_s1 + $0xeb0] sm:$0xff] }
 0x2cb   :  { %8025 = vmatprep.subr.bf16.mxu0 %v14769_v60  ;;  %8513 = vmatprep.subr.bf16.mxu1 %v14771_v53  ;;  %v488_v60 = vld [vmem:[%s23497_s1 + $0xdd0] sm:$0xff] }
 0x2cc   :  { %v492_v53 = vld [vmem:[%s23497_s1 + $0xdf0] sm:$0xff] }
 0x2cd   :  { %8003 = vmatmul.mubr.bf16.gmra.mrb[16].mxu0 %v17647_v42  ;;  %8491 = vmatmul.mubr.bf16.gmra.mrb[16].mxu1 %v17647_v42  ;;  %v473_v42 = vld [vmem:[%s23497_s1 + $0xd58] sm:$0xff]  ;;  %v14809_v37 = vcombine.high %v488_v60, %v492_v53 }
 0x2ce   :  { %8026 = vmatpush1.bf16.msra.mxu0 %v14768_v58  ;;  %8514 = vmatpush1.bf16.msra.mxu1 %v14770_v31  ;;  %v14795_v15 = vcombine.high %v473_v42, %v477_v49  ;;  %v14794_v28 = vcombine.low %v473_v42, %v477_v49  ;;  %v14800_v31 = vcombine.low %v480_v16, %v484_v10 }
 0x2cf   :  { %8027 = vmatprep.subr.bf16.mxu0 %v14777_v48  ;;  %8515 = vmatprep.subr.bf16.mxu1 %v14779_v41 }
 0x2d0   :  { %8012 = vmatprep.mubr.bf16.mxu0 %v17661_v51  ;;  %8500 = vmatprep.mubr.bf16.mxu1 %v17661_v51  ;;  %v481_v51 = vld [vmem:[%s23497_s1 + $0xd98] sm:$0xff] }
 0x2d1   :  { %v14803_v19 = vcombine.high %v481_v51, %v485_v44  ;;  %v14802_v30 = vcombine.low %v481_v51, %v485_v44  ;;  %v505_v44 = vld [vmem:[%s23497_s1 + $0xe58] sm:$0xff] }
 0x2d2   :  { %8028 = vmatpush1.bf16.msra.mxu0 %v14776_v14  ;;  %8516 = vmatpush1.bf16.msra.mxu1 %v14778_v4  ;;  %v500_v14 = vld [vmem:[%s23497_s1 + $0xe30] sm:$0xff]  ;;  %v497_v4 = vld [vmem:[%s23497_s1 + $0xe18] sm:$0xff] }
 0x2d3   :  { %8029 = vmatprep.subr.bf16.mxu0 %v14785_v3  ;;  %8517 = vmatprep.subr.bf16.mxu1 %v14787_v35  ;;  %v501_v3 = vld [vmem:[%s23497_s1 + $0xe38] sm:$0xff]  ;;  %v14808_v35 = vcombine.low %v488_v60, %v492_v53 }
 0x2d4   :  { %v14819_v49 = vcombine.high %v497_v4, %v501_v3 }
 0x2d5   :  { %8013 = vmatmul.mubr.bf16.gmra.mrb[20].mxu0 %v17689_v6  ;;  %8501 = vmatmul.mubr.bf16.gmra.mrb[20].mxu1 %v17689_v6 }
 0x2d6   :  { %8030 = vmatpush1.bf16.msra.mxu0 %v14784_v18  ;;  %8518 = vmatpush1.bf16.msra.mxu1 %v14786_v22 }
 0x2d7   :  { %8031 = vmatprep.subr.bf16.mxu0 %v14793_v9  ;;  %8519 = vmatprep.subr.bf16.mxu1 %v14795_v15  ;;  %v504_v9 = vld [vmem:[%s23497_s1 + $0xe50] sm:$0xff] }
 0x2d8   :  { %v19502_v40 = vpop.f32.mrb[0].mxu0  ;;  %8053 = vmatprep.mubr.bf16.mxu0 %v17705_v17  ;;  %v19511_v61 = vpop.f32.mrb[0].mxu1  ;;  %8541 = vmatprep.mubr.bf16.mxu1 %v17705_v17  ;;  %v496_v17 = vld [vmem:[%s23497_s1 + $0xe10] sm:$0xff] }
 0x2d9   :  { %v19513_v6 = vpop.f32.mrb[1].mxu0  ;;  %v19522_v57 = vpop.f32.mrb[1].mxu1  ;;  %v14817_v7 = vcombine.high %v496_v17, %v500_v14  ;;  %v508_v15 = vld [vmem:[%s23497_s1 + $0xe70] sm:$0xff]  ;;  %v14816_v51 = vcombine.low %v496_v17, %v500_v14  ;;  %v14833_v14 = vcombine.high %v512_v23, %v516_v54 }
 0x2da   :  { %v19524_v58 = vpop.f32.mrb[2].mxu0  ;;  %8032 = vmatpush1.bf16.msra.mxu0 %v14792_v25  ;;  %v19526_v48 = vpop.f32.mrb[2].mxu1  ;;  %8520 = vmatpush1.bf16.msra.mxu1 %v14794_v28  ;;  %v509_v25 = vld [vmem:[%s23497_s1 + $0xe78] sm:$0xff]  ;;  %v14825_v53 = vcombine.high %v504_v9, %v508_v15 }
 0x2db   :  { %v19528_v41 = vpop.f32.mrb[3].mxu0  ;;  %8033 = vmatprep.subr.bf16.mxu0 %v14801_v2  ;;  %v19530_v29 = vpop.f32.mrb[3].mxu1  ;;  %8521 = vmatprep.subr.bf16.mxu1 %v14803_v19  ;;  %v14818_v19 = vcombine.low %v497_v4, %v501_v3  ;;  %v14826_v17 = vcombine.low %v505_v44, %v509_v25 }
 0x2de   :  { %8034 = vmatpush1.bf16.msra.mxu0 %v14800_v31  ;;  %8522 = vmatpush1.bf16.msra.mxu1 %v14802_v30  ;;  %v14827_v31 = vcombine.high %v505_v44, %v509_v25  ;;  %v513_v30 = vld [vmem:[%s23497_s1 + $0xe98] sm:$0xff]  ;;  %v14832_v25 = vcombine.low %v512_v23, %v516_v54 }
 0x2df   :  { %8035 = vmatprep.subr.bf16.mxu0 %v14809_v37  ;;  %8523 = vmatprep.subr.bf16.mxu1 %v14811_v36  ;;  %v517_v37 = vld [vmem:[%s23497_s1 + $0xeb8] sm:$0xff]  ;;  %v14824_v36 = vcombine.low %v504_v9, %v508_v15 }
 0x2e0   :  { %v19544_v42 = vpop.f32.mrb[4].mxu0  ;;  %v19546_v18 = vpop.f32.mrb[4].mxu1  ;;  %v14835_v3 = vcombine.high %v513_v30, %v517_v37  ;;  %v521_v9 = vld [vmem:[%s23497_s1 + $0xed8] sm:$0xff]  ;;  %v14834_v39 = vcombine.low %v513_v30, %v517_v37 }
 0x2e1   :  { %v19548_v22 = vpop.f32.mrb[5].mxu0  ;;  %v19556_v16 = vpop.f32.mrb[5].mxu1  ;;  %v525_v15 = vld [vmem:[%s23497_s1 + $0xef8] sm:$0xff] }
 0x2e2   :  { %v19558_v10 = vpop.f32.mrb[6].mxu0  ;;  %8036 = vmatpush1.bf16.msra.mxu0 %v14808_v35  ;;  %v19566_v28 = vpop.f32.mrb[6].mxu1  ;;  %8524 = vmatpush1.bf16.msra.mxu1 %v14810_v0  ;;  %v520_v35 = vld [vmem:[%s23497_s1 + $0xed0] sm:$0xff]  ;;  %v14843_v52 = vcombine.high %v521_v9, %v525_v15  ;;  %v529_v23 = vld [vmem:[%s23497_s1 + $0xf18] sm:$0xff]  ;;  %v14842_v37 = vcombine.low %v521_v9, %v525_v15 }
 0x2e3   :  { %v19568_v2 = vpop.f32.mrb[7].mxu0  ;;  %8037 = vmatprep.subr.bf16.mxu0 %v14817_v7  ;;  %v19570_v60 = vpop.f32.mrb[7].mxu1  ;;  %8525 = vmatprep.subr.bf16.mxu1 %v14819_v49  ;;  %v524_v0 = vld [vmem:[%s23497_s1 + $0xef0] sm:$0xff]  ;;  %v533_v54 = vld [vmem:[%s23497_s1 + $0xf38] sm:$0xff] }
 0x2e4   :  { %v14841_v55 = vcombine.high %v520_v35, %v524_v0  ;;  %v14840_v30 = vcombine.low %v520_v35, %v524_v0  ;;  %v544_v9 = vld [vmem:[%s23497_s1 + $0xf90] sm:$0xff] }
 0x2e5   :  { %v548_v15 = vld [vmem:[%s23497_s1 + $0xfb0] sm:$0xff] }
 0x2e6   :  { %8038 = vmatpush1.bf16.msra.mxu0 %v14816_v51  ;;  %8526 = vmatpush1.bf16.msra.mxu1 %v14818_v19 }
 0x2e7   :  { %8039 = vmatprep.subr.bf16.mxu0 %v14825_v53  ;;  %8527 = vmatprep.subr.bf16.mxu1 %v14827_v31 }
 0x2e8   :  { %v19584_v4 = vpop.f32.mrb[8].mxu0  ;;  %v19592_v7 = vpop.f32.mrb[8].mxu1 }
 0x2e9   :  { %23632 = vst [vmem:[#allocation11_spill] sm:$0xff] %v19592_v7  ;;  %v19594_v49 = vpop.f32.mrb[9].mxu0  ;;  %v19602_v51 = vpop.f32.mrb[9].mxu1  ;;  %v532_v7 = vld [vmem:[%s23497_s1 + $0xf30] sm:$0xff] }
 0x2ea   :  { %v7347_v44 = vpop.f32.mrb[10].mxu0  ;;  %8040 = vmatpush1.bf16.msra.mxu0 %v14824_v36  ;;  %v7835_v19 = vpop.f32.mrb[10].mxu1  ;;  %8528 = vmatpush1.bf16.msra.mxu1 %v14826_v17  ;;  %v14849_v36 = vcombine.high %v528_v38, %v532_v7  ;;  %v14851_v17 = vcombine.high %v529_v23, %v533_v54 }
 0x2eb   :  { %v7348_v53 = vpop.f32.mrb[11].mxu0  ;;  %8041 = vmatprep.subr.bf16.mxu0 %v14833_v14  ;;  %v7836_v31 = vpop.f32.mrb[11].mxu1  ;;  %8529 = vmatprep.subr.bf16.mxu1 %v14835_v3  ;;  %v536_v14 = vld [vmem:[%s23497_s1 + $0xf50] sm:$0xff]  ;;  %v537_v44 = vld [vmem:[%s23497_s1 + $0xf58] sm:$0xff] }
 0x2ec   :  { %v540_v3 = vld [vmem:[%s23497_s1 + $0xf70] sm:$0xff]  ;;  %v14865_v53 = vcombine.high %v544_v9, %v548_v15 }
 0x2ed   :  { %v14857_v35 = vcombine.high %v536_v14, %v540_v3 }
 0x2ee   :  { %8042 = vmatpush1.bf16.msra.mxu0 %v14832_v25  ;;  %8530 = vmatpush1.bf16.msra.mxu1 %v14834_v39  ;;  %v14848_v39 = vcombine.low %v528_v38, %v532_v7  ;;  %v545_v25 = vld [vmem:[%s23497_s1 + $0xf98] sm:$0xff]  ;;  %v14856_v7 = vcombine.low %v536_v14, %v540_v3 }
 0x2ef   :  { %8043 = vmatprep.subr.bf16.mxu0 %v14841_v55  ;;  %8531 = vmatprep.subr.bf16.mxu1 %v14843_v52  ;;  %v541_v55 = vld [vmem:[%s23497_s1 + $0xf78] sm:$0xff]  ;;  %v14850_v52 = vcombine.low %v529_v23, %v533_v54  ;;  %v552_v23 = vld [vmem:[%s23497_s1 + $0xfd0] sm:$0xff] }
 0x2f0   :  { %v14859_v0 = vcombine.high %v537_v44, %v541_v55  ;;  %v549_v38 = vld [vmem:[%s23497_s1 + $0xfb8] sm:$0xff]  ;;  %v14858_v19 = vcombine.low %v537_v44, %v541_v55  ;;  %v556_v54 = vld [vmem:[%s23497_s1 + $0xff0] sm:$0xff] }
 0x2f1   :  { %v14867_v31 = vcombine.high %v545_v25, %v549_v38  ;;  %v14873_v14 = vcombine.high %v552_v23, %v556_v54  ;;  %v560_v44 = vld [vmem:[%s23497_s1 + $0x1010] sm:$0xff] }
 0x2f2   :  { %8044 = vmatpush1.bf16.msra.mxu0 %v14840_v30  ;;  %8532 = vmatpush1.bf16.msra.mxu1 %v14842_v37  ;;  %v553_v30 = vld [vmem:[%s23497_s1 + $0xfd8] sm:$0xff]  ;;  %v564_v55 = vld [vmem:[%s23497_s1 + $0x1030] sm:$0xff] }
 0x2f3   :  { %8045 = vmatprep.subr.bf16.mxu0 %v14849_v36  ;;  %8533 = vmatprep.subr.bf16.mxu1 %v14851_v17  ;;  %v557_v37 = vld [vmem:[%s23497_s1 + $0xff8] sm:$0xff]  ;;  %v14864_v36 = vcombine.low %v544_v9, %v548_v15  ;;  %v14866_v17 = vcombine.low %v545_v25, %v549_v38  ;;  %v14881_v9 = vcombine.high %v560_v44, %v564_v55  ;;  %v568_v25 = vld [vmem:[%s23497_s1 + $0x1050] sm:$0xff] }
 0x2f4   :  { %v14875_v3 = vcombine.high %v553_v30, %v557_v37  ;;  %v572_v38 = vld [vmem:[%s23497_s1 + $0x1070] sm:$0xff] }
 0x2f6   :  { %8046 = vmatpush1.bf16.msra.mxu0 %v14848_v39  ;;  %8534 = vmatpush1.bf16.msra.mxu1 %v14850_v52  ;;  %v561_v39 = vld [vmem:[%s23497_s1 + $0x1018] sm:$0xff] }
 0x2f7   :  { %8047 = vmatprep.subr.bf16.mxu0 %v14857_v35  ;;  %8535 = vmatprep.subr.bf16.mxu1 %v14859_v0  ;;  %v565_v52 = vld [vmem:[%s23497_s1 + $0x1038] sm:$0xff]  ;;  %v14872_v35 = vcombine.low %v552_v23, %v556_v54  ;;  %v14874_v0 = vcombine.low %v553_v30, %v557_v37  ;;  %v14889_v23 = vcombine.high %v568_v25, %v572_v38  ;;  %v576_v30 = vld [vmem:[%s23497_s1 + $0x1090] sm:$0xff] }
 0x2f8   :  { %v14883_v15 = vcombine.high %v561_v39, %v565_v52  ;;  %v580_v37 = vld [vmem:[%s23497_s1 + $0x10b0] sm:$0xff] }
 0x2fa   :  { %8048 = vmatpush1.bf16.msra.mxu0 %v14856_v7  ;;  %8536 = vmatpush1.bf16.msra.mxu1 %v14858_v19  ;;  %v569_v7 = vld [vmem:[%s23497_s1 + $0x1058] sm:$0xff] }
 0x2fb   :  { %8049 = vmatprep.subr.bf16.mxu0 %v14865_v53  ;;  %8537 = vmatprep.subr.bf16.mxu1 %v14867_v31  ;;  %v573_v19 = vld [vmem:[%s23497_s1 + $0x1078] sm:$0xff]  ;;  %v14880_v53 = vcombine.low %v560_v44, %v564_v55  ;;  %v14882_v31 = vcombine.low %v561_v39, %v565_v52  ;;  %v14897_v44 = vcombine.high %v576_v30, %v580_v37  ;;  %v584_v39 = vld [vmem:[%s23497_s1 + $0x10d0] sm:$0xff] }
 0x2fc   :  { %v14891_v54 = vcombine.high %v569_v7, %v573_v19  ;;  %v588_v52 = vld [vmem:[%s23497_s1 + $0x10f0] sm:$0xff] }
 0x2fe   :  { %8050 = vmatpush1.bf16.msra.mxu0 %v14864_v36  ;;  %8538 = vmatpush1.bf16.msra.mxu1 %v14866_v17  ;;  %v577_v36 = vld [vmem:[%s23497_s1 + $0x1098] sm:$0xff] }
 0x2ff   :  { %8051 = vmatprep.subr.bf16.mxu0 %v14873_v14  ;;  %8539 = vmatprep.subr.bf16.mxu1 %v14875_v3  ;;  %v581_v17 = vld [vmem:[%s23497_s1 + $0x10b8] sm:$0xff]  ;;  %v14888_v14 = vcombine.low %v568_v25, %v572_v38  ;;  %v14890_v3 = vcombine.low %v569_v7, %v573_v19  ;;  %v592_v38 = vld [vmem:[%s23497_s1 + $0x1110] sm:$0xff] }
 0x300   :  { %v14899_v55 = vcombine.high %v577_v36, %v581_v17  ;;  %v596_v7 = vld [vmem:[%s23497_s1 + $0x1130] sm:$0xff]  ;;  %v597_v19 = vld [vmem:[%s23497_s1 + $0x1138] sm:$0xff] }
 0x302   :  { %8052 = vmatpush1.bf16.msra.mxu0 %v14872_v35  ;;  %8540 = vmatpush1.bf16.msra.mxu1 %v14874_v0  ;;  %v589_v35 = vld [vmem:[%s23497_s1 + $0x10f8] sm:$0xff]  ;;  %v14896_v0 = vcombine.low %v576_v30, %v580_v37  ;;  %v600_v30 = vld [vmem:[%s23497_s1 + $0x1150] sm:$0xff] }
 0x303   :  { %8082 = vmatprep.subr.bf16.mxu0 %v14881_v9  ;;  %8570 = vmatprep.subr.bf16.mxu1 %v14883_v15  ;;  %v14898_v9 = vcombine.low %v577_v36, %v581_v17  ;;  %v14905_v15 = vcombine.high %v584_v39, %v588_v52  ;;  %v604_v37 = vld [vmem:[%s23497_s1 + $0x1170] sm:$0xff]  ;;  %v605_v36 = vld [vmem:[%s23497_s1 + $0x1178] sm:$0xff]  ;;  %v14912_v17 = vcombine.low %v592_v38, %v596_v7 }
 0x305   :  { %8054 = vmatmul.mubr.bf16.vlgmr.msra.gmra.mrb[12].mxu0 %v17842_v20  ;;  %8542 = vmatmul.mubr.bf16.vlgmr.msra.gmra.mrb[12].mxu1 %v17842_v20  ;;  %v585_v20 = vld [vmem:[%s23497_s1 + $0x10d8] sm:$0xff] }
 0x306   :  { %8083 = vmatpush1.bf16.msra.mxu0 %v14880_v53  ;;  %8571 = vmatpush1.bf16.msra.mxu1 %v14882_v31  ;;  %v14907_v25 = vcombine.high %v585_v20, %v589_v35  ;;  %v14904_v53 = vcombine.low %v584_v39, %v588_v52  ;;  %v14906_v31 = vcombine.low %v585_v20, %v589_v35  ;;  %v612_v39 = vld [vmem:[%s23497_s1 + $0x11b0] sm:$0xff]  ;;  %v613_v52 = vld [vmem:[%s23497_s1 + $0x11b8] sm:$0xff] }
 0x307   :  { %8084 = vmatprep.subr.bf16.mxu0 %v14889_v23  ;;  %8572 = vmatprep.subr.bf16.mxu1 %v14891_v54  ;;  %v14913_v23 = vcombine.high %v592_v38, %v596_v7  ;;  %v14920_v20 = vcombine.low %v600_v30, %v604_v37  ;;  %v621_v38 = vld [vmem:[%s23497_s1 + $0x11f8] sm:$0xff] }
 0x308   :  { %8063 = vmatprep.mubr.bf16.mxu0 %v17859_v21  ;;  %8551 = vmatprep.mubr.bf16.mxu1 %v17859_v21  ;;  %v593_v21 = vld [vmem:[%s23497_s1 + $0x1118] sm:$0xff] }
 0x309   :  { %v14915_v54 = vcombine.high %v593_v21, %v597_v19 }
 0x30a   :  { %8085 = vmatpush1.bf16.msra.mxu0 %v14888_v14  ;;  %8573 = vmatpush1.bf16.msra.mxu1 %v14890_v3  ;;  %v14914_v14 = vcombine.low %v593_v21, %v597_v19  ;;  %v14921_v3 = vcombine.high %v600_v30, %v604_v37 }
 0x30b   :  { %8086 = vmatprep.subr.bf16.mxu0 %v14897_v44  ;;  %8574 = vmatprep.subr.bf16.mxu1 %v14899_v55  ;;  %v608_v55 = vld [vmem:[%s23497_s1 + $0x1190] sm:$0xff] }
 0x30c   :  { %v14928_v7 = vcombine.low %v608_v55, %v612_v39 }
 0x30d   :  { %8064 = vmatmul.mubr.bf16.gmra.mrb[16].mxu0 %v17883_v45  ;;  %8552 = vmatmul.mubr.bf16.gmra.mrb[16].mxu1 %v17883_v45  ;;  %v601_v45 = vld [vmem:[%s23497_s1 + $0x1158] sm:$0xff] }
 0x30e   :  { %8087 = vmatpush1.bf16.msra.mxu0 %v14896_v0  ;;  %8575 = vmatpush1.bf16.msra.mxu1 %v14898_v9  ;;  %v14923_v44 = vcombine.high %v601_v45, %v605_v36  ;;  %v14922_v35 = vcombine.low %v601_v45, %v605_v36  ;;  %v14929_v0 = vcombine.high %v608_v55, %v612_v39 }
 0x30f   :  { %8088 = vmatprep.subr.bf16.mxu0 %v14905_v15  ;;  %8576 = vmatprep.subr.bf16.mxu1 %v14907_v25  ;;  %v616_v15 = vld [vmem:[%s23497_s1 + $0x11d0] sm:$0xff] }
 0x310   :  { %8073 = vmatprep.mubr.bf16.mxu0 %v17894_v59  ;;  %8561 = vmatprep.mubr.bf16.mxu1 %v17894_v59  ;;  %v609_v59 = vld [vmem:[%s23497_s1 + $0x1198] sm:$0xff]  ;;  %v620_v25 = vld [vmem:[%s23497_s1 + $0x11f0] sm:$0xff] }
 0x311   :  { %v14931_v9 = vcombine.high %v609_v59, %v613_v52  ;;  %v14930_v21 = vcombine.low %v609_v59, %v613_v52  ;;  %v14937_v19 = vcombine.high %v616_v15, %v620_v25  ;;  %v14936_v30 = vcombine.low %v616_v15, %v620_v25 }
 0x312   :  { %8089 = vmatpush1.bf16.msra.mxu0 %v14904_v53  ;;  %8577 = vmatpush1.bf16.msra.mxu1 %v14906_v31  ;;  %v624_v31 = vld [vmem:[%s23497_s1 + $0x1210] sm:$0xff] }
 0x313   :  { %8090 = vmatprep.subr.bf16.mxu0 %v14913_v23  ;;  %8578 = vmatprep.subr.bf16.mxu1 %v14915_v54  ;;  %v628_v23 = vld [vmem:[%s23497_s1 + $0x1230] sm:$0xff]  ;;  %v629_v54 = vld [vmem:[%s23497_s1 + $0x1238] sm:$0xff] }
 0x314   :  { %v14945_v45 = vcombine.high %v624_v31, %v628_v23  ;;  %v14944_v55 = vcombine.low %v624_v31, %v628_v23 }
 0x315   :  { %8074 = vmatmul.mubr.bf16.gmra.mrb[20].mxu0 %v17918_v12  ;;  %8562 = vmatmul.mubr.bf16.gmra.mrb[20].mxu1 %v17918_v12  ;;  %v617_v12 = vld [vmem:[%s23497_s1 + $0x11d8] sm:$0xff] }
 0x316   :  { %8091 = vmatpush1.bf16.msra.mxu0 %v14912_v17  ;;  %8579 = vmatpush1.bf16.msra.mxu1 %v14914_v14  ;;  %v14939_v53 = vcombine.high %v617_v12, %v621_v38  ;;  %v14938_v37 = vcombine.low %v617_v12, %v621_v38  ;;  %v632_v17 = vld [vmem:[%s23497_s1 + $0x1250] sm:$0xff] }
 0x317   :  { %8092 = vmatprep.subr.bf16.mxu0 %v14921_v3  ;;  %8580 = vmatprep.subr.bf16.mxu1 %v14923_v44  ;;  %v636_v14 = vld [vmem:[%s23497_s1 + $0x1270] sm:$0xff]  ;;  %v633_v3 = vld [vmem:[%s23497_s1 + $0x1258] sm:$0xff] }
 0x318   :  { %8114 = vmatprep.mubr.bf16.mxu0 %v17938_v27  ;;  %8602 = vmatprep.mubr.bf16.mxu1 %v17938_v27  ;;  %v625_v27 = vld [vmem:[%s23497_s1 + $0x1218] sm:$0xff]  ;;  %v14953_v59 = vcombine.high %v632_v17, %v636_v14  ;;  %v14952_v15 = vcombine.low %v632_v17, %v636_v14 }
 0x319   :  { %v14947_v36 = vcombine.high %v625_v27, %v629_v54  ;;  %v637_v44 = vld [vmem:[%s23497_s1 + $0x1278] sm:$0xff]  ;;  %v14946_v39 = vcombine.low %v625_v27, %v629_v54 }
 0x31a   :  { %8093 = vmatpush1.bf16.msra.mxu0 %v14920_v20  ;;  %8581 = vmatpush1.bf16.msra.mxu1 %v14922_v35  ;;  %v14955_v52 = vcombine.high %v633_v3, %v637_v44  ;;  %v640_v20 = vld [vmem:[%s23497_s1 + $0x1290] sm:$0xff]  ;;  %v14954_v25 = vcombine.low %v633_v3, %v637_v44 }
 0x31b   :  { %8094 = vmatprep.subr.bf16.mxu0 %v14929_v0  ;;  %8582 = vmatprep.subr.bf16.mxu1 %v14931_v9  ;;  %v644_v35 = vld [vmem:[%s23497_s1 + $0x12b0] sm:$0xff]  ;;  %v641_v0 = vld [vmem:[%s23497_s1 + $0x1298] sm:$0xff] }
 0x31c   :  { %v645_v9 = vld [vmem:[%s23497_s1 + $0x12b8] sm:$0xff]  ;;  %v14961_v12 = vcombine.high %v640_v20, %v644_v35  ;;  %v14960_v31 = vcombine.low %v640_v20, %v644_v35 }
 0x31d   :  { %v14963_v38 = vcombine.high %v641_v0, %v645_v9  ;;  %v14962_v23 = vcombine.low %v641_v0, %v645_v9 }
 0x31e   :  { %8095 = vmatpush1.bf16.msra.mxu0 %v14928_v7  ;;  %8583 = vmatpush1.bf16.msra.mxu1 %v14930_v21  ;;  %v648_v7 = vld [vmem:[%s23497_s1 + $0x12d0] sm:$0xff] }
 0x31f   :  { %8096 = vmatprep.subr.bf16.mxu0 %v14937_v19  ;;  %8584 = vmatprep.subr.bf16.mxu1 %v14939_v53  ;;  %v652_v21 = vld [vmem:[%s23497_s1 + $0x12f0] sm:$0xff]  ;;  %v649_v19 = vld [vmem:[%s23497_s1 + $0x12d8] sm:$0xff] }
 0x320   :  { %v653_v53 = vld [vmem:[%s23497_s1 + $0x12f8] sm:$0xff]  ;;  %v14969_v27 = vcombine.high %v648_v7, %v652_v21  ;;  %v14968_v17 = vcombine.low %v648_v7, %v652_v21 }
 0x321   :  { %v14971_v54 = vcombine.high %v649_v19, %v653_v53  ;;  %v14970_v14 = vcombine.low %v649_v19, %v653_v53 }
 0x322   :  { %8097 = vmatpush1.bf16.msra.mxu0 %v14936_v30  ;;  %8585 = vmatpush1.bf16.msra.mxu1 %v14938_v37  ;;  %v656_v30 = vld [vmem:[%s23497_s1 + $0x1310] sm:$0xff] }
 0x323   :  { %8098 = vmatprep.subr.bf16.mxu0 %v14945_v45  ;;  %8586 = vmatprep.subr.bf16.mxu1 %v14947_v36  ;;  %v660_v37 = vld [vmem:[%s23497_s1 + $0x1330] sm:$0xff]  ;;  %v657_v45 = vld [vmem:[%s23497_s1 + $0x1318] sm:$0xff] }
 0x324   :  { %v661_v36 = vld [vmem:[%s23497_s1 + $0x1338] sm:$0xff]  ;;  %v14977_v3 = vcombine.high %v656_v30, %v660_v37  ;;  %v14976_v20 = vcombine.low %v656_v30, %v660_v37 }
 0x325   :  { %v14979_v44 = vcombine.high %v657_v45, %v661_v36  ;;  %v14978_v35 = vcombine.low %v657_v45, %v661_v36 }
 0x326   :  { %8099 = vmatpush1.bf16.msra.mxu0 %v14944_v55  ;;  %8587 = vmatpush1.bf16.msra.mxu1 %v14946_v39  ;;  %v664_v55 = vld [vmem:[%s23497_s1 + $0x1350] sm:$0xff] }
 0x327   :  { %8100 = vmatprep.subr.bf16.mxu0 %v14953_v59  ;;  %8588 = vmatprep.subr.bf16.mxu1 %v14955_v52  ;;  %v668_v39 = vld [vmem:[%s23497_s1 + $0x1370] sm:$0xff]  ;;  %v665_v59 = vld [vmem:[%s23497_s1 + $0x1358] sm:$0xff] }
 0x328   :  { %v669_v52 = vld [vmem:[%s23497_s1 + $0x1378] sm:$0xff]  ;;  %v14985_v0 = vcombine.high %v664_v55, %v668_v39  ;;  %v14984_v7 = vcombine.low %v664_v55, %v668_v39 }
 0x329   :  { %v14987_v9 = vcombine.high %v665_v59, %v669_v52  ;;  %v14986_v21 = vcombine.low %v665_v59, %v669_v52 }
 0x32a   :  { %8101 = vmatpush1.bf16.msra.mxu0 %v14952_v15  ;;  %8589 = vmatpush1.bf16.msra.mxu1 %v14954_v25  ;;  %v672_v15 = vld [vmem:[%s23497_s1 + $0x1390] sm:$0xff] }
 0x32b   :  { %8102 = vmatprep.subr.bf16.mxu0 %v14961_v12  ;;  %8590 = vmatprep.subr.bf16.mxu1 %v14963_v38  ;;  %v676_v25 = vld [vmem:[%s23497_s1 + $0x13b0] sm:$0xff]  ;;  %v673_v12 = vld [vmem:[%s23497_s1 + $0x1398] sm:$0xff] }
 0x32c   :  { %v677_v38 = vld [vmem:[%s23497_s1 + $0x13b8] sm:$0xff]  ;;  %v14993_v19 = vcombine.high %v672_v15, %v676_v25  ;;  %v14992_v30 = vcombine.low %v672_v15, %v676_v25 }
 0x32d   :  { %v14995_v53 = vcombine.high %v673_v12, %v677_v38  ;;  %v14994_v37 = vcombine.low %v673_v12, %v677_v38 }
 0x32e   :  { %8103 = vmatpush1.bf16.msra.mxu0 %v14960_v31  ;;  %8591 = vmatpush1.bf16.msra.mxu1 %v14962_v23  ;;  %v680_v31 = vld [vmem:[%s23497_s1 + $0x13d0] sm:$0xff] }
 0x32f   :  { %8104 = vmatprep.subr.bf16.mxu0 %v14969_v27  ;;  %8592 = vmatprep.subr.bf16.mxu1 %v14971_v54  ;;  %v684_v23 = vld [vmem:[%s23497_s1 + $0x13f0] sm:$0xff]  ;;  %v681_v27 = vld [vmem:[%s23497_s1 + $0x13d8] sm:$0xff] }
 0x330   :  { %v685_v54 = vld [vmem:[%s23497_s1 + $0x13f8] sm:$0xff]  ;;  %v15001_v45 = vcombine.high %v680_v31, %v684_v23  ;;  %v15000_v55 = vcombine.low %v680_v31, %v684_v23 }
 0x331   :  { %v15003_v36 = vcombine.high %v681_v27, %v685_v54  ;;  %v15002_v39 = vcombine.low %v681_v27, %v685_v54 }
 0x332   :  { %8105 = vmatpush1.bf16.msra.mxu0 %v14968_v17  ;;  %8593 = vmatpush1.bf16.msra.mxu1 %v14970_v14  ;;  %v688_v17 = vld [vmem:[%s23497_s1 + $0x1410] sm:$0xff] }
 0x333   :  { %8106 = vmatprep.subr.bf16.mxu0 %v14977_v3  ;;  %8594 = vmatprep.subr.bf16.mxu1 %v14979_v44  ;;  %v692_v14 = vld [vmem:[%s23497_s1 + $0x1430] sm:$0xff]  ;;  %v689_v3 = vld [vmem:[%s23497_s1 + $0x1418] sm:$0xff] }
 0x334   :  { %v693_v44 = vld [vmem:[%s23497_s1 + $0x1438] sm:$0xff]  ;;  %v15009_v59 = vcombine.high %v688_v17, %v692_v14  ;;  %v15008_v15 = vcombine.low %v688_v17, %v692_v14 }
 0x335   :  { %v15011_v52 = vcombine.high %v689_v3, %v693_v44  ;;  %v15010_v25 = vcombine.low %v689_v3, %v693_v44  ;;  %v720_v44 = vld [vmem:[%s23497_s1 + $0x1510] sm:$0xff] }
 0x336   :  { %8107 = vmatpush1.bf16.msra.mxu0 %v14976_v20  ;;  %8595 = vmatpush1.bf16.msra.mxu1 %v14978_v35  ;;  %v696_v20 = vld [vmem:[%s23497_s1 + $0x1450] sm:$0xff] }
 0x337   :  { %8108 = vmatprep.subr.bf16.mxu0 %v14985_v0  ;;  %8596 = vmatprep.subr.bf16.mxu1 %v14987_v9  ;;  %v700_v35 = vld [vmem:[%s23497_s1 + $0x1470] sm:$0xff]  ;;  %v697_v0 = vld [vmem:[%s23497_s1 + $0x1458] sm:$0xff] }
 0x338   :  { %v701_v9 = vld [vmem:[%s23497_s1 + $0x1478] sm:$0xff]  ;;  %v15017_v12 = vcombine.high %v696_v20, %v700_v35  ;;  %v15016_v31 = vcombine.low %v696_v20, %v700_v35 }
 0x339   :  { %v15019_v38 = vcombine.high %v697_v0, %v701_v9  ;;  %v15018_v23 = vcombine.low %v697_v0, %v701_v9  ;;  %v728_v0 = vld [vmem:[%s23497_s1 + $0x1550] sm:$0xff] }
 0x33a   :  { %8109 = vmatpush1.bf16.msra.mxu0 %v14984_v7  ;;  %8597 = vmatpush1.bf16.msra.mxu1 %v14986_v21  ;;  %v704_v7 = vld [vmem:[%s23497_s1 + $0x1490] sm:$0xff] }
 0x33b   :  { %8110 = vmatprep.subr.bf16.mxu0 %v14993_v19  ;;  %8598 = vmatprep.subr.bf16.mxu1 %v14995_v53  ;;  %v708_v21 = vld [vmem:[%s23497_s1 + $0x14b0] sm:$0xff]  ;;  %v705_v19 = vld [vmem:[%s23497_s1 + $0x1498] sm:$0xff] }
 0x33c   :  { %v709_v53 = vld [vmem:[%s23497_s1 + $0x14b8] sm:$0xff]  ;;  %v15025_v27 = vcombine.high %v704_v7, %v708_v21  ;;  %v732_v9 = vld [vmem:[%s23497_s1 + $0x1570] sm:$0xff] }
 0x33d   :  { %v15027_v54 = vcombine.high %v705_v19, %v709_v53  ;;  %v15026_v17 = vcombine.low %v705_v19, %v709_v53  ;;  %v740_v19 = vld [vmem:[%s23497_s1 + $0x15b0] sm:$0xff]  ;;  %v741_v53 = vld [vmem:[%s23497_s1 + $0x15b8] sm:$0xff] }
 0x33e   :  { %8111 = vmatpush1.bf16.msra.mxu0 %v14992_v30  ;;  %8599 = vmatpush1.bf16.msra.mxu1 %v14994_v37  ;;  %v712_v30 = vld [vmem:[%s23497_s1 + $0x14d0] sm:$0xff] }
 0x33f   :  { %8112 = vmatprep.subr.bf16.mxu0 %v15001_v45  ;;  %8600 = vmatprep.subr.bf16.mxu1 %v15003_v36  ;;  %v716_v37 = vld [vmem:[%s23497_s1 + $0x14f0] sm:$0xff]  ;;  %v717_v45 = vld [vmem:[%s23497_s1 + $0x14f8] sm:$0xff]  ;;  %v15024_v36 = vcombine.low %v704_v7, %v708_v21 }
 0x340   :  { %v15033_v14 = vcombine.high %v712_v30, %v716_v37  ;;  %v736_v21 = vld [vmem:[%s23497_s1 + $0x1590] sm:$0xff] }
 0x342   :  { %8113 = vmatpush1.bf16.msra.mxu0 %v15000_v55  ;;  %8601 = vmatpush1.bf16.msra.mxu1 %v15002_v39  ;;  %v724_v55 = vld [vmem:[%s23497_s1 + $0x1530] sm:$0xff]  ;;  %v725_v39 = vld [vmem:[%s23497_s1 + $0x1538] sm:$0xff] }
 0x343   :  { %8143 = vmatprep.subr.bf16.mxu0 %v15009_v59  ;;  %8631 = vmatprep.subr.bf16.mxu1 %v15011_v52  ;;  %v15032_v59 = vcombine.low %v712_v30, %v716_v37  ;;  %v15041_v20 = vcombine.high %v720_v44, %v724_v55  ;;  %v744_v30 = vld [vmem:[%s23497_s1 + $0x15d0] sm:$0xff] }
 0x344   :  { %v748_v37 = vld [vmem:[%s23497_s1 + $0x15f0] sm:$0xff] }
 0x345   :  { %8115 = vmatmul.mubr.bf16.vlgmr.msra.gmra.mrb[12].mxu0 %v18081_v47  ;;  %8603 = vmatmul.mubr.bf16.vlgmr.msra.gmra.mrb[12].mxu1 %v18081_v47  ;;  %v713_v47 = vld [vmem:[%s23497_s1 + $0x14d8] sm:$0xff] }
 0x346   :  { %8144 = vmatpush1.bf16.msra.mxu0 %v15008_v15  ;;  %8632 = vmatpush1.bf16.msra.mxu1 %v15010_v25  ;;  %v15035_v3 = vcombine.high %v713_v47, %v717_v45  ;;  %v15034_v52 = vcombine.low %v713_v47, %v717_v45  ;;  %v733_v15 = vld [vmem:[%s23497_s1 + $0x1578] sm:$0xff]  ;;  %v15040_v25 = vcombine.low %v720_v44, %v724_v55  ;;  %v756_v44 = vld [vmem:[%s23497_s1 + $0x1630] sm:$0xff] }
 0x347   :  { %8145 = vmatprep.subr.bf16.mxu0 %v15017_v12  ;;  %8633 = vmatprep.subr.bf16.mxu1 %v15019_v38  ;;  %v15049_v38 = vcombine.high %v728_v0, %v732_v9  ;;  %v749_v47 = vld [vmem:[%s23497_s1 + $0x15f8] sm:$0xff]  ;;  %v15056_v45 = vcombine.low %v736_v21, %v740_v19 }
 0x348   :  { %8124 = vmatprep.mubr.bf16.mxu0 %v18098_v62  ;;  %8612 = vmatprep.mubr.bf16.mxu1 %v18098_v62  ;;  %v721_v62 = vld [vmem:[%s23497_s1 + $0x1518] sm:$0xff] }
 0x349   :  { %v15043_v35 = vcombine.high %v721_v62, %v725_v39  ;;  %v15042_v12 = vcombine.low %v721_v62, %v725_v39  ;;  %v757_v55 = vld [vmem:[%s23497_s1 + $0x1638] sm:$0xff]  ;;  %v15064_v62 = vcombine.low %v744_v30, %v748_v37 }
 0x34a   :  { %8146 = vmatpush1.bf16.msra.mxu0 %v15016_v31  ;;  %8634 = vmatpush1.bf16.msra.mxu1 %v15018_v23  ;;  %v15048_v31 = vcombine.low %v728_v0, %v732_v9  ;;  %v761_v0 = vld [vmem:[%s23497_s1 + $0x1658] sm:$0xff] }
 0x34b   :  { %8147 = vmatprep.subr.bf16.mxu0 %v15025_v27  ;;  %8635 = vmatprep.subr.bf16.mxu1 %v15027_v54  ;;  %v15057_v27 = vcombine.high %v736_v21, %v740_v19  ;;  %v765_v9 = vld [vmem:[%s23497_s1 + $0x1678] sm:$0xff] }
 0x34c   :  { %v769_v21 = vld [vmem:[%s23497_s1 + $0x1698] sm:$0xff] }
 0x34d   :  { %8125 = vmatmul.mubr.bf16.gmra.mrb[16].mxu0 %v18122_v24  ;;  %8613 = vmatmul.mubr.bf16.gmra.mrb[16].mxu1 %v18122_v24  ;;  %v729_v24 = vld [vmem:[%s23497_s1 + $0x1558] sm:$0xff] }
 0x34e   :  { %8148 = vmatpush1.bf16.msra.mxu0 %v15024_v36  ;;  %8636 = vmatpush1.bf16.msra.mxu1 %v15026_v17  ;;  %v15051_v7 = vcombine.high %v729_v24, %v733_v15  ;;  %v15050_v23 = vcombine.low %v729_v24, %v733_v15  ;;  %v15065_v17 = vcombine.high %v744_v30, %v748_v37  ;;  %v773_v19 = vld [vmem:[%s23497_s1 + $0x16b8] sm:$0xff] }
 0x34f   :  { %8149 = vmatprep.subr.bf16.mxu0 %v15033_v14  ;;  %8637 = vmatprep.subr.bf16.mxu1 %v15035_v3  ;;  %v752_v3 = vld [vmem:[%s23497_s1 + $0x1610] sm:$0xff]  ;;  %v777_v30 = vld [vmem:[%s23497_s1 + $0x16d8] sm:$0xff] }
 0x350   :  { %8134 = vmatprep.mubr.bf16.mxu0 %v18133_v32  ;;  %8622 = vmatprep.mubr.bf16.mxu1 %v18133_v32  ;;  %v737_v32 = vld [vmem:[%s23497_s1 + $0x1598] sm:$0xff]  ;;  %v15072_v24 = vcombine.low %v752_v3, %v756_v44 }
 0x351   :  { %v15059_v54 = vcombine.high %v737_v32, %v741_v53  ;;  %v15058_v36 = vcombine.low %v737_v32, %v741_v53  ;;  %v15082_v53 = vcombine.low %v761_v0, %v765_v9  ;;  %v781_v37 = vld [vmem:[%s23497_s1 + $0x16f8] sm:$0xff] }
 0x352   :  { %8150 = vmatpush1.bf16.msra.mxu0 %v15032_v59  ;;  %8638 = vmatpush1.bf16.msra.mxu1 %v15034_v52  ;;  %v15073_v59 = vcombine.high %v752_v3, %v756_v44  ;;  %v785_v3 = vld [vmem:[%s23497_s1 + $0x1718] sm:$0xff] }
 0x353   :  { %8151 = vmatprep.subr.bf16.mxu0 %v15041_v20  ;;  %8639 = vmatprep.subr.bf16.mxu1 %v15043_v35  ;;  %v760_v20 = vld [vmem:[%s23497_s1 + $0x1650] sm:$0xff]  ;;  %v789_v44 = vld [vmem:[%s23497_s1 + $0x1738] sm:$0xff] }
 0x354   :  { %v764_v35 = vld [vmem:[%s23497_s1 + $0x1670] sm:$0xff] }
 0x355   :  { %8135 = vmatmul.mubr.bf16.gmra.mrb[20].mxu0 %v18157_v56  ;;  %8623 = vmatmul.mubr.bf16.gmra.mrb[20].mxu1 %v18157_v56  ;;  %v745_v56 = vld [vmem:[%s23497_s1 + $0x15d8] sm:$0xff]  ;;  %v15080_v32 = vcombine.low %v760_v20, %v764_v35 }
 0x356   :  { %8152 = vmatpush1.bf16.msra.mxu0 %v15040_v25  ;;  %8640 = vmatpush1.bf16.msra.mxu1 %v15042_v12  ;;  %v15067_v14 = vcombine.high %v745_v56, %v749_v47  ;;  %v15066_v39 = vcombine.low %v745_v56, %v749_v47  ;;  %v15081_v25 = vcombine.high %v760_v20, %v764_v35  ;;  %v793_v20 = vld [vmem:[%s23497_s1 + $0x1758] sm:$0xff] }
 0x357   :  { %8153 = vmatprep.subr.bf16.mxu0 %v15049_v38  ;;  %8641 = vmatprep.subr.bf16.mxu1 %v15051_v7  ;;  %v15083_v12 = vcombine.high %v761_v0, %v765_v9  ;;  %v768_v38 = vld [vmem:[%s23497_s1 + $0x1690] sm:$0xff]  ;;  %v15090_v47 = vcombine.low %v769_v21, %v773_v19  ;;  %v797_v35 = vld [vmem:[%s23497_s1 + $0x1778] sm:$0xff]  ;;  %v15106_v9 = vcombine.low %v785_v3, %v789_v44 }
 0x358   :  { %8175 = vmatprep.mubr.bf16.mxu0 %v18177_v1  ;;  %8663 = vmatprep.mubr.bf16.mxu1 %v18177_v1  ;;  %v753_v1 = vld [vmem:[%s23497_s1 + $0x1618] sm:$0xff]  ;;  %v772_v7 = vld [vmem:[%s23497_s1 + $0x16b0] sm:$0xff] }
 0x359   :  { %v15075_v52 = vcombine.high %v753_v1, %v757_v55  ;;  %v15074_v15 = vcombine.low %v753_v1, %v757_v55  ;;  %v15088_v56 = vcombine.low %v768_v38, %v772_v7  ;;  %v15098_v55 = vcombine.low %v777_v30, %v781_v37 }
 0x35a   :  { %8154 = vmatpush1.bf16.msra.mxu0 %v15048_v31  ;;  %8642 = vmatpush1.bf16.msra.mxu1 %v15050_v23  ;;  %v15089_v31 = vcombine.high %v768_v38, %v772_v7  ;;  %v15091_v23 = vcombine.high %v769_v21, %v773_v19  ;;  %v801_v38 = vld [vmem:[%s23497_s1 + $0x1798] sm:$0xff]  ;;  %v15114_v19 = vcombine.low %v793_v20, %v797_v35 }
 0x35b   :  { %8155 = vmatprep.subr.bf16.mxu0 %v15057_v27  ;;  %8643 = vmatprep.subr.bf16.mxu1 %v15059_v54  ;;  %v776_v27 = vld [vmem:[%s23497_s1 + $0x16d0] sm:$0xff]  ;;  %v805_v7 = vld [vmem:[%s23497_s1 + $0x17b8] sm:$0xff] }
 0x35c   :  { %v780_v54 = vld [vmem:[%s23497_s1 + $0x16f0] sm:$0xff] }
 0x35d   :  { %v15096_v1 = vcombine.low %v776_v27, %v780_v54 }
 0x35e   :  { %8156 = vmatpush1.bf16.msra.mxu0 %v15056_v45  ;;  %8644 = vmatpush1.bf16.msra.mxu1 %v15058_v36  ;;  %v15097_v45 = vcombine.high %v776_v27, %v780_v54  ;;  %v15099_v36 = vcombine.high %v777_v30, %v781_v37  ;;  %v809_v27 = vld [vmem:[%s23497_s1 + $0x17d8] sm:$0xff]  ;;  %v15122_v37 = vcombine.low %v801_v38, %v805_v7 }
 0x35f   :  { %8157 = vmatprep.subr.bf16.mxu0 %v15065_v17  ;;  %8645 = vmatprep.subr.bf16.mxu1 %v15067_v14  ;;  %v784_v17 = vld [vmem:[%s23497_s1 + $0x1710] sm:$0xff]  ;;  %v813_v54 = vld [vmem:[%s23497_s1 + $0x17f8] sm:$0xff] }
 0x360   :  { %v788_v14 = vld [vmem:[%s23497_s1 + $0x1730] sm:$0xff] }
 0x361   :  { %v15104_v0 = vcombine.low %v784_v17, %v788_v14 }
 0x362   :  { %8158 = vmatpush1.bf16.msra.mxu0 %v15064_v62  ;;  %8646 = vmatpush1.bf16.msra.mxu1 %v15066_v39  ;;  %v15105_v62 = vcombine.high %v784_v17, %v788_v14  ;;  %v15107_v39 = vcombine.high %v785_v3, %v789_v44  ;;  %v817_v17 = vld [vmem:[%s23497_s1 + $0x1818] sm:$0xff]  ;;  %v15130_v44 = vcombine.low %v809_v27, %v813_v54 }
 0x363   :  { %8159 = vmatprep.subr.bf16.mxu0 %v15073_v59  ;;  %8647 = vmatprep.subr.bf16.mxu1 %v15075_v52  ;;  %v792_v59 = vld [vmem:[%s23497_s1 + $0x1750] sm:$0xff]  ;;  %v821_v14 = vld [vmem:[%s23497_s1 + $0x1838] sm:$0xff] }
 0x364   :  { %v796_v52 = vld [vmem:[%s23497_s1 + $0x1770] sm:$0xff] }
 0x365   :  { %v15112_v21 = vcombine.low %v792_v59, %v796_v52 }
 0x366   :  { %8160 = vmatpush1.bf16.msra.mxu0 %v15072_v24  ;;  %8648 = vmatpush1.bf16.msra.mxu1 %v15074_v15  ;;  %v15113_v24 = vcombine.high %v792_v59, %v796_v52  ;;  %v15115_v15 = vcombine.high %v793_v20, %v797_v35  ;;  %v825_v59 = vld [vmem:[%s23497_s1 + $0x1858] sm:$0xff]  ;;  %v15138_v35 = vcombine.low %v817_v17, %v821_v14 }
 0x367   :  { %8161 = vmatprep.subr.bf16.mxu0 %v15081_v25  ;;  %8649 = vmatprep.subr.bf16.mxu1 %v15083_v12  ;;  %v800_v25 = vld [vmem:[%s23497_s1 + $0x1790] sm:$0xff]  ;;  %v829_v52 = vld [vmem:[%s23497_s1 + $0x1878] sm:$0xff] }
 0x368   :  { %v804_v12 = vld [vmem:[%s23497_s1 + $0x17b0] sm:$0xff] }
 0x369   :  { %v15120_v30 = vcombine.low %v800_v25, %v804_v12 }
 0x36a   :  { %8162 = vmatpush1.bf16.msra.mxu0 %v15080_v32  ;;  %8650 = vmatpush1.bf16.msra.mxu1 %v15082_v53  ;;  %v15121_v32 = vcombine.high %v800_v25, %v804_v12  ;;  %v15123_v53 = vcombine.high %v801_v38, %v805_v7  ;;  %v833_v25 = vld [vmem:[%s23497_s1 + $0x1898] sm:$0xff]  ;;  %v15146_v7 = vcombine.low %v825_v59, %v829_v52 }
 0x36b   :  { %8163 = vmatprep.subr.bf16.mxu0 %v15089_v31  ;;  %8651 = vmatprep.subr.bf16.mxu1 %v15091_v23  ;;  %v808_v31 = vld [vmem:[%s23497_s1 + $0x17d0] sm:$0xff]  ;;  %v837_v12 = vld [vmem:[%s23497_s1 + $0x18b8] sm:$0xff] }
 0x36c   :  { %v812_v23 = vld [vmem:[%s23497_s1 + $0x17f0] sm:$0xff] }
 0x36d   :  { %v15128_v3 = vcombine.low %v808_v31, %v812_v23 }
 0x36e   :  { %8164 = vmatpush1.bf16.msra.mxu0 %v15088_v56  ;;  %8652 = vmatpush1.bf16.msra.mxu1 %v15090_v47  ;;  %v15129_v56 = vcombine.high %v808_v31, %v812_v23  ;;  %v15131_v47 = vcombine.high %v809_v27, %v813_v54  ;;  %v845_v31 = vld [vmem:[%s23497_s1 + $0x18f8] sm:$0xff]  ;;  %v15154_v27 = vcombine.low %v833_v25, %v837_v12 }
 0x36f   :  { %8165 = vmatprep.subr.bf16.mxu0 %v15097_v45  ;;  %8653 = vmatprep.subr.bf16.mxu1 %v15099_v36  ;;  %v816_v45 = vld [vmem:[%s23497_s1 + $0x1810] sm:$0xff] }
 0x370   :  { %v820_v36 = vld [vmem:[%s23497_s1 + $0x1830] sm:$0xff] }
 0x371   :  { %v15136_v20 = vcombine.low %v816_v45, %v820_v36 }
 0x372   :  { %8166 = vmatpush1.bf16.msra.mxu0 %v15096_v1  ;;  %8654 = vmatpush1.bf16.msra.mxu1 %v15098_v55  ;;  %v15137_v1 = vcombine.high %v816_v45, %v820_v36  ;;  %v15139_v55 = vcombine.high %v817_v17, %v821_v14 }
 0x373   :  { %8167 = vmatprep.subr.bf16.mxu0 %v15105_v62  ;;  %8655 = vmatprep.subr.bf16.mxu1 %v15107_v39  ;;  %v824_v62 = vld [vmem:[%s23497_s1 + $0x1850] sm:$0xff] }
 0x374   :  { %v828_v39 = vld [vmem:[%s23497_s1 + $0x1870] sm:$0xff] }
 0x375   :  { %v15144_v38 = vcombine.low %v824_v62, %v828_v39 }
 0x376   :  { %8168 = vmatpush1.bf16.msra.mxu0 %v15104_v0  ;;  %8656 = vmatpush1.bf16.msra.mxu1 %v15106_v9  ;;  %v15145_v0 = vcombine.high %v824_v62, %v828_v39  ;;  %v15147_v9 = vcombine.high %v825_v59, %v829_v52  ;;  %v864_v52 = vld [vmem:[%s23497_s1 + $0x1990] sm:$0xff] }
 0x377   :  { %8169 = vmatprep.subr.bf16.mxu0 %v15113_v24  ;;  %8657 = vmatprep.subr.bf16.mxu1 %v15115_v15  ;;  %v832_v24 = vld [vmem:[%s23497_s1 + $0x1890] sm:$0xff] }
 0x378   :  { %v836_v15 = vld [vmem:[%s23497_s1 + $0x18b0] sm:$0xff] }
 0x379   :  { %v15152_v23 = vcombine.low %v832_v24, %v836_v15 }
 0x37a   :  { %8170 = vmatpush1.bf16.msra.mxu0 %v15112_v21  ;;  %8658 = vmatpush1.bf16.msra.mxu1 %v15114_v19  ;;  %v15153_v21 = vcombine.high %v832_v24, %v836_v15  ;;  %v15155_v19 = vcombine.high %v833_v25, %v837_v12  ;;  %v872_v25 = vld [vmem:[%s23497_s1 + $0x19d0] sm:$0xff] }
 0x37b   :  { %8171 = vmatprep.subr.bf16.mxu0 %v15121_v32  ;;  %8659 = vmatprep.subr.bf16.mxu1 %v15123_v53  ;;  %v840_v32 = vld [vmem:[%s23497_s1 + $0x18d0] sm:$0xff] }
 0x37c   :  { %v844_v53 = vld [vmem:[%s23497_s1 + $0x18f0] sm:$0xff] }
 0x37d   :  { %v15161_v54 = vcombine.high %v840_v32, %v844_v53  ;;  %v15160_v45 = vcombine.low %v840_v32, %v844_v53  ;;  %v876_v12 = vld [vmem:[%s23497_s1 + $0x19f0] sm:$0xff] }
 0x37e   :  { %8172 = vmatpush1.bf16.msra.mxu0 %v15120_v30  ;;  %8660 = vmatpush1.bf16.msra.mxu1 %v15122_v37  ;;  %v848_v37 = vld [vmem:[%s23497_s1 + $0x1910] sm:$0xff] }
 0x37f   :  { %8173 = vmatprep.subr.bf16.mxu0 %v15129_v56  ;;  %8661 = vmatprep.subr.bf16.mxu1 %v15131_v47  ;;  %v852_v56 = vld [vmem:[%s23497_s1 + $0x1930] sm:$0xff]  ;;  %v853_v47 = vld [vmem:[%s23497_s1 + $0x1938] sm:$0xff] }
 0x380   :  { %v15169_v17 = vcombine.high %v848_v37, %v852_v56  ;;  %v880_v53 = vld [vmem:[%s23497_s1 + $0x1a10] sm:$0xff] }
 0x382   :  { %8174 = vmatpush1.bf16.msra.mxu0 %v15128_v3  ;;  %8662 = vmatpush1.bf16.msra.mxu1 %v15130_v44  ;;  %v856_v3 = vld [vmem:[%s23497_s1 + $0x1950] sm:$0xff] }
 0x383   :  { %8204 = vmatprep.subr.bf16.mxu0 %v15137_v1  ;;  %8692 = vmatprep.subr.bf16.mxu1 %v15139_v55  ;;  %v860_v44 = vld [vmem:[%s23497_s1 + $0x1970] sm:$0xff]  ;;  %v861_v1 = vld [vmem:[%s23497_s1 + $0x1978] sm:$0xff]  ;;  %v15168_v55 = vcombine.low %v848_v37, %v852_v56 }
 0x384   :  { %v15177_v39 = vcombine.high %v856_v3, %v860_v44  ;;  %v888_v37 = vld [vmem:[%s23497_s1 + $0x1a50] sm:$0xff] }
 0x385   :  { %8176 = vmatmul.mubr.bf16.vlgmr.msra.gmra.mrb[12].mxu0 %v18320_v13  ;;  %8664 = vmatmul.mubr.bf16.vlgmr.msra.gmra.mrb[12].mxu1 %v18320_v13  ;;  %v841_v13 = vld [vmem:[%s23497_s1 + $0x18d8] sm:$0xff]  ;;  %v892_v56 = vld [vmem:[%s23497_s1 + $0x1a70] sm:$0xff] }
 0x386   :  { %8205 = vmatpush1.bf16.msra.mxu0 %v15136_v20  ;;  %8693 = vmatpush1.bf16.msra.mxu1 %v15138_v35  ;;  %v15163_v30 = vcombine.high %v841_v13, %v845_v31  ;;  %v15162_v36 = vcombine.low %v841_v13, %v845_v31  ;;  %v868_v20 = vld [vmem:[%s23497_s1 + $0x19b0] sm:$0xff]  ;;  %v869_v35 = vld [vmem:[%s23497_s1 + $0x19b8] sm:$0xff] }
 0x387   :  { %8206 = vmatprep.subr.bf16.mxu0 %v15145_v0  ;;  %8694 = vmatprep.subr.bf16.mxu1 %v15147_v9  ;;  %v15176_v0 = vcombine.low %v856_v3, %v860_v44  ;;  %v15185_v24 = vcombine.high %v864_v52, %v868_v20  ;;  %v884_v13 = vld [vmem:[%s23497_s1 + $0x1a30] sm:$0xff]  ;;  %v885_v31 = vld [vmem:[%s23497_s1 + $0x1a38] sm:$0xff] }
 0x388   :  { %8185 = vmatprep.mubr.bf16.mxu0 %v18337_v11  ;;  %8673 = vmatprep.mubr.bf16.mxu1 %v18337_v11  ;;  %v849_v11 = vld [vmem:[%s23497_s1 + $0x1918] sm:$0xff]  ;;  %v896_v3 = vld [vmem:[%s23497_s1 + $0x1a90] sm:$0xff] }
 0x389   :  { %v15171_v14 = vcombine.high %v849_v11, %v853_v47  ;;  %v15170_v62 = vcombine.low %v849_v11, %v853_v47  ;;  %v889_v11 = vld [vmem:[%s23497_s1 + $0x1a58] sm:$0xff]  ;;  %v900_v44 = vld [vmem:[%s23497_s1 + $0x1ab0] sm:$0xff] }
 0x38a   :  { %8207 = vmatpush1.bf16.msra.mxu0 %v15144_v38  ;;  %8695 = vmatpush1.bf16.msra.mxu1 %v15146_v7  ;;  %v877_v38 = vld [vmem:[%s23497_s1 + $0x19f8] sm:$0xff]  ;;  %v15184_v7 = vcombine.low %v864_v52, %v868_v20  ;;  %v904_v52 = vld [vmem:[%s23497_s1 + $0x1ad0] sm:$0xff] }
 0x38b   :  { %8208 = vmatprep.subr.bf16.mxu0 %v15153_v21  ;;  %8696 = vmatprep.subr.bf16.mxu1 %v15155_v19  ;;  %v15193_v19 = vcombine.high %v872_v25, %v876_v12  ;;  %v893_v47 = vld [vmem:[%s23497_s1 + $0x1a78] sm:$0xff]  ;;  %v908_v20 = vld [vmem:[%s23497_s1 + $0x1af0] sm:$0xff] }
 0x38d   :  { %8186 = vmatmul.mubr.bf16.gmra.mrb[16].mxu0 %v18361_v33  ;;  %8674 = vmatmul.mubr.bf16.gmra.mrb[16].mxu1 %v18361_v33  ;;  %v857_v33 = vld [vmem:[%s23497_s1 + $0x1958] sm:$0xff] }
 0x38e   :  { %8209 = vmatpush1.bf16.msra.mxu0 %v15152_v23  ;;  %8697 = vmatpush1.bf16.msra.mxu1 %v15154_v27  ;;  %v15179_v59 = vcombine.high %v857_v33, %v861_v1  ;;  %v15178_v9 = vcombine.low %v857_v33, %v861_v1  ;;  %v15192_v23 = vcombine.low %v872_v25, %v876_v12  ;;  %v897_v33 = vld [vmem:[%s23497_s1 + $0x1a98] sm:$0xff]  ;;  %v912_v25 = vld [vmem:[%s23497_s1 + $0x1b10] sm:$0xff] }
 0x38f   :  { %8210 = vmatprep.subr.bf16.mxu0 %v15161_v54  ;;  %8698 = vmatprep.subr.bf16.mxu1 %v15163_v30  ;;  %v15201_v54 = vcombine.high %v880_v53, %v884_v13  ;;  %v901_v1 = vld [vmem:[%s23497_s1 + $0x1ab8] sm:$0xff]  ;;  %v916_v12 = vld [vmem:[%s23497_s1 + $0x1b30] sm:$0xff] }
 0x390   :  { %8195 = vmatprep.mubr.bf16.mxu0 %v18372_v46  ;;  %8683 = vmatprep.mubr.bf16.mxu1 %v18372_v46  ;;  %v865_v46 = vld [vmem:[%s23497_s1 + $0x1998] sm:$0xff] }
 0x391   :  { %v15187_v15 = vcombine.high %v865_v46, %v869_v35  ;;  %v15186_v21 = vcombine.low %v865_v46, %v869_v35  ;;  %v905_v46 = vld [vmem:[%s23497_s1 + $0x1ad8] sm:$0xff] }
 0x392   :  { %8211 = vmatpush1.bf16.msra.mxu0 %v15160_v45  ;;  %8699 = vmatpush1.bf16.msra.mxu1 %v15162_v36  ;;  %v15200_v45 = vcombine.low %v880_v53, %v884_v13  ;;  %v909_v35 = vld [vmem:[%s23497_s1 + $0x1af8] sm:$0xff]  ;;  %v920_v53 = vld [vmem:[%s23497_s1 + $0x1b50] sm:$0xff] }
 0x393   :  { %8212 = vmatprep.subr.bf16.mxu0 %v15169_v17  ;;  %8700 = vmatprep.subr.bf16.mxu1 %v15171_v14  ;;  %v15209_v17 = vcombine.high %v888_v37, %v892_v56  ;;  %v15211_v14 = vcombine.high %v889_v11, %v893_v47  ;;  %v924_v13 = vld [vmem:[%s23497_s1 + $0x1b70] sm:$0xff] }
 0x395   :  { %8196 = vmatmul.mubr.bf16.gmra.mrb[20].mxu0 %v18396_v50  ;;  %8684 = vmatmul.mubr.bf16.gmra.mrb[20].mxu1 %v18396_v50  ;;  %v873_v50 = vld [vmem:[%s23497_s1 + $0x19d8] sm:$0xff] }
 0x396   :  { %8213 = vmatpush1.bf16.msra.mxu0 %v15168_v55  ;;  %8701 = vmatpush1.bf16.msra.mxu1 %v15170_v62  ;;  %v15195_v32 = vcombine.high %v873_v50, %v877_v38  ;;  %v15194_v27 = vcombine.low %v873_v50, %v877_v38  ;;  %v15208_v55 = vcombine.low %v888_v37, %v892_v56  ;;  %v913_v50 = vld [vmem:[%s23497_s1 + $0x1b18] sm:$0xff]  ;;  %v928_v37 = vld [vmem:[%s23497_s1 + $0x1b90] sm:$0xff] }
 0x397   :  { %8214 = vmatprep.subr.bf16.mxu0 %v15177_v39  ;;  %8702 = vmatprep.subr.bf16.mxu1 %v15179_v59  ;;  %v15210_v62 = vcombine.low %v889_v11, %v893_v47  ;;  %v15217_v39 = vcombine.high %v896_v3, %v900_v44  ;;  %v15219_v59 = vcombine.high %v897_v33, %v901_v1  ;;  %v917_v38 = vld [vmem:[%s23497_s1 + $0x1b38] sm:$0xff]  ;;  %v932_v56 = vld [vmem:[%s23497_s1 + $0x1bb0] sm:$0xff]  ;;  %v1486_v11 = vlaneseq }
 0x398   :  { %8236 = vmatprep.mubr.bf16.mxu0 %v18416_v5  ;;  %8724 = vmatprep.mubr.bf16.mxu1 %v18416_v5  ;;  %v881_v5 = vld [vmem:[%s23497_s1 + $0x1a18] sm:$0xff] }
 0x399   :  { %v15203_v30 = vcombine.high %v881_v5, %v885_v31  ;;  %v15202_v36 = vcombine.low %v881_v5, %v885_v31  ;;  %v921_v5 = vld [vmem:[%s23497_s1 + $0x1b58] sm:$0xff] }
 0x39a   :  { %8215 = vmatpush1.bf16.msra.mxu0 %v15176_v0  ;;  %8703 = vmatpush1.bf16.msra.mxu1 %v15178_v9  ;;  %v15216_v0 = vcombine.low %v896_v3, %v900_v44  ;;  %v15218_v9 = vcombine.low %v897_v33, %v901_v1  ;;  %v925_v31 = vld [vmem:[%s23497_s1 + $0x1b78] sm:$0xff]  ;;  %v936_v44 = vld [vmem:[%s23497_s1 + $0x1bd0] sm:$0xff]  ;;  %v20258_v1 = vshrl.u32 %v1486_v11, 7 }
 0x39b   :  { %8216 = vmatprep.subr.bf16.mxu0 %v15185_v24  ;;  %8704 = vmatprep.subr.bf16.mxu1 %v15187_v15  ;;  %v15225_v24 = vcombine.high %v904_v52, %v908_v20  ;;  %v15227_v15 = vcombine.high %v905_v46, %v909_v35  ;;  %v929_v47 = vld [vmem:[%s23497_s1 + $0x1b98] sm:$0xff]  ;;  %v940_v33 = vld [vmem:[%s23497_s1 + $0x1bf0] sm:$0xff] }
 0x39c   :  { %23633 = vst [vmem:[#allocation12_spill] sm:$0xff] %v20258_v1  ;;  %v964_v11 = vld [vmem:[%s23497_s1 + $0x1cb0] sm:$0xff] }
 0x39e   :  { %8217 = vmatpush1.bf16.msra.mxu0 %v15184_v7  ;;  %8705 = vmatpush1.bf16.msra.mxu1 %v15186_v21  ;;  %v15224_v7 = vcombine.low %v904_v52, %v908_v20  ;;  %v15226_v21 = vcombine.low %v905_v46, %v909_v35  ;;  %v15257_v52 = vcombine.high %v936_v44, %v940_v33  ;;  %v944_v46 = vld [vmem:[%s23497_s1 + $0x1c10] sm:$0xff] }
 0x39f   :  { %8218 = vmatprep.subr.bf16.mxu0 %v15193_v19  ;;  %8706 = vmatprep.subr.bf16.mxu1 %v15195_v32  ;;  %v15233_v19 = vcombine.high %v912_v25, %v916_v12  ;;  %v15235_v32 = vcombine.high %v913_v50, %v917_v38  ;;  %v948_v35 = vld [vmem:[%s23497_s1 + $0x1c30] sm:$0xff] }
 0x3a2   :  { %8219 = vmatpush1.bf16.msra.mxu0 %v15192_v23  ;;  %8707 = vmatpush1.bf16.msra.mxu1 %v15194_v27  ;;  %v15232_v23 = vcombine.low %v912_v25, %v916_v12  ;;  %v15234_v27 = vcombine.low %v913_v50, %v917_v38  ;;  %v15256_v25 = vcombine.low %v936_v44, %v940_v33  ;;  %v20285_v12 = vsub.s32 2, %v20258_v1 }
 0x3a3   :  { %8220 = vmatprep.subr.bf16.mxu0 %v15201_v54  ;;  %8708 = vmatprep.subr.bf16.mxu1 %v15203_v30  ;;  %v15241_v54 = vcombine.high %v920_v53, %v924_v13  ;;  %v15243_v30 = vcombine.high %v921_v5, %v925_v31  ;;  %v15265_v38 = vcombine.high %v944_v46, %v948_v35 }
 0x3a4   :  { %23635 = vst [vmem:[#allocation14_spill] sm:$0xff] %v20285_v12 }
 0x3a6   :  { %8221 = vmatpush1.bf16.msra.mxu0 %v15200_v45  ;;  %8709 = vmatpush1.bf16.msra.mxu1 %v15202_v36  ;;  %v933_v45 = vld [vmem:[%s23497_s1 + $0x1bb8] sm:$0xff]  ;;  %v15240_v36 = vcombine.low %v920_v53, %v924_v13  ;;  %v20297_v53 = vsub.s32 1, %v20258_v1 }
 0x3a7   :  { %8222 = vmatprep.subr.bf16.mxu0 %v15209_v17  ;;  %8710 = vmatprep.subr.bf16.mxu1 %v15211_v14  ;;  %v15242_v17 = vcombine.low %v921_v5, %v925_v31  ;;  %v15249_v14 = vcombine.high %v928_v37, %v932_v56  ;;  %v15251_v3 = vcombine.high %v929_v47, %v933_v45  ;;  %v953_v13 = vld [vmem:[%s23497_s1 + $0x1c58] sm:$0xff]  ;;  %v20306_v31 = vsub.s32 3, %v20258_v1 }
 0x3a8   :  { %23636 = vst [vmem:[#allocation15_spill] sm:$0xff] %v20297_v53  ;;  %v957_v5 = vld [vmem:[%s23497_s1 + $0x1c78] sm:$0xff] }
 0x3a9   :  { %23637 = vst [vmem:[#allocation16_spill] sm:$0xff] %v20306_v31  ;;  %v15274_v44 = vcombine.low %v953_v13, %v957_v5 }
 0x3aa   :  { %8223 = vmatpush1.bf16.msra.mxu0 %v15208_v55  ;;  %8711 = vmatpush1.bf16.msra.mxu1 %v15210_v62  ;;  %v937_v55 = vld [vmem:[%s23497_s1 + $0x1bd8] sm:$0xff] }
 0x3ab   :  { %8224 = vmatprep.subr.bf16.mxu0 %v15217_v39  ;;  %8712 = vmatprep.subr.bf16.mxu1 %v15219_v59  ;;  %v941_v62 = vld [vmem:[%s23497_s1 + $0x1bf8] sm:$0xff]  ;;  %v15248_v39 = vcombine.low %v928_v37, %v932_v56  ;;  %v15250_v59 = vcombine.low %v929_v47, %v933_v45  ;;  %v15275_v37 = vcombine.high %v953_v13, %v957_v5  ;;  %v960_v56 = vld [vmem:[%s23497_s1 + $0x1c90] sm:$0xff] }
 0x3ac   :  { %v15259_v20 = vcombine.high %v937_v55, %v941_v62  ;;  %v15258_v50 = vcombine.low %v937_v55, %v941_v62  ;;  %v15281_v33 = vcombine.high %v960_v56, %v964_v11  ;;  %v968_v62 = vld [vmem:[%s23497_s1 + $0x1cd0] sm:$0xff]  ;;  %v981_v13 = vld [vmem:[%s23497_s1 + $0x1d38] sm:$0xff] }
 0x3ae   :  { %8225 = vmatpush1.bf16.msra.mxu0 %v15216_v0  ;;  %8713 = vmatpush1.bf16.msra.mxu1 %v15218_v9  ;;  %v20273_v0 = vsub.s32 0, %v20258_v1  ;;  %v945_v9 = vld [vmem:[%s23497_s1 + $0x1c18] sm:$0xff] }
 0x3af   :  { %8226 = vmatprep.subr.bf16.mxu0 %v15225_v24  ;;  %8714 = vmatprep.subr.bf16.mxu1 %v15227_v15  ;;  %v949_v24 = vld [vmem:[%s23497_s1 + $0x1c38] sm:$0xff]  ;;  %v1070_v15 = vld [vmem:[%s23498_s2] sm:$0xff] }
 0x3b0   :  { %23634 = vst [vmem:[#allocation13_spill] sm:$0xff] %v20273_v0  ;;  %v20322_v45 = vrot.slane %v1070_v15, %v20297_v53 }
 0x3b2   :  { %8227 = vmatpush1.bf16.msra.mxu0 %v15224_v7  ;;  %8715 = vmatpush1.bf16.msra.mxu1 %v15226_v21  ;;  %v15267_v7 = vcombine.high %v945_v9, %v949_v24  ;;  %v952_v21 = vld [vmem:[%s23497_s1 + $0x1c50] sm:$0xff] }
 0x3b3   :  { %8228 = vmatprep.subr.bf16.mxu0 %v15233_v19  ;;  %8716 = vmatprep.subr.bf16.mxu1 %v15235_v32  ;;  %v956_v19 = vld [vmem:[%s23497_s1 + $0x1c70] sm:$0xff]  ;;  %v20294_v32 = vrot.slane %v1070_v15, %v20273_v0 }
 0x3b5   :  { %v20319_v47 = vadd.f32 %v19502_v40, %v20294_v32  ;;  %v15272_v40 = vcombine.low %v952_v21, %v956_v19 }
 0x3b6   :  { %8229 = vmatpush1.bf16.msra.mxu0 %v15232_v23  ;;  %8717 = vmatpush1.bf16.msra.mxu1 %v15234_v27  ;;  %v15264_v23 = vcombine.low %v944_v46, %v948_v35  ;;  %v20309_v27 = vrot.slane %v1070_v15, %v20285_v12  ;;  %v15280_v35 = vcombine.low %v960_v56, %v964_v11 }
 0x3b7   :  { %8230 = vmatprep.subr.bf16.mxu0 %v15241_v54  ;;  %8718 = vmatprep.subr.bf16.mxu1 %v15243_v30  ;;  %v15266_v54 = vcombine.low %v945_v9, %v949_v24  ;;  %v15273_v30 = vcombine.high %v952_v21, %v956_v19  ;;  %23638 = vst [vmem:[#allocation17_spill] sm:$0xff] %v20319_v47  ;;  %v977_v19 = vld [vmem:[%s23497_s1 + $0x1d18] sm:$0xff] }
 0x3ba   :  { %8231 = vmatpush1.bf16.msra.mxu0 %v15240_v36  ;;  %8719 = vmatpush1.bf16.msra.mxu1 %v15242_v17  ;;  %v961_v36 = vld [vmem:[%s23497_s1 + $0x1c98] sm:$0xff] }
 0x3bb   :  { %8232 = vmatprep.subr.bf16.mxu0 %v15249_v14  ;;  %8720 = vmatprep.subr.bf16.mxu1 %v15251_v3  ;;  %v965_v17 = vld [vmem:[%s23497_s1 + $0x1cb8] sm:$0xff]  ;;  %v20332_v14 = vrot.slane %v1070_v15, %v20306_v31  ;;  %v20337_v3 = vadd.f32 %v19511_v61, %v20309_v27  ;;  %v9054_v61 = vmul.f32 %v20319_v47, %v20319_v47 }
 0x3bc   :  { %v15283_v55 = vcombine.high %v961_v36, %v965_v17  ;;  %v15282_v24 = vcombine.low %v961_v36, %v965_v17  ;;  %v15299_v36 = vcombine.high %v977_v19, %v981_v13  ;;  %v984_v17 = vld [vmem:[%s23497_s1 + $0x1d50] sm:$0xff] }
 0x3bd   :  { %23639 = vst [vmem:[#allocation18_spill] sm:$0xff] %v20337_v3  ;;  %v20362_v46 = vadd.f32 %v19522_v57, %v20332_v14  ;;  %v8826_v9 = vrot.slane %v20337_v3, 4  ;;  %v980_v57 = vld [vmem:[%s23497_s1 + $0x1d30] sm:$0xff] }
 0x3be   :  { %8233 = vmatpush1.bf16.msra.mxu0 %v15248_v39  ;;  %8721 = vmatpush1.bf16.msra.mxu1 %v15250_v59  ;;  %v972_v39 = vld [vmem:[%s23497_s1 + $0x1cf0] sm:$0xff]  ;;  %v20351_v59 = vadd.f32 %v19513_v6, %v20322_v45  ;;  %v9056_v6 = vmul.f32 %v20337_v3, %v20337_v3 }
 0x3bf   :  { %8234 = vmatprep.subr.bf16.mxu0 %v15257_v52  ;;  %8722 = vmatprep.subr.bf16.mxu1 %v15259_v20  ;;  %v969_v52 = vld [vmem:[%s23497_s1 + $0x1cd8] sm:$0xff]  ;;  %23641 = vst [vmem:[#allocation20_spill] sm:$0xff] %v20362_v46  ;;  %v15289_v15 = vcombine.high %v968_v62, %v972_v39  ;;  %v8832_v5 = vrot.slane %v20362_v46, 4 }
 0x3c0   :  { %23640 = vst [vmem:[#allocation19_spill] sm:$0xff] %v20351_v59  ;;  %v973_v20 = vld [vmem:[%s23497_s1 + $0x1cf8] sm:$0xff]  ;;  %v9055_v21 = vmul.f32 %v20351_v59, %v20351_v59 }
 0x3c1   :  { %v15290_v56 = vcombine.low %v969_v52, %v973_v20 }
 0x3c2   :  { %8235 = vmatpush1.bf16.msra.mxu0 %v15256_v25  ;;  %8723 = vmatpush1.bf16.msra.mxu1 %v15258_v50  ;;  %v15291_v25 = vcombine.high %v969_v52, %v973_v20  ;;  %v20407_v20 = vadd.f32 %v19524_v58, %v20294_v32  ;;  %v996_v58 = vld [vmem:[%s23497_s1 + $0x1db0] sm:$0xff] }
 0x3c3   :  { %8265 = vmatprep.subr.bf16.mxu0 %v15265_v38  ;;  %8753 = vmatprep.subr.bf16.mxu1 %v15267_v7  ;;  %v9094_v38 = vrot.slane %v9054_v61, 4  ;;  %v8820_v7 = vrot.slane %v20351_v59, 4 }
 0x3c4   :  { %23642 = vst [vmem:[#allocation21_spill] sm:$0xff] %v20407_v20 }
 0x3c5   :  { %8237 = vmatmul.mubr.bf16.vlgmr.msra.gmra.mrb[12].mxu0 %v18559_v63  ;;  %8725 = vmatmul.mubr.bf16.vlgmr.msra.gmra.mrb[12].mxu1 %v18559_v63  ;;  %v8814_v63 = vrot.slane %v20319_v47, 4 }
 0x3c6   :  { %8266 = vmatpush1.bf16.msra.mxu0 %v15264_v23  ;;  %8754 = vmatpush1.bf16.msra.mxu1 %v15266_v54  ;;  %v9057_v23 = vmul.f32 %v20362_v46, %v20362_v46  ;;  %v15288_v54 = vcombine.low %v968_v62, %v972_v39  ;;  %v985_v62 = vld [vmem:[%s23497_s1 + $0x1d58] sm:$0xff] }
 0x3c7   :  { %8267 = vmatprep.subr.bf16.mxu0 %v15273_v30  ;;  %8755 = vmatprep.subr.bf16.mxu1 %v15275_v37  ;;  %v8815_v50 = vadd.f32 %v20319_v47, %v8814_v63  ;;  %v8827_v30 = vadd.f32 %v20337_v3, %v8826_v9  ;;  %v9106_v37 = vrot.slane %v9056_v6, 4  ;;  %v989_v39 = vld [vmem:[%s23497_s1 + $0x1d78] sm:$0xff]  ;;  %v8833_v63 = vadd.f32 %v20362_v46, %v8832_v5 }
 0x3c8   :  { %8246 = vmatprep.mubr.bf16.mxu0 %v18576_v26  ;;  %8734 = vmatprep.mubr.bf16.mxu1 %v18576_v26  ;;  %v976_v26 = vld [vmem:[%s23497_s1 + $0x1d10] sm:$0xff]  ;;  %v9112_v52 = vrot.slane %v9057_v23, 4 }
 0x3c9   :  { %v15297_v11 = vcombine.high %v976_v26, %v980_v57  ;;  %v9107_v9 = vadd.f32 %v9106_v37, %v9056_v6  ;;  %v993_v6 = vld [vmem:[%s23497_s1 + $0x1d98] sm:$0xff] }
 0x3ca   :  { %8268 = vmatpush1.bf16.msra.mxu0 %v15272_v40  ;;  %8756 = vmatpush1.bf16.msra.mxu1 %v15274_v44  ;;  %v988_v40 = vld [vmem:[%s23497_s1 + $0x1d70] sm:$0xff]  ;;  %v9095_v44 = vadd.f32 %v9094_v38, %v9054_v61  ;;  %v15296_v61 = vcombine.low %v976_v26, %v980_v57  ;;  %v20424_v5 = vadd.f32 %v9112_v52, %v9057_v23  ;;  %v1005_v52 = vld [vmem:[%s23497_s1 + $0x1df8] sm:$0xff] }
 0x3cb   :  { %8269 = vmatprep.subr.bf16.mxu0 %v15281_v33  ;;  %8757 = vmatprep.subr.bf16.mxu1 %v15283_v55  ;;  %v8821_v33 = vadd.f32 %v20351_v59, %v8820_v7  ;;  %v9100_v55 = vrot.slane %v9055_v21, 4  ;;  %v9108_v37 = vrot.slane %v9107_v9, 2  ;;  %v20435_v23 = vadd.f32 %v19526_v48, %v20309_v27 }
 0x3cc   :  { %v9096_v7 = vrot.slane %v9095_v44, 2 }
 0x3cd   :  { %8247 = vmatmul.mubr.bf16.gmra.mrb[16].mxu0 %v18600_v43  ;;  %8735 = vmatmul.mubr.bf16.gmra.mrb[16].mxu1 %v18600_v43  ;;  %v8816_v43 = vrot.slane %v8815_v50, 2  ;;  %v8822_v26 = vrot.slane %v8821_v33, 2  ;;  %v9101_v57 = vadd.f32 %v9100_v55, %v9055_v21  ;;  %23643 = vst [vmem:[#allocation22_spill] sm:$0xff] %v20435_v23 }
 0x3ce   :  { %8270 = vmatpush1.bf16.msra.mxu0 %v15280_v35  ;;  %8758 = vmatpush1.bf16.msra.mxu1 %v15282_v24  ;;  %v8828_v35 = vrot.slane %v8827_v30, 2  ;;  %v15298_v24 = vcombine.low %v977_v19, %v981_v13  ;;  %v997_v19 = vld [vmem:[%s23497_s1 + $0x1db8] sm:$0xff]  ;;  %v8834_v13 = vrot.slane %v8833_v63, 2 }
 0x3cf   :  { %8271 = vmatprep.subr.bf16.mxu0 %v15289_v15  ;;  %8759 = vmatprep.subr.bf16.mxu1 %v15291_v25  ;;  %v15305_v15 = vcombine.high %v984_v17, %v988_v40  ;;  %v15307_v25 = vcombine.high %v985_v62, %v989_v39  ;;  %v8817_v38 = vadd.f32 %v8816_v43, %v8815_v50 }
 0x3d0   :  { %8256 = vmatprep.mubr.bf16.mxu0 %v18611_v8  ;;  %8744 = vmatprep.mubr.bf16.mxu1 %v18611_v8  ;;  %v20412_v8 = vld [vmem:[%s23497_s1 + $0x1d90] sm:$0xff]  ;;  %v15304_v50 = vcombine.low %v984_v17, %v988_v40  ;;  %v20429_v21 = vadd.f32 %v8828_v35, %v8827_v30  ;;  %v20439_v43 = vadd.f32 %v19528_v41, %v20322_v45  ;;  %v23645_v40 = vld [vmem:[#allocation5_spill] sm:$0xff]  ;;  %v1001_v41 = vld [vmem:[%s23497_s1 + $0x1dd8] sm:$0xff] }
 0x3d1   :  { %v1000_v30 = vld [vmem:[%s23497_s1 + $0x1dd0] sm:$0xff]  ;;  %v8818_v55 = vrot.slane %v8817_v38, 1  ;;  %v8823_v48 = vadd.f32 %v8822_v26, %v8821_v33  ;;  %v20464_v33 = vadd.f32 %v9108_v37, %v9107_v9  ;;  %v1009_v37 = vld [vmem:[%s23497_s1 + $0x1e18] sm:$0xff]  ;;  %v15322_v3 = vcombine.low %v1001_v41, %v1005_v52 }
 0x3d2   :  { %8272 = vmatpush1.bf16.msra.mxu0 %v15288_v54  ;;  %8760 = vmatpush1.bf16.msra.mxu1 %v15290_v56  ;;  %v9062_v54 = vmul.f32 %v20407_v20, %v20407_v20  ;;  %v15306_v56 = vcombine.low %v985_v62, %v989_v39  ;;  %23644 = vst [vmem:[#allocation23_spill] sm:$0xff] %v20439_v43  ;;  %v1004_v17 = vld [vmem:[%s23497_s1 + $0x1df0] sm:$0xff]  ;;  %v9102_v39 = vrot.slane %v9101_v57, 2 }
 0x3d3   :  { %8273 = vmatprep.subr.bf16.mxu0 %v15297_v11  ;;  %8761 = vmatprep.subr.bf16.mxu1 %v15299_v36  ;;  %v15313_v11 = vcombine.high %v20412_v8, %v996_v58  ;;  %v8862_v36 = vrot.slane %v20407_v20, 4  ;;  %v20448_v62 = vadd.f32 %v9096_v7, %v9095_v44  ;;  %v15312_v44 = vcombine.low %v20412_v8, %v996_v58  ;;  %v1008_v9 = vld [vmem:[%s23497_s1 + $0x1e10] sm:$0xff] }
 0x3d4   :  { %v9142_v35 = vrot.slane %v9062_v54, 4  ;;  %v15321_v7 = vcombine.high %v1000_v30, %v1004_v17  ;;  %v1012_v8 = vld [vmem:[%s23497_s1 + $0x1e30] sm:$0xff]  ;;  %v8824_v58 = vrot.slane %v8823_v48, 1 }
 0x3d5   :  { %8257 = vmatmul.mubr.bf16.gmra.mrb[20].mxu0 %v18635_v34  ;;  %8745 = vmatmul.mubr.bf16.gmra.mrb[20].mxu1 %v18635_v34  ;;  %v15315_v34 = vcombine.high %v993_v6, %v997_v19  ;;  %v8863_v26 = vadd.f32 %v20407_v20, %v8862_v36  ;;  %v15329_v46 = vcombine.high %v1008_v9, %v1012_v8 }
 0x3d6   :  { %8274 = vmatpush1.bf16.msra.mxu0 %v15296_v61  ;;  %8762 = vmatpush1.bf16.msra.mxu1 %v15298_v24  ;;  %v20457_v61 = vadd.f32 %v8834_v13, %v8833_v63  ;;  %v20461_v24 = vadd.f32 %v19530_v29, %v20332_v14  ;;  %v9064_v63 = vmul.f32 %v20435_v23, %v20435_v23  ;;  %v8868_v13 = vrot.slane %v20439_v43, 4 }
 0x3d7   :  { %8275 = vmatprep.subr.bf16.mxu0 %v15305_v15  ;;  %8763 = vmatprep.subr.bf16.mxu1 %v15307_v25  ;;  %v9114_v15 = vrot.slane %v20424_v5, 2  ;;  %v15314_v25 = vcombine.low %v993_v6, %v997_v19  ;;  %v15323_v29 = vcombine.high %v1001_v41, %v1005_v52  ;;  %v20477_v6 = vadd.f32 %v9102_v39, %v9101_v57 }
 0x3d8   :  { %8297 = vmatprep.mubr.bf16.mxu0 %v23645_v40  ;;  %8785 = vmatprep.mubr.bf16.mxu1 %v23645_v40  ;;  %23646 = vst [vmem:[#allocation5_spill] sm:$0xff] %v20461_v24  ;;  %v8874_v19 = vrot.slane %v20435_v23, 4  ;;  %v9143_v36 = vadd.f32 %v9142_v35, %v9062_v54  ;;  %v15320_v57 = vcombine.low %v1000_v30, %v1004_v17  ;;  %v9098_v40 = vrot.slane %v20448_v62, 1  ;;  %v1016_v54 = vld [vmem:[%s23497_s1 + $0x1e50] sm:$0xff]  ;;  %v1017_v35 = vld [vmem:[%s23497_s1 + $0x1e58] sm:$0xff] }
 0x3d9   :  { %v9065_v39 = vmul.f32 %v20461_v24, %v20461_v24  ;;  %v8864_v20 = vrot.slane %v8863_v26, 2  ;;  %v9154_v47 = vrot.slane %v9064_v63, 4  ;;  %v8869_v59 = vadd.f32 %v20439_v43, %v8868_v13  ;;  %v1020_v30 = vld [vmem:[%s23497_s1 + $0x1e70] sm:$0xff] }
 0x3da   :  { %8276 = vmatpush1.bf16.msra.mxu0 %v15304_v50  ;;  %8764 = vmatpush1.bf16.msra.mxu1 %v15306_v56  ;;  %v9063_v50 = vmul.f32 %v20439_v43, %v20439_v43  ;;  %v1013_v56 = vld [vmem:[%s23497_s1 + $0x1e38] sm:$0xff]  ;;  %v8836_v17 = vrot.slane %v20457_v61, 1  ;;  %v20505_v52 = vadd.f32 %v19544_v42, %v20294_v32  ;;  %v15337_v43 = vcombine.high %v1016_v54, %v1020_v30 }
 0x3db   :  { %8277 = vmatprep.subr.bf16.mxu0 %v15313_v11  ;;  %8765 = vmatprep.subr.bf16.mxu1 %v15315_v34  ;;  %v20488_v11 = vadd.f32 %v8818_v55, %v8817_v38  ;;  %v8880_v34 = vrot.slane %v20461_v24, 4  ;;  %v15331_v38 = vcombine.high %v1009_v37, %v1013_v56  ;;  %v8875_v55 = vadd.f32 %v20435_v23, %v8874_v19 }
 0x3dc   :  { %v9148_v41 = vrot.slane %v9063_v50, 4  ;;  %23647 = vst [vmem:[#allocation24_spill] sm:$0xff] %v20505_v52  ;;  %v20517_v19 = vadd.f32 %v8824_v58, %v8823_v48  ;;  %v9160_v42 = vrot.slane %v9065_v39, 4  ;;  %v15330_v23 = vcombine.low %v1009_v37, %v1013_v56 }
 0x3dd   :  { %v8881_v13 = vadd.f32 %v20461_v24, %v8880_v34  ;;  %v8865_v12 = vadd.f32 %v8864_v20, %v8863_v26  ;;  %v9155_v31 = vadd.f32 %v9154_v47, %v9064_v63  ;;  %v8870_v0 = vrot.slane %v8869_v59, 2  ;;  %v1025_v47 = vld [vmem:[%s23497_s1 + $0x1e98] sm:$0xff] }
 0x3de   :  { %8278 = vmatpush1.bf16.msra.mxu0 %v15312_v44  ;;  %8766 = vmatpush1.bf16.msra.mxu1 %v15314_v25  ;;  %v1021_v44 = vld [vmem:[%s23497_s1 + $0x1e78] sm:$0xff]  ;;  %v20514_v25 = vadd.f32 %v9114_v15, %v20424_v5  ;;  %v1024_v5 = vld [vmem:[%s23497_s1 + $0x1e90] sm:$0xff]  ;;  %v20526_v48 = vadd.f32 %v9098_v40, %v20448_v62  ;;  %v20536_v26 = vadd.f32 %v8836_v17, %v20457_v61 }
 0x3df   :  { %8279 = vmatprep.subr.bf16.mxu0 %v15321_v7  ;;  %8767 = vmatprep.subr.bf16.mxu1 %v15323_v29  ;;  %v9144_v7 = vrot.slane %v9143_v36, 2  ;;  %v15328_v29 = vcombine.low %v1008_v9, %v1012_v8  ;;  %v15339_v53 = vcombine.high %v1017_v35, %v1021_v44  ;;  %v1028_v15 = vld [vmem:[%s23497_s1 + $0x1eb0] sm:$0xff]  ;;  %v8910_v9 = vrot.slane %v20505_v52, 4  ;;  %v1029_v20 = vld [vmem:[%s23497_s1 + $0x1eb8] sm:$0xff] }
 0x3e0   :  { %v8882_v8 = vrot.slane %v8881_v13, 2  ;;  %v15336_v62 = vcombine.low %v1016_v54, %v1020_v30  ;;  %v9161_v58 = vadd.f32 %v9160_v42, %v9065_v39  ;;  %v15345_v37 = vcombine.high %v1024_v5, %v1028_v15  ;;  %v1036_v61 = vld [vmem:[%s23497_s1 + $0x1ef0] sm:$0xff] }
 0x3e1   :  { %v9145_v63 = vadd.f32 %v9144_v7, %v9143_v36  ;;  %v8866_v56 = vrot.slane %v8865_v12, 1  ;;  %v9156_v34 = vrot.slane %v9155_v31, 2  ;;  %v15347_v40 = vcombine.high %v1025_v47, %v1029_v20 }
 0x3e2   :  { %8280 = vmatpush1.bf16.msra.mxu0 %v15320_v57  ;;  %8768 = vmatpush1.bf16.msra.mxu1 %v15322_v3  ;;  %v8876_v3 = vrot.slane %v8875_v55, 2  ;;  %v8871_v57 = vadd.f32 %v8870_v0, %v8869_v59  ;;  %v1033_v0 = vld [vmem:[%s23497_s1 + $0x1ed8] sm:$0xff]  ;;  %v8883_v54 = vadd.f32 %v8882_v8, %v8881_v13  ;;  %v20557_v30 = vadd.f32 %v19548_v22, %v20322_v45  ;;  %v1040_v22 = vld [vmem:[%s23497_s1 + $0x1f10] sm:$0xff] }
 0x3e3   :  { %8281 = vmatprep.subr.bf16.mxu0 %v15329_v46  ;;  %8769 = vmatprep.subr.bf16.mxu1 %v15331_v38  ;;  %v9149_v46 = vadd.f32 %v9148_v41, %v9063_v50  ;;  %v15338_v50 = vcombine.low %v1017_v35, %v1021_v44  ;;  %v1032_v38 = vld [vmem:[%s23497_s1 + $0x1ed0] sm:$0xff]  ;;  %v9146_v59 = vrot.slane %v9145_v63, 1  ;;  %v15344_v17 = vcombine.low %v1024_v5, %v1028_v15 }
 0x3e4   :  { %v20544_v36 = vadd.f32 %v8876_v3, %v8875_v55  ;;  %23648 = vst [vmem:[#allocation25_spill] sm:$0xff] %v20557_v30  ;;  %v9162_v55 = vrot.slane %v9161_v58, 2  ;;  %v20561_v41 = vadd.f32 %v19546_v18, %v20309_v27  ;;  %v15346_v35 = vcombine.low %v1025_v47, %v1029_v20  ;;  %v1044_v18 = vld [vmem:[%s23497_s1 + $0x1f30] sm:$0xff] }
 0x3e5   :  { %v9150_v39 = vrot.slane %v9149_v46, 2  ;;  %v15353_v44 = vcombine.high %v1032_v38, %v1036_v61  ;;  %v20563_v7 = vadd.f32 %v8866_v56, %v8865_v12  ;;  %v8872_v13 = vrot.slane %v8871_v57, 1 }
 0x3e6   :  { %8282 = vmatpush1.bf16.msra.mxu0 %v15328_v29  ;;  %8770 = vmatpush1.bf16.msra.mxu1 %v15330_v23  ;;  %v8911_v23 = vadd.f32 %v20505_v52, %v8910_v9  ;;  %23649 = vst [vmem:[#allocation26_spill] sm:$0xff] %v20561_v41  ;;  %v20565_v29 = vadd.f32 %v9156_v34, %v9155_v31  ;;  %v1041_v31 = vld [vmem:[%s23497_s1 + $0x1f18] sm:$0xff]  ;;  %v8884_v20 = vrot.slane %v8883_v54, 1 }
 0x3e7   :  { %8283 = vmatprep.subr.bf16.mxu0 %v15337_v43  ;;  %8771 = vmatprep.subr.bf16.mxu1 %v15339_v53  ;;  %v9070_v43 = vmul.f32 %v20505_v52, %v20505_v52  ;;  %v1037_v53 = vld [vmem:[%s23497_s1 + $0x1ef8] sm:$0xff]  ;;  %v20573_v5 = vadd.f32 %v9150_v39, %v9149_v46  ;;  %v20577_v12 = vadd.f32 %v19556_v16, %v20332_v14  ;;  %v8916_v46 = vrot.slane %v20557_v30, 4 }
 0x3e8   :  { %v15355_v42 = vcombine.high %v1033_v0, %v1037_v53  ;;  %v8912_v15 = vrot.slane %v8911_v23, 2  ;;  %v1045_v9 = vld [vmem:[%s23497_s1 + $0x1f38] sm:$0xff]  ;;  %v20585_v47 = vadd.f32 %v9146_v59, %v9145_v63  ;;  %v15352_v8 = vcombine.low %v1032_v38, %v1036_v61  ;;  %v1052_v38 = vld [vmem:[%s23497_s1 + $0x1f70] sm:$0xff] }
 0x3e9   :  { %v9190_v3 = vrot.slane %v9070_v43, 4  ;;  %23650 = vst [vmem:[#allocation27_spill] sm:$0xff] %v20577_v12  ;;  %v8922_v16 = vrot.slane %v20561_v41, 4  ;;  %v9072_v56 = vmul.f32 %v20561_v41, %v20561_v41  ;;  %v9071_v63 = vmul.f32 %v20557_v30, %v20557_v30  ;;  %v1053_v59 = vld [vmem:[%s23497_s1 + $0x1f78] sm:$0xff] }
 0x3ea   :  { %8284 = vmatpush1.bf16.msra.mxu0 %v15336_v62  ;;  %8772 = vmatpush1.bf16.msra.mxu1 %v15338_v50  ;;  %v20588_v62 = vadd.f32 %v9162_v55, %v9161_v58  ;;  %v15354_v50 = vcombine.low %v1033_v0, %v1037_v53  ;;  %v20597_v34 = vadd.f32 %v19558_v10, %v20294_v32  ;;  %v1048_v58 = vld [vmem:[%s23497_s1 + $0x1f50] sm:$0xff]  ;;  %v8928_v53 = vrot.slane %v20577_v12, 4  ;;  %v1049_v10 = vld [vmem:[%s23497_s1 + $0x1f58] sm:$0xff] }
 0x3eb   :  { %8285 = vmatprep.subr.bf16.mxu0 %v15345_v37  ;;  %8773 = vmatprep.subr.bf16.mxu1 %v15347_v40  ;;  %v15361_v37 = vcombine.high %v1040_v22, %v1044_v18  ;;  %v15363_v40 = vcombine.high %v1041_v31, %v1045_v9  ;;  %v20605_v61 = vadd.f32 %v8872_v13, %v8871_v57  ;;  %v9202_v13 = vrot.slane %v9072_v56, 4 }
 0x3ec   :  { %23651 = vst [vmem:[#allocation28_spill] sm:$0xff] %v20597_v34  ;;  %v8913_v39 = vadd.f32 %v8912_v15, %v8911_v23  ;;  %v9191_v0 = vadd.f32 %v9190_v3, %v9070_v43  ;;  %v8917_v55 = vadd.f32 %v20557_v30, %v8916_v46  ;;  %v20619_v57 = vmul.f32 %v20577_v12, %v20577_v12  ;;  %v1056_v3 = vld [vmem:[%s23497_s1 + $0x1f90] sm:$0xff] }
 0x3ed   :  { %v15360_v23 = vcombine.low %v1040_v22, %v1044_v18  ;;  %v8923_v43 = vadd.f32 %v20561_v41, %v8922_v16  ;;  %v8958_v15 = vrot.slane %v20597_v34, 4  ;;  %v1060_v22 = vld [vmem:[%s23497_s1 + $0x1fb0] sm:$0xff]  ;;  %v8929_v46 = vadd.f32 %v20577_v12, %v8928_v53 }
 0x3ee   :  { %8286 = vmatpush1.bf16.msra.mxu0 %v15344_v17  ;;  %8774 = vmatpush1.bf16.msra.mxu1 %v15346_v35  ;;  %v20614_v17 = vadd.f32 %v8884_v20, %v8883_v54  ;;  %v15362_v35 = vcombine.low %v1041_v31, %v1045_v9  ;;  %v15371_v54 = vcombine.high %v1049_v10, %v1053_v59  ;;  %v8914_v18 = vrot.slane %v8913_v39, 1  ;;  %v1057_v9 = vld [vmem:[%s23497_s1 + $0x1f98] sm:$0xff] }
 0x3ef   :  { %8287 = vmatprep.subr.bf16.mxu0 %v15353_v44  ;;  %8775 = vmatprep.subr.bf16.mxu1 %v15355_v42  ;;  %v15369_v44 = vcombine.high %v1048_v58, %v1052_v38  ;;  %v9196_v42 = vrot.slane %v9071_v63, 4  ;;  %v9192_v20 = vrot.slane %v9191_v0, 2  ;;  %v20632_v31 = vadd.f32 %v19568_v2, %v20322_v45 }
 0x3f0   :  { %v8918_v16 = vrot.slane %v8917_v55, 2  ;;  %v15368_v2 = vcombine.low %v1048_v58, %v1052_v38  ;;  %v9208_v53 = vrot.slane %v20619_v57, 4  ;;  %v15370_v41 = vcombine.low %v1049_v10, %v1053_v59  ;;  %v1065_v10 = vld [vmem:[%s23497_s1 + $0x1fd8] sm:$0xff] }
 0x3f1   :  { %23652 = vst [vmem:[#allocation29_spill] sm:$0xff] %v20632_v31  ;;  %v15377_v12 = vcombine.high %v1056_v3, %v1060_v22  ;;  %v20649_v24 = vadd.f32 %v9202_v13, %v9072_v56  ;;  %v20651_v52 = vadd.f32 %v9196_v42, %v9071_v63  ;;  %v20660_v58 = vadd.f32 %v8914_v18, %v8913_v39  ;;  %v1069_v59 = vld [vmem:[%s23497_s1 + $0x1ff8] sm:$0xff] }
 0x3f2   :  { %8288 = vmatpush1.bf16.msra.mxu0 %v15352_v8  ;;  %8776 = vmatpush1.bf16.msra.mxu1 %v15354_v50  ;;  %v1061_v8 = vld [vmem:[%s23497_s1 + $0x1fb8] sm:$0xff]  ;;  %v20642_v50 = vadd.f32 %v19566_v28, %v20309_v27  ;;  %v8959_v28 = vadd.f32 %v20597_v34, %v8958_v15  ;;  %v20662_v38 = vadd.f32 %v9192_v20, %v9191_v0  ;;  %v8930_v56 = vrot.slane %v8929_v46, 2 }
 0x3f3   :  { %8289 = vmatprep.subr.bf16.mxu0 %v15361_v37  ;;  %8777 = vmatprep.subr.bf16.mxu1 %v15363_v40  ;;  %v20646_v37 = vadd.f32 %v19594_v49, %v20322_v45  ;;  %v8924_v40 = vrot.slane %v8923_v43, 2  ;;  %v15379_v30 = vcombine.high %v1057_v9, %v1061_v8  ;;  %v1064_v49 = vld [vmem:[%s23497_s1 + $0x1fd0] sm:$0xff]  ;;  %v8964_v63 = vrot.slane %v20632_v31, 4 }
 0x3f4   :  { %23653 = vst [vmem:[#allocation30_spill] sm:$0xff] %v20642_v50  ;;  %v1068_v45 = vld [vmem:[%s23497_s1 + $0x1ff0] sm:$0xff]  ;;  %v15376_v39 = vcombine.low %v1056_v3, %v1060_v22  ;;  %v20676_v13 = vadd.f32 %v19584_v4, %v20294_v32  ;;  %v15378_v42 = vcombine.low %v1057_v9, %v1061_v8  ;;  %v8960_v18 = vrot.slane %v8959_v28, 2  ;;  %v1074_v3 = vld [vmem:[%s23501_s5 + $0x8] sm:$0xff] }
 0x3f5   :  { %23654 = vst [vmem:[#allocation31_spill] sm:$0xff] %v20646_v37  ;;  %v15385_v15 = vcombine.high %v1064_v49, %v1068_v45  ;;  %v15387_v20 = vcombine.high %v1065_v10, %v1069_v59  ;;  %v1082_v4 = vld [vmem:[%s23501_s5 + $0x48] sm:$0xff]  ;;  %v8931_v32 = vadd.f32 %v8930_v56, %v8929_v46  ;;  %v15384_v9 = vcombine.low %v1064_v49, %v1068_v45 }
 0x3f6   :  { %8290 = vmatpush1.bf16.msra.mxu0 %v15360_v23  ;;  %8778 = vmatpush1.bf16.msra.mxu1 %v15362_v35  ;;  %v8919_v23 = vadd.f32 %v8918_v16, %v8917_v55  ;;  %v8970_v35 = vrot.slane %v20642_v50, 4  ;;  %23655 = vst [vmem:[#allocation32_spill] sm:$0xff] %v20676_v13  ;;  %v20682_v55 = vadd.f32 %v19570_v60, %v20332_v14 }
 0x3f7   :  { %8291 = vmatprep.subr.bf16.mxu0 %v15369_v44  ;;  %8779 = vmatprep.subr.bf16.mxu1 %v15371_v54  ;;  %v9012_v44 = vrot.slane %v20646_v37, 4  ;;  %v20678_v54 = vadd.f32 %v8924_v40, %v8923_v43  ;;  %v8965_v60 = vadd.f32 %v20632_v31, %v8964_v63  ;;  %v20702_v8 = vmul.f32 %v20642_v50, %v20642_v50 }
 0x3f8   :  { %23656 = vst [vmem:[#allocation33_spill] sm:$0xff] %v20682_v55  ;;  %v8971_v43 = vadd.f32 %v20642_v50, %v8970_v35  ;;  %v15386_v46 = vcombine.low %v1065_v10, %v1069_v59  ;;  %v15733_v16 = vpack.c.bf16 %v1082_v4, %v1074_v3  ;;  %v8976_v56 = vrot.slane %v20682_v55, 4  ;;  %v1098_v3 = vld [vmem:[%s23501_s5 + $0xc8] sm:$0xff] }
 0x3f9   :  { %v9013_v22 = vadd.f32 %v20646_v37, %v9012_v44  ;;  %v8932_v63 = vrot.slane %v8931_v32, 1  ;;  %v8966_v45 = vrot.slane %v8965_v60, 2  ;;  %v9087_v35 = vmul.f32 %v20646_v37, %v20646_v37 }
 0x3fa   :  { %8292 = vmatpush1.bf16.msra.mxu0 %v15368_v2  ;;  %8780 = vmatpush1.bf16.msra.mxu1 %v15370_v41  ;;  %v20691_v41 = vadd.f32 %v9208_v53, %v20619_v57  ;;  %v9006_v57 = vrot.slane %v20676_v13, 4  ;;  %v8961_v53 = vadd.f32 %v8960_v18, %v8959_v28  ;;  %v20715_v59 = vadd.f32 %v19602_v51, %v20332_v14  ;;  %v1073_v28 = vld [vmem:[%s23501_s5] sm:$0xff]  ;;  %v23658_v51 = vld [vmem:[#allocation11_spill] sm:$0xff]  ;;  %v23660_v2 = vld [vmem:[#allocation6_spill] sm:$0xff] }
 0x3fb   :  { %8293 = vmatprep.subr.bf16.mxu0 %v15377_v12  ;;  %8781 = vmatprep.subr.bf16.mxu1 %v15379_v30  ;;  %v20695_v12 = vmul.f32 %v20597_v34, %v20597_v34  ;;  %v8920_v30 = vrot.slane %v8919_v23, 1  ;;  %v9014_v10 = vrot.slane %v9013_v22, 2  ;;  %v20729_v14 = vadd.f32 %v23658_v51, %v20309_v27 }
 0x3fc   :  { %23657 = vst [vmem:[#allocation34_spill] sm:$0xff] %v20715_v59  ;;  %v9007_v18 = vadd.f32 %v20676_v13, %v9006_v57  ;;  %v8962_v4 = vrot.slane %v8961_v53, 1  ;;  %v9198_v27 = vrot.slane %v20651_v52, 2  ;;  %v20741_v57 = vadd.f32 %v8932_v63, %v8931_v32  ;;  %v1097_v32 = vld [vmem:[%s23501_s5 + $0xc0] sm:$0xff] }
 0x3fd   :  { %v20711_v44 = vadd.f32 %v8920_v30, %v8919_v23  ;;  %v9079_v23 = vmul.f32 %v20632_v31, %v20632_v31  ;;  %23659 = vst [vmem:[#allocation11_spill] sm:$0xff] %v20729_v14  ;;  %v8977_v30 = vadd.f32 %v20682_v55, %v8976_v56  ;;  %v9292_v51 = vrot.slane %v9087_v35, 4  ;;  %v23661_v56 = vld [vmem:[#allocation7_spill] sm:$0xff] }
 0x3fe   :  { %8294 = vmatpush1.bf16.msra.mxu0 %v15376_v39  ;;  %8782 = vmatpush1.bf16.msra.mxu1 %v15378_v42  ;;  %v8972_v39 = vrot.slane %v8971_v43, 2  ;;  %v1081_v42 = vld [vmem:[%s23501_s5 + $0x40] sm:$0xff]  ;;  %v9152_v50 = vrot.slane %v20573_v5, 1 }
 0x3ff   :  { %8295 = vmatprep.subr.bf16.mxu0 %v15385_v15  ;;  %8783 = vmatprep.subr.bf16.mxu1 %v15387_v20  ;;  %v1090_v20 = vld [vmem:[%s23501_s5 + $0x88] sm:$0xff]  ;;  %v15735_v40 = vpack.c.bf16 %v1081_v42, %v1073_v28  ;;  %v9024_v15 = vrot.slane %v20715_v59, 4  ;;  %v9244_v63 = vrot.slane %v9079_v23, 4  ;;  %v8978_v28 = vrot.slane %v8977_v30, 2 }
 0x400   :  { %v20744_v0 = vadd.f32 %v8972_v39, %v8971_v43  ;;  %v15737_v49 = vpack.c.bf16 %v1098_v3, %v1090_v20  ;;  %v20757_v43 = vmul.f32 %v20682_v55, %v20682_v55  ;;  %v1076_v39 = vld [vmem:[%s23501_s5 + $0x18] sm:$0xff]  ;;  %v9199_v20 = vadd.f32 %v9198_v27, %v20651_v52 }
 0x401   :  { %v9293_v55 = vadd.f32 %v9292_v51, %v9087_v35  ;;  %v9025_v37 = vadd.f32 %v20715_v59, %v9024_v15  ;;  %v9245_v27 = vadd.f32 %v9244_v63, %v9079_v23  ;;  %v9104_v35 = vrot.slane %v20477_v6, 1  ;;  %v23662_v15 = vld [vmem:[#allocation8_spill] sm:$0xff] }
 0x402   :  { %8296 = vmatpush1.bf16.msra.mxu0 %v15384_v9  ;;  %8784 = vmatpush1.bf16.msra.mxu1 %v15386_v46  ;;  %v9086_v9 = vmul.f32 %v20676_v13, %v20676_v13  ;;  %v8967_v46 = vadd.f32 %v8966_v45, %v8965_v60  ;;  %v9015_v60 = vadd.f32 %v9014_v10, %v9013_v22  ;;  %v9008_v45 = vrot.slane %v9007_v18, 2  ;;  %v1084_v22 = vld [vmem:[%s23501_s5 + $0x58] sm:$0xff] }
 0x403   :  { %15734 = vmatprep.subr.bf16.mxu0 %v15733_v16  ;;  %15766 = vmatprep.subr.bf16.mxu1 %v15733_v16  ;;  %v1089_v16 = vld [vmem:[%s23501_s5 + $0x80] sm:$0xff]  ;;  %v20767_v10 = vadd.f32 %v8962_v4, %v8961_v53  ;;  %v20773_v13 = vmul.f32 %v20729_v14, %v20729_v14  ;;  %v15741_v53 = vpack.c.bf16 %v1084_v22, %v1076_v39  ;;  %v9256_v4 = vrot.slane %v20757_v43, 4 }
 0x404   :  { %v9286_v42 = vrot.slane %v9086_v9, 4  ;;  %v8968_v3 = vrot.slane %v8967_v46, 1  ;;  %v9016_v34 = vrot.slane %v9015_v60, 1  ;;  %v9009_v31 = vadd.f32 %v9008_v45, %v9007_v18 }
 0x405   :  { %8298 = vmatmul.mubr.bf16.vlgmr.msra.gmra.mrb[12].mxu0 %v23660_v2  ;;  %8786 = vmatmul.mubr.bf16.vlgmr.msra.gmra.mrb[12].mxu1 %v23660_v2  ;;  %v9018_v2 = vrot.slane %v20729_v14, 4  ;;  %v9200_v51 = vrot.slane %v9199_v20, 1  ;;  %v9153_v39 = vadd.f32 %v9152_v50, %v20573_v5  ;;  %v9382_v18 = vsel %vm9374_vm0, %v20605_v61, %v20517_v19 }
 0x406   :  { %8307 = vmatprep.mubr.bf16.mxu0 %v23661_v56  ;;  %8795 = vmatprep.mubr.bf16.mxu1 %v23661_v56  ;;  %v15739_v56 = vpack.c.bf16 %v1097_v32, %v1089_v16  ;;  %v20778_v16 = vadd.f32 %v8978_v28, %v8977_v30  ;;  %v9287_v32 = vadd.f32 %v9286_v42, %v9086_v9  ;;  %v9026_v23 = vrot.slane %v9025_v37, 2  ;;  %v23663_v30 = vld [vmem:[#allocation9_spill] sm:$0xff] }
 0x407   :  { %15768 = vmatpush1.bf16.msra.mxu1 %v15735_v40  ;;  %v9019_v52 = vadd.f32 %v20729_v14, %v9018_v2  ;;  %v8969_v1 = vadd.f32 %v8968_v3, %v8967_v46  ;;  %v9383_v9 = vsel %vm9376_vm1, %v20711_v44, %v9382_v18  ;;  %v23664_v63 = vrot.slane %v20695_v12, 4 }
 0x408   :  { %15770 = vmatprep.subr.bf16.mxu1 %v15737_v49  ;;  %v9010_v45 = vrot.slane %v9009_v31, 1  ;;  %v9298_v5 = vrot.slane %v20773_v13, 4  ;;  %v9194_v19 = vrot.slane %v20662_v38, 1  ;;  %v9246_v61 = vrot.slane %v9245_v27, 2 }
 0x409   :  { %v9239_v46 = vadd.f32 %v23664_v63, %v20695_v12  ;;  %v9105_v50 = vadd.f32 %v9104_v35, %v20477_v6  ;;  %v9201_v2 = vadd.f32 %v9200_v51, %v9199_v20  ;;  %v9288_v22 = vrot.slane %v9287_v32, 2 }
 0x40a   :  { %v9089_v44 = vmul.f32 %v20715_v59, %v20715_v59  ;;  %v9384_v12 = vsel %vm9378_vm2, %v8969_v1, %v9383_v9  ;;  %v9027_v18 = vadd.f32 %v9026_v23, %v9025_v37  ;;  %v9195_v6 = vadd.f32 %v9194_v19, %v20662_v38 }
 0x40b   :  { %15736 = vmatpush1.bf16.xpose.msra.mxu0 %v15735_v40  ;;  %15772 = vmatpush1.bf16.msra.mxu1 %v15739_v56  ;;  %v9294_v40 = vrot.slane %v9293_v55, 2  ;;  %v9462_v3 = vsel %vm9458_vm4, %v9153_v39, %v9105_v50  ;;  %v9375_v20 = vsel %vm9374_vm0, %v20563_v7, %v20488_v11  ;;  %v9247_v35 = vadd.f32 %v9246_v61, %v9245_v27  ;;  %v1075_v27 = vld [vmem:[%s23501_s5 + $0x10] sm:$0xff] }
 0x40c   :  { %15738 = vmatprep.subr.bf16.mxu0 %v15737_v49  ;;  %15774 = vmatprep.subr.bf16.mxu1 %v15741_v53  ;;  %v9017_v49 = vadd.f32 %v9016_v34, %v9015_v60  ;;  %v9210_v34 = vrot.slane %v20691_v41, 2  ;;  %v9020_v60 = vrot.slane %v9019_v52, 2  ;;  %v9463_v51 = vsel %vm9460_vm5, %v9201_v2, %v9462_v3 }
 0x40d   :  { %8308 = vmatmul.mubr.bf16.gmra.mrb[16].mxu0 %v23662_v15  ;;  %8796 = vmatmul.mubr.bf16.gmra.mrb[16].mxu1 %v23662_v15  ;;  %v9295_v28 = vadd.f32 %v9294_v40, %v9293_v55  ;;  %v9240_v15 = vrot.slane %v9239_v46, 2  ;;  %v9377_v1 = vsel %vm9376_vm1, %v20660_v58, %v9375_v20  ;;  %v9289_v55 = vadd.f32 %v9288_v22, %v9287_v32 }
 0x40e   :  { %8317 = vmatprep.mubr.bf16.mxu0 %v23663_v30  ;;  %8805 = vmatprep.mubr.bf16.mxu1 %v23663_v30  ;;  %v9385_v42 = vsel %vm9380_vm3, %v9017_v49, %v9384_v12  ;;  %v9011_v30 = vadd.f32 %v9010_v45, %v9009_v31  ;;  %v9211_v39 = vadd.f32 %v9210_v34, %v20691_v41  ;;  %v8980_v37 = vrot.slane %v20778_v16, 1  ;;  %v23665_v31 = vld [vmem:[#allocation10_spill] sm:$0xff] }
 0x40f   :  { %v9502_v38 = vsel %vm9500_vm6, %v9385_v42, %v9463_v51  ;;  %v9296_v40 = vrot.slane %v9295_v28, 1  ;;  %v20814_v23 = vadd.f32 %v9020_v60, %v9019_v52  ;;  %v9241_v11 = vadd.f32 %v9240_v15, %v9239_v46  ;;  %v1083_v52 = vld [vmem:[%s23501_s5 + $0x50] sm:$0xff] }
 0x410   :  { %v9028_v7 = vrot.slane %v9027_v18, 1  ;;  %v9116_v58 = vrot.slane %v20514_v25, 1  ;;  %v9379_v41 = vsel %vm9378_vm2, %v20767_v10, %v9377_v1  ;;  %v9248_v32 = vrot.slane %v9247_v35, 1  ;;  %v1091_v1 = vld [vmem:[%s23501_s5 + $0x90] sm:$0xff] }
 0x411   :  { %v9164_v49 = vrot.slane %v20588_v62, 1  ;;  %v9381_v9 = vsel %vm9380_vm3, %v9011_v30, %v9379_v41  ;;  %v9290_v10 = vrot.slane %v9289_v55, 1  ;;  %v9212_v46 = vrot.slane %v9211_v39, 1 }
 0x412   :  { %v9297_v45 = vadd.f32 %v9296_v40, %v9295_v28  ;;  %v8981_v19 = vadd.f32 %v8980_v37, %v20778_v16  ;;  %v9390_v61 = vsel %vm9374_vm0, %v20614_v17, %v20536_v26  ;;  %v20842_v2 = vpack.c.bf16 %v1083_v52, %v1075_v27 }
 0x413   :  { %15740 = vmatpush1.bf16.xpose.msra.mxu0 %v15739_v56  ;;  %v9304_v56 = vrot.slane %v9089_v44, 4  ;;  %v9242_v22 = vrot.slane %v9241_v11, 1  ;;  %v9029_v34 = vadd.f32 %v9028_v7, %v9027_v18  ;;  %v9391_v60 = vsel %vm9376_vm1, %v20741_v57, %v9390_v61 }
 0x414   :  { %15742 = vmatprep.subr.bf16.mxu0 %v15741_v53  ;;  %v9459_v53 = vsel %vm9458_vm4, %v20585_v47, %v20526_v48  ;;  %v1092_v48 = vld [vmem:[%s23501_s5 + $0x98] sm:$0xff]  ;;  %v9249_v12 = vadd.f32 %v9248_v32, %v9247_v35  ;;  %v9165_v42 = vadd.f32 %v9164_v49, %v20588_v62  ;;  %v9257_v16 = vadd.f32 %v9256_v4, %v20757_v43 }
 0x415   :  { %8318 = vmatmul.mubr.bf16.gmra.mrb[20].mxu0 %v23665_v31  ;;  %8806 = vmatmul.mubr.bf16.gmra.mrb[20].mxu1 %v23665_v31  ;;  %v9461_v63 = vsel %vm9460_vm5, %v9195_v6, %v9459_v53  ;;  %v1100_v47 = vld [vmem:[%s23501_s5 + $0xd8] sm:$0xff]  ;;  %v9305_v50 = vadd.f32 %v9304_v56, %v9089_v44  ;;  %v9291_v26 = vadd.f32 %v9290_v10, %v9289_v55  ;;  %v8830_v30 = vrot.slane %v20429_v21, 1 }
 0x416   :  { %9573 = vmatprep.mubr.f32.mxu0 %v9502_v38  ;;  %v20847_v3 = vpack.c.bf16 %v1100_v47, %v1092_v48  ;;  %v9501_v28 = vsel %vm9500_vm6, %v9381_v9, %v9461_v63  ;;  %v9213_v17 = vadd.f32 %v9212_v46, %v9211_v39  ;;  %v9299_v44 = vadd.f32 %v9298_v5, %v20773_v13 }
 0x417   :  { %v9477_v57 = vsel %vm9374_vm0, %v9297_v45, %v9249_v12  ;;  %v9117_v15 = vadd.f32 %v9116_v58, %v20514_v25  ;;  %v9392_v62 = vsel %vm9378_vm2, %v8981_v19, %v9391_v60  ;;  %v9306_v18 = vrot.slane %v9305_v50, 2 }
 0x418   :  { %23666 = vst [vmem:[#allocation6_spill] sm:$0xff] %v20847_v3  ;;  %v9243_v43 = vadd.f32 %v9242_v22, %v9241_v11  ;;  %v9393_v4 = vsel %vm9380_vm3, %v9029_v34, %v9392_v62  ;;  %v23667_v6 = vrot.slane %v20702_v8, 4  ;;  %v23668_v5 = vrot.slane %v20544_v36, 1  ;;  %v1094_v62 = vld [vmem:[%s23501_s5 + $0xa8] sm:$0xff] }
 0x419   :  { %v23669_v25 = vrot.slane %v20649_v24, 2  ;;  %v9466_v51 = vsel %vm9458_vm4, %v9165_v42, %v9117_v15  ;;  %v9258_v55 = vrot.slane %v9257_v16, 2  ;;  %v8974_v39 = vrot.slane %v20744_v0, 1  ;;  %v1085_v15 = vld [vmem:[%s23501_s5 + $0x60] sm:$0xff] }
 0x41a   :  { %v9251_v13 = vadd.f32 %v23667_v6, %v20702_v8  ;;  %v8879_v20 = vadd.f32 %v23668_v5, %v20544_v36  ;;  %v1099_v8 = vld [vmem:[%s23501_s5 + $0xd0] sm:$0xff]  ;;  %v9476_v36 = vsel %vm9374_vm0, %v9291_v26, %v9243_v43  ;;  %v9467_v37 = vsel %vm9460_vm5, %v9213_v17, %v9466_v51  ;;  %v1078_v26 = vld [vmem:[%s23501_s5 + $0x28] sm:$0xff]  ;;  %v1101_v6 = vld [vmem:[%s23501_s5 + $0xe0] sm:$0xff] }
 0x41b   :  { %v9205_v35 = vadd.f32 %v23669_v25, %v20649_v24  ;;  %v9300_v24 = vrot.slane %v9299_v44, 2  ;;  %v23670_v56 = vrot.slane %v20678_v54, 1  ;;  %v9022_v38 = vrot.slane %v20814_v23, 1  ;;  %v1086_v17 = vld [vmem:[%s23501_s5 + $0x68] sm:$0xff]  ;;  %v1080_v5 = vld [vmem:[%s23501_s5 + $0x38] sm:$0xff] }
 0x41c   :  { %v9504_v40 = vsel %vm9500_vm6, %v9393_v4, %v9467_v37  ;;  %v9307_v11 = vadd.f32 %v9306_v18, %v9305_v50  ;;  %v8831_v7 = vadd.f32 %v8830_v30, %v20429_v21  ;;  %v9158_v58 = vrot.slane %v20565_v29, 1  ;;  %v1102_v18 = vld [vmem:[%s23501_s5 + $0xe8] sm:$0xff]  ;;  %v1093_v4 = vld [vmem:[%s23501_s5 + $0xa0] sm:$0xff] }
 0x41d   :  { %9574 = vmatmul.mubr.f32.vlgmr.msra.gmra.mrb[24].mxu0 %v9501_v28  ;;  %v8927_v31 = vadd.f32 %v23670_v56, %v20678_v54  ;;  %v20889_v41 = vpack.c.bf16 %v1099_v8, %v1091_v1  ;;  %v9252_v53 = vrot.slane %v9251_v13, 2  ;;  %v9206_v27 = vrot.slane %v9205_v35, 1 }
 0x41e   :  { %15744 = vmatpush1.bf16.xpose.msra.mxu0 %v20842_v2  ;;  %9578 = vmatprep.mubr.f32.mxu0 %v9477_v57  ;;  %v9259_v52 = vadd.f32 %v9258_v55, %v9257_v16  ;;  %v9110_v32 = vrot.slane %v20464_v33, 1  ;;  %v8975_v54 = vadd.f32 %v8974_v39, %v20744_v0  ;;  %v9386_v49 = vsel %vm9374_vm0, %v8879_v20, %v8831_v7  ;;  %v1088_v20 = vld [vmem:[%s23501_s5 + $0x78] sm:$0xff]  ;;  %v16796_v39 = vld [vmem:[%s23498_s2] sm:$0xff] }
 0x41f   :  { %15746 = vmatprep.subr.bf16.mxu0 %v20847_v3  ;;  %23671 = vst [vmem:[#allocation7_spill] sm:$0xff] %v20889_v41  ;;  %v9301_v9 = vadd.f32 %v9300_v24, %v9299_v44  ;;  %v9023_v63 = vadd.f32 %v9022_v38, %v20814_v23  ;;  %v9387_v10 = vsel %vm9376_vm1, %v8927_v31, %v9386_v49  ;;  %v9308_v21 = vrot.slane %v9307_v11, 1  ;;  %v1077_v44 = vld [vmem:[%s23501_s5 + $0x20] sm:$0xff] }
 0x420   :  { %v9159_v46 = vadd.f32 %v9158_v58, %v20565_v29  ;;  %v9253_v48 = vadd.f32 %v9252_v53, %v9251_v13  ;;  %v9207_v47 = vadd.f32 %v9206_v27, %v9205_v35  ;;  %v9260_v45 = vrot.slane %v9259_v52, 1  ;;  %v23677_v35 = vld [vmem:[#allocation12_spill] sm:$0xff] }
 0x421   :  { %9579 = vmatmul.mubr.f32.gmra.mrb[26].mxu0 %v9476_v36  ;;  %v9111_v19 = vadd.f32 %v9110_v32, %v20464_v33  ;;  %v9388_v61 = vsel %vm9378_vm2, %v8975_v54, %v9387_v10  ;;  %v9302_v0 = vrot.slane %v9301_v9, 1  ;;  %v9309_v22 = vadd.f32 %v9308_v21, %v9307_v11 }
 0x422   :  { %9648 = vmatprep.mubr.f32.mxu0 %v9504_v40  ;;  %v9389_v50 = vsel %vm9380_vm3, %v9023_v63, %v9388_v61  ;;  %v9254_v34 = vrot.slane %v9253_v48, 1  ;;  %v9261_v12 = vadd.f32 %v9260_v45, %v9259_v52  ;;  %v20915_v57 = vpack.c.bf16 %v1086_v17, %v1078_v26 }
 0x423   :  { %v9464_v23 = vsel %vm9458_vm4, %v9159_v46, %v9111_v19  ;;  %v9303_v42 = vadd.f32 %v9302_v0, %v9301_v9  ;;  %v20926_v30 = vpack.c.bf16 %v1085_v15, %v1077_v44  ;;  %v20928_v43 = vpack.c.bf16 %v1102_v18, %v1094_v62  ;;  %v1079_v44 = vld [vmem:[%s23501_s5 + $0x30] sm:$0xff] }
 0x424   :  { %v9465_v60 = vsel %vm9460_vm5, %v9207_v47, %v9464_v23  ;;  %v9479_v16 = vsel %vm9374_vm0, %v9309_v22, %v9261_v12  ;;  %v9255_v33 = vadd.f32 %v9254_v34, %v9253_v48  ;;  %23672 = vst [vmem:[#allocation8_spill] sm:$0xff] %v20915_v57  ;;  %v20939_v13 = vpack.c.bf16 %v1101_v6, %v1093_v4  ;;  %v1087_v15 = vld [vmem:[%s23501_s5 + $0x70] sm:$0xff] }
 0x425   :  { %v9503_v29 = vsel %vm9500_vm6, %v9389_v50, %v9465_v60  ;;  %23673 = vst [vmem:[#allocation9_spill] sm:$0xff] %v20926_v30  ;;  %23674 = vst [vmem:[#allocation10_spill] sm:$0xff] %v20928_v43  ;;  %v20947_v25 = vpack.c.bf16 %v1088_v20, %v1080_v5  ;;  %v20952_v51 = vsub.s32 4, %v23677_v35  ;;  %v20955_v1 = vsub.s32 6, %v23677_v35 }
 0x426   :  { %15748 = vmatpush1.bf16.xpose.msra.mxu0 %v20889_v41  ;;  %v9478_v28 = vsel %vm9374_vm0, %v9303_v42, %v9255_v33  ;;  %23675 = vst [vmem:[#allocation35_spill] sm:$0xff] %v20939_v13  ;;  %v20958_v8 = vsub.s32 5, %v23677_v35  ;;  %v20961_v55 = vsub.s32 7, %v23677_v35 }
 0x427   :  { %15750 = vmatprep.subr.bf16.mxu0 %v20915_v57  ;;  %23676 = vst [vmem:[#allocation36_spill] sm:$0xff] %v20947_v25  ;;  %23678 = vst [vmem:[#allocation37_spill] sm:$0xff] %v20952_v51  ;;  %v20967_v36 = vrot.slane %v16796_v39, %v20952_v51  ;;  %v20970_v37 = vrot.slane %v16796_v39, %v20955_v1 }
 0x428   :  { %23679 = vst [vmem:[#allocation38_spill] sm:$0xff] %v20955_v1  ;;  %23680 = vst [vmem:[#allocation39_spill] sm:$0xff] %v20958_v8  ;;  %v20973_v24 = vrot.slane %v16796_v39, %v20958_v8  ;;  %v20976_v56 = vrot.slane %v16796_v39, %v20961_v55  ;;  %v1096_v39 = vld [vmem:[%s23501_s5 + $0xb8] sm:$0xff] }
 0x429   :  { %23681 = vst [vmem:[#allocation40_spill] sm:$0xff] %v20961_v55 }
 0x42d   :  { %9649 = vmatmul.mubr.f32.vlgmr.msra.gmra.mrb[24].mxu0 %v9503_v29 }
 0x42e   :  { %9653 = vmatprep.mubr.f32.mxu0 %v9479_v16  ;;  %15752 = vmatpush1.bf16.xpose.msra.mxu0 %v20926_v30 }
 0x42f   :  { %15754 = vmatprep.subr.bf16.mxu0 %v20928_v43 }
 0x431   :  { %9654 = vmatmul.mubr.f32.gmra.mrb[26].mxu0 %v9478_v28 }
 0x436   :  { %15756 = vmatpush1.bf16.xpose.msra.mxu0 %v20939_v13 }
 0x437   :  { %15758 = vmatprep.subr.bf16.mxu0 %v20947_v25 }
 0x4d8   :  { %v8299_v31 = vpop.f32.mrb[12].mxu0  ;;  %v8787_v40 = vpop.f32.mrb[12].mxu1 }
 0x4d9   :  { %v20979_v38 = vadd.f32 %v8299_v31, %v20967_v36  ;;  %v8301_v11 = vpop.f32.mrb[13].mxu0  ;;  %v20982_v7 = vadd.f32 %v8787_v40, %v20970_v37  ;;  %v8789_v53 = vpop.f32.mrb[13].mxu1  ;;  %v1104_v31 = vld [vmem:[%s23501_s5 + $0xf8] sm:$0xff] }
 0x4da   :  { %v20985_v58 = vadd.f32 %v8301_v11, %v20973_v24  ;;  %v8303_v27 = vpop.f32.mrb[14].mxu0  ;;  %v20991_v54 = vadd.f32 %v8789_v53, %v20976_v56  ;;  %v8791_v9 = vpop.f32.mrb[14].mxu1 }
 0x4db   :  { %23682 = vst [vmem:[#allocation41_spill] sm:$0xff] %v20979_v38  ;;  %23683 = vst [vmem:[#allocation42_spill] sm:$0xff] %v20982_v7  ;;  %v8838_v52 = vrot.slane %v20979_v38, 4  ;;  %v9058_v32 = vmul.f32 %v20979_v38, %v20979_v38  ;;  %v20994_v49 = vadd.f32 %v8303_v27, %v20967_v36  ;;  %v20996_v63 = vpop.f32.mrb[15].mxu0  ;;  %v8850_v10 = vrot.slane %v20982_v7, 4  ;;  %v8793_v47 = vpop.f32.mrb[15].mxu1 }
 0x4dc   :  { %23684 = vst [vmem:[#allocation43_spill] sm:$0xff] %v20985_v58  ;;  %23685 = vst [vmem:[#allocation44_spill] sm:$0xff] %v20991_v54  ;;  %v9060_v21 = vmul.f32 %v20982_v7, %v20982_v7  ;;  %v8844_v46 = vrot.slane %v20985_v58, 4  ;;  %v9059_v48 = vmul.f32 %v20985_v58, %v20985_v58  ;;  %v8856_v61 = vrot.slane %v20991_v54, 4 }
 0x4dd   :  { %23686 = vst [vmem:[#allocation45_spill] sm:$0xff] %v20994_v49  ;;  %v8839_v45 = vadd.f32 %v20979_v38, %v8838_v52  ;;  %v9118_v19 = vrot.slane %v9058_v32, 4  ;;  %v9061_v0 = vmul.f32 %v20991_v54, %v20991_v54  ;;  %v8851_v50 = vadd.f32 %v20982_v7, %v8850_v10  ;;  %v1095_v10 = vld [vmem:[%s23501_s5 + $0xb0] sm:$0xff] }
 0x4de   :  { %v9130_v22 = vrot.slane %v9060_v21, 4  ;;  %v8845_v23 = vadd.f32 %v20985_v58, %v8844_v46  ;;  %v9124_v34 = vrot.slane %v9059_v48, 4  ;;  %v8857_v29 = vadd.f32 %v20991_v54, %v8856_v61 }
 0x4df   :  { %v8840_v60 = vrot.slane %v8839_v45, 2  ;;  %v9119_v12 = vadd.f32 %v9118_v19, %v9058_v32  ;;  %v9136_v42 = vrot.slane %v9061_v0, 4  ;;  %v8852_v16 = vrot.slane %v8851_v50, 2 }
 0x4e0   :  { %v9131_v33 = vadd.f32 %v9130_v22, %v9060_v21  ;;  %v8846_v28 = vrot.slane %v8845_v23, 2  ;;  %v9125_v26 = vadd.f32 %v9124_v34, %v9059_v48  ;;  %v8309_v17 = vpop.f32.mrb[16].mxu0  ;;  %v8858_v4 = vrot.slane %v8857_v29, 2  ;;  %v21017_v5 = vpop.f32.mrb[16].mxu1  ;;  %v1103_v21 = vld [vmem:[%s23501_s5 + $0xf0] sm:$0xff] }
 0x4e1   :  { %v8841_v62 = vadd.f32 %v8840_v60, %v8839_v45  ;;  %v9120_v18 = vrot.slane %v9119_v12, 2  ;;  %v9137_v6 = vadd.f32 %v9136_v42, %v9061_v0  ;;  %v21019_v20 = vpop.f32.mrb[17].mxu0  ;;  %v21027_v40 = vadd.f32 %v8852_v16, %v8851_v50  ;;  %v21031_v52 = vpop.f32.mrb[17].mxu1 }
 0x4e2   :  { %v9132_v11 = vrot.slane %v9131_v33, 2  ;;  %v21029_v53 = vadd.f32 %v8846_v28, %v8845_v23  ;;  %v9126_v27 = vrot.slane %v9125_v26, 2  ;;  %v21033_v32 = vpop.f32.mrb[18].mxu0  ;;  %v21043_v45 = vadd.f32 %v8858_v4, %v8857_v29  ;;  %v21045_v19 = vpop.f32.mrb[18].mxu1 }
 0x4e3   :  { %v8842_v46 = vrot.slane %v8841_v62, 1  ;;  %v21041_v48 = vadd.f32 %v9120_v18, %v9119_v12  ;;  %v21047_v61 = vpop.f32.mrb[19].mxu0  ;;  %v9138_v0 = vrot.slane %v9137_v6, 2  ;;  %v21049_v50 = vpop.f32.mrb[19].mxu1  ;;  %v21051_v22 = vpack.c.bf16 %v1087_v15, %v1079_v44 }
 0x4e4   :  { %v8854_v23 = vrot.slane %v21027_v40, 1  ;;  %v21054_v34 = vadd.f32 %v9132_v11, %v9131_v33  ;;  %v21056_v60 = vpack.c.bf16 %v1104_v31, %v1096_v39  ;;  %v21058_v42 = vpack.c.bf16 %v1103_v21, %v1095_v10 }
 0x4e5   :  { %v21060_v12 = vadd.f32 %v8842_v46, %v8841_v62  ;;  %v8848_v29 = vrot.slane %v21029_v53, 1  ;;  %v21063_v16 = vadd.f32 %v9126_v27, %v9125_v26  ;;  %v8886_v28 = vrot.slane %v20994_v49, 4 }
 0x4e6   :  { %v9122_v18 = vrot.slane %v21041_v48, 1  ;;  %v8860_v44 = vrot.slane %v21043_v45, 1  ;;  %v9066_v33 = vmul.f32 %v20994_v49, %v20994_v49  ;;  %v21071_v15 = vadd.f32 %v8791_v9, %v20970_v37 }
 0x4e7   :  { %v21073_v4 = vadd.f32 %v9138_v0, %v9137_v6  ;;  %v8887_v62 = vadd.f32 %v20994_v49, %v8886_v28  ;;  %v21078_v26 = vadd.f32 %v20996_v63, %v20973_v24  ;;  %v21081_v39 = vadd.f32 %v8793_v47, %v20976_v56 }
 0x4e8   :  { %23687 = vst [vmem:[#allocation46_spill] sm:$0xff] %v21071_v15  ;;  %v21083_v31 = vpop.f32.mrb[20].mxu0  ;;  %v9166_v11 = vrot.slane %v9066_v33, 4  ;;  %v8898_v27 = vrot.slane %v21071_v15, 4  ;;  %v9068_v9 = vmul.f32 %v21071_v15, %v21071_v15  ;;  %v21089_v6 = vadd.f32 %v8309_v17, %v20967_v36  ;;  %v21091_v10 = vpop.f32.mrb[20].mxu1 }
 0x4e9   :  { %23688 = vst [vmem:[#allocation47_spill] sm:$0xff] %v21078_v26  ;;  %23689 = vst [vmem:[#allocation48_spill] sm:$0xff] %v21081_v39  ;;  %v21093_v21 = vpop.f32.mrb[21].mxu0  ;;  %v8888_v63 = vrot.slane %v8887_v62, 2  ;;  %v8892_v46 = vrot.slane %v21078_v26, 4  ;;  %v9067_v47 = vmul.f32 %v21078_v26, %v21078_v26  ;;  %v8904_v0 = vrot.slane %v21081_v39, 4 }
 0x4ea   :  { %23690 = vst [vmem:[#allocation49_spill] sm:$0xff] %v21089_v6  ;;  %v21099_v28 = vpop.f32.mrb[21].mxu1  ;;  %v8323_v7 = vpop.f32.mrb[22].mxu0  ;;  %v9167_v54 = vadd.f32 %v9166_v11, %v9066_v33  ;;  %v8899_v49 = vadd.f32 %v21071_v15, %v8898_v27  ;;  %v9178_v17 = vrot.slane %v9068_v9, 4  ;;  %v9069_v38 = vmul.f32 %v21081_v39, %v21081_v39 }
 0x4eb   :  { %v8811_v1 = vpop.f32.mrb[22].mxu1  ;;  %v8324_v58 = vpop.f32.mrb[23].mxu0  ;;  %v8889_v14 = vadd.f32 %v8888_v63, %v8887_v62  ;;  %v8893_v59 = vadd.f32 %v21078_v26, %v8892_v46  ;;  %v9172_v55 = vrot.slane %v9067_v47, 4  ;;  %v8905_v51 = vadd.f32 %v21081_v39, %v8904_v0 }
 0x4ec   :  { %v8812_v8 = vpop.f32.mrb[23].mxu1  ;;  %v9168_v35 = vrot.slane %v9167_v54, 2  ;;  %v8900_v25 = vrot.slane %v8899_v49, 2  ;;  %v9179_v13 = vadd.f32 %v9178_v17, %v9068_v9  ;;  %v9184_v7 = vrot.slane %v9069_v38, 4 }
 0x4ed   :  { %v8890_v33 = vrot.slane %v8889_v14, 1  ;;  %v8894_v11 = vrot.slane %v8893_v59, 2  ;;  %v9173_v27 = vadd.f32 %v9172_v55, %v9067_v47  ;;  %v8906_v15 = vrot.slane %v8905_v51, 2 }
 0x4ee   :  { %v9169_v43 = vadd.f32 %v9168_v35, %v9167_v54  ;;  %v8901_v30 = vadd.f32 %v8900_v25, %v8899_v49  ;;  %v9180_v57 = vrot.slane %v9179_v13, 2  ;;  %v9185_v1 = vadd.f32 %v9184_v7, %v9069_v38 }
 0x4ef   :  { %v21107_v58 = vadd.f32 %v8854_v23, %v21027_v40  ;;  %v8895_v62 = vadd.f32 %v8894_v11, %v8893_v59  ;;  %v9174_v63 = vrot.slane %v9173_v27, 2  ;;  %v8907_v46 = vadd.f32 %v8906_v15, %v8905_v51 }
 0x4f0   :  { %v21111_v0 = vadd.f32 %v8848_v29, %v21029_v53  ;;  %v9170_v9 = vrot.slane %v9169_v43, 1  ;;  %v8902_v17 = vrot.slane %v8901_v30, 1  ;;  %v21114_v55 = vadd.f32 %v9122_v18, %v21041_v48 }
 0x4f1   :  { %v21117_v25 = vadd.f32 %v8860_v44, %v21043_v45  ;;  %v21119_v35 = vadd.f32 %v9180_v57, %v9179_v13  ;;  %v8934_v38 = vrot.slane %v21089_v6, 4  ;;  %v21122_v59 = vadd.f32 %v8890_v33, %v8889_v14 }
 0x4f2   :  { %v8896_v51 = vrot.slane %v8895_v62, 1  ;;  %v21124_v54 = vadd.f32 %v9174_v63, %v9173_v27  ;;  %v9186_v49 = vrot.slane %v9185_v1, 2  ;;  %v21126_v40 = vadd.f32 %v9170_v9, %v9169_v43 }
 0x4f3   :  { %v8908_v53 = vrot.slane %v8907_v46, 1  ;;  %v8935_v23 = vadd.f32 %v21089_v6, %v8934_v38  ;;  %v9074_v48 = vmul.f32 %v21089_v6, %v21089_v6  ;;  %v21131_v45 = vadd.f32 %v8902_v17, %v8901_v30 }
 0x4f4   :  { %v21135_v57 = vadd.f32 %v21017_v5, %v20970_v37  ;;  %v21139_v14 = vadd.f32 %v21019_v20, %v20973_v24  ;;  %v21143_v43 = vadd.f32 %v21031_v52, %v20976_v56  ;;  %v21148_v30 = vadd.f32 %v21033_v32, %v20967_v36 }
 0x4f5   :  { %v8936_v29 = vrot.slane %v8935_v23, 2  ;;  %v9214_v18 = vrot.slane %v9074_v48, 4  ;;  %v21163_v63 = vadd.f32 %v21045_v19, %v20970_v37  ;;  %v21166_v13 = vadd.f32 %v8896_v51, %v8895_v62 }
 0x4f6   :  { %23691 = vst [vmem:[#allocation50_spill] sm:$0xff] %v21135_v57  ;;  %23692 = vst [vmem:[#allocation51_spill] sm:$0xff] %v21139_v14  ;;  %v8946_v44 = vrot.slane %v21135_v57, 4  ;;  %v9076_v5 = vmul.f32 %v21135_v57, %v21135_v57  ;;  %v8940_v20 = vrot.slane %v21139_v14, 4  ;;  %v9075_v15 = vmul.f32 %v21139_v14, %v21139_v14 }
 0x4f7   :  { %23693 = vst [vmem:[#allocation52_spill] sm:$0xff] %v21143_v43  ;;  %23694 = vst [vmem:[#allocation53_spill] sm:$0xff] %v21148_v30  ;;  %v8937_v52 = vadd.f32 %v8936_v29, %v8935_v23  ;;  %v9215_v47 = vadd.f32 %v9214_v18, %v9074_v48  ;;  %v8952_v7 = vrot.slane %v21143_v43, 4  ;;  %v9077_v33 = vmul.f32 %v21143_v43, %v21143_v43 }
 0x4f8   :  { %v8947_v32 = vadd.f32 %v21135_v57, %v8946_v44  ;;  %v9226_v11 = vrot.slane %v9076_v5, 4  ;;  %v8941_v27 = vadd.f32 %v21139_v14, %v8940_v20  ;;  %23695 = vst [vmem:[#allocation54_spill] sm:$0xff] %v21163_v63  ;;  %v9220_v38 = vrot.slane %v9075_v15, 4 }
 0x4f9   :  { %v8938_v9 = vrot.slane %v8937_v52, 1  ;;  %v9216_v17 = vrot.slane %v9215_v47, 2  ;;  %v8953_v23 = vadd.f32 %v21143_v43, %v8952_v7  ;;  %v9232_v8 = vrot.slane %v9077_v33, 4 }
 0x4fa   :  { %v8948_v48 = vrot.slane %v8947_v32, 2  ;;  %v9227_v29 = vadd.f32 %v9226_v11, %v9076_v5  ;;  %v8942_v18 = vrot.slane %v8941_v27, 2  ;;  %v21168_v39 = vadd.f32 %v8908_v53, %v8907_v46 }
 0x4fb   :  { %v21170_v44 = vadd.f32 %v9186_v49, %v9185_v1  ;;  %v8954_v20 = vrot.slane %v8953_v23, 2  ;;  %v8982_v14 = vrot.slane %v21148_v30, 4  ;;  %v21173_v26 = vadd.f32 %v9220_v38, %v9075_v15 }
 0x4fc   :  { %v8949_v57 = vadd.f32 %v8948_v48, %v8947_v32  ;;  %v9228_v6 = vrot.slane %v9227_v29, 2  ;;  %v8943_v19 = vadd.f32 %v8942_v18, %v8941_v27  ;;  %v21177_v5 = vmul.f32 %v21148_v30, %v21148_v30 }
 0x4fd   :  { %v8955_v41 = vadd.f32 %v8954_v20, %v8953_v23  ;;  %v8994_v62 = vrot.slane %v21163_v63, 4  ;;  %v21180_v51 = vadd.f32 %v8938_v9, %v8937_v52  ;;  %v21182_v46 = vadd.f32 %v9216_v17, %v9215_v47 }
 0x4fe   :  { %v21184_v1 = vadd.f32 %v9232_v8, %v9077_v33  ;;  %v8983_v49 = vadd.f32 %v21148_v30, %v8982_v14  ;;  %v8950_v53 = vrot.slane %v8949_v57, 1  ;;  %v21187_v7 = vadd.f32 %v9228_v6, %v9227_v29 }
 0x4ff   :  { %v8995_v15 = vadd.f32 %v21163_v63, %v8994_v62  ;;  %v21192_v32 = vmul.f32 %v21163_v63, %v21163_v63  ;;  %v8944_v11 = vrot.slane %v8943_v19, 1  ;;  %v8956_v27 = vrot.slane %v8955_v41, 1 }
 0x500   :  { %v8984_v38 = vrot.slane %v8983_v49, 2  ;;  %v21196_v52 = vadd.f32 %v21047_v61, %v20973_v24  ;;  %v21201_v6 = vadd.f32 %v21049_v50, %v20976_v56  ;;  %v21205_v14 = vadd.f32 %v21083_v31, %v20967_v36 }
 0x501   :  { %v8996_v47 = vrot.slane %v8995_v15, 2  ;;  %v21212_v61 = vadd.f32 %v21091_v10, %v20970_v37  ;;  %v21222_v31 = vadd.f32 %v8950_v53, %v8949_v57  ;;  %v8945_v29 = vadd.f32 %v8944_v11, %v8943_v19 }
 0x502   :  { %23696 = vst [vmem:[#allocation55_spill] sm:$0xff] %v21196_v52  ;;  %23697 = vst [vmem:[#allocation56_spill] sm:$0xff] %v21201_v6  ;;  %v8985_v33 = vadd.f32 %v8984_v38, %v8983_v49  ;;  %v8988_v9 = vrot.slane %v21196_v52, 4  ;;  %v9083_v17 = vmul.f32 %v21196_v52, %v21196_v52  ;;  %v9000_v48 = vrot.slane %v21201_v6, 4 }
 0x503   :  { %23698 = vst [vmem:[#allocation57_spill] sm:$0xff] %v21205_v14  ;;  %23699 = vst [vmem:[#allocation58_spill] sm:$0xff] %v21212_v61  ;;  %v21214_v23 = vadd.f32 %v8996_v47, %v8995_v15  ;;  %v21219_v50 = vmul.f32 %v21201_v6, %v21201_v6  ;;  %v9030_v36 = vrot.slane %v21205_v14, 4  ;;  %v21230_v49 = vmul.f32 %v21205_v14, %v21205_v14 }
 0x504   :  { %v8989_v20 = vadd.f32 %v21196_v52, %v8988_v9  ;;  %v8986_v62 = vrot.slane %v8985_v33, 1  ;;  %v9001_v37 = vadd.f32 %v21201_v6, %v9000_v48  ;;  %v21232_v15 = vadd.f32 %v8956_v27, %v8955_v41 }
 0x505   :  { %v9031_v10 = vadd.f32 %v21205_v14, %v9030_v36  ;;  %v9268_v47 = vrot.slane %v9083_v17, 4  ;;  %v9042_v57 = vrot.slane %v21212_v61, 4  ;;  %v21240_v36 = vadd.f32 %v21093_v21, %v20973_v24 }
 0x506   :  { %v8990_v38 = vrot.slane %v8989_v20, 2  ;;  %v9002_v53 = vrot.slane %v9001_v37, 2  ;;  %v21244_v41 = vadd.f32 %v21099_v28, %v20976_v56  ;;  %v8987_v27 = vadd.f32 %v8986_v62, %v8985_v33 }
 0x507   :  { %v9032_v9 = vrot.slane %v9031_v10, 2  ;;  %v9043_v48 = vadd.f32 %v21212_v61, %v9042_v57  ;;  %23700 = vst [vmem:[#allocation59_spill] sm:$0xff] %v21240_v36  ;;  %v9310_v19 = vrot.slane %v21230_v49, 4  ;;  %v21254_v24 = vmul.f32 %v21212_v61, %v21212_v61 }
 0x508   :  { %v8991_v18 = vadd.f32 %v8990_v38, %v8989_v20  ;;  %23701 = vst [vmem:[#allocation60_spill] sm:$0xff] %v21244_v41  ;;  %v21246_v8 = vadd.f32 %v9002_v53, %v9001_v37  ;;  %v9036_v20 = vrot.slane %v21240_v36, 4  ;;  %v9091_v38 = vmul.f32 %v21240_v36, %v21240_v36 }
 0x509   :  { %v9033_v63 = vadd.f32 %v9032_v9, %v9031_v10  ;;  %v9044_v11 = vrot.slane %v9043_v48, 2  ;;  %v9048_v56 = vrot.slane %v21244_v41, 4  ;;  %v21259_v21 = vmul.f32 %v21244_v41, %v21244_v41 }
 0x50a   :  { %v8992_v6 = vrot.slane %v8991_v18, 1  ;;  %v9128_v28 = vrot.slane %v21063_v16, 1  ;;  %v9004_v33 = vrot.slane %v21246_v8, 1  ;;  %v9037_v10 = vadd.f32 %v21240_v36, %v9036_v20 }
 0x50b   :  { %v9034_v62 = vrot.slane %v9033_v63, 1  ;;  %v21263_v37 = vadd.f32 %v9044_v11, %v9043_v48  ;;  %v9316_v57 = vrot.slane %v9091_v38, 4  ;;  %v9049_v53 = vadd.f32 %v21244_v41, %v9048_v56 }
 0x50c   :  { %v8993_v9 = vadd.f32 %v8992_v6, %v8991_v18  ;;  %v9176_v61 = vrot.slane %v21124_v54, 1  ;;  %v9038_v43 = vrot.slane %v9037_v10, 2  ;;  %v9222_v30 = vrot.slane %v21173_v26, 2 }
 0x50d   :  { %v9398_v52 = vsel %vm9374_vm0, %v21166_v13, %v21111_v0  ;;  %v9050_v3 = vrot.slane %v9049_v53, 2  ;;  %v9129_v11 = vadd.f32 %v9128_v28, %v21063_v16  ;;  %v9035_v18 = vadd.f32 %v9034_v62, %v9033_v63 }
 0x50e   :  { %v9177_v48 = vadd.f32 %v9176_v61, %v21124_v54  ;;  %v9399_v20 = vsel %vm9376_vm1, %v8945_v29, %v9398_v52  ;;  %v9039_v56 = vadd.f32 %v9038_v43, %v9037_v10  ;;  %v9223_v6 = vadd.f32 %v9222_v30, %v21173_v26 }
 0x50f   :  { %v9218_v41 = vrot.slane %v21182_v46, 1  ;;  %v9400_v14 = vsel %vm9378_vm2, %v8993_v9, %v9399_v20  ;;  %v9394_v0 = vsel %vm9374_vm0, %v21122_v59, %v21060_v12  ;;  %v9269_v13 = vadd.f32 %v9268_v47, %v9083_v17 }
 0x510   :  { %v9470_v36 = vsel %vm9458_vm4, %v9177_v48, %v9129_v11  ;;  %v9040_v16 = vrot.slane %v9039_v56, 1  ;;  %v9224_v28 = vrot.slane %v9223_v6, 1  ;;  %v9395_v43 = vsel %vm9376_vm1, %v21180_v51, %v9394_v0 }
 0x511   :  { %v9219_v54 = vadd.f32 %v9218_v41, %v21182_v46  ;;  %v9396_v26 = vsel %vm9378_vm2, %v8987_v27, %v9395_v43  ;;  %v9270_v30 = vrot.slane %v9269_v13, 2  ;;  %v9317_v63 = vadd.f32 %v9316_v57, %v9091_v38 }
 0x512   :  { %v23702_v52 = vrot.slane %v21177_v5, 4  ;;  %v9041_v29 = vadd.f32 %v9040_v16, %v9039_v56  ;;  %v9225_v62 = vadd.f32 %v9224_v28, %v9223_v6  ;;  %v9397_v12 = vsel %vm9380_vm3, %v9035_v18, %v9396_v26 }
 0x513   :  { %v9468_v59 = vsel %vm9458_vm4, %v21126_v40, %v21114_v55  ;;  %v9271_v17 = vadd.f32 %v9270_v30, %v9269_v13  ;;  %v9318_v51 = vrot.slane %v9317_v63, 2  ;;  %v9051_v40 = vadd.f32 %v9050_v3, %v9049_v53 }
 0x514   :  { %v9263_v61 = vadd.f32 %v23702_v52, %v21177_v5  ;;  %v9469_v46 = vsel %vm9460_vm5, %v9219_v54, %v9468_v59  ;;  %v9401_v41 = vsel %vm9380_vm3, %v9041_v29, %v9400_v14  ;;  %v9471_v27 = vsel %vm9460_vm5, %v9225_v62, %v9470_v36 }
 0x515   :  { %v9505_v38 = vsel %vm9500_vm6, %v9397_v12, %v9469_v46  ;;  %v9311_v5 = vadd.f32 %v9310_v19, %v21230_v49  ;;  %v9506_v10 = vsel %vm9500_vm6, %v9401_v41, %v9471_v27  ;;  %v9272_v57 = vrot.slane %v9271_v17, 1 }
 0x516   :  { %v9264_v47 = vrot.slane %v9263_v61, 2  ;;  %v9319_v9 = vadd.f32 %v9318_v51, %v9317_v63  ;;  %9723 = vmatprep.mubr.f32.mxu0 %v9506_v10  ;;  %v9140_v48 = vrot.slane %v21073_v4, 1  ;;  %v9188_v20 = vrot.slane %v21170_v44, 1 }
 0x517   :  { %v9312_v55 = vrot.slane %v9311_v5, 2  ;;  %v9046_v14 = vrot.slane %v21263_v37, 1  ;;  %9724 = vmatmul.mubr.f32.vlgmr.msra.gmra.mrb[24].mxu0 %v9505_v38  ;;  %v9005_v56 = vadd.f32 %v9004_v33, %v21246_v8  ;;  %v9234_v49 = vrot.slane %v21184_v1, 2 }
 0x518   :  { %v9265_v11 = vadd.f32 %v9264_v47, %v9263_v61  ;;  %v9320_v36 = vrot.slane %v9319_v9, 1  ;;  %15760 = vmatpush1.bf16.xpose.msra.mxu0 %v21051_v22  ;;  %v9052_v18 = vrot.slane %v9051_v40, 1  ;;  %v9189_v0 = vadd.f32 %v9188_v20, %v21170_v44 }
 0x519   :  { %v9313_v6 = vadd.f32 %v9312_v55, %v9311_v5  ;;  %v9273_v3 = vadd.f32 %v9272_v57, %v9271_v17  ;;  %v9235_v13 = vadd.f32 %v9234_v49, %v21184_v1  ;;  %v9406_v16 = vsel %vm9374_vm0, %v21168_v39, %v21117_v25  ;;  %15762 = vmatprep.subr.bf16.mxu0 %v21056_v60 }
 0x51a   :  { %v9266_v19 = vrot.slane %v9265_v11, 1  ;;  %v9321_v53 = vadd.f32 %v9320_v36, %v9319_v9  ;;  %v9053_v33 = vadd.f32 %v9052_v18, %v9051_v40  ;;  %v9141_v28 = vadd.f32 %v9140_v48, %v21073_v4 }
 0x51b   :  { %v9314_v8 = vrot.slane %v9313_v6, 1  ;;  %v9407_v54 = vsel %vm9376_vm1, %v21232_v15, %v9406_v16  ;;  %v23703_v44 = vrot.slane %v21214_v23, 1  ;;  %v9322_v26 = vrot.slane %v21254_v24, 4 }
 0x51c   :  { %v9481_v1 = vsel %vm9374_vm0, %v9321_v53, %v9273_v3  ;;  %v9236_v30 = vrot.slane %v9235_v13, 1  ;;  %v9267_v39 = vadd.f32 %v9266_v19, %v9265_v11  ;;  %v9408_v63 = vsel %vm9378_vm2, %v9005_v56, %v9407_v54 }
 0x51d   :  { %v8999_v43 = vadd.f32 %v23703_v44, %v21214_v23  ;;  %9728 = vmatprep.mubr.f32.mxu0 %v9481_v1  ;;  %v9315_v25 = vadd.f32 %v9314_v8, %v9313_v6  ;;  %v9474_v52 = vsel %vm9458_vm4, %v9189_v0, %v9141_v28  ;;  %v9409_v61 = vsel %vm9380_vm3, %v9053_v33, %v9408_v63  ;;  %v23711_v63 = vld [vmem:[#allocation8_spill] sm:$0xff] }
 0x51e   :  { %v9237_v4 = vadd.f32 %v9236_v30, %v9235_v13  ;;  %v9230_v15 = vrot.slane %v21187_v7, 1  ;;  %v23704_v23 = vrot.slane %v21219_v50, 4  ;;  %v9047_v12 = vadd.f32 %v9046_v14, %v21263_v37 }
 0x51f   :  { %v9480_v62 = vsel %vm9374_vm0, %v9315_v25, %v9267_v39  ;;  %v9402_v59 = vsel %vm9374_vm0, %v21131_v45, %v21107_v58  ;;  %v23705_v46 = vrot.slane %v21259_v21, 4  ;;  %v23707_v37 = vrot.slane %v21119_v35, 1  ;;  %v23709_v39 = vld [vmem:[#allocation6_spill] sm:$0xff]  ;;  %v23710_v25 = vld [vmem:[#allocation7_spill] sm:$0xff] }
 0x520   :  { %v9281_v29 = vadd.f32 %v23704_v23, %v21219_v50  ;;  %9729 = vmatmul.mubr.f32.gmra.mrb[26].mxu0 %v9480_v62  ;;  %v9475_v51 = vsel %vm9460_vm5, %v9237_v4, %v9474_v52  ;;  %v9403_v47 = vsel %vm9376_vm1, %v21222_v31, %v9402_v59  ;;  %v23706_v50 = vrot.slane %v21192_v32, 4  ;;  %v23712_v52 = vld [vmem:[#allocation9_spill] sm:$0xff]  ;;  %v23713_v4 = vld [vmem:[#allocation10_spill] sm:$0xff] }
 0x521   :  { %v9329_v17 = vadd.f32 %v23705_v46, %v21259_v21  ;;  %v9183_v38 = vadd.f32 %v23707_v37, %v21119_v35  ;;  %v9508_v58 = vsel %vm9500_vm6, %v9409_v61, %v9475_v51  ;;  %15764 = vmatpush1.bf16.xpose.msra.mxu0 %v21058_v42  ;;  %v9323_v21 = vadd.f32 %v9322_v26, %v21254_v24  ;;  %v23715_v61 = vld [vmem:[#allocation36_spill] sm:$0xff]  ;;  %v16341_v62 = vld [vmem:[%s23502_s6 + $0x28] ss:$16 sps:$4 sm:$0xff]   ;;  %v16349_v51 = vld [vmem:[%s23502_s6 + $0x4c] ss:$16 sps:$4 sm:$0xff]  }
 0x522   :  { %v9282_v41 = vrot.slane %v9281_v29, 2  ;;  %v9275_v27 = vadd.f32 %v23706_v50, %v21192_v32  ;;  %9798 = vmatprep.mubr.f32.mxu0 %v9508_v58  ;;  %v9231_v5 = vadd.f32 %v9230_v15, %v21187_v7  ;;  %v23708_v57 = vrot.slane %v21054_v34, 1  ;;  %v16337_v15 = vld [vmem:[%s23502_s6 + $0xc] ss:$16 sps:$4 sm:$0xff]   ;;  %v16338_v23 = vld [vmem:[%s23502_s6 + $0x20] ss:$16 sps:$4 sm:$0xff]  }
 0x523   :  { %v9330_v45 = vrot.slane %v9329_v17, 2  ;;  %v9404_v9 = vsel %vm9378_vm2, %v8999_v43, %v9403_v47  ;;  %v9324_v35 = vrot.slane %v9323_v21, 2  ;;  %v23588_v53 = vmov 0.0   ;;  %12746 = vmatprep.subr.bf16.mxu0 %v16337_v15  ;;  %v16344_v59 = vld [vmem:[%s23502_s6 + $0x40] ss:$16 sps:$4 sm:$0xff]  }
 0x524   :  { %v9283_v31 = vadd.f32 %v9282_v41, %v9281_v29  ;;  %v9276_v10 = vrot.slane %v9275_v27, 2  ;;  %v9135_v32 = vadd.f32 %v23708_v57, %v21054_v34  ;;  %v9405_v55 = vsel %vm9380_vm3, %v9047_v12, %v9404_v9  ;;  %9889 = vmatprep.mubr.f32.mxu1 %v23588_v53  ;;  %v16340_v29 = vld [vmem:[%s23502_s6 + $0x24] ss:$16 sps:$4 sm:$0xff]   ;;  %v16343_v12 = vld [vmem:[%s23502_s6 + $0x2c] ss:$16 sps:$4 sm:$0xff]  }
 0x525   :  { %v9331_v11 = vadd.f32 %v9330_v45, %v9329_v17  ;;  %v9325_v14 = vadd.f32 %v9324_v35, %v9323_v21  ;;  %v16346_v46 = vld [vmem:[%s23502_s6 + $0x44] ss:$16 sps:$4 sm:$0xff]   ;;  %v16347_v17 = vld [vmem:[%s23502_s6 + $0x48] ss:$16 sps:$4 sm:$0xff]   ;;  %v16350_v47 = vld [vmem:[%s23502_s6 + $0x60] ss:$16 sps:$4 sm:$0xff]  }
 0x526   :  { %v9284_v40 = vrot.slane %v9283_v31, 1  ;;  %v9277_v48 = vadd.f32 %v9276_v10, %v9275_v27  ;;  %v9472_v20 = vsel %vm9458_vm4, %v9183_v38, %v9135_v32  ;;  %v16352_v41 = vld [vmem:[%s23502_s6 + $0x64] ss:$16 sps:$4 sm:$0xff]   ;;  %v16353_v50 = vld [vmem:[%s23502_s6 + $0x68] ss:$16 sps:$4 sm:$0xff]  }
 0x527   :  { %v9332_v24 = vrot.slane %v9331_v11, 1  ;;  %v9473_v7 = vsel %vm9460_vm5, %v9231_v5, %v9472_v20  ;;  %v9326_v34 = vrot.slane %v9325_v14, 1  ;;  %v16355_v27 = vld [vmem:[%s23502_s6 + $0x6c] ss:$16 sps:$4 sm:$0xff]   ;;  %v16358_v37 = vld [vmem:[%s23502_s6 + $0x84] ss:$16 sps:$4 sm:$0xff]  }
 0x528   :  { %v9278_v36 = vrot.slane %v9277_v48, 1  ;;  %v9507_v56 = vsel %vm9500_vm6, %v9405_v55, %v9473_v7  ;;  %v9285_v49 = vadd.f32 %v9284_v40, %v9283_v31  ;;  %v16361_v38 = vld [vmem:[%s23502_s6 + $0x8c] ss:$16 sps:$4 sm:$0xff]   ;;  %v16356_v58 = vld [vmem:[%s23502_s6 + $0x80] ss:$16 sps:$4 sm:$0xff]  }
 0x529   :  { %v9333_v19 = vadd.f32 %v9332_v24, %v9331_v11  ;;  %9799 = vmatmul.mubr.f32.vlgmr.msra.gmra.mrb[24].mxu0 %v9507_v56  ;;  %v9327_v0 = vadd.f32 %v9326_v34, %v9325_v14  ;;  %v16359_v45 = vld [vmem:[%s23502_s6 + $0x88] ss:$16 sps:$4 sm:$0xff]   ;;  %v16364_v21 = vld [vmem:[%s23502_s6 + $0xa4] ss:$16 sps:$4 sm:$0xff]   ;;  %v16367_v5 = vld [vmem:[%s23502_s6 + $0xac] ss:$16 sps:$4 sm:$0xff]  }
 0x52a   :  { %v9279_v18 = vadd.f32 %v9278_v36, %v9277_v48  ;;  %v16362_v31 = vld [vmem:[%s23502_s6 + $0xa0] ss:$16 sps:$4 sm:$0xff]   ;;  %v16365_v10 = vld [vmem:[%s23502_s6 + $0xa8] ss:$16 sps:$4 sm:$0xff]   ;;  %v16370_v32 = vld [vmem:[%s23502_s6 + $0xc4] ss:$16 sps:$4 sm:$0xff]  }
 0x52b   :  { %v9483_v6 = vsel %vm9374_vm0, %v9333_v19, %v9285_v49  ;;  %v16368_v57 = vld [vmem:[%s23502_s6 + $0xc0] ss:$16 sps:$4 sm:$0xff]   ;;  %v16371_v9 = vld [vmem:[%s23502_s6 + $0xc8] ss:$16 sps:$4 sm:$0xff]   ;;  %v16373_v11 = vld [vmem:[%s23502_s6 + $0xcc] ss:$16 sps:$4 sm:$0xff]  }
 0x52c   :  { %9803 = vmatprep.mubr.f32.mxu0 %v9483_v6  ;;  %v9482_v3 = vsel %vm9374_vm0, %v9327_v0, %v9279_v18  ;;  %v16374_v35 = vld [vmem:[%s23502_s6 + $0xe0] ss:$16 sps:$4 sm:$0xff]   ;;  %v16376_v55 = vld [vmem:[%s23502_s6 + $0xe4] ss:$16 sps:$4 sm:$0xff]   ;;  %v16377_v40 = vld [vmem:[%s23502_s6 + $0xe8] ss:$16 sps:$4 sm:$0xff]  }
 0x52d   :  { %9804 = vmatmul.mubr.f32.gmra.mrb[26].mxu0 %v9482_v3  ;;  %v16379_v48 = vld [vmem:[%s23502_s6 + $0xec] ss:$16 sps:$4 sm:$0xff]   ;;  %v16382_v20 = vld [vmem:[%s23502_s6 + $0x104] ss:$16 sps:$4 sm:$0xff]   ;;  %v16380_v14 = vld [vmem:[%s23502_s6 + $0x100] ss:$16 sps:$4 sm:$0xff]  }
 0x52e   :  { %v16385_v24 = vld [vmem:[%s23502_s6 + $0x10c] ss:$16 sps:$4 sm:$0xff]   ;;  %v16383_v7 = vld [vmem:[%s23502_s6 + $0x108] ss:$16 sps:$4 sm:$0xff]   ;;  %v16388_v36 = vld [vmem:[%s23502_s6 + $0x124] ss:$16 sps:$4 sm:$0xff]  }
 0x52f   :  { %v16391_v56 = vld [vmem:[%s23502_s6 + $0x12c] ss:$16 sps:$4 sm:$0xff]   ;;  %v16386_v49 = vld [vmem:[%s23502_s6 + $0x120] ss:$16 sps:$4 sm:$0xff]   ;;  %v16389_v19 = vld [vmem:[%s23502_s6 + $0x128] ss:$16 sps:$4 sm:$0xff]  }
 0x530   :  { %v16394_v34 = vld [vmem:[%s23502_s6 + $0x144] ss:$16 sps:$4 sm:$0xff]   ;;  %v16397_v6 = vld [vmem:[%s23502_s6 + $0x14c] ss:$16 sps:$4 sm:$0xff]   ;;  %v16392_v18 = vld [vmem:[%s23502_s6 + $0x140] ss:$16 sps:$4 sm:$0xff]  }
 0x531   :  { %v16395_v0 = vld [vmem:[%s23502_s6 + $0x148] ss:$16 sps:$4 sm:$0xff]   ;;  %v16400_v3 = vld [vmem:[%s23502_s6 + $0x164] ss:$16 sps:$4 sm:$0xff]   ;;  %v16822_v15 = vmov 1966171168  }
 0x5fc   :  { %v9800_v13 = vpop.f32.mrb[24].mxu0 }
 0x5fd   :  { %v9809_v16 = vmul.f32 0.00390625, %v9800_v13  ;;  %v9802_v8 = vpop.f32.mrb[25].mxu0  ;;  %v16403_v13 = vld [vmem:[%s23502_s6 + $0x16c] ss:$16 sps:$4 sm:$0xff]  }
 0x5fe   :  { %v16401_v8 = vld [vmem:[%s23502_s6 + $0x168] ss:$16 sps:$4 sm:$0xff]  }
 0x5ff   :  { %v9811_v33 = vmul.f32 %v9809_v16, %v9809_v16 }
 0x600   :  { %v9805_v28 = vpop.f32.mrb[26].mxu0 }
 0x601   :  { %v9810_v54 = vmul.f32 0.00390625, %v9805_v28  ;;  %v9813_v44 = vrot.slane %v9811_v33, 3  ;;  %v9807_v43 = vpop.f32.mrb[27].mxu0  ;;  %v16406_v33 = vld [vmem:[%s23502_s6 + $0x184] ss:$16 sps:$4 sm:$0xff]  }
 0x602   :  { %v16409_v28 = vld [vmem:[%s23502_s6 + $0x18c] ss:$16 sps:$4 sm:$0xff]   ;;  %v16412_v43 = vld [vmem:[%s23502_s6 + $0x1a4] ss:$16 sps:$4 sm:$0xff]  }
 0x603   :  { %v9815_v26 = vsub.f32 %v9809_v16, %v9813_v44  ;;  %v9816_v1 = vsub.f32 %v9810_v54, %v9813_v44  ;;  %v16404_v54 = vld [vmem:[%s23502_s6 + $0x180] ss:$16 sps:$4 sm:$0xff]   ;;  %v16407_v44 = vld [vmem:[%s23502_s6 + $0x188] ss:$16 sps:$4 sm:$0xff]  }
 0x605   :  { %v9817_v30 = vsel %vm9500_vm6, %v9809_v16, %v9815_v26  ;;  %v16398_v16 = vld [vmem:[%s23502_s6 + $0x160] ss:$16 sps:$4 sm:$0xff]   ;;  %v16415_v26 = vld [vmem:[%s23502_s6 + $0x1ac] ss:$16 sps:$4 sm:$0xff]  }
 0x606   :  { %15388 = vmatmul.mubr.msk.f32.vlgmr.msra.gmra.mrb[24].mxu1 %vm9818_vm7, %v9817_v30 }
 0x607   :  { %15776 = vmatpush1.bf16.msra.mxu1 %v20842_v2  ;;  %9895 = vmatprep.mubr.f32.mxu1 %v23588_v53  ;;  %v23714_v2 = vld [vmem:[#allocation35_spill] sm:$0xff] }
 0x608   :  { %15778 = vmatprep.subr.bf16.mxu1 %v23709_v39  ;;  %v16418_v39 = vld [vmem:[%s23502_s6 + $0x1c4] ss:$16 sps:$4 sm:$0xff]  }
 0x60a   :  { %15389 = vmatmul.mubr.msk.f32.gmra.mrb[26].mxu1 %vm9818_vm7, %v9816_v1 }
 0x60b   :  { %15780 = vmatpush1.bf16.msra.mxu1 %v23710_v25  ;;  %9966 = vmatprep.mubr.f32.mxu1 %v23588_v53  ;;  %v16421_v25 = vld [vmem:[%s23502_s6 + $0x1cc] ss:$16 sps:$4 sm:$0xff]  }
 0x60c   :  { %15782 = vmatprep.subr.bf16.mxu1 %v23711_v63  ;;  %v16416_v63 = vld [vmem:[%s23502_s6 + $0x1c0] ss:$16 sps:$4 sm:$0xff]  }
 0x60e   :  { %15390 = vmatmul.mubr.msk.f32.vlgmr.msra.gmra.mrb[28].mxu1 %vm9818_vm7, %v9817_v30 }
 0x60f   :  { %15784 = vmatpush1.bf16.msra.mxu1 %v23712_v52  ;;  %9972 = vmatprep.mubr.f32.mxu1 %v23588_v53  ;;  %v16419_v52 = vld [vmem:[%s23502_s6 + $0x1c8] ss:$16 sps:$4 sm:$0xff]  }
 0x610   :  { %15786 = vmatprep.subr.bf16.mxu1 %v23713_v4  ;;  %v16424_v4 = vld [vmem:[%s23502_s6 + $0x1e4] ss:$16 sps:$4 sm:$0xff]  }
 0x612   :  { %15391 = vmatmul.mubr.msk.f32.gmra.mrb[30].mxu1 %vm9818_vm7, %v9816_v1 }
 0x613   :  { %15788 = vmatpush1.bf16.msra.mxu1 %v23714_v2  ;;  %10043 = vmatprep.mubr.f32.mxu1 %v23588_v53  ;;  %v16427_v2 = vld [vmem:[%s23502_s6 + $0x1ec] ss:$16 sps:$4 sm:$0xff]  }
 0x614   :  { %15790 = vmatprep.subr.bf16.mxu1 %v23715_v61  ;;  %v16422_v61 = vld [vmem:[%s23502_s6 + $0x1e0] ss:$16 sps:$4 sm:$0xff]  }
 0x616   :  { %15392 = vmatmul.mubr.msk.f32.vlgmr.msra.gmra.mrb[32].mxu1 %vm9818_vm7, %v9817_v30 }
 0x617   :  { %15792 = vmatpush1.bf16.msra.mxu1 %v21051_v22  ;;  %10049 = vmatprep.mubr.f32.mxu1 %v23588_v53  ;;  %v16332_v22 = vld [vmem:[%s23502_s6] ss:$16 sps:$4 sm:$0xff]  }
 0x618   :  { %15794 = vmatprep.subr.bf16.mxu1 %v21056_v60  ;;  %v16334_v60 = vld [vmem:[%s23502_s6 + $0x4] ss:$16 sps:$4 sm:$0xff]  }
 0x61a   :  { %15393 = vmatmul.mubr.msk.f32.gmra.mrb[34].mxu1 %vm9818_vm7, %v9816_v1 }
 0x61b   :  { %15796 = vmatpush1.bf16.msra.mxu1 %v21058_v42  ;;  %10120 = vmatprep.mubr.f32.mxu1 %v23588_v53  ;;  %v16335_v42 = vld [vmem:[%s23502_s6 + $0x8] ss:$16 sps:$4 sm:$0xff]  }
 0x61c   :  { %12502 = vmatprep.subr.bf16.mxu1 %v16334_v60  ;;  %12747 = vmatpush1.bf16.msra.mxu0 %v16335_v42  ;;  %v16430_v60 = vld [vmem:[%s23502_s6 + $0x204] ss:$16 sps:$4 sm:$0xff]   ;;  %v16433_v42 = vld [vmem:[%s23502_s6 + $0x20c] ss:$16 sps:$4 sm:$0xff]  }
 0x61d   :  { %12748 = vmatprep.subr.bf16.mxu0 %v16343_v12 }
 0x61e   :  { %15394 = vmatmul.mubr.msk.f32.vlgmr.msra.gmra.mrb[36].mxu1 %vm9818_vm7, %v9817_v30  ;;  %v16413_v30 = vld [vmem:[%s23502_s6 + $0x1a8] ss:$16 sps:$4 sm:$0xff]  }
 0x61f   :  { %10126 = vmatprep.mubr.f32.mxu1 %v23588_v53  ;;  %12503 = vmatpush1.bf16.msra.mxu1 %v16332_v22  ;;  %v16425_v22 = vld [vmem:[%s23502_s6 + $0x1e8] ss:$16 sps:$4 sm:$0xff]  }
 0x620   :  { %12504 = vmatprep.subr.bf16.mxu1 %v16340_v29  ;;  %12749 = vmatpush1.bf16.msra.mxu0 %v16341_v62 }
 0x621   :  { %12750 = vmatprep.subr.bf16.mxu0 %v16349_v51 }
 0x622   :  { %15395 = vmatmul.mubr.msk.f32.gmra.mrb[38].mxu1 %vm9818_vm7, %v9816_v1  ;;  %v16410_v1 = vld [vmem:[%s23502_s6 + $0x1a0] ss:$16 sps:$4 sm:$0xff]  }
 0x623   :  { %12505 = vmatpush1.bf16.msra.mxu1 %v16338_v23  ;;  %v10198_v23 = vunpack.c.l.s4 %v16822_v15 }
 0x624   :  { %12506 = vmatprep.subr.bf16.mxu1 %v16346_v46  ;;  %12751 = vmatpush1.bf16.msra.mxu0 %v16347_v17 }
 0x625   :  { %12752 = vmatprep.subr.bf16.mxu0 %v16355_v27 }
 0x627   :  { %12507 = vmatpush1.bf16.msra.mxu1 %v16344_v59 }
 0x628   :  { %12508 = vmatprep.subr.bf16.mxu1 %v16352_v41  ;;  %12753 = vmatpush1.bf16.msra.mxu0 %v16353_v50 }
 0x629   :  { %12754 = vmatprep.subr.bf16.mxu0 %v16361_v38 }
 0x62b   :  { %12509 = vmatpush1.bf16.msra.mxu1 %v16350_v47  ;;  %v10199_v47 = vunpack.c.0.s8 %v10198_v23 }
 0x62c   :  { %12510 = vmatprep.subr.bf16.mxu1 %v16358_v37  ;;  %12755 = vmatpush1.bf16.msra.mxu0 %v16359_v45 }
 0x62d   :  { %12756 = vmatprep.subr.bf16.mxu0 %v16367_v5 }
 0x62f   :  { %12511 = vmatpush1.bf16.msra.mxu1 %v16356_v58  ;;  %v23716_v58 = vld [vmem:[#allocation12_spill] sm:$0xff] }
 0x630   :  { %12512 = vmatprep.subr.bf16.mxu1 %v16364_v21  ;;  %12757 = vmatpush1.bf16.msra.mxu0 %v16365_v10  ;;  %v21585_v45 = vsub.s32 %v10199_v47, %v23716_v58 }
 0x631   :  { %12758 = vmatprep.subr.bf16.mxu0 %v16373_v11 }
 0x633   :  { %12513 = vmatpush1.bf16.msra.mxu1 %v16362_v31 }
 0x634   :  { %12514 = vmatprep.subr.bf16.mxu1 %v16370_v32  ;;  %12759 = vmatpush1.bf16.msra.mxu0 %v16371_v9 }
 0x635   :  { %12760 = vmatprep.subr.bf16.mxu0 %v16379_v48 }
 0x637   :  { %12515 = vmatpush1.bf16.msra.mxu1 %v16368_v57 }
 0x638   :  { %12516 = vmatprep.subr.bf16.mxu1 %v16376_v55  ;;  %12761 = vmatpush1.bf16.msra.mxu0 %v16377_v40 }
 0x639   :  { %12762 = vmatprep.subr.bf16.mxu0 %v16385_v24 }
 0x63b   :  { %12517 = vmatpush1.bf16.msra.mxu1 %v16374_v35 }
 0x63c   :  { %12518 = vmatprep.subr.bf16.mxu1 %v16382_v20  ;;  %12763 = vmatpush1.bf16.msra.mxu0 %v16383_v7 }
 0x63d   :  { %12764 = vmatprep.subr.bf16.mxu0 %v16391_v56 }
 0x63f   :  { %12519 = vmatpush1.bf16.msra.mxu1 %v16380_v14 }
 0x640   :  { %12520 = vmatprep.subr.bf16.mxu1 %v16388_v36  ;;  %12765 = vmatpush1.bf16.msra.mxu0 %v16389_v19 }
 0x641   :  { %12766 = vmatprep.subr.bf16.mxu0 %v16397_v6 }
 0x643   :  { %12521 = vmatpush1.bf16.msra.mxu1 %v16386_v49 }
 0x644   :  { %12522 = vmatprep.subr.bf16.mxu1 %v16394_v34  ;;  %12767 = vmatpush1.bf16.msra.mxu0 %v16395_v0 }
 0x645   :  { %12768 = vmatprep.subr.bf16.mxu0 %v16403_v13 }
 0x647   :  { %12523 = vmatpush1.bf16.msra.mxu1 %v16392_v18 }
 0x648   :  { %12524 = vmatprep.subr.bf16.mxu1 %v16400_v3  ;;  %12769 = vmatpush1.bf16.msra.mxu0 %v16401_v8 }
 0x649   :  { %12770 = vmatprep.subr.bf16.mxu0 %v16409_v28 }
 0x64b   :  { %12525 = vmatpush1.bf16.msra.mxu1 %v16398_v16 }
 0x64c   :  { %12526 = vmatprep.subr.bf16.mxu1 %v16406_v33  ;;  %12771 = vmatpush1.bf16.msra.mxu0 %v16407_v44 }
 0x64d   :  { %12772 = vmatprep.subr.bf16.mxu0 %v16415_v26 }
 0x64f   :  { %12527 = vmatpush1.bf16.msra.mxu1 %v16404_v54 }
 0x650   :  { %12528 = vmatprep.subr.bf16.mxu1 %v16412_v43  ;;  %12773 = vmatpush1.bf16.msra.mxu0 %v16413_v30  ;;  %v21613_v30 = vld [vmem:[%s23500_s4] sm:$0xff] }
 0x651   :  { %12774 = vmatprep.subr.bf16.mxu0 %v16421_v25  ;;  %23718 = vst [vmem:[#allocation7_spill] sm:$0xff] %v21613_v30 }
 0x653   :  { %12529 = vmatpush1.bf16.msra.mxu1 %v16410_v1  ;;  %v21608_v1 = vld [vmem:[%s23499_s3] sm:$0xff] }
 0x654   :  { %12530 = vmatprep.subr.bf16.mxu1 %v16418_v39  ;;  %12775 = vmatpush1.bf16.msra.mxu0 %v16419_v52  ;;  %23717 = vst [vmem:[#allocation6_spill] sm:$0xff] %v21608_v1 }
 0x655   :  { %12776 = vmatprep.subr.bf16.mxu0 %v16427_v2 }
 0x657   :  { %12531 = vmatpush1.bf16.msra.mxu1 %v16416_v63 }
 0x658   :  { %12532 = vmatprep.subr.bf16.mxu1 %v16424_v4  ;;  %12777 = vmatpush1.bf16.msra.mxu0 %v16425_v22  ;;  %v23719_v22 = vld [vmem:[#allocation15_spill] sm:$0xff] }
 0x659   :  { %12807 = vmatprep.subr.bf16.mxu0 %v16433_v42  ;;  %v21621_v42 = vrot.slane %v21613_v30, %v23719_v22 }
 0x65b   :  { %12533 = vmatpush1.bf16.msra.mxu1 %v16422_v61 }
 0x65c   :  { %12563 = vmatprep.subr.bf16.mxu1 %v16430_v60  ;;  %v21617_v60 = vrot.slane %v21608_v1, %v23719_v22 }
 0x6d9   :  { %v9891_v29 = vpop.f32.mrb[24].mxu1 }
 0x6da   :  { %v10133_v62 = vmax.f32 %v9891_v29, 0.0  ;;  %v9893_v12 = vpop.f32.mrb[25].mxu1 }
 0x6db   :  { %v10134_v59 = vmax.f32 %v9893_v12, 0.0  ;;  %v10189_v46 = vcombine.low %v9891_v29, %v9893_v12  ;;  %v10190_v17 = vcombine.high %v9891_v29, %v9893_v12  ;;  %v23720_v29 = vld [vmem:[#allocation13_spill] sm:$0xff] }
 0x6dc   :  { %v10149_v51 = vadd.f32 1e-05, %v10133_v62  ;;  %v21625_v62 = vrot.slane %v21608_v1, %v23720_v29  ;;  %v21629_v12 = vrot.slane %v21613_v30, %v23720_v29 }
 0x6dd   :  { %v10150_v41 = vadd.f32 1e-05, %v10134_v59  ;;  %v9897_v50 = vpop.f32.mrb[26].mxu1  ;;  %v21588_v35 = vrot.slane %v10189_v46, %v21585_v45  ;;  %v21591_v40 = vrot.slane %v10190_v17, %v21585_v45  ;;  %v23721_v59 = vld [vmem:[#allocation16_spill] sm:$0xff] }
 0x6de   :  { %16748 = vrsqrt.f32 %v10149_v51  ;;  %v10141_v27 = vmax.f32 %v9897_v50, 0.0  ;;  %v9899_v37 = vpop.f32.mrb[27].mxu1  ;;  %v21633_v46 = vrot.slane %v21608_v1, %v23721_v59  ;;  %v23722_v50 = vld [vmem:[#allocation14_spill] sm:$0xff] }
 0x6df   :  { %16750 = vrsqrt.f32 %v10150_v41  ;;  %v10142_v38 = vmax.f32 %v9899_v37, 0.0  ;;  %v21637_v41 = vrot.slane %v21613_v30, %v23721_v59  ;;  %v23723_v37 = vld [vmem:[#allocation39_spill] sm:$0xff] }
 0x6e0   :  { %v10157_v21 = vadd.f32 1e-05, %v10141_v27  ;;  %v21641_v27 = vrot.slane %v21608_v1, %v23722_v50 }
 0x6e1   :  { %v10158_v5 = vadd.f32 1e-05, %v10142_v38  ;;  %v9968_v31 = vpop.f32.mrb[28].mxu1  ;;  %v21645_v38 = vrot.slane %v21608_v1, %v23723_v37 }
 0x6e2   :  { %16752 = vrsqrt.f32 %v10157_v21  ;;  %v10135_v10 = vmax.f32 %v9968_v31, 0.0  ;;  %v9970_v57 = vpop.f32.mrb[29].mxu1 }
 0x6e3   :  { %16754 = vrsqrt.f32 %v10158_v5  ;;  %v10136_v32 = vmax.f32 %v9970_v57, 0.0  ;;  %v10191_v9 = vcombine.low %v9968_v31, %v9970_v57  ;;  %v10192_v11 = vcombine.high %v9968_v31, %v9970_v57  ;;  %23724 = vst [vmem:[#allocation8_spill] sm:$0xff] %v21645_v38  ;;  %v23725_v31 = vld [vmem:[#allocation37_spill] sm:$0xff] }
 0x6e4   :  { %v10151_v55 = vadd.f32 1e-05, %v10135_v10  ;;  %v21649_v10 = vrot.slane %v21608_v1, %v23725_v31 }
 0x6e5   :  { %v10152_v48 = vadd.f32 1e-05, %v10136_v32  ;;  %v21594_v20 = vrot.slane %v10191_v9, %v21585_v45  ;;  %v21597_v24 = vrot.slane %v10192_v11, %v21585_v45  ;;  %v9974_v14 = vpop.f32.mrb[30].mxu1 }
 0x6e6   :  { %16756 = vrsqrt.f32 %v10151_v55  ;;  %v10143_v7 = vmax.f32 %v9974_v14, 0.0  ;;  %v9976_v36 = vpop.f32.mrb[31].mxu1  ;;  %23726 = vst [vmem:[#allocation9_spill] sm:$0xff] %v21649_v10 }
 0x6e7   :  { %16758 = vrsqrt.f32 %v10152_v48  ;;  %v10253_v56 = vcombine.low %v21588_v35, %v21594_v20  ;;  %v10254_v49 = vcombine.high %v21588_v35, %v21594_v20  ;;  %v10255_v19 = vcombine.low %v21591_v40, %v21597_v24 }
 0x6e8   :  { %v16749_v34 = vpop.eup %16748  ;;  %v10159_v6 = vadd.f32 1e-05, %v10143_v7  ;;  %v10144_v18 = vmax.f32 %v9976_v36, 0.0  ;;  %v21686_v35 = vrot.slane %v21613_v30, %v23722_v50 }
 0x6e9   :  { %v16751_v0 = vpop.eup %16750  ;;  %v10045_v3 = vpop.f32.mrb[32].mxu1 }
 0x6ea   :  { %v10562_v13 = vcombine.high %v16749_v34, %v16751_v0  ;;  %16760 = vrsqrt.f32 %v10159_v6  ;;  %v10160_v16 = vadd.f32 1e-05, %v10144_v18  ;;  %v10137_v8 = vmax.f32 %v10045_v3, 0.0  ;;  %v10047_v33 = vpop.f32.mrb[33].mxu1 }
 0x6eb   :  { %v10138_v28 = vmax.f32 %v10047_v33, 0.0  ;;  %v10193_v54 = vcombine.low %v10045_v3, %v10047_v33  ;;  %v10194_v44 = vcombine.high %v10045_v3, %v10047_v33 }
 0x6ec   :  { %v16753_v43 = vpop.eup %16752  ;;  %16762 = vrsqrt.f32 %v10160_v16  ;;  %v10153_v26 = vadd.f32 1e-05, %v10137_v8  ;;  %v10572_v55 = vrot.slane %v10562_v13, %v21585_v45 }
 0x6ed   :  { %v16755_v39 = vpop.eup %16754  ;;  %v10154_v25 = vadd.f32 1e-05, %v10138_v28  ;;  %v10051_v63 = vpop.f32.mrb[34].mxu1  ;;  %v10231_v14 = vrot.slane %v10193_v54, %v21585_v45  ;;  %v10238_v36 = vrot.slane %v10194_v44, %v21585_v45  ;;  %v10265_v44 = vrot.slane %v10253_v56, %v21585_v45 }
 0x6ee   :  { %v10629_v52 = vcombine.low %v16753_v43, %v16755_v39  ;;  %16764 = vrsqrt.f32 %v10153_v26  ;;  %v10145_v4 = vmax.f32 %v10051_v63, 0.0  ;;  %v10053_v2 = vpop.f32.mrb[35].mxu1  ;;  %v10279_v56 = vrot.slane %v10254_v49, %v21585_v45 }
 0x6ef   :  { %16766 = vrsqrt.f32 %v10154_v25  ;;  %v10146_v61 = vmax.f32 %v10053_v2, 0.0 }
 0x6f0   :  { %v16757_v15 = vpop.eup %16756  ;;  %v10161_v23 = vadd.f32 1e-05, %v10145_v4  ;;  %v10639_v39 = vrot.slane %v10629_v52, %v21585_v45  ;;  %v10272_v52 = vrot.slane %v10255_v19, %v21585_v45  ;;  %v21692_v19 = vrot.slane %v21613_v30, %v23723_v37 }
 0x6f1   :  { %v16759_v17 = vpop.eup %16758  ;;  %v10162_v51 = vadd.f32 1e-05, %v10146_v61  ;;  %v10122_v47 = vpop.f32.mrb[36].mxu1 }
 0x6f2   :  { %v10563_v58 = vcombine.high %v16757_v15, %v16759_v17  ;;  %16768 = vrsqrt.f32 %v10161_v23  ;;  %v10139_v21 = vmax.f32 %v10122_v47, 0.0  ;;  %v10124_v5 = vpop.f32.mrb[37].mxu1  ;;  %23728 = vst [vmem:[#allocation35_spill] sm:$0xff] %v21692_v19 }
 0x6f3   :  { %16770 = vrsqrt.f32 %v10162_v51  ;;  %v10140_v57 = vmax.f32 %v10124_v5, 0.0  ;;  %v10195_v32 = vcombine.low %v10122_v47, %v10124_v5  ;;  %v10196_v9 = vcombine.high %v10122_v47, %v10124_v5 }
 0x6f4   :  { %v16761_v11 = vpop.eup %16760  ;;  %v10579_v48 = vrot.slane %v10563_v58, %v21585_v45  ;;  %v10155_v7 = vadd.f32 1e-05, %v10139_v21 }
 0x6f5   :  { %v10156_v34 = vadd.f32 1e-05, %v10140_v57  ;;  %v10245_v6 = vrot.slane %v10195_v32, %v21585_v45  ;;  %v10252_v18 = vrot.slane %v10196_v9, %v21585_v45  ;;  %v10128_v0 = vpop.f32.mrb[38].mxu1 }
 0x6f6   :  { %v16763_v3 = vpop.eup %16762  ;;  %v10594_v16 = vcombine.low %v10572_v55, %v10579_v48  ;;  %v10595_v8 = vcombine.high %v10572_v55, %v10579_v48  ;;  %16772 = vrsqrt.f32 %v10155_v7  ;;  %v10147_v33 = vmax.f32 %v10128_v0, 0.0  ;;  %v10130_v28 = vpop.f32.mrb[39].mxu1 }
 0x6f7   :  { %v10630_v13 = vcombine.low %v16761_v11, %v16763_v3  ;;  %16774 = vrsqrt.f32 %v10156_v34  ;;  %v10256_v43 = vcombine.low %v10231_v14, %v10245_v6  ;;  %v10257_v26 = vcombine.high %v10231_v14, %v10245_v6  ;;  %v23730_v14 = vld [vmem:[#allocation40_spill] sm:$0xff] }
 0x6f8   :  { %v16765_v54 = vpop.eup %16764  ;;  %v10258_v25 = vcombine.low %v10238_v36, %v10252_v18  ;;  %v10163_v63 = vadd.f32 1e-05, %v10147_v33  ;;  %v10148_v23 = vmax.f32 %v10130_v28, 0.0  ;;  %v21698_v48 = vrot.slane %v21613_v30, %v23725_v31 }
 0x6f9   :  { %v16767_v4 = vpop.eup %16766  ;;  %v10646_v2 = vrot.slane %v10630_v13, %v21585_v45  ;;  %v10286_v61 = vrot.slane %v10256_v43, %v21585_v45  ;;  %v10300_v15 = vrot.slane %v10257_v26, %v21585_v45  ;;  %v21702_v7 = vrot.slane %v21608_v1, %v23730_v14 }
 0x6fa   :  { %v10564_v17 = vcombine.high %v16765_v54, %v16767_v4  ;;  %v10293_v51 = vrot.slane %v10258_v25, %v21585_v45  ;;  %16776 = vrsqrt.f32 %v10163_v63  ;;  %v10164_v24 = vadd.f32 1e-05, %v10148_v23  ;;  %23729 = vst [vmem:[#allocation36_spill] sm:$0xff] %v21698_v48  ;;  %v23733_v54 = vld [vmem:[#allocation19_spill] sm:$0xff] }
 0x6fb   :  { %v10661_v47 = vcombine.low %v10639_v39, %v10646_v2  ;;  %v10662_v58 = vcombine.high %v10639_v39, %v10646_v2  ;;  %v21674_v21 = vcombine.low %v10265_v44, %v10286_v61  ;;  %v21676_v5 = vcombine.high %v10265_v44, %v10286_v61  ;;  %23731 = vst [vmem:[#allocation12_spill] sm:$0xff] %v21702_v7  ;;  %v23734_v25 = vld [vmem:[#allocation23_spill] sm:$0xff]  ;;  %v23735_v2 = vld [vmem:[#allocation17_spill] sm:$0xff] }
 0x6fc   :  { %v16769_v57 = vpop.eup %16768  ;;  %v21678_v32 = vcombine.low %v10272_v52, %v10293_v51  ;;  %v21680_v9 = vcombine.low %v10279_v56, %v10300_v15  ;;  %v21682_v40 = vcombine.high %v10279_v56, %v10300_v15  ;;  %16778 = vrsqrt.f32 %v10164_v24  ;;  %v23736_v15 = vld [vmem:[#allocation21_spill] sm:$0xff] }
 0x6fd   :  { %23727 = vst [vmem:[#allocation10_spill] sm:$0xff] %v21676_v5  ;;  %v16771_v20 = vpop.eup %16770  ;;  %v10313_v49 = vrot.slane %v21674_v21, %v23719_v22  ;;  %v10309_v36 = vrot.slane %v21674_v21, %v23720_v29  ;;  %v21710_v6 = vrot.slane %v21613_v30, %v23730_v14  ;;  %v10604_v0 = vrot.slane %v10594_v16, %v21585_v45  ;;  %v23737_v51 = vld [vmem:[#allocation25_spill] sm:$0xff]  ;;  %v23746_v30 = vld [vmem:[#allocation22_spill] sm:$0xff]  ;;  %v23747_v14 = vld [vmem:[#allocation27_spill] sm:$0xff] }
 0x6fe   :  { %v10631_v11 = vcombine.low %v16769_v57, %v16771_v20  ;;  %v10345_v55 = vrot.slane %v21680_v9, %v23719_v22  ;;  %v10341_v34 = vrot.slane %v21680_v9, %v23720_v29  ;;  %v10611_v3 = vrot.slane %v10595_v8, %v21585_v45 }
 0x6ff   :  { %23732 = vst [vmem:[#allocation39_spill] sm:$0xff] %v21710_v6  ;;  %v10586_v33 = vrot.slane %v10564_v17, %v21585_v45  ;;  %v10377_v28 = vrot.slane %v21676_v5, %v23719_v22  ;;  %v21718_v43 = vrot.slane %v10661_v47, %v21585_v45  ;;  %v21721_v26 = vrot.slane %v10662_v58, %v21585_v45 }
 0x700   :  { %v16773_v18 = vpop.eup %16772  ;;  %v10507_v39 = vsub.f32 %v23733_v54, %v10313_v49  ;;  %v10409_v44 = vrot.slane %v21682_v40, %v23719_v22  ;;  %v10653_v16 = vrot.slane %v10631_v11, %v21585_v45  ;;  %v10515_v63 = vsub.f32 %v23734_v25, %v10345_v55 }
 0x701   :  { %v16775_v13 = vpop.eup %16774  ;;  %v10373_v4 = vrot.slane %v21676_v5, %v23720_v29  ;;  %v10506_v61 = vsub.f32 %v23735_v2, %v10309_v36  ;;  %v10514_v23 = vsub.f32 %v23736_v15, %v10341_v34  ;;  %v10405_v52 = vrot.slane %v21682_v40, %v23720_v29  ;;  %v23738_v34 = vld [vmem:[#allocation29_spill] sm:$0xff]  ;;  %v23741_v2 = vld [vmem:[#allocation31_spill] sm:$0xff] }
 0x702   :  { %v10565_v8 = vcombine.high %v16773_v18, %v16775_v13  ;;  %v10441_v56 = vrot.slane %v21678_v32, %v23719_v22  ;;  %v10523_v47 = vsub.f32 %v23737_v51, %v10377_v28  ;;  %v10437_v58 = vrot.slane %v21678_v32, %v23720_v29  ;;  %v23739_v28 = vld [vmem:[#allocation24_spill] sm:$0xff] }
 0x703   :  { %v10321_v57 = vrot.slane %v21674_v21, %v23721_v59  ;;  %v10353_v20 = vrot.slane %v21680_v9, %v23721_v59  ;;  %v10317_v24 = vrot.slane %v21674_v21, %v23722_v50  ;;  %v10349_v49 = vrot.slane %v21680_v9, %v23722_v50 }
 0x704   :  { %v10593_v17 = vrot.slane %v10565_v8, %v21585_v45  ;;  %v10385_v11 = vrot.slane %v21676_v5, %v23721_v59  ;;  %v21751_v18 = vsub.f32 %v23738_v34, %v10409_v44  ;;  %v10522_v13 = vsub.f32 %v23739_v28, %v10373_v4  ;;  %v16777_v54 = vpop.eup %16776  ;;  %v23740_v8 = vld [vmem:[#allocation28_spill] sm:$0xff] }
 0x705   :  { %v21755_v25 = vsub.f32 %v23740_v8, %v10405_v52  ;;  %v21758_v15 = vsub.f32 %v23741_v2, %v10441_v56  ;;  %v10417_v51 = vrot.slane %v21682_v40, %v23721_v59  ;;  %v10381_v53 = vrot.slane %v21676_v5, %v23722_v50  ;;  %v23743_v4 = vld [vmem:[#allocation20_spill] sm:$0xff]  ;;  %v23744_v8 = vld [vmem:[#allocation5_spill] sm:$0xff]  ;;  %v23745_v2 = vld [vmem:[#allocation18_spill] sm:$0xff] }
 0x706   :  { %v10596_v55 = vcombine.low %v10586_v33, %v10593_v17  ;;  %v10597_v36 = vcombine.high %v10586_v33, %v10593_v17  ;;  %v23742_v17 = vld [vmem:[#allocation32_spill] sm:$0xff]  ;;  %v21770_v28 = vsub.f32 %v23743_v4, %v10321_v57  ;;  %v16779_v52 = vpop.eup %16778  ;;  %v21773_v56 = vsub.f32 %v23744_v8, %v10353_v20  ;;  %v23748_v4 = vld [vmem:[#allocation33_spill] sm:$0xff] }
 0x707   :  { %v21767_v34 = vsub.f32 %v23742_v17, %v10437_v58  ;;  %v21776_v6 = vsub.f32 %v23745_v2, %v10317_v24  ;;  %v21779_v7 = vsub.f32 %v23746_v30, %v10349_v49  ;;  %v10632_v57 = vcombine.low %v16777_v54, %v16779_v52  ;;  %v23749_v24 = vld [vmem:[#allocation26_spill] sm:$0xff] }
 0x708   :  { %v10618_v33 = vrot.slane %v10596_v55, %v21585_v45  ;;  %v10625_v44 = vrot.slane %v10597_v36, %v21585_v45  ;;  %v21782_v55 = vsub.f32 %v23747_v14, %v10385_v11  ;;  %v21791_v48 = vsub.f32 %v23748_v4, %v10417_v51 }
 0x709   :  { %v21796_v8 = vsub.f32 %v23749_v24, %v10381_v53  ;;  %v10660_v14 = vrot.slane %v10632_v57, %v21585_v45 }
 0x70a   :  { %v21784_v36 = vcombine.high %v10604_v0, %v10618_v33  ;;  %v21786_v58 = vcombine.low %v10611_v3, %v10625_v44  ;;  %v21788_v17 = vcombine.high %v10611_v3, %v10625_v44 }
 0x70b   :  { %v10663_v33 = vcombine.low %v10653_v16, %v10660_v14  ;;  %v10664_v44 = vcombine.high %v10653_v16, %v10660_v14 }
 0x70c   :  { %v10702_v0 = vrot.slane %v21786_v58, %v23719_v22  ;;  %v10734_v3 = vrot.slane %v21784_v36, %v23719_v22  ;;  %v10698_v49 = vrot.slane %v21786_v58, %v23720_v29  ;;  %v10730_v11 = vrot.slane %v21784_v36, %v23720_v29 }
 0x70d   :  { %v10766_v53 = vrot.slane %v21788_v17, %v23719_v22  ;;  %v10762_v54 = vrot.slane %v21788_v17, %v23720_v29  ;;  %v10710_v51 = vrot.slane %v21786_v58, %v23721_v59  ;;  %v10685_v20 = vrot.slane %v10663_v33, %v21585_v45 }
 0x70e   :  { %v10896_v52 = vmul.f32 %v10702_v0, %v10507_v39  ;;  %v10904_v2 = vmul.f32 %v10734_v3, %v10515_v63  ;;  %v10895_v57 = vmul.f32 %v10698_v49, %v10506_v61  ;;  %v10903_v4 = vmul.f32 %v10730_v11, %v10514_v23 }
 0x70f   :  { %v10912_v24 = vmul.f32 %v10766_v53, %v10523_v47  ;;  %v10911_v30 = vmul.f32 %v10762_v54, %v10522_v13  ;;  %v10692_v10 = vrot.slane %v10664_v44, %v21585_v45  ;;  %v21824_v63 = vcombine.low %v21718_v43, %v10685_v20 }
 0x710   :  { %v10977_v5 = vmul.f32 %v21617_v60, %v10896_v52  ;;  %v10985_v19 = vmul.f32 %v21617_v60, %v10904_v2  ;;  %v10976_v38 = vmul.f32 %v21625_v62, %v10895_v57  ;;  %v10984_v1 = vmul.f32 %v21625_v62, %v10903_v4  ;;  %v16428_v2 = vld [vmem:[%s23502_s6 + $0x200] ss:$16 sps:$4 sm:$0xff]   ;;  %v16431_v57 = vld [vmem:[%s23502_s6 + $0x208] ss:$16 sps:$4 sm:$0xff]  }
 0x711   :  { %v10993_v16 = vmul.f32 %v21617_v60, %v10912_v24  ;;  %v10992_v39 = vmul.f32 %v21625_v62, %v10911_v30  ;;  %v21827_v61 = vcombine.low %v21721_v26, %v10692_v10  ;;  %v10798_v10 = vrot.slane %v21824_v63, %v23719_v22 }
 0x712   :  { %v11058_v45 = vadd.f32 %v21621_v42, %v10977_v5  ;;  %v11066_v23 = vadd.f32 %v21621_v42, %v10985_v19  ;;  %v11057_v47 = vadd.f32 %v21629_v12, %v10976_v38  ;;  %v11065_v13 = vadd.f32 %v21629_v12, %v10984_v1 }
 0x713   :  { %v21834_v14 = vadd.f32 %v21621_v42, %v10993_v16  ;;  %v21837_v0 = vadd.f32 %v21629_v12, %v10992_v39  ;;  %v10794_v5 = vrot.slane %v21824_v63, %v23720_v29  ;;  %v10830_v1 = vrot.slane %v21827_v61, %v23719_v22  ;;  %v16436_v16 = vld [vmem:[%s23502_s6 + $0x224] ss:$16 sps:$4 sm:$0xff]   ;;  %v16439_v39 = vld [vmem:[%s23502_s6 + $0x22c] ss:$16 sps:$4 sm:$0xff]  }
 0x714   :  { %v11098_v30 = vmul.f32 0.01, %v11058_v45  ;;  %v11106_v43 = vmul.f32 0.01, %v11066_v23  ;;  %v11097_v26 = vmul.f32 0.01, %v11057_v47  ;;  %v10920_v49 = vmul.f32 %v10798_v10, %v21751_v18 }
 0x715   :  { %v11105_v19 = vmul.f32 0.01, %v11065_v13  ;;  %v11114_v38 = vmul.f32 0.01, %v21834_v14  ;;  %v10919_v11 = vmul.f32 %v10794_v5, %v21755_v25  ;;  %v11113_v44 = vmul.f32 0.01, %v21837_v0 }
 0x716   :  { %v11138_v20 = vmax.f32 %v11058_v45, %v11098_v30  ;;  %v11146_v3 = vmax.f32 %v11066_v23, %v11106_v43  ;;  %v11137_v53 = vmax.f32 %v11057_v47, %v11097_v26  ;;  %v11001_v4 = vmul.f32 %v21617_v60, %v10920_v49  ;;  %v16437_v26 = vld [vmem:[%s23502_s6 + $0x228] ss:$16 sps:$4 sm:$0xff]  }
 0x717   :  { %v11145_v54 = vmax.f32 %v11065_v13, %v11105_v19  ;;  %v11154_v33 = vmax.f32 %v21834_v14, %v11114_v38  ;;  %v11000_v18 = vmul.f32 %v21625_v62, %v10919_v11  ;;  %v10928_v25 = vmul.f32 %v10830_v1, %v21758_v15 }
 0x718   :  { %v11178_v52 = vpack.c.bf16 %v11146_v3, %v11138_v20  ;;  %v11153_v45 = vmax.f32 %v21837_v0, %v11113_v44  ;;  %v10826_v23 = vrot.slane %v21827_v61, %v23720_v29  ;;  %v10742_v47 = vrot.slane %v21784_v36, %v23721_v59  ;;  %v16434_v0 = vld [vmem:[%s23502_s6 + $0x220] ss:$16 sps:$4 sm:$0xff]  }
 0x719   :  { %v11177_v24 = vpack.c.bf16 %v11145_v54, %v11137_v53  ;;  %v11082_v15 = vadd.f32 %v21621_v42, %v11001_v4  ;;  %v11081_v13 = vadd.f32 %v21629_v12, %v11000_v18  ;;  %v11009_v14 = vmul.f32 %v21617_v60, %v10928_v25 }
 0x71a   :  { %12534 = vmatprep.mubr.bf16.mxu1 %v11178_v52  ;;  %12778 = vmatprep.mubr.bf16.mxu0 %v11178_v52  ;;  %v10927_v30 = vmul.f32 %v10826_v23, %v21767_v34  ;;  %v10898_v43 = vmul.f32 %v10710_v51, %v21770_v28  ;;  %v10906_v10 = vmul.f32 %v10742_v47, %v21773_v56  ;;  %v16442_v34 = vld [vmem:[%s23502_s6 + $0x244] ss:$16 sps:$4 sm:$0xff]   ;;  %v16445_v28 = vld [vmem:[%s23502_s6 + $0x24c] ss:$16 sps:$4 sm:$0xff]  }
 0x71b   :  { %12535 = vmatmul.mubr.bf16.vlgmr.msra.gmra.mrb[40].mxu1 %v11177_v24  ;;  %12779 = vmatmul.mubr.bf16.vlgmr.msra.gmra.mrb[28].mxu0 %v11177_v24  ;;  %v11122_v5 = vmul.f32 0.01, %v11082_v15  ;;  %v11121_v60 = vmul.f32 0.01, %v11081_v13  ;;  %v11090_v19 = vadd.f32 %v21621_v42, %v11009_v14  ;;  %v10706_v38 = vrot.slane %v21786_v58, %v23722_v50  ;;  %v16451_v24 = vld [vmem:[%s23502_s6 + $0x26c] ss:$16 sps:$4 sm:$0xff]  }
 0x71c   :  { %12564 = vmatpush1.bf16.msra.mxu1 %v16428_v2  ;;  %12808 = vmatpush1.bf16.msra.mxu0 %v16431_v57  ;;  %v11008_v56 = vmul.f32 %v21625_v62, %v10927_v30  ;;  %v10979_v51 = vmul.f32 %v21633_v46, %v10898_v43  ;;  %v10987_v1 = vmul.f32 %v21633_v46, %v10906_v10  ;;  %v16440_v62 = vld [vmem:[%s23502_s6 + $0x240] ss:$16 sps:$4 sm:$0xff]   ;;  %v16443_v2 = vld [vmem:[%s23502_s6 + $0x248] ss:$16 sps:$4 sm:$0xff]  }
 0x71d   :  { %12565 = vmatprep.subr.bf16.mxu1 %v16436_v16  ;;  %12809 = vmatprep.subr.bf16.mxu0 %v16439_v39  ;;  %v11162_v42 = vmax.f32 %v11082_v15, %v11122_v5  ;;  %v11161_v20 = vmax.f32 %v11081_v13, %v11121_v60  ;;  %v11130_v3 = vmul.f32 0.01, %v11090_v19  ;;  %v10738_v49 = vrot.slane %v21784_v36, %v23722_v50  ;;  %v16446_v14 = vld [vmem:[%s23502_s6 + $0x260] ss:$16 sps:$4 sm:$0xff]   ;;  %v16454_v5 = vld [vmem:[%s23502_s6 + $0x284] ss:$16 sps:$4 sm:$0xff]  }
 0x71e   :  { %v11089_v11 = vadd.f32 %v21629_v12, %v11008_v56  ;;  %v11060_v53 = vadd.f32 %v21637_v41, %v10979_v51  ;;  %v11068_v54 = vadd.f32 %v21637_v41, %v10987_v1  ;;  %v10897_v44 = vmul.f32 %v10706_v38, %v21776_v6  ;;  %v23753_v1 = vld [vmem:[#allocation34_spill] sm:$0xff] }
 0x71f   :  { %v11186_v52 = vpack.c.bf16 %v11162_v42, %v11154_v33  ;;  %v11185_v57 = vpack.c.bf16 %v11161_v20, %v11153_v45  ;;  %v11170_v4 = vmax.f32 %v11090_v19, %v11130_v3  ;;  %v10905_v6 = vmul.f32 %v10738_v49, %v21779_v7  ;;  %v16448_v33 = vld [vmem:[%s23502_s6 + $0x264] ss:$16 sps:$4 sm:$0xff]   ;;  %v23754_v3 = vld [vmem:[#allocation11_spill] sm:$0xff] }
 0x720   :  { %12566 = vmatpush1.bf16.msra.mxu1 %v16434_v0  ;;  %12810 = vmatpush1.bf16.msra.mxu0 %v16437_v26  ;;  %v11129_v12 = vmul.f32 0.01, %v11089_v11  ;;  %v11100_v18 = vmul.f32 0.01, %v11060_v53  ;;  %v11108_v25 = vmul.f32 0.01, %v11068_v54  ;;  %v10978_v16 = vmul.f32 %v21641_v27, %v10897_v44 }
 0x721   :  { %12567 = vmatprep.subr.bf16.mxu1 %v16442_v34  ;;  %12811 = vmatprep.subr.bf16.mxu0 %v16445_v28  ;;  %v23750_v39 = vrot.slane %v21682_v40, %v23722_v50  ;;  %v23751_v45 = vld [vmem:[#allocation30_spill] sm:$0xff]  ;;  %v10445_v7 = vrot.slane %v21678_v32, %v23722_v50  ;;  %v11194_v47 = vpack.c.bf16 %v11170_v4, %v11170_v4  ;;  %v16449_v0 = vld [vmem:[%s23502_s6 + $0x268] ss:$16 sps:$4 sm:$0xff]   ;;  %v16457_v26 = vld [vmem:[%s23502_s6 + $0x28c] ss:$16 sps:$4 sm:$0xff]  }
 0x722   :  { %12544 = vmatprep.mubr.bf16.mxu1 %v11186_v52  ;;  %12788 = vmatprep.mubr.bf16.mxu0 %v11186_v52  ;;  %v11140_v15 = vmax.f32 %v11060_v53, %v11100_v18  ;;  %v11148_v13 = vmax.f32 %v11068_v54, %v11108_v25  ;;  %v11169_v30 = vmax.f32 %v11089_v11, %v11129_v12  ;;  %v16452_v54 = vld [vmem:[%s23502_s6 + $0x280] ss:$16 sps:$4 sm:$0xff]   ;;  %v16455_v44 = vld [vmem:[%s23502_s6 + $0x288] ss:$16 sps:$4 sm:$0xff]   ;;  %v16460_v25 = vld [vmem:[%s23502_s6 + $0x2a4] ss:$16 sps:$4 sm:$0xff]  }
 0x723   :  { %v10532_v23 = vsub.f32 %v23751_v45, %v23750_v39  ;;  %12545 = vmatmul.mubr.bf16.gmra.mrb[44].mxu1 %v11185_v57  ;;  %12789 = vmatmul.mubr.bf16.gmra.mrb[32].mxu0 %v11185_v57  ;;  %v10986_v43 = vmul.f32 %v21641_v27, %v10905_v6  ;;  %v11059_v10 = vadd.f32 %v21686_v35, %v10978_v16  ;;  %v16463_v6 = vld [vmem:[%s23502_s6 + $0x2ac] ss:$16 sps:$4 sm:$0xff]  }
 0x724   :  { %12568 = vmatpush1.bf16.msra.mxu1 %v16440_v62  ;;  %12812 = vmatpush1.bf16.msra.mxu0 %v16443_v2  ;;  %v11180_v60 = vpack.c.bf16 %v11148_v13, %v11140_v15  ;;  %v10774_v19 = vrot.slane %v21788_v17, %v23721_v59  ;;  %v10806_v38 = vrot.slane %v21824_v63, %v23721_v59  ;;  %v23755_v39 = vld [vmem:[#allocation43_spill] sm:$0xff] }
 0x725   :  { %12554 = vmatprep.mubr.bf16.mxu1 %v11194_v47  ;;  %12798 = vmatprep.mubr.bf16.mxu0 %v11194_v47  ;;  %v11067_v34 = vadd.f32 %v21686_v35, %v10986_v43  ;;  %v11099_v28 = vmul.f32 0.01, %v11059_v10  ;;  %v10770_v56 = vrot.slane %v21788_v17, %v23722_v50  ;;  %v23752_v51 = vrot.slane %v21678_v32, %v23721_v59 }
 0x726   :  { %12569 = vmatprep.subr.bf16.mxu1 %v16448_v33  ;;  %12813 = vmatprep.subr.bf16.mxu0 %v16451_v24  ;;  %v10802_v20 = vrot.slane %v21824_v63, %v23722_v50  ;;  %v10540_v49 = vsub.f32 %v23754_v3, %v10445_v7  ;;  %v10834_v11 = vrot.slane %v21827_v61, %v23722_v50  ;;  %v16461_v7 = vld [vmem:[%s23502_s6 + $0x2a8] ss:$16 sps:$4 sm:$0xff]   ;;  %v23758_v3 = vld [vmem:[#allocation6_spill] sm:$0xff] }
 0x727   :  { %v10541_v42 = vsub.f32 %v23753_v1, %v23752_v51  ;;  %v10329_v53 = vrot.slane %v21674_v21, %v23723_v37  ;;  %v11193_v52 = vpack.c.bf16 %v11169_v30, %v11169_v30  ;;  %v11107_v62 = vmul.f32 0.01, %v11067_v34  ;;  %v16464_v51 = vld [vmem:[%s23502_s6 + $0x2c0] ss:$16 sps:$4 sm:$0xff]  }
 0x728   :  { %12570 = vmatpush1.bf16.msra.mxu1 %v16446_v14  ;;  %12814 = vmatpush1.bf16.msra.mxu0 %v16449_v0  ;;  %v11139_v2 = vmax.f32 %v11059_v10, %v11099_v28  ;;  %v10913_v57 = vmul.f32 %v10770_v56, %v21796_v8  ;;  %v10914_v4 = vmul.f32 %v10774_v19, %v21782_v55  ;;  %v16466_v14 = vld [vmem:[%s23502_s6 + $0x2c4] ss:$16 sps:$4 sm:$0xff]   ;;  %v16469_v0 = vld [vmem:[%s23502_s6 + $0x2cc] ss:$16 sps:$4 sm:$0xff]  }
 0x729   :  { %12571 = vmatprep.subr.bf16.mxu1 %v16454_v5  ;;  %12815 = vmatprep.subr.bf16.mxu0 %v16457_v26  ;;  %v10922_v12 = vmul.f32 %v10806_v38, %v21791_v48  ;;  %v10921_v18 = vmul.f32 %v10802_v20, %v10532_v23  ;;  %v11147_v33 = vmax.f32 %v11067_v34, %v11107_v62  ;;  %v16458_v23 = vld [vmem:[%s23502_s6 + $0x2a0] ss:$16 sps:$4 sm:$0xff]   ;;  %v23756_v38 = vld [vmem:[#allocation47_spill] sm:$0xff] }
 0x72a   :  { %v10994_v24 = vmul.f32 %v21641_v27, %v10913_v57  ;;  %v10838_v8 = vrot.slane %v21827_v61, %v23721_v59  ;;  %v10929_v16 = vmul.f32 %v10834_v11, %v10540_v49  ;;  %v10361_v55 = vrot.slane %v21680_v9, %v23723_v37  ;;  %v23757_v20 = vld [vmem:[#allocation38_spill] sm:$0xff] }
 0x72b   :  { %12555 = vmatmul.mubr.bf16.gmra.mrb[48].mxu1 %v11193_v52  ;;  %12799 = vmatmul.mubr.bf16.gmra.mrb[36].mxu0 %v11193_v52  ;;  %v11002_v48 = vmul.f32 %v21641_v27, %v10921_v18  ;;  %v10511_v45 = vsub.f32 %v23755_v39, %v10329_v53  ;;  %v21980_v47 = vpack.c.bf16 %v11147_v33, %v11139_v2  ;;  %v16472_v11 = vld [vmem:[%s23502_s6 + $0x2e4] ss:$16 sps:$4 sm:$0xff]   ;;  %v16475_v53 = vld [vmem:[%s23502_s6 + $0x2ec] ss:$16 sps:$4 sm:$0xff]  }
 0x72c   :  { %12572 = vmatpush1.bf16.msra.mxu1 %v16452_v54  ;;  %12816 = vmatpush1.bf16.msra.mxu0 %v16455_v44  ;;  %v11075_v15 = vadd.f32 %v21686_v35, %v10994_v24  ;;  %v11010_v13 = vmul.f32 %v21641_v27, %v10929_v16  ;;  %v10995_v30 = vmul.f32 %v21633_v46, %v10914_v4  ;;  %v23759_v4 = vld [vmem:[#allocation8_spill] sm:$0xff]  ;;  %v23761_v16 = vld [vmem:[#allocation35_spill] sm:$0xff] }
 0x72d   :  { %12595 = vmatprep.mubr.bf16.mxu1 %v11180_v60  ;;  %12839 = vmatprep.mubr.bf16.mxu0 %v11180_v60  ;;  %v11003_v43 = vmul.f32 %v21633_v46, %v10922_v12  ;;  %v11083_v10 = vadd.f32 %v21686_v35, %v11002_v48  ;;  %v10930_v27 = vmul.f32 %v10838_v8, %v10541_v42  ;;  %v16470_v8 = vld [vmem:[%s23502_s6 + $0x2e0] ss:$16 sps:$4 sm:$0xff]  }
 0x72e   :  { %12573 = vmatprep.subr.bf16.mxu1 %v16460_v25  ;;  %12817 = vmatprep.subr.bf16.mxu0 %v16463_v6  ;;  %v11115_v5 = vmul.f32 0.01, %v11075_v15  ;;  %v21994_v26 = vadd.f32 %v21686_v35, %v11010_v13  ;;  %v10718_v60 = vrot.slane %v21786_v58, %v23723_v37  ;;  %v10519_v34 = vsub.f32 %v23756_v38, %v10361_v55  ;;  %v16467_v35 = vld [vmem:[%s23502_s6 + $0x2c8] ss:$16 sps:$4 sm:$0xff]  }
 0x72f   :  { %v11123_v19 = vmul.f32 0.01, %v11083_v10  ;;  %v10750_v28 = vrot.slane %v21784_v36, %v23723_v37  ;;  %v10325_v56 = vrot.slane %v21674_v21, %v23725_v31  ;;  %v10357_v42 = vrot.slane %v21680_v9, %v23725_v31  ;;  %v23760_v6 = vld [vmem:[#allocation41_spill] sm:$0xff]  ;;  %v23765_v38 = vld [vmem:[#allocation51_spill] sm:$0xff] }
 0x730   :  { %12574 = vmatpush1.bf16.msra.mxu1 %v16458_v23  ;;  %12818 = vmatpush1.bf16.msra.mxu0 %v16461_v7  ;;  %v10900_v1 = vmul.f32 %v10718_v60, %v10511_v45  ;;  %v22013_v49 = vrot.slane %v23758_v3, %v23757_v20  ;;  %v11155_v54 = vmax.f32 %v11075_v15, %v11115_v5  ;;  %v23762_v55 = vld [vmem:[#allocation45_spill] sm:$0xff]  ;;  %v16478_v23 = vld [vmem:[%s23502_s6 + $0x304] ss:$16 sps:$4 sm:$0xff]  }
 0x731   :  { %12575 = vmatprep.subr.bf16.mxu1 %v16466_v14  ;;  %12819 = vmatprep.subr.bf16.mxu0 %v16469_v0  ;;  %v11163_v44 = vmax.f32 %v11083_v10, %v11123_v19  ;;  %v10908_v52 = vmul.f32 %v10750_v28, %v10519_v34  ;;  %v22022_v62 = vadd.f32 %v21637_v41, %v10995_v30  ;;  %v16481_v7 = vld [vmem:[%s23502_s6 + $0x30c] ss:$16 sps:$4 sm:$0xff]   ;;  %v23763_v14 = vld [vmem:[#allocation10_spill] sm:$0xff] }
 0x732   :  { %v22025_v2 = vadd.f32 %v21637_v41, %v11003_v43  ;;  %v22028_v57 = vmul.f32 %v21633_v46, %v10930_v27  ;;  %v10981_v12 = vmul.f32 %v23759_v4, %v10900_v1  ;;  %v10510_v33 = vsub.f32 %v23760_v6, %v10325_v56  ;;  %v16473_v46 = vld [vmem:[%s23502_s6 + $0x2e8] ss:$16 sps:$4 sm:$0xff]   ;;  %v16476_v56 = vld [vmem:[%s23502_s6 + $0x300] ss:$16 sps:$4 sm:$0xff]  }
 0x733   :  { %v22031_v18 = vpack.c.bf16 %v11163_v44, %v11155_v54  ;;  %v10989_v25 = vmul.f32 %v23759_v4, %v10908_v52  ;;  %v10714_v24 = vrot.slane %v21786_v58, %v23725_v31  ;;  %v10518_v39 = vsub.f32 %v23762_v55, %v10357_v42  ;;  %v23764_v60 = vld [vmem:[#allocation9_spill] sm:$0xff]  ;;  %v23766_v42 = vld [vmem:[#allocation55_spill] sm:$0xff]  ;;  %v23767_v44 = vld [vmem:[#allocation36_spill] sm:$0xff] }
 0x734   :  { %12576 = vmatpush1.bf16.msra.mxu1 %v16464_v51  ;;  %12820 = vmatpush1.bf16.msra.mxu0 %v16467_v35  ;;  %v11062_v48 = vadd.f32 %v23761_v16, %v10981_v12  ;;  %v10746_v45 = vrot.slane %v21784_v36, %v23725_v31  ;;  %v10393_v0 = vrot.slane %v23763_v14, %v23723_v37  ;;  %v16479_v51 = vld [vmem:[%s23502_s6 + $0x308] ss:$16 sps:$4 sm:$0xff]  }
 0x735   :  { %12577 = vmatprep.subr.bf16.mxu1 %v16472_v11  ;;  %12821 = vmatprep.subr.bf16.mxu0 %v16475_v53  ;;  %v11070_v15 = vadd.f32 %v23761_v16, %v10989_v25  ;;  %v10899_v13 = vmul.f32 %v10714_v24, %v10510_v33  ;;  %v10425_v10 = vrot.slane %v21682_v40, %v23723_v37  ;;  %v16484_v11 = vld [vmem:[%s23502_s6 + $0x324] ss:$16 sps:$4 sm:$0xff]   ;;  %v16487_v53 = vld [vmem:[%s23502_s6 + $0x32c] ss:$16 sps:$4 sm:$0xff]  }
 0x736   :  { %v11102_v30 = vmul.f32 0.01, %v11062_v48  ;;  %v10907_v43 = vmul.f32 %v10746_v45, %v10518_v39  ;;  %v10782_v5 = vrot.slane %v21788_v17, %v23723_v37  ;;  %v10527_v34 = vsub.f32 %v23765_v38, %v10393_v0  ;;  %v16482_v39 = vld [vmem:[%s23502_s6 + $0x320] ss:$16 sps:$4 sm:$0xff]   ;;  %v16485_v45 = vld [vmem:[%s23502_s6 + $0x328] ss:$16 sps:$4 sm:$0xff]  }
 0x737   :  { %v11110_v27 = vmul.f32 0.01, %v11070_v15  ;;  %v10980_v19 = vmul.f32 %v23764_v60, %v10899_v13  ;;  %v10814_v28 = vrot.slane %v21824_v63, %v23723_v37  ;;  %v10535_v3 = vsub.f32 %v23766_v42, %v10425_v10  ;;  %v23769_v0 = vld [vmem:[#allocation53_spill] sm:$0xff] }
 0x738   :  { %12578 = vmatpush1.bf16.msra.mxu1 %v16470_v8  ;;  %12822 = vmatpush1.bf16.msra.mxu0 %v16473_v46  ;;  %v11142_v35 = vmax.f32 %v11062_v48, %v11102_v30  ;;  %v10988_v1 = vmul.f32 %v23764_v60, %v10907_v43  ;;  %v10916_v12 = vmul.f32 %v10782_v5, %v10527_v34  ;;  %v16490_v43 = vld [vmem:[%s23502_s6 + $0x344] ss:$16 sps:$4 sm:$0xff]   ;;  %v16493_v10 = vld [vmem:[%s23502_s6 + $0x34c] ss:$16 sps:$4 sm:$0xff]  }
 0x739   :  { %12579 = vmatprep.subr.bf16.mxu1 %v16478_v23  ;;  %12823 = vmatprep.subr.bf16.mxu0 %v16481_v7  ;;  %v11150_v54 = vmax.f32 %v11070_v15, %v11110_v27  ;;  %v11061_v52 = vadd.f32 %v23767_v44, %v10980_v19  ;;  %v10924_v6 = vmul.f32 %v10814_v28, %v10535_v3  ;;  %v23768_v15 = vld [vmem:[#allocation49_spill] sm:$0xff]  ;;  %v16488_v3 = vld [vmem:[%s23502_s6 + $0x340] ss:$16 sps:$4 sm:$0xff]  }
 0x73a   :  { %v11069_v25 = vadd.f32 %v23767_v44, %v10988_v1  ;;  %v10389_v33 = vrot.slane %v23763_v14, %v23725_v31  ;;  %v10421_v24 = vrot.slane %v21682_v40, %v23725_v31  ;;  %v10997_v48 = vmul.f32 %v23759_v4, %v10916_v12  ;;  %v23770_v12 = vld [vmem:[#allocation59_spill] sm:$0xff] }
 0x73b   :  { %v22084_v8 = vpack.c.bf16 %v11150_v54, %v11142_v35  ;;  %v11101_v46 = vmul.f32 0.01, %v11061_v52  ;;  %v10778_v55 = vrot.slane %v21788_v17, %v23725_v31  ;;  %v11005_v7 = vmul.f32 %v23759_v4, %v10924_v6  ;;  %v16499_v6 = vld [vmem:[%s23502_s6 + $0x36c] ss:$16 sps:$4 sm:$0xff]  }
 0x73c   :  { %12580 = vmatpush1.bf16.msra.mxu1 %v16476_v56  ;;  %12824 = vmatpush1.bf16.msra.mxu0 %v16479_v51  ;;  %v11109_v23 = vmul.f32 0.01, %v11069_v25  ;;  %v10526_v13 = vsub.f32 %v23768_v15, %v10389_v33  ;;  %v10534_v30 = vsub.f32 %v23769_v0, %v10421_v24  ;;  %v11078_v27 = vadd.f32 %v23761_v16, %v10997_v48  ;;  %v23772_v15 = vld [vmem:[#allocation40_spill] sm:$0xff] }
 0x73d   :  { %12581 = vmatprep.subr.bf16.mxu1 %v16484_v11  ;;  %12825 = vmatprep.subr.bf16.mxu0 %v16487_v53  ;;  %v11141_v5 = vmax.f32 %v11061_v52, %v11101_v46  ;;  %v10810_v19 = vrot.slane %v21824_v63, %v23725_v31  ;;  %v11086_v34 = vadd.f32 %v23761_v16, %v11005_v7  ;;  %v16491_v11 = vld [vmem:[%s23502_s6 + $0x348] ss:$16 sps:$4 sm:$0xff]  }
 0x73e   :  { %v11149_v38 = vmax.f32 %v11069_v25, %v11109_v23  ;;  %v10915_v28 = vmul.f32 %v10778_v55, %v10526_v13  ;;  %v10457_v56 = vrot.slane %v21678_v32, %v23723_v37  ;;  %v11118_v51 = vmul.f32 0.01, %v11078_v27  ;;  %v16496_v25 = vld [vmem:[%s23502_s6 + $0x364] ss:$16 sps:$4 sm:$0xff]   ;;  %v23771_v46 = vld [vmem:[#allocation57_spill] sm:$0xff] }
 0x73f   :  { %v10923_v35 = vmul.f32 %v10810_v19, %v10534_v30  ;;  %v10846_v1 = vrot.slane %v21827_v61, %v23723_v37  ;;  %v10453_v42 = vrot.slane %v21678_v32, %v23725_v31  ;;  %v11126_v54 = vmul.f32 0.01, %v11086_v34 }
 0x740   :  { %12582 = vmatpush1.bf16.msra.mxu1 %v16482_v39  ;;  %12826 = vmatpush1.bf16.msra.mxu0 %v16485_v45  ;;  %v22120_v53 = vpack.c.bf16 %v11149_v38, %v11141_v5  ;;  %v10996_v52 = vmul.f32 %v23764_v60, %v10915_v28  ;;  %v10543_v37 = vsub.f32 %v23770_v12, %v10457_v56  ;;  %v16502_v38 = vld [vmem:[%s23502_s6 + $0x384] ss:$16 sps:$4 sm:$0xff]  }
 0x741   :  { %12583 = vmatprep.subr.bf16.mxu1 %v16490_v43  ;;  %12827 = vmatprep.subr.bf16.mxu0 %v16493_v10  ;;  %v11158_v33 = vmax.f32 %v11078_v27, %v11118_v51  ;;  %v11004_v24 = vmul.f32 %v23764_v60, %v10923_v35  ;;  %v10542_v48 = vsub.f32 %v23771_v46, %v10453_v42  ;;  %v16494_v43 = vld [vmem:[%s23502_s6 + $0x360] ss:$16 sps:$4 sm:$0xff]   ;;  %v16508_v46 = vld [vmem:[%s23502_s6 + $0x3a4] ss:$16 sps:$4 sm:$0xff]  }
 0x742   :  { %v11166_v55 = vmax.f32 %v11086_v34, %v11126_v54  ;;  %v11077_v39 = vadd.f32 %v23767_v44, %v10996_v52  ;;  %v10932_v45 = vmul.f32 %v10846_v1, %v10543_v37  ;;  %v10842_v23 = vrot.slane %v21827_v61, %v23725_v31  ;;  %v16497_v31 = vld [vmem:[%s23502_s6 + $0x368] ss:$16 sps:$4 sm:$0xff]   ;;  %v16505_v34 = vld [vmem:[%s23502_s6 + $0x38c] ss:$16 sps:$4 sm:$0xff]   ;;  %v23773_v56 = vld [vmem:[#allocation44_spill] sm:$0xff] }
 0x743   :  { %v11085_v7 = vadd.f32 %v23767_v44, %v11004_v24  ;;  %v10337_v13 = vrot.slane %v21674_v21, %v23772_v15  ;;  %v10369_v0 = vrot.slane %v21680_v9, %v23772_v15  ;;  %v10726_v30 = vrot.slane %v21786_v58, %v23772_v15  ;;  %v23774_v35 = vld [vmem:[#allocation48_spill] sm:$0xff] }
 0x744   :  { %12584 = vmatpush1.bf16.msra.mxu1 %v16488_v3  ;;  %12828 = vmatpush1.bf16.msra.mxu0 %v16491_v11  ;;  %v22148_v10 = vpack.c.bf16 %v11166_v55, %v11158_v33  ;;  %v11117_v5 = vmul.f32 0.01, %v11077_v39  ;;  %v11013_v27 = vmul.f32 %v23759_v4, %v10932_v45  ;;  %v10931_v19 = vmul.f32 %v10842_v23, %v10542_v48  ;;  %v23775_v33 = vld [vmem:[#allocation42_spill] sm:$0xff]  ;;  %v16511_v48 = vld [vmem:[%s23502_s6 + $0x3ac] ss:$16 sps:$4 sm:$0xff]  }
 0x745   :  { %12585 = vmatprep.subr.bf16.mxu1 %v16496_v25  ;;  %12829 = vmatprep.subr.bf16.mxu0 %v16499_v6  ;;  %v11125_v28 = vmul.f32 0.01, %v11085_v7  ;;  %v10513_v51 = vsub.f32 %v23773_v56, %v10337_v13  ;;  %v10521_v1 = vsub.f32 %v23774_v35, %v10369_v0  ;;  %v10758_v42 = vrot.slane %v21784_v36, %v23772_v15  ;;  %v16500_v6 = vld [vmem:[%s23502_s6 + $0x380] ss:$16 sps:$4 sm:$0xff]   ;;  %v23778_v0 = vld [vmem:[#allocation7_spill] sm:$0xff] }
 0x746   :  { %v11157_v4 = vmax.f32 %v11077_v39, %v11117_v5  ;;  %v22162_v3 = vadd.f32 %v23761_v16, %v11013_v27  ;;  %v11012_v11 = vmul.f32 %v23764_v60, %v10931_v19  ;;  %v10333_v54 = vrot.slane %v21674_v21, %v23757_v20  ;;  %v16503_v16 = vld [vmem:[%s23502_s6 + $0x388] ss:$16 sps:$4 sm:$0xff]   ;;  %v23776_v39 = vld [vmem:[#allocation12_spill] sm:$0xff]  ;;  %v16517_v35 = vld [vmem:[%s23502_s6 + $0x3cc] ss:$16 sps:$4 sm:$0xff]  }
 0x747   :  { %v11165_v52 = vmax.f32 %v11085_v7, %v11125_v28  ;;  %v10902_v12 = vmul.f32 %v10726_v30, %v10513_v51  ;;  %v10910_v37 = vmul.f32 %v10758_v42, %v10521_v1  ;;  %v10365_v25 = vrot.slane %v21680_v9, %v23757_v20 }
 0x748   :  { %12586 = vmatpush1.bf16.msra.mxu1 %v16494_v43  ;;  %12830 = vmatpush1.bf16.msra.mxu0 %v16497_v31  ;;  %v22176_v60 = vmul.f32 0.01, %v22022_v62  ;;  %v22179_v21 = vadd.f32 %v23767_v44, %v11012_v11  ;;  %v10512_v24 = vsub.f32 %v23775_v33, %v10333_v54  ;;  %v10722_v9 = vrot.slane %v21786_v58, %v23757_v20  ;;  %v23777_v58 = vld [vmem:[#allocation46_spill] sm:$0xff]  ;;  %v23779_v43 = vld [vmem:[#allocation39_spill] sm:$0xff] }
 0x749   :  { %12587 = vmatprep.subr.bf16.mxu1 %v16502_v38  ;;  %12831 = vmatprep.subr.bf16.mxu0 %v16505_v34  ;;  %v22190_v55 = vpack.c.bf16 %v11165_v52, %v11157_v4  ;;  %v10983_v44 = vmul.f32 %v23776_v39, %v10902_v12  ;;  %v10991_v45 = vmul.f32 %v23776_v39, %v10910_v37  ;;  %v22195_v23 = vmul.f32 0.01, %v22025_v2  ;;  %v16506_v38 = vld [vmem:[%s23502_s6 + $0x3a0] ss:$16 sps:$4 sm:$0xff]   ;;  %v16514_v34 = vld [vmem:[%s23502_s6 + $0x3c4] ss:$16 sps:$4 sm:$0xff]  }
 0x74a   :  { %v10520_v7 = vsub.f32 %v23777_v58, %v10365_v25  ;;  %v10754_v13 = vrot.slane %v21784_v36, %v23757_v20  ;;  %v22202_v30 = vrot.slane %v23778_v0, %v23757_v20  ;;  %v10901_v27 = vmul.f32 %v10722_v9, %v10512_v24  ;;  %v16509_v36 = vld [vmem:[%s23502_s6 + $0x3a8] ss:$16 sps:$4 sm:$0xff]   ;;  %v16512_v24 = vld [vmem:[%s23502_s6 + $0x3c0] ss:$16 sps:$4 sm:$0xff]   ;;  %v16523_v58 = vld [vmem:[%s23502_s6 + $0x3ec] ss:$16 sps:$4 sm:$0xff]  }
 0x74b   :  { %v11064_v31 = vadd.f32 %v23779_v43, %v10983_v44  ;;  %v11072_v5 = vadd.f32 %v23779_v43, %v10991_v45  ;;  %v10401_v19 = vrot.slane %v23763_v14, %v23772_v15  ;;  %v11156_v28 = vmax.f32 %v22022_v62, %v22176_v60  ;;  %v16515_v9 = vld [vmem:[%s23502_s6 + $0x3c8] ss:$16 sps:$4 sm:$0xff]   ;;  %v16520_v45 = vld [vmem:[%s23502_s6 + $0x3e4] ss:$16 sps:$4 sm:$0xff]  }
 0x74c   :  { %12588 = vmatpush1.bf16.msra.mxu1 %v16500_v6  ;;  %12832 = vmatpush1.bf16.msra.mxu0 %v16503_v16  ;;  %v22221_v56 = vadd.f32 %v21637_v41, %v22028_v57  ;;  %v10909_v51 = vmul.f32 %v10754_v13, %v10520_v7  ;;  %v10982_v4 = vmul.f32 %v22013_v49, %v10901_v27  ;;  %v23780_v57 = vld [vmem:[#allocation52_spill] sm:$0xff] }
 0x74d   :  { %12589 = vmatprep.subr.bf16.mxu1 %v16508_v46  ;;  %12833 = vmatprep.subr.bf16.mxu0 %v16511_v48  ;;  %v11104_v1 = vmul.f32 0.01, %v11064_v31  ;;  %v11112_v42 = vmul.f32 0.01, %v11072_v5  ;;  %v10433_v11 = vrot.slane %v21682_v40, %v23772_v15  ;;  %v11164_v54 = vmax.f32 %v22025_v2, %v22195_v23  ;;  %v23781_v16 = vld [vmem:[#allocation56_spill] sm:$0xff] }
 0x74e   :  { %v10990_v41 = vmul.f32 %v22013_v49, %v10909_v51  ;;  %v10529_v52 = vsub.f32 %v23780_v57, %v10401_v19  ;;  %v10790_v12 = vrot.slane %v21788_v17, %v23772_v15  ;;  %v11063_v6 = vadd.f32 %v22202_v30, %v10982_v4  ;;  %v23782_v51 = vld [vmem:[#allocation50_spill] sm:$0xff] }
 0x74f   :  { %v11144_v37 = vmax.f32 %v11064_v31, %v11104_v1  ;;  %v11152_v25 = vmax.f32 %v11072_v5, %v11112_v42  ;;  %v10537_v33 = vsub.f32 %v23781_v16, %v10433_v11  ;;  %v10822_v48 = vrot.slane %v21824_v63, %v23772_v15  ;;  %v23783_v1 = vld [vmem:[#allocation54_spill] sm:$0xff] }
 0x750   :  { %12590 = vmatpush1.bf16.msra.mxu1 %v16506_v38  ;;  %12834 = vmatpush1.bf16.msra.mxu0 %v16509_v36  ;;  %v11071_v46 = vadd.f32 %v22202_v30, %v10990_v41  ;;  %v10918_v44 = vmul.f32 %v10790_v12, %v10529_v52  ;;  %v11103_v13 = vmul.f32 0.01, %v11063_v6  ;;  %v10397_v0 = vrot.slane %v23763_v14, %v23757_v20  ;;  %v16521_v14 = vld [vmem:[%s23502_s6 + $0x3e8] ss:$16 sps:$4 sm:$0xff]   ;;  %v16526_v11 = vld [vmem:[%s23502_s6 + $0x404] ss:$16 sps:$4 sm:$0xff]  }
 0x751   :  { %12591 = vmatprep.subr.bf16.mxu1 %v16514_v34  ;;  %12835 = vmatprep.subr.bf16.mxu0 %v16517_v35  ;;  %v22252_v7 = vpack.c.bf16 %v11152_v25, %v11144_v37  ;;  %v10429_v31 = vrot.slane %v21682_v40, %v23757_v20  ;;  %v10926_v5 = vmul.f32 %v10822_v48, %v10537_v33  ;;  %v16518_v40 = vld [vmem:[%s23502_s6 + $0x3e0] ss:$16 sps:$4 sm:$0xff]   ;;  %v16529_v41 = vld [vmem:[%s23502_s6 + $0x40c] ss:$16 sps:$4 sm:$0xff]  }
 0x752   :  { %v10999_v27 = vmul.f32 %v23776_v39, %v10918_v44  ;;  %v10786_v19 = vrot.slane %v21788_v17, %v23757_v20  ;;  %v10818_v38 = vrot.slane %v21824_v63, %v23757_v20  ;;  %v11111_v36 = vmul.f32 0.01, %v11071_v46  ;;  %v23784_v25 = vld [vmem:[#allocation60_spill] sm:$0xff] }
 0x753   :  { %v11143_v34 = vmax.f32 %v11063_v6, %v11103_v13  ;;  %v10528_v35 = vsub.f32 %v23782_v51, %v10397_v0  ;;  %v10536_v42 = vsub.f32 %v23783_v1, %v10429_v31  ;;  %v11007_v17 = vmul.f32 %v23776_v39, %v10926_v5  ;;  %v23785_v13 = vld [vmem:[#allocation58_spill] sm:$0xff]  ;;  %v16527_v0 = vld [vmem:[%s23502_s6 + $0x408] ss:$16 sps:$4 sm:$0xff]  }
 0x754   :  { %12592 = vmatpush1.bf16.msra.mxu1 %v16512_v24  ;;  %12836 = vmatpush1.bf16.msra.mxu0 %v16515_v9  ;;  %v11080_v63 = vadd.f32 %v23779_v43, %v10999_v27  ;;  %v10465_v4 = vrot.slane %v21678_v32, %v23772_v15  ;;  %v11151_v57 = vmax.f32 %v11071_v46, %v11111_v36  ;;  %v16524_v46 = vld [vmem:[%s23502_s6 + $0x400] ss:$16 sps:$4 sm:$0xff]   ;;  %v11132_v5 = vmul.f32 0.01, %v22221_v56  ;;  %v16538_v51 = vld [vmem:[%s23502_s6 + $0x444] ss:$16 sps:$4 sm:$0xff]  }
 0x755   :  { %12593 = vmatprep.subr.bf16.mxu1 %v16520_v45  ;;  %12837 = vmatprep.subr.bf16.mxu0 %v16523_v58  ;;  %v10917_v52 = vmul.f32 %v10786_v19, %v10528_v35  ;;  %v10925_v12 = vmul.f32 %v10818_v38, %v10536_v42  ;;  %v11088_v37 = vadd.f32 %v23779_v43, %v11007_v17  ;;  %v16539_v17 = vld [vmem:[%s23502_s6 + $0x448] ss:$16 sps:$4 sm:$0xff]  }
 0x756   :  { %v10545_v6 = vsub.f32 %v23784_v25, %v10465_v4  ;;  %v10854_v16 = vrot.slane %v21827_v61, %v23772_v15  ;;  %v10461_v33 = vrot.slane %v21678_v32, %v23757_v20  ;;  %v22287_v24 = vpack.c.bf16 %v11151_v57, %v11143_v34  ;;  %v16547_v4 = vld [vmem:[%s23502_s6 + $0x46c] ss:$16 sps:$4 sm:$0xff]   ;;  %v16556_v25 = vld [vmem:[%s23502_s6 + $0x4a4] ss:$16 sps:$4 sm:$0xff]  }
 0x757   :  { %v11120_v9 = vmul.f32 0.01, %v11080_v63  ;;  %v10998_v48 = vmul.f32 %v22013_v49, %v10917_v52  ;;  %v11006_v44 = vmul.f32 %v22013_v49, %v10925_v12  ;;  %v11128_v45 = vmul.f32 0.01, %v11088_v37  ;;  %v16550_v52 = vld [vmem:[%s23502_s6 + $0x484] ss:$16 sps:$4 sm:$0xff]  }
 0x758   :  { %12594 = vmatpush1.bf16.msra.mxu1 %v16518_v40  ;;  %12838 = vmatpush1.bf16.msra.mxu0 %v16521_v14  ;;  %v10934_v58 = vmul.f32 %v10854_v16, %v10545_v6  ;;  %v10544_v15 = vsub.f32 %v23785_v13, %v10461_v33  ;;  %v10850_v32 = vrot.slane %v21827_v61, %v23757_v20  ;;  %v16532_v61 = vld [vmem:[%s23502_s6 + $0x424] ss:$16 sps:$4 sm:$0xff]   ;;  %v16535_v20 = vld [vmem:[%s23502_s6 + $0x42c] ss:$16 sps:$4 sm:$0xff]   ;;  %v16536_v14 = vld [vmem:[%s23502_s6 + $0x440] ss:$16 sps:$4 sm:$0xff]  }
 0x759   :  { %12624 = vmatprep.subr.bf16.mxu1 %v16526_v11  ;;  %12868 = vmatprep.subr.bf16.mxu0 %v16529_v41  ;;  %v11188_v31 = vpack.c.bf16 %v11164_v54, %v11156_v28  ;;  %v11079_v27 = vadd.f32 %v22202_v30, %v10998_v48  ;;  %v11087_v19 = vadd.f32 %v22202_v30, %v11006_v44  ;;  %v16530_v54 = vld [vmem:[%s23502_s6 + $0x420] ss:$16 sps:$4 sm:$0xff]   ;;  %v16545_v41 = vld [vmem:[%s23502_s6 + $0x468] ss:$16 sps:$4 sm:$0xff]   ;;  %v16559_v6 = vld [vmem:[%s23502_s6 + $0x4ac] ss:$16 sps:$4 sm:$0xff]  }
 0x75a   :  { %v11160_v38 = vmax.f32 %v11080_v63, %v11120_v9  ;;  %v11168_v62 = vmax.f32 %v11088_v37, %v11128_v45  ;;  %v11015_v60 = vmul.f32 %v23776_v39, %v10934_v58  ;;  %v10933_v2 = vmul.f32 %v10850_v32, %v10544_v15  ;;  %v16542_v11 = vld [vmem:[%s23502_s6 + $0x460] ss:$16 sps:$4 sm:$0xff]   ;;  %v16557_v33 = vld [vmem:[%s23502_s6 + $0x4a8] ss:$16 sps:$4 sm:$0xff]   ;;  %v16562_v9 = vld [vmem:[%s23502_s6 + $0x4c4] ss:$16 sps:$4 sm:$0xff]  }
 0x75b   :  { %12596 = vmatmul.mubr.bf16.vlgmr.msra.gmra.mrb[40].mxu1 %v21980_v47  ;;  %12840 = vmatmul.mubr.bf16.vlgmr.msra.gmra.mrb[28].mxu0 %v21980_v47  ;;  %v11119_v23 = vmul.f32 0.01, %v11079_v27  ;;  %v11127_v28 = vmul.f32 0.01, %v11087_v19  ;;  %v16533_v47 = vld [vmem:[%s23502_s6 + $0x428] ss:$16 sps:$4 sm:$0xff]  }
 0x75c   :  { %12605 = vmatprep.mubr.bf16.mxu1 %v11188_v31  ;;  %12625 = vmatpush1.bf16.msra.mxu1 %v16524_v46  ;;  %v22321_v36 = vpack.c.bf16 %v11168_v62, %v11160_v38  ;;  %v22324_v34 = vadd.f32 %v23779_v43, %v11015_v60  ;;  %v11014_v39 = vmul.f32 %v22013_v49, %v10933_v2  ;;  %v16541_v43 = vld [vmem:[%s23502_s6 + $0x44c] ss:$16 sps:$4 sm:$0xff]   ;;  %v11131_v63 = vmul.f32 0.01, %v21994_v26  ;;  %v16548_v12 = vld [vmem:[%s23502_s6 + $0x480] ss:$16 sps:$4 sm:$0xff]  }
 0x75d   :  { %12849 = vmatprep.mubr.bf16.mxu0 %v11188_v31  ;;  %12869 = vmatpush1.bf16.msra.mxu0 %v16527_v0  ;;  %v11159_v35 = vmax.f32 %v11079_v27, %v11119_v23  ;;  %v11167_v1 = vmax.f32 %v11087_v19, %v11127_v28  ;;  %v11172_v49 = vmax.f32 %v22221_v56, %v11132_v5  ;;  %v16554_v16 = vld [vmem:[%s23502_s6 + $0x4a0] ss:$16 sps:$4 sm:$0xff]   ;;  %v16565_v48 = vld [vmem:[%s23502_s6 + $0x4cc] ss:$16 sps:$4 sm:$0xff]   ;;  %v16568_v46 = vld [vmem:[%s23502_s6 + $0x4e4] ss:$16 sps:$4 sm:$0xff]  }
 0x75e   :  { %12626 = vmatprep.subr.bf16.mxu1 %v16532_v61  ;;  %12870 = vmatprep.subr.bf16.mxu0 %v16535_v20  ;;  %v22338_v42 = vadd.f32 %v22202_v30, %v11014_v39  ;;  %v16544_v30 = vld [vmem:[%s23502_s6 + $0x464] ss:$16 sps:$4 sm:$0xff]   ;;  %v11171_v57 = vmax.f32 %v21994_v26, %v11131_v63  ;;  %v16551_v26 = vld [vmem:[%s23502_s6 + $0x488] ss:$16 sps:$4 sm:$0xff]   ;;  %v16560_v44 = vld [vmem:[%s23502_s6 + $0x4c0] ss:$16 sps:$4 sm:$0xff]  }
 0x75f   :  { %v22340_v40 = vpack.c.bf16 %v11167_v1, %v11159_v35  ;;  %v11196_v56 = vpack.c.bf16 %v11172_v49, %v11172_v49  ;;  %v16571_v45 = vld [vmem:[%s23502_s6 + $0x4ec] ss:$16 sps:$4 sm:$0xff]   ;;  %v16566_v58 = vld [vmem:[%s23502_s6 + $0x4e0] ss:$16 sps:$4 sm:$0xff]   ;;  %v16569_v13 = vld [vmem:[%s23502_s6 + $0x4e8] ss:$16 sps:$4 sm:$0xff]  }
 0x760   :  { %12627 = vmatpush1.bf16.msra.mxu1 %v16530_v54  ;;  %v11195_v37 = vpack.c.bf16 %v11171_v57, %v11171_v57  ;;  %v16574_v15 = vld [vmem:[%s23502_s6 + $0x504] ss:$16 sps:$4 sm:$0xff]   ;;  %v16577_v32 = vld [vmem:[%s23502_s6 + $0x50c] ss:$16 sps:$4 sm:$0xff]   ;;  %v16572_v0 = vld [vmem:[%s23502_s6 + $0x500] ss:$16 sps:$4 sm:$0xff]  }
 0x761   :  { %12871 = vmatpush1.bf16.msra.mxu0 %v16533_v47  ;;  %12628 = vmatprep.subr.bf16.mxu1 %v16538_v51  ;;  %v16575_v31 = vld [vmem:[%s23502_s6 + $0x508] ss:$16 sps:$4 sm:$0xff]   ;;  %v16580_v5 = vld [vmem:[%s23502_s6 + $0x524] ss:$16 sps:$4 sm:$0xff]   ;;  %v16583_v27 = vld [vmem:[%s23502_s6 + $0x52c] ss:$16 sps:$4 sm:$0xff]  }
 0x762   :  { %12872 = vmatprep.subr.bf16.mxu0 %v16541_v43  ;;  %v16578_v19 = vld [vmem:[%s23502_s6 + $0x520] ss:$16 sps:$4 sm:$0xff]   ;;  %v16581_v61 = vld [vmem:[%s23502_s6 + $0x528] ss:$16 sps:$4 sm:$0xff]   ;;  %v16586_v20 = vld [vmem:[%s23502_s6 + $0x544] ss:$16 sps:$4 sm:$0xff]  }
 0x763   :  { %12606 = vmatmul.mubr.bf16.gmra.mrb[44].mxu1 %v22031_v18  ;;  %12850 = vmatmul.mubr.bf16.gmra.mrb[32].mxu0 %v22031_v18  ;;  %v16553_v18 = vld [vmem:[%s23502_s6 + $0x48c] ss:$16 sps:$4 sm:$0xff]   ;;  %v16584_v62 = vld [vmem:[%s23502_s6 + $0x540] ss:$16 sps:$4 sm:$0xff]   ;;  %v16587_v60 = vld [vmem:[%s23502_s6 + $0x548] ss:$16 sps:$4 sm:$0xff]  }
 0x764   :  { %12615 = vmatprep.mubr.bf16.mxu1 %v11196_v56  ;;  %12629 = vmatpush1.bf16.msra.mxu1 %v16536_v14  ;;  %v16589_v38 = vld [vmem:[%s23502_s6 + $0x54c] ss:$16 sps:$4 sm:$0xff]   ;;  %v16592_v2 = vld [vmem:[%s23502_s6 + $0x564] ss:$16 sps:$4 sm:$0xff]   ;;  %v16590_v28 = vld [vmem:[%s23502_s6 + $0x560] ss:$16 sps:$4 sm:$0xff]  }
 0x765   :  { %12859 = vmatprep.mubr.bf16.mxu0 %v11196_v56  ;;  %12873 = vmatpush1.bf16.msra.mxu0 %v16539_v17  ;;  %v16595_v23 = vld [vmem:[%s23502_s6 + $0x56c] ss:$16 sps:$4 sm:$0xff]   ;;  %v16593_v54 = vld [vmem:[%s23502_s6 + $0x568] ss:$16 sps:$4 sm:$0xff]   ;;  %v16598_v39 = vld [vmem:[%s23502_s6 + $0x584] ss:$16 sps:$4 sm:$0xff]  }
 0x766   :  { %12630 = vmatprep.subr.bf16.mxu1 %v16544_v30  ;;  %12874 = vmatprep.subr.bf16.mxu0 %v16547_v4  ;;  %v16601_v47 = vld [vmem:[%s23502_s6 + $0x58c] ss:$16 sps:$4 sm:$0xff]   ;;  %v16596_v51 = vld [vmem:[%s23502_s6 + $0x580] ss:$16 sps:$4 sm:$0xff]   ;;  %v16599_v35 = vld [vmem:[%s23502_s6 + $0x588] ss:$16 sps:$4 sm:$0xff]  }
 0x767   :  { %v16604_v1 = vld [vmem:[%s23502_s6 + $0x5a4] ss:$16 sps:$4 sm:$0xff]   ;;  %v16607_v43 = vld [vmem:[%s23502_s6 + $0x5ac] ss:$16 sps:$4 sm:$0xff]   ;;  %v16602_v49 = vld [vmem:[%s23502_s6 + $0x5a0] ss:$16 sps:$4 sm:$0xff]  }
 0x768   :  { %12631 = vmatpush1.bf16.msra.mxu1 %v16542_v11  ;;  %v16605_v14 = vld [vmem:[%s23502_s6 + $0x5a8] ss:$16 sps:$4 sm:$0xff]   ;;  %v16610_v17 = vld [vmem:[%s23502_s6 + $0x5c4] ss:$16 sps:$4 sm:$0xff]   ;;  %v16613_v63 = vld [vmem:[%s23502_s6 + $0x5cc] ss:$16 sps:$4 sm:$0xff]  }
 0x769   :  { %12875 = vmatpush1.bf16.msra.mxu0 %v16545_v41  ;;  %12632 = vmatprep.subr.bf16.mxu1 %v16550_v52  ;;  %v16608_v56 = vld [vmem:[%s23502_s6 + $0x5c0] ss:$16 sps:$4 sm:$0xff]   ;;  %v16611_v30 = vld [vmem:[%s23502_s6 + $0x5c8] ss:$16 sps:$4 sm:$0xff]   ;;  %v16616_v4 = vld [vmem:[%s23502_s6 + $0x5e4] ss:$16 sps:$4 sm:$0xff]  }
 0x76a   :  { %12876 = vmatprep.subr.bf16.mxu0 %v16553_v18  ;;  %v16619_v11 = vld [vmem:[%s23502_s6 + $0x5ec] ss:$16 sps:$4 sm:$0xff]   ;;  %v16614_v41 = vld [vmem:[%s23502_s6 + $0x5e0] ss:$16 sps:$4 sm:$0xff]   ;;  %v16617_v57 = vld [vmem:[%s23502_s6 + $0x5e8] ss:$16 sps:$4 sm:$0xff]  }
 0x76b   :  { %12616 = vmatmul.mubr.bf16.gmra.mrb[48].mxu1 %v11195_v37  ;;  %12860 = vmatmul.mubr.bf16.gmra.mrb[36].mxu0 %v11195_v37  ;;  %v16622_v52 = vld [vmem:[%s23502_s6 + $0x604] ss:$16 sps:$4 sm:$0xff]   ;;  %v16625_v18 = vld [vmem:[%s23502_s6 + $0x60c] ss:$16 sps:$4 sm:$0xff]   ;;  %v16623_v37 = vld [vmem:[%s23502_s6 + $0x608] ss:$16 sps:$4 sm:$0xff]  }
 0x76c   :  { %12633 = vmatpush1.bf16.msra.mxu1 %v16548_v12  ;;  %12656 = vmatprep.mubr.bf16.mxu1 %v22084_v8  ;;  %v16620_v12 = vld [vmem:[%s23502_s6 + $0x600] ss:$16 sps:$4 sm:$0xff]  }
 0x76d   :  { %12877 = vmatpush1.bf16.msra.mxu0 %v16551_v26  ;;  %12900 = vmatprep.mubr.bf16.mxu0 %v22084_v8  ;;  %v16563_v8 = vld [vmem:[%s23502_s6 + $0x4c8] ss:$16 sps:$4 sm:$0xff]   ;;  %v16628_v26 = vld [vmem:[%s23502_s6 + $0x624] ss:$16 sps:$4 sm:$0xff]  }
 0x76e   :  { %12634 = vmatprep.subr.bf16.mxu1 %v16556_v25  ;;  %12878 = vmatprep.subr.bf16.mxu0 %v16559_v6  ;;  %v11134_v25 = vmul.f32 0.01, %v22162_v3  ;;  %v16631_v6 = vld [vmem:[%s23502_s6 + $0x62c] ss:$16 sps:$4 sm:$0xff]  }
 0x770   :  { %12635 = vmatpush1.bf16.msra.mxu1 %v16554_v16  ;;  %v16626_v16 = vld [vmem:[%s23502_s6 + $0x620] ss:$16 sps:$4 sm:$0xff]  }
 0x771   :  { %12879 = vmatpush1.bf16.msra.mxu0 %v16557_v33  ;;  %12636 = vmatprep.subr.bf16.mxu1 %v16562_v9  ;;  %v16629_v33 = vld [vmem:[%s23502_s6 + $0x628] ss:$16 sps:$4 sm:$0xff]   ;;  %v16634_v9 = vld [vmem:[%s23502_s6 + $0x644] ss:$16 sps:$4 sm:$0xff]  }
 0x772   :  { %12880 = vmatprep.subr.bf16.mxu0 %v16565_v48  ;;  %v16632_v48 = vld [vmem:[%s23502_s6 + $0x640] ss:$16 sps:$4 sm:$0xff]  }
 0x774   :  { %12637 = vmatpush1.bf16.msra.mxu1 %v16560_v44  ;;  %v11133_v44 = vmul.f32 0.01, %v22179_v21 }
 0x775   :  { %12881 = vmatpush1.bf16.msra.mxu0 %v16563_v8  ;;  %12638 = vmatprep.subr.bf16.mxu1 %v16568_v46  ;;  %v16635_v8 = vld [vmem:[%s23502_s6 + $0x648] ss:$16 sps:$4 sm:$0xff]  }
 0x776   :  { %12882 = vmatprep.subr.bf16.mxu0 %v16571_v45  ;;  %v16643_v45 = vld [vmem:[%s23502_s6 + $0x66c] ss:$16 sps:$4 sm:$0xff]  }
 0x778   :  { %12639 = vmatpush1.bf16.msra.mxu1 %v16566_v58  ;;  %v16638_v58 = vld [vmem:[%s23502_s6 + $0x660] ss:$16 sps:$4 sm:$0xff]  }
 0x779   :  { %12883 = vmatpush1.bf16.msra.mxu0 %v16569_v13  ;;  %12640 = vmatprep.subr.bf16.mxu1 %v16574_v15  ;;  %v11173_v13 = vmax.f32 %v22179_v21, %v11133_v44  ;;  %v16641_v15 = vld [vmem:[%s23502_s6 + $0x668] ss:$16 sps:$4 sm:$0xff]   ;;  %v16644_v21 = vld [vmem:[%s23502_s6 + $0x680] ss:$16 sps:$4 sm:$0xff]  }
 0x77a   :  { %12884 = vmatprep.subr.bf16.mxu0 %v16577_v32  ;;  %v16646_v32 = vld [vmem:[%s23502_s6 + $0x684] ss:$16 sps:$4 sm:$0xff]   ;;  %v16710_v44 = vld [vmem:[%s23502_s6 + $0x7e0] ss:$16 sps:$4 sm:$0xff]  }
 0x77c   :  { %12641 = vmatpush1.bf16.msra.mxu1 %v16572_v0  ;;  %v11197_v0 = vpack.c.bf16 %v11173_v13, %v11173_v13 }
 0x77d   :  { %12885 = vmatpush1.bf16.msra.mxu0 %v16575_v31  ;;  %12642 = vmatprep.subr.bf16.mxu1 %v16580_v5  ;;  %v16647_v31 = vld [vmem:[%s23502_s6 + $0x688] ss:$16 sps:$4 sm:$0xff]   ;;  %v16652_v5 = vld [vmem:[%s23502_s6 + $0x6a4] ss:$16 sps:$4 sm:$0xff]  }
 0x77e   :  { %12886 = vmatprep.subr.bf16.mxu0 %v16583_v27  ;;  %v16655_v27 = vld [vmem:[%s23502_s6 + $0x6ac] ss:$16 sps:$4 sm:$0xff]  }
 0x780   :  { %12643 = vmatpush1.bf16.msra.mxu1 %v16578_v19  ;;  %v16650_v19 = vld [vmem:[%s23502_s6 + $0x6a0] ss:$16 sps:$4 sm:$0xff]  }
 0x781   :  { %12887 = vmatpush1.bf16.msra.mxu0 %v16581_v61  ;;  %12644 = vmatprep.subr.bf16.mxu1 %v16586_v20  ;;  %v16653_v61 = vld [vmem:[%s23502_s6 + $0x6a8] ss:$16 sps:$4 sm:$0xff]   ;;  %v16658_v20 = vld [vmem:[%s23502_s6 + $0x6c4] ss:$16 sps:$4 sm:$0xff]  }
 0x782   :  { %12888 = vmatprep.subr.bf16.mxu0 %v16589_v38  ;;  %v16661_v38 = vld [vmem:[%s23502_s6 + $0x6cc] ss:$16 sps:$4 sm:$0xff]  }
 0x784   :  { %12645 = vmatpush1.bf16.msra.mxu1 %v16584_v62  ;;  %v16659_v62 = vld [vmem:[%s23502_s6 + $0x6c8] ss:$16 sps:$4 sm:$0xff]  }
 0x785   :  { %12889 = vmatpush1.bf16.msra.mxu0 %v16587_v60  ;;  %12646 = vmatprep.subr.bf16.mxu1 %v16592_v2  ;;  %v16664_v60 = vld [vmem:[%s23502_s6 + $0x6e4] ss:$16 sps:$4 sm:$0xff]   ;;  %v16667_v2 = vld [vmem:[%s23502_s6 + $0x6ec] ss:$16 sps:$4 sm:$0xff]  }
 0x786   :  { %12890 = vmatprep.subr.bf16.mxu0 %v16595_v23  ;;  %v16662_v23 = vld [vmem:[%s23502_s6 + $0x6e0] ss:$16 sps:$4 sm:$0xff]  }
 0x788   :  { %12647 = vmatpush1.bf16.msra.mxu1 %v16590_v28  ;;  %v16665_v28 = vld [vmem:[%s23502_s6 + $0x6e8] ss:$16 sps:$4 sm:$0xff]  }
 0x789   :  { %12891 = vmatpush1.bf16.msra.mxu0 %v16593_v54  ;;  %12648 = vmatprep.subr.bf16.mxu1 %v16598_v39  ;;  %v16670_v54 = vld [vmem:[%s23502_s6 + $0x704] ss:$16 sps:$4 sm:$0xff]   ;;  %v16673_v39 = vld [vmem:[%s23502_s6 + $0x70c] ss:$16 sps:$4 sm:$0xff]  }
 0x78a   :  { %12892 = vmatprep.subr.bf16.mxu0 %v16601_v47  ;;  %v16668_v47 = vld [vmem:[%s23502_s6 + $0x700] ss:$16 sps:$4 sm:$0xff]  }
 0x78c   :  { %12649 = vmatpush1.bf16.msra.mxu1 %v16596_v51  ;;  %v16671_v51 = vld [vmem:[%s23502_s6 + $0x708] ss:$16 sps:$4 sm:$0xff]  }
 0x78d   :  { %12893 = vmatpush1.bf16.msra.mxu0 %v16599_v35  ;;  %12650 = vmatprep.subr.bf16.mxu1 %v16604_v1  ;;  %v16676_v35 = vld [vmem:[%s23502_s6 + $0x724] ss:$16 sps:$4 sm:$0xff]   ;;  %v16679_v1 = vld [vmem:[%s23502_s6 + $0x72c] ss:$16 sps:$4 sm:$0xff]  }
 0x78e   :  { %12894 = vmatprep.subr.bf16.mxu0 %v16607_v43  ;;  %v16674_v43 = vld [vmem:[%s23502_s6 + $0x720] ss:$16 sps:$4 sm:$0xff]  }
 0x790   :  { %12651 = vmatpush1.bf16.msra.mxu1 %v16602_v49  ;;  %v16677_v49 = vld [vmem:[%s23502_s6 + $0x728] ss:$16 sps:$4 sm:$0xff]  }
 0x791   :  { %12895 = vmatpush1.bf16.msra.mxu0 %v16605_v14  ;;  %12652 = vmatprep.subr.bf16.mxu1 %v16610_v17  ;;  %v16682_v14 = vld [vmem:[%s23502_s6 + $0x744] ss:$16 sps:$4 sm:$0xff]   ;;  %v16685_v17 = vld [vmem:[%s23502_s6 + $0x74c] ss:$16 sps:$4 sm:$0xff]  }
 0x792   :  { %12896 = vmatprep.subr.bf16.mxu0 %v16613_v63  ;;  %v16680_v63 = vld [vmem:[%s23502_s6 + $0x740] ss:$16 sps:$4 sm:$0xff]  }
 0x794   :  { %12653 = vmatpush1.bf16.msra.mxu1 %v16608_v56  ;;  %v16683_v56 = vld [vmem:[%s23502_s6 + $0x748] ss:$16 sps:$4 sm:$0xff]  }
 0x795   :  { %12897 = vmatpush1.bf16.msra.mxu0 %v16611_v30  ;;  %12654 = vmatprep.subr.bf16.mxu1 %v16616_v4  ;;  %v16688_v30 = vld [vmem:[%s23502_s6 + $0x764] ss:$16 sps:$4 sm:$0xff]   ;;  %v16691_v4 = vld [vmem:[%s23502_s6 + $0x76c] ss:$16 sps:$4 sm:$0xff]  }
 0x796   :  { %12898 = vmatprep.subr.bf16.mxu0 %v16619_v11  ;;  %v16686_v11 = vld [vmem:[%s23502_s6 + $0x760] ss:$16 sps:$4 sm:$0xff]  }
 0x798   :  { %12655 = vmatpush1.bf16.msra.mxu1 %v16614_v41  ;;  %v16689_v41 = vld [vmem:[%s23502_s6 + $0x768] ss:$16 sps:$4 sm:$0xff]  }
 0x799   :  { %12899 = vmatpush1.bf16.msra.mxu0 %v16617_v57  ;;  %12685 = vmatprep.subr.bf16.mxu1 %v16622_v52  ;;  %v16694_v57 = vld [vmem:[%s23502_s6 + $0x784] ss:$16 sps:$4 sm:$0xff]   ;;  %v16697_v52 = vld [vmem:[%s23502_s6 + $0x78c] ss:$16 sps:$4 sm:$0xff]  }
 0x79a   :  { %12929 = vmatprep.subr.bf16.mxu0 %v16625_v18  ;;  %v16692_v18 = vld [vmem:[%s23502_s6 + $0x780] ss:$16 sps:$4 sm:$0xff]  }
 0x79b   :  { %12657 = vmatmul.mubr.bf16.vlgmr.msra.gmra.mrb[40].mxu1 %v22120_v53 }
 0x79c   :  { %12901 = vmatmul.mubr.bf16.vlgmr.msra.gmra.mrb[28].mxu0 %v22120_v53  ;;  %12666 = vmatprep.mubr.bf16.mxu1 %v22148_v10  ;;  %v11174_v53 = vmax.f32 %v22162_v3, %v11134_v25  ;;  %v16640_v3 = vld [vmem:[%s23502_s6 + $0x664] ss:$16 sps:$4 sm:$0xff]   ;;  %v16698_v25 = vld [vmem:[%s23502_s6 + $0x7a0] ss:$16 sps:$4 sm:$0xff]  }
 0x79d   :  { %12686 = vmatpush1.bf16.msra.mxu1 %v16620_v12  ;;  %12910 = vmatprep.mubr.bf16.mxu0 %v22148_v10  ;;  %v16637_v10 = vld [vmem:[%s23502_s6 + $0x64c] ss:$16 sps:$4 sm:$0xff]   ;;  %v16695_v12 = vld [vmem:[%s23502_s6 + $0x788] ss:$16 sps:$4 sm:$0xff]  }
 0x79e   :  { %12930 = vmatpush1.bf16.msra.mxu0 %v16623_v37  ;;  %12687 = vmatprep.subr.bf16.mxu1 %v16628_v26  ;;  %v11198_v46 = vpack.c.bf16 %v11174_v53, %v11174_v53  ;;  %v16700_v37 = vld [vmem:[%s23502_s6 + $0x7a4] ss:$16 sps:$4 sm:$0xff]   ;;  %v16703_v26 = vld [vmem:[%s23502_s6 + $0x7ac] ss:$16 sps:$4 sm:$0xff]   ;;  %v16707_v53 = vld [vmem:[%s23502_s6 + $0x7c8] ss:$16 sps:$4 sm:$0xff]  }
 0x79f   :  { %12931 = vmatprep.subr.bf16.mxu0 %v16631_v6  ;;  %v16701_v6 = vld [vmem:[%s23502_s6 + $0x7a8] ss:$16 sps:$4 sm:$0xff]  }
 0x7a1   :  { %12688 = vmatpush1.bf16.msra.mxu1 %v16626_v16  ;;  %v16706_v16 = vld [vmem:[%s23502_s6 + $0x7c4] ss:$16 sps:$4 sm:$0xff]  }
 0x7a2   :  { %12932 = vmatpush1.bf16.msra.mxu0 %v16629_v33  ;;  %12689 = vmatprep.subr.bf16.mxu1 %v16634_v9  ;;  %v16709_v33 = vld [vmem:[%s23502_s6 + $0x7cc] ss:$16 sps:$4 sm:$0xff]   ;;  %v16704_v9 = vld [vmem:[%s23502_s6 + $0x7c0] ss:$16 sps:$4 sm:$0xff]  }
 0x7a3   :  { %12667 = vmatmul.mubr.bf16.gmra.mrb[44].mxu1 %v22190_v55  ;;  %12933 = vmatprep.subr.bf16.mxu0 %v16637_v10  ;;  %v16712_v10 = vld [vmem:[%s23502_s6 + $0x7e4] ss:$16 sps:$4 sm:$0xff]  }
 0x7a4   :  { %12911 = vmatmul.mubr.bf16.gmra.mrb[32].mxu0 %v22190_v55  ;;  %12676 = vmatprep.mubr.bf16.mxu1 %v11198_v46  ;;  %v16649_v55 = vld [vmem:[%s23502_s6 + $0x68c] ss:$16 sps:$4 sm:$0xff]  }
 0x7a5   :  { %12690 = vmatpush1.bf16.msra.mxu1 %v16632_v48  ;;  %12920 = vmatprep.mubr.bf16.mxu0 %v11198_v46  ;;  %v16715_v48 = vld [vmem:[%s23502_s6 + $0x7ec] ss:$16 sps:$4 sm:$0xff]   ;;  %v11136_v46 = vmul.f32 0.01, %v22324_v34 }
 0x7a6   :  { %12934 = vmatpush1.bf16.msra.mxu0 %v16635_v8  ;;  %12691 = vmatprep.subr.bf16.mxu1 %v16640_v3  ;;  %v16713_v8 = vld [vmem:[%s23502_s6 + $0x7e8] ss:$16 sps:$4 sm:$0xff]  }
 0x7a7   :  { %12935 = vmatprep.subr.bf16.mxu0 %v16643_v45  ;;  %v11176_v3 = vmax.f32 %v22324_v34, %v11136_v46  ;;  %v11135_v45 = vmul.f32 0.01, %v22338_v42  ;;  %v1369_v34 = vld [vmem:[%s23506_s10 + $0x28] sm:$0xff] }
 0x7a9   :  { %12692 = vmatpush1.bf16.msra.mxu1 %v16638_v58  ;;  %v11200_v58 = vpack.c.bf16 %v11176_v3, %v11176_v3  ;;  %v11175_v13 = vmax.f32 %v22338_v42, %v11135_v45  ;;  %v1364_v42 = vld [vmem:[%s23506_s10] sm:$0xff] }
 0x7aa   :  { %12936 = vmatpush1.bf16.msra.mxu0 %v16641_v15  ;;  %12693 = vmatprep.subr.bf16.mxu1 %v16646_v32 }
 0x7ab   :  { %12677 = vmatmul.mubr.bf16.gmra.mrb[48].mxu1 %v11197_v0  ;;  %12937 = vmatprep.subr.bf16.mxu0 %v16649_v55  ;;  %v11199_v15 = vpack.c.bf16 %v11175_v13, %v11175_v13  ;;  %v1370_v13 = vld [vmem:[%s23506_s10 + $0x30] sm:$0xff] }
 0x7ac   :  { %12921 = vmatmul.mubr.bf16.gmra.mrb[36].mxu0 %v11197_v0  ;;  %12717 = vmatprep.mubr.bf16.mxu1 %v22252_v7  ;;  %v1373_v0 = vld [vmem:[%s23506_s10 + $0x48] sm:$0xff] }
 0x7ad   :  { %12694 = vmatpush1.bf16.msra.mxu1 %v16644_v21  ;;  %12961 = vmatprep.mubr.bf16.mxu0 %v22252_v7  ;;  %v16656_v7 = vld [vmem:[%s23502_s6 + $0x6c0] ss:$16 sps:$4 sm:$0xff]   ;;  %v1377_v21 = vld [vmem:[%s23506_s10 + $0x68] sm:$0xff] }
 0x7ae   :  { %12938 = vmatpush1.bf16.msra.mxu0 %v16647_v31  ;;  %12695 = vmatprep.subr.bf16.mxu1 %v16652_v5  ;;  %v1372_v31 = vld [vmem:[%s23506_s10 + $0x40] sm:$0xff]  ;;  %v15801_v5 = vpack.c.bf16 %v1377_v21, %v1373_v0  ;;  %v1379_v0 = vld [vmem:[%s23506_s10 + $0x78] sm:$0xff] }
 0x7af   :  { %12939 = vmatprep.subr.bf16.mxu0 %v16655_v27  ;;  %v1376_v27 = vld [vmem:[%s23506_s10 + $0x60] sm:$0xff] }
 0x7b1   :  { %12696 = vmatpush1.bf16.msra.mxu1 %v16650_v19  ;;  %v15803_v19 = vpack.c.bf16 %v1376_v27, %v1372_v31 }
 0x7b2   :  { %12940 = vmatpush1.bf16.msra.mxu0 %v16653_v61  ;;  %12697 = vmatprep.subr.bf16.mxu1 %v16658_v20  ;;  %v1367_v61 = vld [vmem:[%s23506_s10 + $0x18] sm:$0xff] }
 0x7b3   :  { %12941 = vmatprep.subr.bf16.mxu0 %v16661_v38  ;;  %v1371_v20 = vld [vmem:[%s23506_s10 + $0x38] sm:$0xff] }
 0x7b4   :  { %v22755_v38 = vpack.c.bf16 %v1371_v20, %v1367_v61  ;;  %v1374_v20 = vld [vmem:[%s23506_s10 + $0x50] sm:$0xff] }
 0x7b5   :  { %12698 = vmatpush1.bf16.msra.mxu1 %v16656_v7  ;;  %v1361_v7 = vld [vmem:[%s23503_s7] sm:$0xf] }
 0x7b6   :  { %12942 = vmatpush1.bf16.msra.mxu0 %v16659_v62  ;;  %12699 = vmatprep.subr.bf16.mxu1 %v16664_v60  ;;  %v22762_v62 = vrot.slane %v1361_v7, %v23720_v29  ;;  %v22765_v60 = vrot.slane %v1361_v7, %v23722_v50 }
 0x7b7   :  { %12943 = vmatprep.subr.bf16.mxu0 %v16667_v2  ;;  %v22768_v2 = vrot.slane %v1361_v7, %v23719_v22 }
 0x7b9   :  { %12700 = vmatpush1.bf16.msra.mxu1 %v16662_v23  ;;  %v22771_v23 = vrot.slane %v1361_v7, %v23721_v59  ;;  %v1378_v7 = vld [vmem:[%s23506_s10 + $0x70] sm:$0xff] }
 0x7ba   :  { %12944 = vmatpush1.bf16.msra.mxu0 %v16665_v28  ;;  %12701 = vmatprep.subr.bf16.mxu1 %v16670_v54 }
 0x7bb   :  { %12945 = vmatprep.subr.bf16.mxu0 %v16673_v39 }
 0x7bd   :  { %12702 = vmatpush1.bf16.msra.mxu1 %v16668_v47 }
 0x7be   :  { %12946 = vmatpush1.bf16.msra.mxu0 %v16671_v51  ;;  %12703 = vmatprep.subr.bf16.mxu1 %v16676_v35 }
 0x7bf   :  { %12947 = vmatprep.subr.bf16.mxu0 %v16679_v1 }
 0x7c1   :  { %12704 = vmatpush1.bf16.msra.mxu1 %v16674_v43 }
 0x7c2   :  { %12948 = vmatpush1.bf16.msra.mxu0 %v16677_v49  ;;  %12705 = vmatprep.subr.bf16.mxu1 %v16682_v14 }
 0x7c3   :  { %12949 = vmatprep.subr.bf16.mxu0 %v16685_v17 }
 0x7c5   :  { %12706 = vmatpush1.bf16.msra.mxu1 %v16680_v63 }
 0x7c6   :  { %12950 = vmatpush1.bf16.msra.mxu0 %v16683_v56  ;;  %12707 = vmatprep.subr.bf16.mxu1 %v16688_v30 }
 0x7c7   :  { %12951 = vmatprep.subr.bf16.mxu0 %v16691_v4 }
 0x7c9   :  { %12708 = vmatpush1.bf16.msra.mxu1 %v16686_v11 }
 0x7ca   :  { %12952 = vmatpush1.bf16.msra.mxu0 %v16689_v41  ;;  %12709 = vmatprep.subr.bf16.mxu1 %v16694_v57 }
 0x7cb   :  { %12953 = vmatprep.subr.bf16.mxu0 %v16697_v52 }
 0x7cd   :  { %12710 = vmatpush1.bf16.msra.mxu1 %v16692_v18 }
 0x7ce   :  { %12954 = vmatpush1.bf16.msra.mxu0 %v16695_v12  ;;  %12711 = vmatprep.subr.bf16.mxu1 %v16700_v37 }
 0x7cf   :  { %12955 = vmatprep.subr.bf16.mxu0 %v16703_v26 }
 0x7d1   :  { %12712 = vmatpush1.bf16.msra.mxu1 %v16698_v25 }
 0x7d2   :  { %12956 = vmatpush1.bf16.msra.mxu0 %v16701_v6  ;;  %12713 = vmatprep.subr.bf16.mxu1 %v16706_v16 }
 0x7d3   :  { %12957 = vmatprep.subr.bf16.mxu0 %v16709_v33 }
 0x7d5   :  { %12714 = vmatpush1.bf16.msra.mxu1 %v16704_v9 }
 0x7d6   :  { %12958 = vmatpush1.bf16.msra.mxu0 %v16707_v53  ;;  %12715 = vmatprep.subr.bf16.mxu1 %v16712_v10 }
 0x7d7   :  { %12959 = vmatprep.subr.bf16.mxu0 %v16715_v48 }
 0x7d9   :  { %12716 = vmatpush1.bf16.msra.mxu1 %v16710_v44 }
 0x7da   :  { %12960 = vmatpush1.bf16.msra.mxu0 %v16713_v8 }
 0x7dc   :  { %12718 = vmatmul.mubr.bf16.vlgmr.msra.gmra.mrb[40].mxu1 %v22287_v24 }
 0x7dd   :  { %12962 = vmatmul.mubr.bf16.vlgmr.msra.gmra.mrb[28].mxu0 %v22287_v24  ;;  %12727 = vmatprep.mubr.bf16.mxu1 %v22321_v36  ;;  %v23786_v24 = vmov 0.0  }
 0x7de   :  { %12971 = vmatprep.mubr.bf16.mxu0 %v22321_v36  ;;  %v1365_v36 = vld [vmem:[%s23506_s10 + $0x8] sm:$0xff] }
 0x7df   :  { %v15797_v32 = vpack.c.bf16 %v1369_v34, %v1365_v36 }
 0x7e1   :  { %15798 = vmatprep.subr.bf16.mxu1 %v15797_v32  ;;  %15814 = vmatprep.subr.bf16.mxu0 %v15797_v32 }
 0x7e4   :  { %12728 = vmatmul.mubr.bf16.gmra.mrb[44].mxu1 %v22340_v40 }
 0x7e5   :  { %12972 = vmatmul.mubr.bf16.gmra.mrb[32].mxu0 %v22340_v40  ;;  %12737 = vmatprep.mubr.bf16.mxu1 %v11200_v58  ;;  %v1368_v40 = vld [vmem:[%s23506_s10 + $0x20] sm:$0xff] }
 0x7e6   :  { %12981 = vmatprep.mubr.bf16.mxu0 %v11200_v58  ;;  %v15799_v55 = vpack.c.bf16 %v1368_v40, %v1364_v42  ;;  %v1366_v58 = vld [vmem:[%s23506_s10 + $0x10] sm:$0xff] }
 0x7e8   :  { %15800 = vmatpush1.bf16.xpose.msra.mxu1 %v15799_v55  ;;  %15816 = vmatpush1.bf16.msra.mxu0 %v15799_v55  ;;  %v1375_v55 = vld [vmem:[%s23506_s10 + $0x58] sm:$0xff] }
 0x7e9   :  { %15802 = vmatprep.subr.bf16.mxu1 %v15801_v5  ;;  %15818 = vmatprep.subr.bf16.mxu0 %v15801_v5 }
 0x7ec   :  { %12738 = vmatmul.mubr.bf16.gmra.mrb[48].mxu1 %v11199_v15  ;;  %15820 = vmatpush1.bf16.msra.mxu0 %v15803_v19 }
 0x7ed   :  { %12982 = vmatmul.mubr.bf16.gmra.mrb[36].mxu0 %v11199_v15 }
 0x7ee   :  { %13563 = vmatprep.mubr.f32.mxu0 %v23786_v24 }
 0x7f0   :  { %15804 = vmatpush1.bf16.xpose.msra.mxu1 %v15803_v19 }
 0x7f1   :  { %15806 = vmatprep.subr.bf16.mxu1 %v22755_v38 }
 0x8af   :  { %v12719_v28 = vpop.f32.mrb[40].mxu1 }
 0x8b0   :  { %v22774_v54 = vadd.f32 %v12719_v28, %v22762_v62  ;;  %v12963_v39 = vpop.f32.mrb[28].mxu0  ;;  %v12721_v47 = vpop.f32.mrb[41].mxu1 }
 0x8b1   :  { %v22777_v51 = vadd.f32 %v12963_v39, %v22765_v60  ;;  %v22780_v35 = vadd.f32 %v12721_v47, %v22768_v2  ;;  %v12965_v1 = vpop.f32.mrb[29].mxu0  ;;  %v12723_v43 = vpop.f32.mrb[42].mxu1 }
 0x8b2   :  { %23787 = vst [vmem:[#allocation37_spill] sm:$0xff] %v22774_v54  ;;  %v12990_v49 = vrot.slane %v22774_v54, 4  ;;  %v13110_v14 = vmul.f32 %v22774_v54, %v22774_v54  ;;  %v22786_v17 = vadd.f32 %v12965_v1, %v22771_v23  ;;  %v22789_v63 = vadd.f32 %v12723_v43, %v22762_v62  ;;  %v12967_v56 = vpop.f32.mrb[30].mxu0  ;;  %v22791_v30 = vpop.f32.mrb[43].mxu1 }
 0x8b3   :  { %23788 = vst [vmem:[#allocation19_spill] sm:$0xff] %v22777_v51  ;;  %23789 = vst [vmem:[#allocation23_spill] sm:$0xff] %v22780_v35  ;;  %v13002_v4 = vrot.slane %v22777_v51, 4  ;;  %v13112_v11 = vmul.f32 %v22777_v51, %v22777_v51  ;;  %v12996_v41 = vrot.slane %v22780_v35, 4  ;;  %v13111_v57 = vmul.f32 %v22780_v35, %v22780_v35  ;;  %v12969_v52 = vpop.f32.mrb[31].mxu0 }
 0x8b4   :  { %23790 = vst [vmem:[#allocation17_spill] sm:$0xff] %v22786_v17  ;;  %23791 = vst [vmem:[#allocation21_spill] sm:$0xff] %v22789_v63  ;;  %v12991_v18 = vadd.f32 %v22774_v54, %v12990_v49  ;;  %v13130_v12 = vrot.slane %v13110_v14, 4  ;;  %v13008_v37 = vrot.slane %v22786_v17, 4  ;;  %v13113_v26 = vmul.f32 %v22786_v17, %v22786_v17 }
 0x8b5   :  { %v13003_v25 = vadd.f32 %v22777_v51, %v13002_v4  ;;  %v13142_v6 = vrot.slane %v13112_v11, 4  ;;  %v12997_v16 = vadd.f32 %v22780_v35, %v12996_v41  ;;  %v13136_v33 = vrot.slane %v13111_v57, 4 }
 0x8b6   :  { %v12992_v9 = vrot.slane %v12991_v18, 2  ;;  %v13131_v53 = vadd.f32 %v13130_v12, %v13110_v14  ;;  %v13009_v10 = vadd.f32 %v22786_v17, %v13008_v37  ;;  %v13148_v48 = vrot.slane %v13113_v26, 4 }
 0x8b7   :  { %v13004_v44 = vrot.slane %v13003_v25, 2  ;;  %v13143_v8 = vadd.f32 %v13142_v6, %v13112_v11  ;;  %v12998_v46 = vrot.slane %v12997_v16, 2  ;;  %v13137_v3 = vadd.f32 %v13136_v33, %v13111_v57  ;;  %v12729_v45 = vpop.f32.mrb[44].mxu1 }
 0x8b8   :  { %v12993_v15 = vadd.f32 %v12992_v9, %v12991_v18  ;;  %v13132_v36 = vrot.slane %v13131_v53, 2  ;;  %v13010_v34 = vrot.slane %v13009_v10, 2  ;;  %v13149_v32 = vadd.f32 %v13148_v48, %v13113_v26  ;;  %v22812_v42 = vpop.f32.mrb[32].mxu0  ;;  %v22814_v40 = vpop.f32.mrb[45].mxu1 }
 0x8b9   :  { %v22822_v21 = vadd.f32 %v13004_v44, %v13003_v25  ;;  %v13144_v31 = vrot.slane %v13143_v8, 2  ;;  %v22824_v5 = vadd.f32 %v12998_v46, %v12997_v16  ;;  %v13138_v27 = vrot.slane %v13137_v3, 2  ;;  %v22826_v19 = vpop.f32.mrb[33].mxu0  ;;  %v22828_v61 = vpop.f32.mrb[46].mxu1 }
 0x8ba   :  { %v12994_v28 = vrot.slane %v12993_v15, 1  ;;  %v22836_v39 = vadd.f32 %v13132_v36, %v13131_v53  ;;  %v22838_v47 = vadd.f32 %v13010_v34, %v13009_v10  ;;  %v22840_v1 = vpop.f32.mrb[34].mxu0  ;;  %v22842_v43 = vpop.f32.mrb[47].mxu1  ;;  %v13150_v49 = vrot.slane %v13149_v32, 2 }
 0x8bb   :  { %v22844_v14 = vpop.f32.mrb[35].mxu0  ;;  %v22846_v4 = vpack.c.bf16 %v1370_v13, %v1366_v58  ;;  %v13006_v11 = vrot.slane %v22822_v21, 1  ;;  %v22849_v41 = vadd.f32 %v13144_v31, %v13143_v8  ;;  %v22851_v57 = vpack.c.bf16 %v1379_v0, %v1375_v55 }
 0x8bc   :  { %v22853_v18 = vpack.c.bf16 %v1378_v7, %v1374_v20  ;;  %v22855_v12 = vadd.f32 %v12994_v28, %v12993_v15  ;;  %v13000_v37 = vrot.slane %v22824_v5, 1  ;;  %v22858_v26 = vadd.f32 %v13138_v27, %v13137_v3 }
 0x8bd   :  { %v13014_v25 = vrot.slane %v22789_v63, 4  ;;  %v13134_v6 = vrot.slane %v22836_v39, 1  ;;  %v13012_v16 = vrot.slane %v22838_v47, 1  ;;  %v13114_v33 = vmul.f32 %v22789_v63, %v22789_v63 }
 0x8be   :  { %v22866_v9 = vadd.f32 %v12967_v56, %v22765_v60  ;;  %v22868_v53 = vadd.f32 %v13150_v49, %v13149_v32  ;;  %v22873_v48 = vadd.f32 %v22791_v30, %v22768_v2  ;;  %v22876_v44 = vadd.f32 %v12969_v52, %v22771_v23 }
 0x8bf   :  { %v13015_v10 = vadd.f32 %v22789_v63, %v13014_v25  ;;  %v22878_v8 = vpop.f32.mrb[48].mxu1  ;;  %v13154_v46 = vrot.slane %v13114_v33, 4  ;;  %v22884_v58 = vadd.f32 %v12729_v45, %v22762_v62 }
 0x8c0   :  { %23792 = vst [vmem:[#allocation25_spill] sm:$0xff] %v22866_v9  ;;  %23793 = vst [vmem:[#allocation29_spill] sm:$0xff] %v22873_v48  ;;  %v13026_v3 = vrot.slane %v22866_v9, 4  ;;  %v13116_v56 = vmul.f32 %v22866_v9, %v22866_v9  ;;  %v22886_v13 = vpop.f32.mrb[36].mxu0  ;;  %v22888_v15 = vpop.f32.mrb[49].mxu1  ;;  %v13020_v36 = vrot.slane %v22873_v48, 4  ;;  %v13115_v52 = vmul.f32 %v22873_v48, %v22873_v48 }
 0x8c1   :  { %23794 = vst [vmem:[#allocation24_spill] sm:$0xff] %v22876_v44  ;;  %23795 = vst [vmem:[#allocation28_spill] sm:$0xff] %v22884_v58  ;;  %v13016_v30 = vrot.slane %v13015_v10, 2  ;;  %v13032_v34 = vrot.slane %v22876_v44, 4  ;;  %v22894_v32 = vpop.f32.mrb[37].mxu0  ;;  %v12743_v55 = vpop.f32.mrb[50].mxu1  ;;  %v13155_v0 = vadd.f32 %v13154_v46, %v13114_v33  ;;  %v13117_v27 = vmul.f32 %v22876_v44, %v22876_v44 }
 0x8c2   :  { %v13027_v31 = vadd.f32 %v22866_v9, %v13026_v3  ;;  %v13166_v45 = vrot.slane %v13116_v56, 4  ;;  %v12987_v20 = vpop.f32.mrb[38].mxu0  ;;  %v12744_v7 = vpop.f32.mrb[51].mxu1  ;;  %v13021_v49 = vadd.f32 %v22873_v48, %v13020_v36  ;;  %v13160_v25 = vrot.slane %v13115_v52, 4 }
 0x8c3   :  { %v13017_v28 = vadd.f32 %v13016_v30, %v13015_v10  ;;  %v13033_v17 = vadd.f32 %v22876_v44, %v13032_v34  ;;  %v12988_v35 = vpop.f32.mrb[39].mxu0  ;;  %v13156_v51 = vrot.slane %v13155_v0, 2  ;;  %v13172_v55 = vrot.slane %v13117_v27, 4 }
 0x8c4   :  { %v13028_v63 = vrot.slane %v13027_v31, 2  ;;  %v13167_v54 = vadd.f32 %v13166_v45, %v13116_v56  ;;  %v13022_v46 = vrot.slane %v13021_v49, 2  ;;  %v13161_v3 = vadd.f32 %v13160_v25, %v13115_v52 }
 0x8c5   :  { %v13018_v33 = vrot.slane %v13017_v28, 1  ;;  %v13034_v9 = vrot.slane %v13033_v17, 2  ;;  %v13157_v59 = vadd.f32 %v13156_v51, %v13155_v0  ;;  %v13173_v20 = vadd.f32 %v13172_v55, %v13117_v27 }
 0x8c6   :  { %v13029_v22 = vadd.f32 %v13028_v63, %v13027_v31  ;;  %v13168_v50 = vrot.slane %v13167_v54, 2  ;;  %v22902_v10 = vadd.f32 %v13006_v11, %v22822_v21  ;;  %v13023_v30 = vadd.f32 %v13022_v46, %v13021_v49 }
 0x8c7   :  { %v13162_v36 = vrot.slane %v13161_v3, 2  ;;  %v13035_v7 = vadd.f32 %v13034_v9, %v13033_v17  ;;  %v22906_v34 = vadd.f32 %v13000_v37, %v22824_v5  ;;  %v13158_v56 = vrot.slane %v13157_v59, 1 }
 0x8c8   :  { %v13030_v45 = vrot.slane %v13029_v22, 1  ;;  %v22909_v52 = vadd.f32 %v13134_v6, %v22836_v39  ;;  %v22912_v51 = vadd.f32 %v13012_v16, %v22838_v47  ;;  %v22914_v63 = vadd.f32 %v13168_v50, %v13167_v54 }
 0x8c9   :  { %v13038_v21 = vrot.slane %v22884_v58, 4  ;;  %v22917_v11 = vadd.f32 %v13018_v33, %v13017_v28  ;;  %v13024_v17 = vrot.slane %v13023_v30, 1  ;;  %v22919_v9 = vadd.f32 %v13162_v36, %v13161_v3 }
 0x8ca   :  { %v13174_v0 = vrot.slane %v13173_v20, 2  ;;  %v22921_v5 = vadd.f32 %v13158_v56, %v13157_v59  ;;  %v13036_v37 = vrot.slane %v13035_v7, 1  ;;  %v13118_v39 = vmul.f32 %v22884_v58, %v22884_v58 }
 0x8cb   :  { %v13039_v31 = vadd.f32 %v22884_v58, %v13038_v21  ;;  %v22926_v47 = vadd.f32 %v13030_v45, %v13029_v22  ;;  %v22930_v50 = vadd.f32 %v22812_v42, %v22765_v60  ;;  %v22934_v54 = vadd.f32 %v22814_v40, %v22768_v2 }
 0x8cc   :  { %v22938_v59 = vadd.f32 %v22826_v19, %v22771_v23  ;;  %v13178_v27 = vrot.slane %v13118_v39, 4  ;;  %v22943_v22 = vadd.f32 %v22828_v61, %v22762_v62  ;;  %v22958_v36 = vadd.f32 %v22840_v1, %v22765_v60 }
 0x8cd   :  { %23796 = vst [vmem:[#allocation31_spill] sm:$0xff] %v22930_v50  ;;  %23797 = vst [vmem:[#allocation32_spill] sm:$0xff] %v22934_v54  ;;  %v13040_v16 = vrot.slane %v13039_v31, 2  ;;  %v13050_v28 = vrot.slane %v22930_v50, 4  ;;  %v13120_v42 = vmul.f32 %v22930_v50, %v22930_v50  ;;  %v13044_v40 = vrot.slane %v22934_v54, 4 }
 0x8ce   :  { %23798 = vst [vmem:[#allocation20_spill] sm:$0xff] %v22938_v59  ;;  %23799 = vst [vmem:[#allocation5_spill] sm:$0xff] %v22943_v22  ;;  %v13119_v49 = vmul.f32 %v22934_v54, %v22934_v54  ;;  %v13179_v25 = vadd.f32 %v13178_v27, %v13118_v39  ;;  %v13056_v55 = vrot.slane %v22938_v59, 4  ;;  %v13121_v33 = vmul.f32 %v22938_v59, %v22938_v59 }
 0x8cf   :  { %v13041_v19 = vadd.f32 %v13040_v16, %v13039_v31  ;;  %v13051_v61 = vadd.f32 %v22930_v50, %v13050_v28  ;;  %v13190_v46 = vrot.slane %v13120_v42, 4  ;;  %v13045_v3 = vadd.f32 %v22934_v54, %v13044_v40  ;;  %23800 = vst [vmem:[#allocation18_spill] sm:$0xff] %v22958_v36 }
 0x8d0   :  { %v13180_v45 = vrot.slane %v13179_v25, 2  ;;  %v13184_v21 = vrot.slane %v13119_v49, 4  ;;  %v13057_v31 = vadd.f32 %v22938_v59, %v13056_v55  ;;  %v13196_v35 = vrot.slane %v13121_v33, 4 }
 0x8d1   :  { %v13042_v56 = vrot.slane %v13041_v19, 1  ;;  %v13052_v39 = vrot.slane %v13051_v61, 2  ;;  %v13191_v16 = vadd.f32 %v13190_v46, %v13120_v42  ;;  %v13046_v27 = vrot.slane %v13045_v3, 2 }
 0x8d2   :  { %v22961_v6 = vadd.f32 %v13024_v17, %v13023_v30  ;;  %v22963_v44 = vadd.f32 %v13036_v37, %v13035_v7  ;;  %v22965_v28 = vadd.f32 %v13174_v0, %v13173_v20  ;;  %v13058_v40 = vrot.slane %v13057_v31, 2 }
 0x8d3   :  { %v13053_v54 = vadd.f32 %v13052_v39, %v13051_v61  ;;  %v13192_v48 = vrot.slane %v13191_v16, 2  ;;  %v13047_v1 = vadd.f32 %v13046_v27, %v13045_v3  ;;  %v13062_v50 = vrot.slane %v22943_v22, 4 }
 0x8d4   :  { %v22968_v58 = vadd.f32 %v13184_v21, %v13119_v49  ;;  %v13059_v29 = vadd.f32 %v13058_v40, %v13057_v31  ;;  %v22972_v42 = vmul.f32 %v22943_v22, %v22943_v22  ;;  %v13074_v30 = vrot.slane %v22958_v36, 4 }
 0x8d5   :  { %v22975_v17 = vadd.f32 %v13042_v56, %v13041_v19  ;;  %v22977_v7 = vadd.f32 %v13180_v45, %v13179_v25  ;;  %v22979_v20 = vadd.f32 %v13196_v35, %v13121_v33  ;;  %v13063_v0 = vadd.f32 %v22943_v22, %v13062_v50 }
 0x8d6   :  { %v13054_v37 = vrot.slane %v13053_v54, 1  ;;  %v22982_v55 = vadd.f32 %v13192_v48, %v13191_v16  ;;  %v13075_v49 = vadd.f32 %v22958_v36, %v13074_v30  ;;  %v22987_v61 = vmul.f32 %v22958_v36, %v22958_v36 }
 0x8d7   :  { %v13048_v46 = vrot.slane %v13047_v1, 1  ;;  %v13060_v3 = vrot.slane %v13059_v29, 1  ;;  %v13064_v21 = vrot.slane %v13063_v0, 2  ;;  %v22991_v19 = vadd.f32 %v22842_v43, %v22768_v2 }
 0x8d8   :  { %v13076_v25 = vrot.slane %v13075_v49, 2  ;;  %v22996_v48 = vadd.f32 %v22844_v14, %v22771_v23  ;;  %v23000_v50 = vadd.f32 %v22878_v8, %v22762_v62  ;;  %v23007_v43 = vadd.f32 %v22886_v13, %v22765_v60 }
 0x8d9   :  { %23801 = vst [vmem:[#allocation22_spill] sm:$0xff] %v22991_v19  ;;  %v13065_v33 = vadd.f32 %v13064_v21, %v13063_v0  ;;  %v13068_v56 = vrot.slane %v22991_v19, 4  ;;  %v13123_v45 = vmul.f32 %v22991_v19, %v22991_v19  ;;  %v23017_v8 = vadd.f32 %v13054_v37, %v13053_v54 }
 0x8da   :  { %23802 = vst [vmem:[#allocation27_spill] sm:$0xff] %v22996_v48  ;;  %23803 = vst [vmem:[#allocation33_spill] sm:$0xff] %v23000_v50  ;;  %v23009_v31 = vadd.f32 %v13076_v25, %v13075_v49  ;;  %v13080_v39 = vrot.slane %v22996_v48, 4  ;;  %v23014_v14 = vmul.f32 %v22996_v48, %v22996_v48  ;;  %v13086_v62 = vrot.slane %v23000_v50, 4 }
 0x8db   :  { %23804 = vst [vmem:[#allocation26_spill] sm:$0xff] %v23007_v43  ;;  %v13049_v16 = vadd.f32 %v13048_v46, %v13047_v1  ;;  %v13069_v40 = vadd.f32 %v22991_v19, %v13068_v56  ;;  %v13066_v30 = vrot.slane %v13065_v33, 1  ;;  %v23025_v0 = vmul.f32 %v23000_v50, %v23000_v50 }
 0x8dc   :  { %v13081_v60 = vadd.f32 %v22996_v48, %v13080_v39  ;;  %v13087_v13 = vadd.f32 %v23000_v50, %v13086_v62  ;;  %v23027_v49 = vadd.f32 %v13060_v3, %v13059_v29  ;;  %v13208_v25 = vrot.slane %v13123_v45, 4 }
 0x8dd   :  { %v13070_v21 = vrot.slane %v13069_v40, 2  ;;  %v13098_v54 = vrot.slane %v23007_v43, 4  ;;  %v23035_v62 = vadd.f32 %v22888_v15, %v22768_v2  ;;  %v23039_v29 = vadd.f32 %v22894_v32, %v22771_v23 }
 0x8de   :  { %v13082_v37 = vrot.slane %v13081_v60, 2  ;;  %v13088_v56 = vrot.slane %v13087_v13, 2  ;;  %v13067_v3 = vadd.f32 %v13066_v30, %v13065_v33  ;;  %v13226_v1 = vrot.slane %v23025_v0, 4 }
 0x8df   :  { %v13071_v27 = vadd.f32 %v13070_v21, %v13069_v40  ;;  %v13099_v39 = vadd.f32 %v23007_v43, %v13098_v54  ;;  %23805 = vst [vmem:[#allocation30_spill] sm:$0xff] %v23035_v62  ;;  %23806 = vst [vmem:[#allocation34_spill] sm:$0xff] %v23039_v29  ;;  %v13092_v40 = vrot.slane %v23035_v62, 4  ;;  %v13127_v21 = vmul.f32 %v23035_v62, %v23035_v62 }
 0x8e0   :  { %v23041_v35 = vadd.f32 %v13082_v37, %v13081_v60  ;;  %v13089_v48 = vadd.f32 %v13088_v56, %v13087_v13  ;;  %v23049_v2 = vmul.f32 %v23007_v43, %v23007_v43  ;;  %v13104_v23 = vrot.slane %v23039_v29, 4 }
 0x8e1   :  { %v13072_v59 = vrot.slane %v13071_v27, 1  ;;  %v13100_v46 = vrot.slane %v13099_v39, 2  ;;  %v23054_v15 = vmul.f32 %v23039_v29, %v23039_v29  ;;  %v13140_v32 = vrot.slane %v22858_v26, 1 }
 0x8e2   :  { %v13084_v33 = vrot.slane %v23041_v35, 1  ;;  %v13090_v30 = vrot.slane %v13089_v48, 1  ;;  %v13093_v13 = vadd.f32 %v23035_v62, %v13092_v40  ;;  %v13232_v54 = vrot.slane %v13127_v21, 4 }
 0x8e3   :  { %v23058_v60 = vadd.f32 %v13100_v46, %v13099_v39  ;;  %v13105_v37 = vadd.f32 %v23039_v29, %v13104_v23  ;;  %v13073_v56 = vadd.f32 %v13072_v59, %v13071_v27  ;;  %v13164_v19 = vrot.slane %v22919_v9, 1 }
 0x8e4   :  { %v13094_v43 = vrot.slane %v13093_v13, 2  ;;  %v13186_v50 = vrot.slane %v22968_v58, 2  ;;  %v13274_v22 = vsel %vm9374_vm0, %v22961_v6, %v22906_v34  ;;  %v13141_v46 = vadd.f32 %v13140_v32, %v22858_v26 }
 0x8e5   :  { %v13106_v24 = vrot.slane %v13105_v37, 2  ;;  %v13165_v39 = vadd.f32 %v13164_v19, %v22919_v9  ;;  %v13275_v40 = vsel %vm9376_vm1, %v13049_v16, %v13274_v22  ;;  %v13091_v27 = vadd.f32 %v13090_v30, %v13089_v48 }
 0x8e6   :  { %v13095_v23 = vadd.f32 %v13094_v43, %v13093_v13  ;;  %v13187_v59 = vadd.f32 %v13186_v50, %v22968_v58  ;;  %v13182_v29 = vrot.slane %v22977_v7, 1  ;;  %v13276_v36 = vsel %vm9378_vm2, %v13073_v56, %v13275_v40 }
 0x8e7   :  { %v13312_v62 = vsel %vm9458_vm4, %v13165_v39, %v13141_v46  ;;  %v13270_v34 = vsel %vm9374_vm0, %v22917_v11, %v22855_v12  ;;  %v13209_v6 = vadd.f32 %v13208_v25, %v13123_v45  ;;  %v13233_v48 = vadd.f32 %v13232_v54, %v13127_v21 }
 0x8e8   :  { %v13096_v26 = vrot.slane %v13095_v23, 1  ;;  %v13188_v32 = vrot.slane %v13187_v59, 1  ;;  %v13183_v9 = vadd.f32 %v13182_v29, %v22977_v7  ;;  %v13271_v22 = vsel %vm9376_vm1, %v22975_v17, %v13270_v34 }
 0x8e9   :  { %v13272_v58 = vsel %vm9378_vm2, %v13067_v3, %v13271_v22  ;;  %v13210_v19 = vrot.slane %v13209_v6, 2  ;;  %v23807_v50 = vrot.slane %v22972_v42, 4  ;;  %v13310_v11 = vsel %vm9458_vm4, %v22921_v5, %v22909_v52 }
 0x8ea   :  { %v13097_v16 = vadd.f32 %v13096_v26, %v13095_v23  ;;  %v13189_v30 = vadd.f32 %v13188_v32, %v13187_v59  ;;  %v13273_v12 = vsel %vm9380_vm3, %v13091_v27, %v13272_v58  ;;  %v13311_v7 = vsel %vm9460_vm5, %v13183_v9, %v13310_v11 }
 0x8eb   :  { %v13203_v43 = vadd.f32 %v23807_v50, %v22972_v42  ;;  %v13211_v45 = vadd.f32 %v13210_v19, %v13209_v6  ;;  %v13234_v17 = vrot.slane %v13233_v48, 2  ;;  %v13330_v21 = vsel %vm9500_vm6, %v13273_v12, %v13311_v7 }
 0x8ec   :  { %v13277_v29 = vsel %vm9380_vm3, %v13097_v16, %v13276_v36  ;;  %v13313_v3 = vsel %vm9460_vm5, %v13189_v30, %v13312_v62  ;;  %v13227_v42 = vadd.f32 %v13226_v1, %v23025_v0  ;;  %v13107_v5 = vadd.f32 %v13106_v24, %v13105_v37 }
 0x8ed   :  { %v13204_v25 = vrot.slane %v13203_v43, 2  ;;  %v13331_v13 = vsel %vm9500_vm6, %v13277_v29, %v13313_v3  ;;  %v13212_v54 = vrot.slane %v13211_v45, 1  ;;  %v13235_v56 = vadd.f32 %v13234_v17, %v13233_v48 }
 0x8ee   :  { %13398 = vmatprep.mubr.f32.mxu1 %v13331_v13  ;;  %v13228_v52 = vrot.slane %v13227_v42, 2  ;;  %v13152_v39 = vrot.slane %v22868_v53, 1  ;;  %v13176_v40 = vrot.slane %v22965_v28, 1  ;;  %v13102_v36 = vrot.slane %v23058_v60, 1 }
 0x8ef   :  { %v13205_v46 = vadd.f32 %v13204_v25, %v13203_v43  ;;  %13399 = vmatmul.mubr.f32.vlgmr.msra.gmra.mrb[52].mxu1 %v13330_v21  ;;  %v13236_v62 = vrot.slane %v13235_v56, 1  ;;  %v13085_v23 = vadd.f32 %v13084_v33, %v23041_v35  ;;  %v13198_v0 = vrot.slane %v22979_v20, 2 }
 0x8f0   :  { %15808 = vmatpush1.bf16.xpose.msra.mxu1 %v22846_v4  ;;  %v13229_v59 = vadd.f32 %v13228_v52, %v13227_v42  ;;  %v13108_v27 = vrot.slane %v13107_v5, 1  ;;  %v13177_v34 = vadd.f32 %v13176_v40, %v22965_v28  ;;  %v13213_v24 = vadd.f32 %v13212_v54, %v13211_v45 }
 0x8f1   :  { %v13206_v1 = vrot.slane %v13205_v46, 1  ;;  %v13237_v37 = vadd.f32 %v13236_v62, %v13235_v56  ;;  %v13199_v6 = vadd.f32 %v13198_v0, %v22979_v20  ;;  %v13282_v26 = vsel %vm9374_vm0, %v22963_v44, %v22912_v51  ;;  %15810 = vmatprep.subr.bf16.mxu1 %v22851_v57 }
 0x8f2   :  { %v13230_v35 = vrot.slane %v13229_v59, 1  ;;  %v13109_v33 = vadd.f32 %v13108_v27, %v13107_v5  ;;  %v13153_v32 = vadd.f32 %v13152_v39, %v22868_v53  ;;  %v13283_v9 = vsel %vm9376_vm1, %v23027_v49, %v13282_v26 }
 0x8f3   :  { %v23808_v28 = vrot.slane %v23009_v31, 1  ;;  %v13238_v58 = vrot.slane %v23049_v2, 4  ;;  %v13319_v20 = vsel %vm9374_vm0, %v13237_v37, %v13213_v24  ;;  %v13200_v19 = vrot.slane %v13199_v6, 1 }
 0x8f4   :  { %13403 = vmatprep.mubr.f32.mxu1 %v13319_v20  ;;  %v13207_v44 = vadd.f32 %v13206_v1, %v13205_v46  ;;  %v13231_v51 = vadd.f32 %v13230_v35, %v13229_v59  ;;  %v13284_v48 = vsel %vm9378_vm2, %v13085_v23, %v13283_v9  ;;  %v13316_v50 = vsel %vm9458_vm4, %v13177_v34, %v13153_v32  ;;  %v16718_v20 = vld [vmem:[%s23507_s11] sm:$0xff]  }
 0x8f5   :  { %v13079_v22 = vadd.f32 %v23808_v28, %v23009_v31  ;;  %v13201_v53 = vadd.f32 %v13200_v19, %v13199_v6  ;;  %v13285_v43 = vsel %vm9380_vm3, %v13109_v33, %v13284_v48  ;;  %v13194_v49 = vrot.slane %v22982_v55, 1  ;;  %v16719_v19 = vld [vmem:[%s23507_s11 + $0x80] sm:$0xff]   ;;  %v16722_v48 = vld [vmem:[%s23507_s11 + $0x8] sm:$0xff]  }
 0x8f6   :  { %v23809_v31 = vrot.slane %v23014_v14, 4  ;;  %v13318_v30 = vsel %vm9374_vm0, %v13231_v51, %v13207_v44  ;;  %v13103_v12 = vadd.f32 %v13102_v36, %v23058_v60  ;;  %v13278_v11 = vsel %vm9374_vm0, %v22926_v47, %v22902_v10  ;;  %v16720_v44 = vld [vmem:[%s23507_s11 + $0x48] sm:$0xff]  }
 0x8f7   :  { %v23810_v7 = vrot.slane %v23054_v15, 4  ;;  %13404 = vmatmul.mubr.f32.gmra.mrb[54].mxu1 %v13318_v30  ;;  %v13317_v17 = vsel %vm9460_vm5, %v13201_v53, %v13316_v50  ;;  %v13279_v25 = vsel %vm9376_vm1, %v23017_v8, %v13278_v11  ;;  %v23812_v60 = vrot.slane %v22914_v63, 1  ;;  %v16721_v51 = vld [vmem:[%s23507_s11 + $0xc8] sm:$0xff]   ;;  %v16724_v53 = vld [vmem:[%s23507_s11 + $0x50] sm:$0xff]   ;;  %v16729_v30 = vld [vmem:[%s23507_s11 + $0xd8] sm:$0xff]  }
 0x8f8   :  { %v13221_v16 = vadd.f32 %v23809_v31, %v23014_v14  ;;  %v23811_v14 = vrot.slane %v22987_v61, 4  ;;  %v13333_v10 = vsel %vm9500_vm6, %v13285_v43, %v13317_v17  ;;  %15812 = vmatpush1.bf16.xpose.msra.mxu1 %v22853_v18  ;;  %v13195_v42 = vadd.f32 %v13194_v49, %v22982_v55  ;;  %v16723_v50 = vld [vmem:[%s23507_s11 + $0x88] sm:$0xff]   ;;  %v16725_v43 = vld [vmem:[%s23507_s11 + $0xd0] sm:$0xff]   ;;  %v16731_v11 = vld [vmem:[%s23507_s11 + $0x98] sm:$0xff]  }
 0x8f9   :  { %v13245_v45 = vadd.f32 %v23810_v7, %v23054_v15  ;;  %v13171_v21 = vadd.f32 %v23812_v60, %v22914_v63  ;;  %v13239_v15 = vadd.f32 %v13238_v58, %v23049_v2  ;;  %13473 = vmatprep.mubr.f32.mxu1 %v13333_v10  ;;  %15822 = vmatprep.subr.bf16.mxu1 %v22755_v38  ;;  %v23814_v24 = vmov 0.0   ;;  %v16726_v49 = vld [vmem:[%s23507_s11 + $0x10] sm:$0xff]   ;;  %v16732_v7 = vld [vmem:[%s23507_s11 + $0x60] sm:$0xff]   ;;  %v16739_v60 = vld [vmem:[%s23507_s11 + $0xa8] sm:$0xff]  }
 0x8fa   :  { %v13222_v29 = vrot.slane %v13221_v16, 2  ;;  %v13215_v3 = vadd.f32 %v23811_v14, %v22987_v61  ;;  %v23813_v61 = vrot.slane %v22849_v41, 1  ;;  %v13280_v63 = vsel %vm9378_vm2, %v13079_v22, %v13279_v25  ;;  %v16727_v31 = vld [vmem:[%s23507_s11 + $0x90] sm:$0xff]   ;;  %v16734_v17 = vld [vmem:[%s23507_s11 + $0x20] sm:$0xff]   ;;  %v16737_v14 = vld [vmem:[%s23507_s11 + $0xe8] sm:$0xff]  }
 0x8fb   :  { %v13246_v47 = vrot.slane %v13245_v45, 2  ;;  %v13240_v46 = vrot.slane %v13239_v15, 2  ;;  %v13281_v52 = vsel %vm9380_vm3, %v13103_v12, %v13280_v63  ;;  %v16730_v12 = vld [vmem:[%s23507_s11 + $0x18] sm:$0xff]   ;;  %v16735_v25 = vld [vmem:[%s23507_s11 + $0xa0] sm:$0xff]   ;;  %v16741_v10 = vld [vmem:[%s23507_s11 + $0xf0] sm:$0xff]  }
 0x8fc   :  { %v13223_v8 = vadd.f32 %v13222_v29, %v13221_v16  ;;  %v13216_v13 = vrot.slane %v13215_v3, 2  ;;  %v13147_v54 = vadd.f32 %v23813_v61, %v22849_v41  ;;  %v16728_v16 = vld [vmem:[%s23507_s11 + $0x58] sm:$0xff]   ;;  %v16736_v29 = vld [vmem:[%s23507_s11 + $0x68] sm:$0xff]   ;;  %v1363_v63 = vld [vmem:[%s23505_s9] sm:$0xf] }
 0x8fd   :  { %v13247_v56 = vadd.f32 %v13246_v47, %v13245_v45  ;;  %v13241_v55 = vadd.f32 %v13240_v46, %v13239_v15  ;;  %v16733_v45 = vld [vmem:[%s23507_s11 + $0xe0] sm:$0xff]   ;;  %v16742_v47 = vld [vmem:[%s23507_s11 + $0x30] sm:$0xff]   ;;  %v16747_v61 = vld [vmem:[%s23507_s11 + $0xb8] sm:$0xff]  }
 0x8fe   :  { %v13224_v5 = vrot.slane %v13223_v8, 1  ;;  %v13217_v39 = vadd.f32 %v13216_v13, %v13215_v3  ;;  %v13314_v2 = vsel %vm9458_vm4, %v13171_v21, %v13147_v54  ;;  %v16738_v3 = vld [vmem:[%s23507_s11 + $0x28] sm:$0xff]   ;;  %v16740_v21 = vld [vmem:[%s23507_s11 + $0x70] sm:$0xff]   ;;  %v16746_v13 = vld [vmem:[%s23507_s11 + $0x38] sm:$0xff]  }
 0x8ff   :  { %v13248_v40 = vrot.slane %v13247_v56, 1  ;;  %v13315_v36 = vsel %vm9460_vm5, %v13195_v42, %v13314_v2  ;;  %v13242_v41 = vrot.slane %v13241_v55, 1  ;;  %v16743_v15 = vld [vmem:[%s23507_s11 + $0xb0] sm:$0xff]   ;;  %v16744_v42 = vld [vmem:[%s23507_s11 + $0x78] sm:$0xff]   ;;  %v1362_v54 = vld [vmem:[%s23504_s8] sm:$0xf] }
 0x900   :  { %v13218_v62 = vrot.slane %v13217_v39, 1  ;;  %v13332_v38 = vsel %vm9500_vm6, %v13281_v52, %v13315_v36  ;;  %v13225_v23 = vadd.f32 %v13224_v5, %v13223_v8  ;;  %v16745_v8 = vld [vmem:[%s23507_s11 + $0xf8] sm:$0xff]   ;;  %v23815_v46 = vld [vmem:[#allocation13_spill] sm:$0xff]  ;;  %v23816_v2 = vld [vmem:[#allocation14_spill] sm:$0xff] }
 0x901   :  { %v13249_v0 = vadd.f32 %v13248_v40, %v13247_v56  ;;  %13474 = vmatmul.mubr.f32.vlgmr.msra.gmra.mrb[52].mxu1 %v13332_v38  ;;  %v13243_v27 = vadd.f32 %v13242_v41, %v13241_v55  ;;  %v23270_v52 = vrot.slane %v1362_v54, %v23815_v46  ;;  %v23273_v5 = vrot.slane %v1363_v63, %v23815_v46 }
 0x902   :  { %v13219_v59 = vadd.f32 %v13218_v62, %v13217_v39  ;;  %15824 = vmatpush1.bf16.msra.mxu1 %v22846_v4  ;;  %v23278_v40 = vrot.slane %v1362_v54, %v23816_v2  ;;  %v23283_v62 = vrot.slane %v1363_v63, %v23816_v2 }
 0x903   :  { %v13321_v1 = vsel %vm9374_vm0, %v13249_v0, %v13225_v23  ;;  %15826 = vmatprep.subr.bf16.mxu1 %v22851_v57  ;;  %v16716_v57 = vld [vmem:[%s23507_s11 + $0x40] sm:$0xff]   ;;  %v23817_v23 = vld [vmem:[#allocation15_spill] sm:$0xff] }
 0x904   :  { %13478 = vmatprep.mubr.f32.mxu1 %v13321_v1  ;;  %v13320_v34 = vsel %vm9374_vm0, %v13243_v27, %v13219_v59  ;;  %15689 = vmatprep.subr.bf16.mxu0 %v16716_v57  ;;  %v23288_v0 = vrot.slane %v1362_v54, %v23817_v23 }
 0x905   :  { %13479 = vmatmul.mubr.f32.gmra.mrb[54].mxu1 %v13320_v34  ;;  %v23296_v34 = vrot.slane %v1363_v63, %v23817_v23  ;;  %v23832_v23 = vld [vmem:[#allocation22_spill] sm:$0xff] }
 0x906   :  { %15828 = vmatpush1.bf16.msra.mxu1 %v22853_v18  ;;  %13640 = vmatprep.mubr.f32.mxu1 %v23814_v24  ;;  %v16717_v18 = vld [vmem:[%s23507_s11 + $0xc0] sm:$0xff]   ;;  %s16823_s11 = smov [#allocation2]  }
 0x907   :  { %15711 = vmatprep.subr.bf16.mxu1 %v16717_v18  ;;  %s14308_s30 = sshll.u32 %s16823_s11, 4  ;;  %s14309_s30 = int_to_ptr.vmem [resolvable:$true] %s14308_s30 }
 0x908   :  { %s16797_s6 = scalar_lea.vmem %s14309_s30, 128  ;;  %p16802_p1 = scmp.lt.s32.totalorder %s14309_s30, %s14309_s30 }
 0x909   :  { %p16798_p0 = scmp.ne.s32.totalorder %s14309_s30, %s16797_s6  ;;  %p16803_p2 = scmp.lt.s32.totalorder %s16797_s6, %s16797_s6 }
 0x90b   :  { %p16804_p3 = por %p16803_p2, %p16802_p1 }
 0x90d   :  { %p16805_p4 = pnand %p16804_p3, %p16798_p0 }
 0x9d4   :  { %v13475_v37 = vpop.f32.mrb[52].mxu1 }
 0x9d5   :  { %v13484_v6 = vmul.f32 0.0078125, %v13475_v37  ;;  %v13477_v26 = vpop.f32.mrb[53].mxu1 }
 0x9d6   :  { %v23818_v26 = vld [vmem:[#allocation16_spill] sm:$0xff] }
 0x9d7   :  { %v13486_v35 = vmul.f32 %v13484_v6, %v13484_v6 }
 0x9d8   :  { %v13480_v33 = vpop.f32.mrb[54].mxu1 }
 0x9d9   :  { %v13485_v32 = vmul.f32 0.0078125, %v13480_v33  ;;  %v13488_v9 = vrot.slane %v13486_v35, 3  ;;  %v13482_v28 = vpop.f32.mrb[55].mxu1  ;;  %v23301_v35 = vrot.slane %v1362_v54, %v23818_v26  ;;  %v23819_v33 = vld [vmem:[#allocation37_spill] sm:$0xff] }
 0x9db   :  { %v13490_v22 = vsub.f32 %v13484_v6, %v13488_v9  ;;  %v13491_v4 = vsub.f32 %v13485_v32, %v13488_v9  ;;  %v23820_v9 = vld [vmem:[#allocation21_spill] sm:$0xff] }
 0x9dd   :  { %v13492_v58 = vsel %vm9500_vm6, %v13484_v6, %v13490_v22 }
 0x9de   :  { %15652 = vmatmul.mubr.msk.f32.vlgmr.msra.gmra.mrb[40].mxu0 %vm9818_vm7, %v13492_v58  ;;  %15654 = vmatmul.mubr.msk.f32.vlgmr.msra.gmra.mrb[56].mxu1 %vm9818_vm7, %v13492_v58 }
 0x9df   :  { %13569 = vmatprep.mubr.f32.mxu0 %v23814_v24  ;;  %13646 = vmatprep.mubr.f32.mxu1 %v23814_v24 }
 0x9e0   :  { %15690 = vmatpush3.bf16.msra.mxu0 %v16718_v20  ;;  %15712 = vmatpush3.bf16.msra.mxu1 %v16719_v19 }
 0x9e1   :  { %15691 = vmatprep.subr.bf16.mxu0 %v16720_v44  ;;  %15713 = vmatprep.subr.bf16.mxu1 %v16721_v51 }
 0x9e2   :  { %15653 = vmatmul.mubr.msk.f32.gmra.mrb[42].mxu0 %vm9818_vm7, %v13491_v4  ;;  %15655 = vmatmul.mubr.msk.f32.gmra.mrb[58].mxu1 %vm9818_vm7, %v13491_v4  ;;  %v23307_v4 = vrot.slane %v1363_v63, %v23818_v26  ;;  %v23830_v63 = vld [vmem:[#allocation29_spill] sm:$0xff] }
 0x9e4   :  { %15692 = vmatpush3.bf16.msra.mxu0 %v16722_v48  ;;  %15714 = vmatpush3.bf16.msra.mxu1 %v16723_v50  ;;  %v23821_v48 = vld [vmem:[#allocation28_spill] sm:$0xff] }
 0x9e5   :  { %15693 = vmatprep.subr.bf16.mxu0 %v16724_v53  ;;  %15715 = vmatprep.subr.bf16.mxu1 %v16725_v43  ;;  %v23822_v53 = vld [vmem:[#allocation5_spill] sm:$0xff] }
 0x9e8   :  { %15694 = vmatpush3.bf16.msra.mxu0 %v16726_v49  ;;  %15716 = vmatpush3.bf16.msra.mxu1 %v16727_v31  ;;  %v23823_v31 = vld [vmem:[#allocation33_spill] sm:$0xff] }
 0x9e9   :  { %15695 = vmatprep.subr.bf16.mxu0 %v16728_v16  ;;  %15717 = vmatprep.subr.bf16.mxu1 %v16729_v30  ;;  %v23824_v30 = vld [vmem:[#allocation19_spill] sm:$0xff] }
 0x9ec   :  { %15696 = vmatpush3.bf16.msra.mxu0 %v16730_v12  ;;  %15718 = vmatpush3.bf16.msra.mxu1 %v16731_v11  ;;  %v23825_v11 = vld [vmem:[#allocation25_spill] sm:$0xff] }
 0x9ed   :  { %15697 = vmatprep.subr.bf16.mxu0 %v16732_v7  ;;  %15719 = vmatprep.subr.bf16.mxu1 %v16733_v45 }
 0x9f0   :  { %15698 = vmatpush3.bf16.msra.mxu0 %v16734_v17  ;;  %15720 = vmatpush3.bf16.msra.mxu1 %v16735_v25 }
 0x9f1   :  { %15699 = vmatprep.subr.bf16.mxu0 %v16736_v29  ;;  %15721 = vmatprep.subr.bf16.mxu1 %v16737_v14 }
 0x9f4   :  { %15700 = vmatpush3.bf16.msra.mxu0 %v16738_v3  ;;  %15722 = vmatpush3.bf16.msra.mxu1 %v16739_v60  ;;  %v23826_v3 = vld [vmem:[#allocation31_spill] sm:$0xff] }
 0x9f5   :  { %15701 = vmatprep.subr.bf16.mxu0 %v16740_v21  ;;  %15723 = vmatprep.subr.bf16.mxu1 %v16741_v10  ;;  %v23827_v21 = vld [vmem:[#allocation18_spill] sm:$0xff] }
 0x9f8   :  { %15702 = vmatpush3.bf16.msra.mxu0 %v16742_v47  ;;  %15724 = vmatpush3.bf16.msra.mxu1 %v16743_v15  ;;  %v23828_v47 = vld [vmem:[#allocation26_spill] sm:$0xff] }
 0x9f9   :  { %15703 = vmatprep.subr.bf16.mxu0 %v16744_v42  ;;  %15725 = vmatprep.subr.bf16.mxu1 %v16745_v8  ;;  %v23829_v8 = vld [vmem:[#allocation23_spill] sm:$0xff] }
 0x9fc   :  { %15704 = vmatpush3.bf16.msra.mxu0 %v16746_v13  ;;  %15726 = vmatpush3.bf16.msra.mxu1 %v16747_v61 }
 0xab1   :  { %v23267_v56 = vpop.f32.mrb[40].mxu0  ;;  %v23275_v39 = vpop.f32.mrb[56].mxu1 }
 0xab2   :  { %v13653_v55 = vmax.f32 %v23267_v56, 0.0  ;;  %v13681_v36 = vrot.slane %v23267_v56, 1  ;;  %v23285_v38 = vpop.f32.mrb[41].mxu0  ;;  %v23290_v41 = vpop.f32.mrb[57].mxu1  ;;  %v13685_v1 = vrot.slane %v23267_v56, 2  ;;  %v13689_v59 = vrot.slane %v23267_v56, 3 }
 0xab3   :  { %v13655_v27 = vmax.f32 %v23275_v39, 0.0  ;;  %v13693_v37 = vrot.slane %v23267_v56, 4  ;;  %v13683_v6 = vrot.slane %v23275_v39, 1  ;;  %v13717_v32 = vsub.f32 %v23819_v33, %v23267_v56 }
 0xab4   :  { %v13661_v24 = vadd.f32 1e-05, %v13653_v55  ;;  %v13721_v28 = vsub.f32 %v23820_v9, %v13681_v36  ;;  %v13687_v18 = vrot.slane %v23275_v39, 2  ;;  %v13691_v20 = vrot.slane %v23275_v39, 3  ;;  %v23831_v55 = vld [vmem:[#allocation32_spill] sm:$0xff] }
 0xab5   :  { %v13663_v22 = vadd.f32 1e-05, %v13655_v27  ;;  %v13571_v58 = vpop.f32.mrb[42].mxu0  ;;  %v13648_v57 = vpop.f32.mrb[58].mxu1  ;;  %v13695_v19 = vrot.slane %v23275_v39, 4  ;;  %v13725_v50 = vsub.f32 %v23821_v48, %v13685_v1  ;;  %v23314_v43 = vsub.f32 %v23822_v53, %v13689_v59  ;;  %v23833_v27 = vld [vmem:[#allocation30_spill] sm:$0xff] }
 0xab6   :  { %16780 = vrsqrt.f32 %v13661_v24  ;;  %v13573_v44 = vpop.f32.mrb[43].mxu0  ;;  %v13650_v51 = vpop.f32.mrb[59].mxu1  ;;  %v13654_v49 = vmax.f32 %v23285_v38, 0.0  ;;  %v23318_v16 = vsub.f32 %v23823_v31, %v13693_v37  ;;  %v13719_v12 = vsub.f32 %v23824_v30, %v23275_v39  ;;  %v23834_v37 = vld [vmem:[#allocation17_spill] sm:$0xff]  ;;  %v23835_v9 = vld [vmem:[#allocation24_spill] sm:$0xff] }
 0xab7   :  { %16782 = vrsqrt.f32 %v13663_v22  ;;  %v13723_v7 = vsub.f32 %v23825_v11, %v13683_v6  ;;  %v13682_v45 = vrot.slane %v23285_v38, 1  ;;  %v13686_v25 = vrot.slane %v23285_v38, 2  ;;  %v23836_v48 = vld [vmem:[#allocation20_spill] sm:$0xff] }
 0xab8   :  { %v13662_v17 = vadd.f32 1e-05, %v13654_v49  ;;  %v13690_v29 = vrot.slane %v23285_v38, 3  ;;  %v13656_v14 = vmax.f32 %v23290_v41, 0.0  ;;  %v13727_v60 = vsub.f32 %v23826_v3, %v13687_v18  ;;  %v23838_v49 = vld [vmem:[#allocation34_spill] sm:$0xff] }
 0xab9   :  { %v23329_v10 = vsub.f32 %v23827_v21, %v13691_v20  ;;  %v23332_v15 = vsub.f32 %v23828_v47, %v13695_v19  ;;  %v13694_v42 = vrot.slane %v23285_v38, 4  ;;  %v13718_v13 = vsub.f32 %v23829_v8, %v23285_v38 }
 0xaba   :  { %16784 = vrsqrt.f32 %v13662_v17  ;;  %v13664_v61 = vadd.f32 1e-05, %v13656_v14  ;;  %v13684_v54 = vrot.slane %v23290_v41, 1  ;;  %v23339_v56 = vsub.f32 %v23830_v63, %v13682_v45 }
 0xabb   :  { %v13688_v46 = vrot.slane %v23290_v41, 2  ;;  %v13692_v39 = vrot.slane %v23290_v41, 3  ;;  %v13696_v2 = vrot.slane %v23290_v41, 4  ;;  %v23345_v36 = vsub.f32 %v23831_v55, %v13686_v25 }
 0xabc   :  { %v23348_v1 = vsub.f32 %v23832_v23, %v13690_v29  ;;  %v13657_v59 = vmax.f32 %v13571_v58, 0.0  ;;  %v13659_v38 = vmax.f32 %v13648_v57, 0.0  ;;  %v23351_v24 = vsub.f32 %v23833_v27, %v13694_v42  ;;  %v23837_v58 = vld [vmem:[#allocation27_spill] sm:$0xff] }
 0xabd   :  { %v13720_v6 = vsub.f32 %v23834_v37, %v23290_v41  ;;  %v13658_v26 = vmax.f32 %v13573_v44, 0.0  ;;  %v13660_v33 = vmax.f32 %v13650_v51, 0.0  ;;  %16786 = vrsqrt.f32 %v13664_v61 }
 0xabe   :  { %v23356_v22 = vsub.f32 %v23835_v9, %v13684_v54  ;;  %v13665_v18 = vadd.f32 1e-05, %v13657_v59  ;;  %v13667_v20 = vadd.f32 1e-05, %v13659_v38  ;;  %v23359_v53 = vsub.f32 %v23836_v48, %v13688_v46 }
 0xabf   :  { %v23362_v57 = vsub.f32 %v23837_v58, %v13692_v39  ;;  %v23365_v31 = vsub.f32 %v23838_v49, %v13696_v2  ;;  %v13666_v30 = vadd.f32 1e-05, %v13658_v26  ;;  %v13668_v17 = vadd.f32 1e-05, %v13660_v33 }
 0xac0   :  { %v16781_v19 = vpop.eup %16780  ;;  %16788 = vrsqrt.f32 %v13665_v18 }
 0xac1   :  { %v16783_v11 = vpop.eup %16782  ;;  %v13745_v44 = vrot.slane %v16781_v19, 5  ;;  %v13749_v51 = vrot.slane %v16781_v19, 6  ;;  %v13753_v45 = vrot.slane %v16781_v19, 7  ;;  %16790 = vrsqrt.f32 %v13667_v20 }
 0xac2   :  { %v13747_v25 = vrot.slane %v16783_v11, 5  ;;  %v13751_v29 = vrot.slane %v16783_v11, 6  ;;  %v13755_v14 = vrot.slane %v16783_v11, 7  ;;  %16792 = vrsqrt.f32 %v13666_v30 }
 0xac3   :  { %v13781_v3 = vmul.f32 %v13745_v44, %v13717_v32  ;;  %v13785_v21 = vmul.f32 %v13749_v51, %v13721_v28  ;;  %v13789_v47 = vmul.f32 %v13753_v45, %v13725_v50  ;;  %16794 = vrsqrt.f32 %v13668_v17 }
 0xac4   :  { %v13783_v42 = vmul.f32 %v13747_v25, %v13719_v12  ;;  %v13787_v8 = vmul.f32 %v13751_v29, %v13723_v7  ;;  %v13791_v61 = vmul.f32 %v13755_v14, %v13727_v60  ;;  %v16785_v54 = vpop.eup %16784 }
 0xac5   :  { %v13822_v63 = vmul.f32 %v23270_v52, %v13781_v3  ;;  %v13826_v46 = vmul.f32 %v23270_v52, %v13785_v21  ;;  %v13830_v39 = vmul.f32 %v23270_v52, %v13789_v47  ;;  %v13746_v28 = vrot.slane %v16785_v54, 5 }
 0xac6   :  { %v13824_v2 = vmul.f32 %v23278_v40, %v13783_v42  ;;  %v13828_v55 = vmul.f32 %v23278_v40, %v13787_v8  ;;  %v13832_v32 = vmul.f32 %v23278_v40, %v13791_v61  ;;  %v13750_v60 = vrot.slane %v16785_v54, 6 }
 0xac7   :  { %v13863_v50 = vadd.f32 %v23273_v5, %v13822_v63  ;;  %v13867_v12 = vadd.f32 %v23273_v5, %v13826_v46  ;;  %v13871_v7 = vadd.f32 %v23273_v5, %v13830_v39  ;;  %v13754_v27 = vrot.slane %v16785_v54, 7  ;;  %v16787_v26 = vpop.eup %16786 }
 0xac8   :  { %v13865_v23 = vadd.f32 %v23283_v62, %v13824_v2  ;;  %v13869_v59 = vadd.f32 %v23283_v62, %v13828_v55  ;;  %v13873_v38 = vadd.f32 %v23283_v62, %v13832_v32  ;;  %v13782_v20 = vmul.f32 %v13746_v28, %v13718_v13 }
 0xac9   :  { %v13883_v33 = vmul.f32 0.01, %v13863_v50  ;;  %v13887_v9 = vmul.f32 0.01, %v13867_v12  ;;  %v13891_v18 = vmul.f32 0.01, %v13871_v7  ;;  %v13786_v49 = vmul.f32 %v13750_v60, %v23339_v56 }
 0xaca   :  { %v13885_v19 = vmul.f32 0.01, %v13865_v23  ;;  %v13889_v48 = vmul.f32 0.01, %v13869_v59  ;;  %v13893_v58 = vmul.f32 0.01, %v13873_v38  ;;  %v13790_v51 = vmul.f32 %v13754_v27, %v23345_v36  ;;  %v16789_v45 = vpop.eup %16788 }
 0xacb   :  { %v13903_v30 = vmax.f32 %v13863_v50, %v13883_v33  ;;  %v13907_v11 = vmax.f32 %v13867_v12, %v13887_v9  ;;  %v23380_v44 = vmax.f32 %v13871_v7, %v13891_v18  ;;  %v13823_v14 = vmul.f32 %v23288_v0, %v13782_v20  ;;  %v16791_v3 = vpop.eup %16790 }
 0xacc   :  { %v13905_v17 = vmax.f32 %v13865_v23, %v13885_v19  ;;  %v13909_v25 = vmax.f32 %v13869_v59, %v13889_v48  ;;  %v23383_v29 = vmax.f32 %v13873_v38, %v13893_v58  ;;  %v13827_v47 = vmul.f32 %v23288_v0, %v13786_v49  ;;  %v16793_v42 = vpop.eup %16792 }
 0xacd   :  { %v13923_v13 = vpack.c.bf16 %v13903_v30, %v13903_v30  ;;  %v13927_v21 = vpack.c.bf16 %v13907_v11, %v13907_v11  ;;  %v13831_v56 = vmul.f32 %v23288_v0, %v13790_v51  ;;  %v13864_v54 = vadd.f32 %v23296_v34, %v13823_v14  ;;  %v16795_v63 = vpop.eup %16794 }
 0xace   :  { %v13925_v8 = vpack.c.bf16 %v13905_v17, %v13905_v17  ;;  %v13929_v61 = vpack.c.bf16 %v13909_v25, %v13909_v25  ;;  %v13748_v36 = vrot.slane %v16787_v26, 5  ;;  %v13752_v2 = vrot.slane %v16787_v26, 6 }
 0xacf   :  { %v23389_v46 = vunpack.c.l.b16 %v13923_v13  ;;  %v23391_v39 = vunpack.c.l.b16 %v13927_v21  ;;  %v13756_v55 = vrot.slane %v16787_v26, 7  ;;  %v13757_v12 = vrot.slane %v16789_v45, 1 }
 0xad0   :  { %v23393_v32 = vunpack.c.l.b16 %v13925_v8  ;;  %v23395_v28 = vunpack.c.l.b16 %v13929_v61  ;;  %v13784_v50 = vmul.f32 %v13748_v36, %v13720_v6  ;;  %v13788_v60 = vmul.f32 %v13752_v2, %v23356_v22 }
 0xad1   :  { %v13989_v7 = vrot.slane %v23391_v39, 7  ;;  %v13792_v23 = vmul.f32 %v13756_v55, %v23359_v53  ;;  %v13793_v59 = vmul.f32 %v16789_v45, %v23314_v43  ;;  %v13797_v26 = vmul.f32 %v13757_v12, %v23318_v16 }
 0xad2   :  { %v14005_v38 = vrot.slane %v23395_v28, 7  ;;  %v13825_v27 = vmul.f32 %v23301_v35, %v13784_v50  ;;  %v13759_v33 = vrot.slane %v16791_v3, 1  ;;  %v13829_v9 = vmul.f32 %v23301_v35, %v13788_v60 }
 0xad3   :  { %v13833_v41 = vmul.f32 %v23301_v35, %v13792_v23  ;;  %v13834_v37 = vmul.f32 %v23270_v52, %v13793_v59  ;;  %v13795_v6 = vmul.f32 %v16791_v3, %v23329_v10  ;;  %v13838_v53 = vmul.f32 %v23270_v52, %v13797_v26 }
 0xad4   :  { %v13866_v22 = vadd.f32 %v23307_v4, %v13825_v27  ;;  %v13799_v43 = vmul.f32 %v13759_v33, %v23332_v15  ;;  %v13758_v18 = vrot.slane %v16793_v42, 1  ;;  %v13794_v19 = vmul.f32 %v16793_v42, %v23348_v1 }
 0xad5   :  { %v13875_v20 = vadd.f32 %v23273_v5, %v13834_v37  ;;  %v13836_v16 = vmul.f32 %v23278_v40, %v13795_v6  ;;  %v13760_v48 = vrot.slane %v16795_v63, 1  ;;  %v23418_v58 = vadd.f32 %v23273_v5, %v13838_v53 }
 0xad6   :  { %v13840_v49 = vmul.f32 %v23278_v40, %v13799_v43  ;;  %v13798_v10 = vmul.f32 %v13758_v18, %v23351_v24  ;;  %v13796_v30 = vmul.f32 %v16795_v63, %v23362_v57  ;;  %v13835_v11 = vmul.f32 %v23288_v0, %v13794_v19 }
 0xad7   :  { %v13895_v52 = vmul.f32 0.01, %v13875_v20  ;;  %v13877_v15 = vadd.f32 %v23283_v62, %v13836_v16  ;;  %v13800_v51 = vmul.f32 %v13760_v48, %v23365_v31  ;;  %v13868_v40 = vadd.f32 %v23296_v34, %v13827_v47 }
 0xad8   :  { %v23427_v45 = vadd.f32 %v23283_v62, %v13840_v49  ;;  %v13837_v1 = vmul.f32 %v23301_v35, %v13796_v30  ;;  %v13839_v5 = vmul.f32 %v23288_v0, %v13798_v10  ;;  %v13872_v57 = vadd.f32 %v23296_v34, %v13831_v56 }
 0xad9   :  { %v23432_v17 = vmax.f32 %v13875_v20, %v13895_v52  ;;  %v13897_v24 = vmul.f32 0.01, %v13877_v15  ;;  %v13876_v25 = vadd.f32 %v23296_v34, %v13835_v11  ;;  %v13884_v3 = vmul.f32 0.01, %v13864_v54 }
 0xada   :  { %v13880_v14 = vadd.f32 %v23296_v34, %v13839_v5  ;;  %v13888_v31 = vmul.f32 0.01, %v13868_v40  ;;  %v13841_v62 = vmul.f32 %v23301_v35, %v13800_v51  ;;  %v13892_v0 = vmul.f32 0.01, %v13872_v57 }
 0xadb   :  { %v13935_v13 = vpack.c.bf16 %v23432_v17, %v23432_v17  ;;  %v23440_v21 = vmax.f32 %v13877_v15, %v13897_v24  ;;  %v13896_v47 = vmul.f32 0.01, %v13876_v25  ;;  %v13904_v8 = vmax.f32 %v13864_v54, %v13884_v3 }
 0xadc   :  { %v13900_v42 = vmul.f32 0.01, %v13880_v14  ;;  %v13908_v61 = vmax.f32 %v13868_v40, %v13888_v31  ;;  %v13870_v56 = vadd.f32 %v23307_v4, %v13829_v9  ;;  %v13912_v34 = vmax.f32 %v13872_v57, %v13892_v0 }
 0xadd   :  { %v13937_v36 = vpack.c.bf16 %v23440_v21, %v23440_v21  ;;  %v13916_v63 = vmax.f32 %v13876_v25, %v13896_v47  ;;  %v13874_v2 = vadd.f32 %v23307_v4, %v13833_v41  ;;  %v13924_v55 = vpack.c.bf16 %v13904_v8, %v13904_v8 }
 0xade   :  { %v13920_v35 = vmax.f32 %v13880_v14, %v13900_v42  ;;  %v13928_v50 = vpack.c.bf16 %v13908_v61, %v13908_v61  ;;  %v13878_v12 = vadd.f32 %v23307_v4, %v13837_v1  ;;  %v13932_v60 = vpack.c.bf16 %v13912_v34, %v13912_v34 }
 0xadf   :  { %v13936_v23 = vpack.c.bf16 %v13916_v63, %v13916_v63  ;;  %v13882_v59 = vadd.f32 %v23307_v4, %v13841_v62  ;;  %v13886_v54 = vmul.f32 0.01, %v13866_v22  ;;  %v13970_v26 = vunpack.c.l.b16 %v13924_v55 }
 0xae0   :  { %v13940_v27 = vpack.c.bf16 %v13920_v35, %v13920_v35  ;;  %v13974_v33 = vunpack.c.l.b16 %v13928_v50  ;;  %v13890_v9 = vmul.f32 0.01, %v13870_v56  ;;  %v13978_v37 = vunpack.c.l.b16 %v13932_v60 }
 0xae1   :  { %v13982_v6 = vunpack.c.l.b16 %v13936_v23  ;;  %v13894_v53 = vmul.f32 0.01, %v13874_v2  ;;  %v13898_v43 = vmul.f32 0.01, %v13878_v12  ;;  %v13902_v20 = vmul.f32 0.01, %v13882_v59 }
 0xae2   :  { %v13986_v18 = vunpack.c.l.b16 %v13940_v27  ;;  %v13997_v41 = vrot.slane %v13974_v33, 7  ;;  %v13906_v16 = vmax.f32 %v13866_v22, %v13886_v54  ;;  %v13999_v19 = vrot.slane %v13978_v37, 6 }
 0xae3   :  { %v14001_v48 = vrot.slane %v13982_v6, 5  ;;  %v13910_v49 = vmax.f32 %v13870_v56, %v13890_v9  ;;  %v13914_v10 = vmax.f32 %v13874_v2, %v13894_v53  ;;  %v13918_v52 = vmax.f32 %v13878_v12, %v13898_v43 }
 0xae4   :  { %v13998_v30 = vsel %vm9374_vm0, %v13997_v41, %v13970_v26  ;;  %v14003_v4 = vrot.slane %v13986_v18, 4  ;;  %v13922_v15 = vmax.f32 %v13882_v59, %v13902_v20  ;;  %v13926_v51 = vpack.c.bf16 %v13906_v16, %v13906_v16  ;;  %v15656_v20 = vld [vmem:[%s23508_s12] ss:$0 sm:$0xff] }
 0xae5   :  { %v14000_v11 = vsel %vm9376_vm1, %v13999_v19, %v13998_v30  ;;  %v13930_v1 = vpack.c.bf16 %v13910_v49, %v13910_v49  ;;  %v13934_v5 = vpack.c.bf16 %v13914_v10, %v13914_v10  ;;  %v13938_v17 = vpack.c.bf16 %v13918_v52, %v13918_v52 }
 0xae6   :  { %v14002_v40 = vsel %vm9378_vm2, %v14001_v48, %v14000_v11  ;;  %v13942_v24 = vpack.c.bf16 %v13922_v15, %v13922_v15  ;;  %v13899_v22 = vmul.f32 0.01, %v23418_v58  ;;  %v13972_v25 = vunpack.c.l.b16 %v13926_v51 }
 0xae7   :  { %v14004_v57 = vsel %vm9380_vm3, %v14003_v4, %v14002_v40  ;;  %v13976_v14 = vunpack.c.l.b16 %v13930_v1  ;;  %v13980_v3 = vunpack.c.l.b16 %v13934_v5  ;;  %v13984_v62 = vunpack.c.l.b16 %v13938_v17 }
 0xae8   :  { %v14022_v31 = vpack.c.b16 %v14004_v57, %v14004_v57  ;;  %v13988_v0 = vunpack.c.l.b16 %v13942_v24  ;;  %v13919_v47 = vmax.f32 %v23418_v58, %v13899_v22  ;;  %v13931_v61 = vpack.c.bf16 %v23380_v44, %v23380_v44 }
 0xae9   :  { %v14013_v42 = vrot.slane %v13976_v14, 7  ;;  %v14015_v8 = vrot.slane %v13980_v3, 6  ;;  %v13981_v56 = vunpack.c.l.b16 %v13935_v13  ;;  %v14017_v34 = vrot.slane %v13984_v62, 5 }
 0xaea   :  { %14253 = vmatprep.mubr.bf16.mxu0 %v14022_v31  ;;  %v14019_v63 = vrot.slane %v13988_v0, 4  ;;  %v13939_v2 = vpack.c.bf16 %v13919_v47, %v13919_v47  ;;  %v13990_v35 = vsel %vm9374_vm0, %v13989_v7, %v23389_v46  ;;  %v13977_v50 = vunpack.c.l.b16 %v13931_v61 }
 0xaeb   :  { %v14014_v55 = vsel %vm9374_vm0, %v14013_v42, %v13972_v25  ;;  %v13993_v12 = vrot.slane %v13981_v56, 5  ;;  %v13901_v58 = vmul.f32 0.01, %v23427_v45  ;;  %v13933_v44 = vpack.c.bf16 %v23383_v29, %v23383_v29 }
 0xaec   :  { %v14016_v60 = vsel %vm9376_vm1, %v14015_v8, %v14014_v55  ;;  %v13985_v23 = vunpack.c.l.b16 %v13939_v2  ;;  %v13983_v13 = vunpack.c.l.b16 %v13937_v36  ;;  %v13991_v59 = vrot.slane %v13977_v50, 6 }
 0xaed   :  { %v14018_v39 = vsel %vm9378_vm2, %v14017_v34, %v14016_v60  ;;  %v13921_v46 = vmax.f32 %v23427_v45, %v13901_v58  ;;  %v13979_v27 = vunpack.c.l.b16 %v13933_v44  ;;  %v14006_v26 = vsel %vm9374_vm0, %v14005_v38, %v23393_v32 }
 0xaee   :  { %v14020_v7 = vsel %vm9380_vm3, %v14019_v63, %v14018_v39  ;;  %v13995_v54 = vrot.slane %v13985_v23, 4  ;;  %v13992_v29 = vsel %vm9376_vm1, %v13991_v59, %v13990_v35  ;;  %v14009_v21 = vrot.slane %v13983_v13, 5 }
 0xaef   :  { %v14024_v33 = vpack.c.b16 %v14020_v7, %v14020_v7  ;;  %v13941_v9 = vpack.c.bf16 %v13921_v46, %v13921_v46  ;;  %v13994_v36 = vsel %vm9378_vm2, %v13993_v12, %v13992_v29  ;;  %v14007_v37 = vrot.slane %v13979_v27, 6 }
 0xaf0   :  { %v13996_v45 = vsel %vm9380_vm3, %v13995_v54, %v13994_v36 }
 0xaf1   :  { %14293 = vmatprep.mubr.bf16.mxu1 %v14024_v33  ;;  %v13987_v6 = vunpack.c.l.b16 %v13941_v9  ;;  %v14021_v53 = vpack.c.b16 %v13996_v45, %v13996_v45  ;;  %v14008_v43 = vsel %vm9376_vm1, %v14007_v37, %v14006_v26 }
 0xaf2   :  { %v14010_v18 = vsel %vm9378_vm2, %v14009_v21, %v14008_v43 }
 0xaf3   :  { %v14011_v28 = vrot.slane %v13987_v6, 4  ;;  %14254 = vmatmul.mubr.bf16.vlgmr.msra.gmra.mrb[44].mxu0 %v14021_v53 }
 0xaf5   :  { %v14012_v32 = vsel %vm9380_vm3, %v14011_v28, %v14010_v18 }
 0xaf6   :  { %v14023_v38 = vpack.c.b16 %v14012_v32, %v14012_v32 }
 0xaf8   :  { %14294 = vmatmul.mubr.bf16.vlgmr.msra.gmra.mrb[60].mxu1 %v14023_v38 }
 0xbc6   :  { %v15705_v41 = vpop.f32.mrb[44].mxu0 }
 0xbc7   :  { %v15706_v16 = vpop.f32.mrb[45].mxu0 }
 0xbc8   :  { %v15707_v19 = vadd.f32 %v15706_v16, %v15705_v41  ;;  %v15708_v48 = vpop.f32.mrb[46].mxu0 }
 0xbc9   :  { %v15709_v49 = vpop.f32.mrb[47].mxu0 }
 0xbca   :  { %v14256_v30 = vadd.f32 %v15707_v19, %v15656_v20 }
 0xbcb   :  { %v15727_v10 = vpop.f32.mrb[60].mxu1 }
 0xbcc   :  { %v15728_v4 = vpop.f32.mrb[61].mxu1 }
 0xbcd   :  { %v15729_v52 = vadd.f32 %v15728_v4, %v15727_v10  ;;  %v15730_v15 = vpop.f32.mrb[62].mxu1 }
 0xbce   :  { %v15731_v11 = vpop.f32.mrb[63].mxu1 }
 0xbcf   :  { %v14296_v51 = vadd.f32 %v15729_v52, %v14256_v30 }
 0xbd1   :  { %14301 = vst [vmem:[#allocation2] sm:$0x1f] %v14296_v51 }
 0xbd2   :  { %16808 = shalt.err (!%p16805_p4)
}
 0xbd3   :  { %s16809_s5 = scalar_lea.hbm %s23509_s13, 128 }
 0xbd4   :  { %p16810_p5 = scmp.ne.s32.totalorder %s23509_s13, %s16809_s5  ;;  %p16813_p6 = scmp.lt.u32.totalorder %s16809_s5, %s23509_s13 }
 0xbd6   :  { %p16815_p7 = pnand %p16813_p6, %p16810_p5 }
 0xbd8   :  { %16818 = shalt.err (!%p16815_p7)
}
 0xbd9   :  { %14311 = dma.vmem_to_hbm [thread:$0]  %s14309_s30, 128, %s23509_s13, [#allocation3]  }
 0xbda   :  { %16819 = dma.done.wait [#allocation3], 128  }
 0xbdb   :  { %16820 = vsyncadd [#allocation3], 4294967168 }
 0xbdc   :  { %14315 = vsyncpa [#allocation3], 1 }

</bundles_post_ra>
